<compile_context>
chip_gen: v5e
topology: v5e:2x2
jax: 0.10.0
libtpu: 0.0.40
codegen_flags: <defaults>
</compile_context>

<pallas_src>
import functools
import math

import numpy as np
import jax
import jax.numpy as jnp
from jax import lax
from jax.experimental import pallas as pl
from jax.experimental.pallas import tpu as pltpu

# The 8 non-center taps of the 3x3 window, in a fixed order shared by the
# kernel (roll shifts / weight columns) and the wrapper (mask rows).
_TAPS = tuple((di, dj) for di in range(3) for dj in range(3) if not (di == 1 and dj == 1))


def dwmlp_kernel(x_ref, m_ref, w1_ref, b1_ref, wdw_ref, bdw_ref,
                 w2_ref, b2_ref, o_ref, *, W):
    # x_ref: (Cin, N) with N = B*H*W (channels-first, lane-dense).
    N = x_ref.shape[1]

    # ---- fc1 (MXU): (Chid, Cin) @ (Cin, N) -> (Chid, N) ----
    h = jnp.dot(w1_ref[...], x_ref[...],
                preferred_element_type=jnp.float32) + b1_ref[...]

    # Precomputed {0,1} boundary masks, one row per non-center tap: (8, N).
    masks = m_ref[...]

    # ---- depthwise 3x3 conv (VPU mul/add + XLU lane rolls) ----
    # Start the accumulator from the center tap + bias (no zeros materialization).
    acc = h * wdw_ref[:, 4:5] + bdw_ref[...]
    for t, (di, dj) in enumerate(_TAPS):
        dh, dw = di - 1, dj - 1
        k = di * 3 + dj                                 # weight column
        shift = (-(dh * W + dw)) % N                    # static python int
        shifted = pltpu.roll(h, shift=shift, axis=1)    # lane roll (XLU slot)
        acc = acc + shifted * masks[t:t + 1, :] * wdw_ref[:, k:k + 1]

    # ---- GELU (exact erf, matches nn.GELU default) ----
    act = 0.5 * acc * (1.0 + lax.erf(acc * (1.0 / math.sqrt(2.0))))

    # ---- fc2 (MXU): (Cout, Chid) @ (Chid, N) -> (Cout, N); dropout p=0 -> identity ----
    y = jnp.dot(w2_ref[...], act, preferred_element_type=jnp.float32) + b2_ref[...]
    o_ref[...] = y.astype(o_ref.dtype)


def dwmlp_forward(x, w1, b1, wdw, bdw, w2, b2):
    """x: (B, H, W, Cin) float32.
    w1: (Chid, Cin), w2: (Cout, Chid)  (torch (out, in) layout),
    wdw: (Chid, 3, 3), biases 1-D.  Returns (B, H, W, Cout)."""
    B, H, W, Cin = x.shape
    Chid = w1.shape[0]
    Cout = w2.shape[0]
    N = B * H * W

    # Channels-first, lane-dense operands (layout plumbing stays outside the kernel).
    x_cf = x.reshape(N, Cin).T                      # (Cin, N)
    wdw_flat = wdw.reshape(Chid, 9)                 # column k = di*3 + dj

    # Static per-tap boundary masks (SAME zero padding), shape (8, N), built at trace time.
    pos = np.arange(N, dtype=np.int64)
    h_idx = (pos // W) % H
    w_idx = pos % W
    tap_masks = np.empty((len(_TAPS), N), dtype=np.float32)
    for t, (di, dj) in enumerate(_TAPS):
        dh, dw = di - 1, dj - 1
        ok = ((h_idx + dh >= 0) & (h_idx + dh <= H - 1) &
              (w_idx + dw >= 0) & (w_idx + dw <= W - 1))
        tap_masks[t] = ok.astype(np.float32)
    tap_masks = jnp.asarray(tap_masks)

    kernel = functools.partial(dwmlp_kernel, W=W)
    vspec = lambda: pl.BlockSpec(memory_space=pltpu.MemorySpace.VMEM)

    y = pl.pallas_call(
        kernel,
        out_shape=jax.ShapeDtypeStruct((Cout, N), x.dtype),
        in_specs=[vspec() for _ in range(8)],
        out_specs=vspec(),
    )(x_cf, tap_masks, w1, b1.reshape(Chid, 1), wdw_flat,
      bdw.reshape(Chid, 1), w2, b2.reshape(Cout, 1))

    return y.T.reshape(B, H, W, Cout)


def dwmlp_reference(x, w1, b1, wdw, bdw, w2, b2):
    """Plain-JAX reference mirroring the PyTorch forward."""
    Chid = w1.shape[0]
    h = jnp.einsum("bhwc,dc->bhwd", x, w1) + b1
    k = jnp.transpose(wdw, (1, 2, 0)).reshape(3, 3, 1, Chid)  # HWIO, I=1 (depthwise)
    h = lax.conv_general_dilated(
        h, k, window_strides=(1, 1), padding="SAME",
        dimension_numbers=("NHWC", "HWIO", "NHWC"),
        feature_group_count=Chid) + bdw
    h = jax.nn.gelu(h, approximate=False)
    return jnp.einsum("bhwc,dc->bhwd", h, w2) + b2


if __name__ == "__main__":
    B, H, W = 2, 16, 16
    in_features, hidden_features, out_features = 32, 64, 32

    key = jax.random.PRNGKey(0)
    kx, k1, k2, k3, k4, k5, k6 = jax.random.split(key, 7)

    x = jax.random.normal(kx, (B, H, W, in_features), dtype=jnp.float32)

    # fc1 / fc2: trunc_normal(std=0.02) weights, torch (out, in) layout.
    w1 = 0.02 * jax.random.truncated_normal(
        k1, -2.0, 2.0, (hidden_features, in_features), dtype=jnp.float32)
    w2 = 0.02 * jax.random.truncated_normal(
        k2, -2.0, 2.0, (out_features, hidden_features), dtype=jnp.float32)
    # depthwise conv: normal(0, sqrt(2/fan_out)), fan_out = 3*3*hidden/groups = 9.
    wdw = math.sqrt(2.0 / 9.0) * jax.random.normal(
        k3, (hidden_features, 3, 3), dtype=jnp.float32)
    # module init zeros biases; use small non-zero ones here to exercise broadcasts.
    b1 = 0.01 * jax.random.normal(k4, (hidden_features,), dtype=jnp.float32)
    bdw = 0.01 * jax.random.normal(k5, (hidden_features,), dtype=jnp.float32)
    b2 = 0.01 * jax.random.normal(k6, (out_features,), dtype=jnp.float32)

    fwd = jax.jit(dwmlp_forward)
    out = jax.block_until_ready(fwd(x, w1, b1, wdw, bdw, w2, b2))

    ref = dwmlp_reference(x, w1, b1, wdw, bdw, w2, b2)
    assert out.shape == (B, H, W, out_features)
    err = float(jnp.max(jnp.abs(out - ref)))
    assert err < 2e-3, f"mismatch vs. reference: {err}"

    print("KERNEL_OK")
</pallas_src>

<mosaic_0001>
module attributes {stable_mosaic.version = 11 : i64} {
  func.func @dwmlp_kernel(%arg0: memref<32x512xf32, #tpu.memory_space<vmem>>, %arg1: memref<8x512xf32, #tpu.memory_space<vmem>>, %arg2: memref<64x32xf32, #tpu.memory_space<vmem>>, %arg3: memref<64x1xf32, #tpu.memory_space<vmem>>, %arg4: memref<64x9xf32, #tpu.memory_space<vmem>>, %arg5: memref<64x1xf32, #tpu.memory_space<vmem>>, %arg6: memref<32x64xf32, #tpu.memory_space<vmem>>, %arg7: memref<32x1xf32, #tpu.memory_space<vmem>>, %arg8: memref<32x512xf32, #tpu.memory_space<vmem>>) attributes {dimension_semantics = [], scalar_prefetch = 0 : i64, scratch_operands = 0 : i64, tpu.core_type = #tpu.core_type<tc>} {
    %c0 = arith.constant 0 : index
    %c0_0 = arith.constant 0 : index
    %0 = vector.load %arg2[%c0, %c0_0] : memref<64x32xf32, #tpu.memory_space<vmem>>, vector<64x32xf32>
    %c0_1 = arith.constant 0 : index
    %c0_2 = arith.constant 0 : index
    %1 = vector.load %arg0[%c0_1, %c0_2] : memref<32x512xf32, #tpu.memory_space<vmem>>, vector<32x512xf32>
    %cst = arith.constant dense<0.000000e+00> : vector<64x512xf32>
    %2 = tpu.matmul %0, %1, %cst {dimension_numbers = #tpu.dot_dimension_numbers<[1], [0], [0], [1], [0, 0, 1, 1], [], []>} : vector<64x32xf32>, vector<32x512xf32>, vector<64x512xf32> -> vector<64x512xf32>
    %c0_3 = arith.constant 0 : index
    %c0_4 = arith.constant 0 : index
    %3 = vector.load %arg3[%c0_3, %c0_4] : memref<64x1xf32, #tpu.memory_space<vmem>>, vector<64x1xf32>
    %4 = vector.broadcast %3 : vector<64x1xf32> to vector<64x512xf32>
    %5 = arith.addf %2, %4 : vector<64x512xf32>
    %c0_5 = arith.constant 0 : index
    %c0_6 = arith.constant 0 : index
    %6 = vector.load %arg1[%c0_5, %c0_6] : memref<8x512xf32, #tpu.memory_space<vmem>>, vector<8x512xf32>
    %c0_7 = arith.constant 0 : index
    %c4 = arith.constant 4 : index
    %7 = vector.load %arg4[%c0_7, %c4] : memref<64x9xf32, #tpu.memory_space<vmem>>, vector<64x1xf32>
    %8 = vector.broadcast %7 : vector<64x1xf32> to vector<64x512xf32>
    %9 = arith.mulf %5, %8 : vector<64x512xf32>
    %c0_8 = arith.constant 0 : index
    %c0_9 = arith.constant 0 : index
    %10 = vector.load %arg5[%c0_8, %c0_9] : memref<64x1xf32, #tpu.memory_space<vmem>>, vector<64x1xf32>
    %11 = vector.broadcast %10 : vector<64x1xf32> to vector<64x512xf32>
    %12 = arith.addf %9, %11 : vector<64x512xf32>
    %c17_i32 = arith.constant 17 : i32
    %13 = tpu.dynamic_rotate %5 by %c17_i32 dim 1 : vector<64x512xf32>, i32 -> vector<64x512xf32>
    %14 = vector.extract_strided_slice %6 {offsets = [0, 0], sizes = [1, 512], strides = [1, 1]} : vector<8x512xf32> to vector<1x512xf32>
    %15 = vector.broadcast %14 : vector<1x512xf32> to vector<64x512xf32>
    %16 = arith.mulf %13, %15 : vector<64x512xf32>
    %c0_10 = arith.constant 0 : index
    %c0_11 = arith.constant 0 : index
    %17 = vector.load %arg4[%c0_10, %c0_11] : memref<64x9xf32, #tpu.memory_space<vmem>>, vector<64x1xf32>
    %18 = vector.broadcast %17 : vector<64x1xf32> to vector<64x512xf32>
    %19 = arith.mulf %16, %18 : vector<64x512xf32>
    %20 = arith.addf %12, %19 : vector<64x512xf32>
    %c16_i32 = arith.constant 16 : i32
    %21 = tpu.dynamic_rotate %5 by %c16_i32 dim 1 : vector<64x512xf32>, i32 -> vector<64x512xf32>
    %22 = vector.extract_strided_slice %6 {offsets = [1, 0], sizes = [1, 512], strides = [1, 1]} : vector<8x512xf32> to vector<1x512xf32>
    %23 = vector.broadcast %22 : vector<1x512xf32> to vector<64x512xf32>
    %24 = arith.mulf %21, %23 : vector<64x512xf32>
    %c0_12 = arith.constant 0 : index
    %c1 = arith.constant 1 : index
    %25 = vector.load %arg4[%c0_12, %c1] : memref<64x9xf32, #tpu.memory_space<vmem>>, vector<64x1xf32>
    %26 = vector.broadcast %25 : vector<64x1xf32> to vector<64x512xf32>
    %27 = arith.mulf %24, %26 : vector<64x512xf32>
    %28 = arith.addf %20, %27 : vector<64x512xf32>
    %c15_i32 = arith.constant 15 : i32
    %29 = tpu.dynamic_rotate %5 by %c15_i32 dim 1 : vector<64x512xf32>, i32 -> vector<64x512xf32>
    %30 = vector.extract_strided_slice %6 {offsets = [2, 0], sizes = [1, 512], strides = [1, 1]} : vector<8x512xf32> to vector<1x512xf32>
    %31 = vector.broadcast %30 : vector<1x512xf32> to vector<64x512xf32>
    %32 = arith.mulf %29, %31 : vector<64x512xf32>
    %c0_13 = arith.constant 0 : index
    %c2 = arith.constant 2 : index
    %33 = vector.load %arg4[%c0_13, %c2] : memref<64x9xf32, #tpu.memory_space<vmem>>, vector<64x1xf32>
    %34 = vector.broadcast %33 : vector<64x1xf32> to vector<64x512xf32>
    %35 = arith.mulf %32, %34 : vector<64x512xf32>
    %36 = arith.addf %28, %35 : vector<64x512xf32>
    %c1_i32 = arith.constant 1 : i32
    %37 = tpu.dynamic_rotate %5 by %c1_i32 dim 1 : vector<64x512xf32>, i32 -> vector<64x512xf32>
    %38 = vector.extract_strided_slice %6 {offsets = [3, 0], sizes = [1, 512], strides = [1, 1]} : vector<8x512xf32> to vector<1x512xf32>
    %39 = vector.broadcast %38 : vector<1x512xf32> to vector<64x512xf32>
    %40 = arith.mulf %37, %39 : vector<64x512xf32>
    %c0_14 = arith.constant 0 : index
    %c3 = arith.constant 3 : index
    %41 = vector.load %arg4[%c0_14, %c3] : memref<64x9xf32, #tpu.memory_space<vmem>>, vector<64x1xf32>
    %42 = vector.broadcast %41 : vector<64x1xf32> to vector<64x512xf32>
    %43 = arith.mulf %40, %42 : vector<64x512xf32>
    %44 = arith.addf %36, %43 : vector<64x512xf32>
    %c511_i32 = arith.constant 511 : i32
    %45 = tpu.dynamic_rotate %5 by %c511_i32 dim 1 : vector<64x512xf32>, i32 -> vector<64x512xf32>
    %46 = vector.extract_strided_slice %6 {offsets = [4, 0], sizes = [1, 512], strides = [1, 1]} : vector<8x512xf32> to vector<1x512xf32>
    %47 = vector.broadcast %46 : vector<1x512xf32> to vector<64x512xf32>
    %48 = arith.mulf %45, %47 : vector<64x512xf32>
    %c0_15 = arith.constant 0 : index
    %c5 = arith.constant 5 : index
    %49 = vector.load %arg4[%c0_15, %c5] : memref<64x9xf32, #tpu.memory_space<vmem>>, vector<64x1xf32>
    %50 = vector.broadcast %49 : vector<64x1xf32> to vector<64x512xf32>
    %51 = arith.mulf %48, %50 : vector<64x512xf32>
    %52 = arith.addf %44, %51 : vector<64x512xf32>
    %c497_i32 = arith.constant 497 : i32
    %53 = tpu.dynamic_rotate %5 by %c497_i32 dim 1 : vector<64x512xf32>, i32 -> vector<64x512xf32>
    %54 = vector.extract_strided_slice %6 {offsets = [5, 0], sizes = [1, 512], strides = [1, 1]} : vector<8x512xf32> to vector<1x512xf32>
    %55 = vector.broadcast %54 : vector<1x512xf32> to vector<64x512xf32>
    %56 = arith.mulf %53, %55 : vector<64x512xf32>
    %c0_16 = arith.constant 0 : index
    %c6 = arith.constant 6 : index
    %57 = vector.load %arg4[%c0_16, %c6] : memref<64x9xf32, #tpu.memory_space<vmem>>, vector<64x1xf32>
    %58 = vector.broadcast %57 : vector<64x1xf32> to vector<64x512xf32>
    %59 = arith.mulf %56, %58 : vector<64x512xf32>
    %60 = arith.addf %52, %59 : vector<64x512xf32>
    %c496_i32 = arith.constant 496 : i32
    %61 = tpu.dynamic_rotate %5 by %c496_i32 dim 1 : vector<64x512xf32>, i32 -> vector<64x512xf32>
    %62 = vector.extract_strided_slice %6 {offsets = [6, 0], sizes = [1, 512], strides = [1, 1]} : vector<8x512xf32> to vector<1x512xf32>
    %63 = vector.broadcast %62 : vector<1x512xf32> to vector<64x512xf32>
    %64 = arith.mulf %61, %63 : vector<64x512xf32>
    %c0_17 = arith.constant 0 : index
    %c7 = arith.constant 7 : index
    %65 = vector.load %arg4[%c0_17, %c7] : memref<64x9xf32, #tpu.memory_space<vmem>>, vector<64x1xf32>
    %66 = vector.broadcast %65 : vector<64x1xf32> to vector<64x512xf32>
    %67 = arith.mulf %64, %66 : vector<64x512xf32>
    %68 = arith.addf %60, %67 : vector<64x512xf32>
    %c495_i32 = arith.constant 495 : i32
    %69 = tpu.dynamic_rotate %5 by %c495_i32 dim 1 : vector<64x512xf32>, i32 -> vector<64x512xf32>
    %70 = vector.extract_strided_slice %6 {offsets = [7, 0], sizes = [1, 512], strides = [1, 1]} : vector<8x512xf32> to vector<1x512xf32>
    %71 = vector.broadcast %70 : vector<1x512xf32> to vector<64x512xf32>
    %72 = arith.mulf %69, %71 : vector<64x512xf32>
    %c0_18 = arith.constant 0 : index
    %c8 = arith.constant 8 : index
    %73 = vector.load %arg4[%c0_18, %c8] : memref<64x9xf32, #tpu.memory_space<vmem>>, vector<64x1xf32>
    %74 = vector.broadcast %73 : vector<64x1xf32> to vector<64x512xf32>
    %75 = arith.mulf %72, %74 : vector<64x512xf32>
    %76 = arith.addf %68, %75 : vector<64x512xf32>
    %cst_19 = arith.constant 5.000000e-01 : f32
    %77 = vector.broadcast %cst_19 : f32 to vector<64x512xf32>
    %78 = arith.mulf %77, %76 : vector<64x512xf32>
    %cst_20 = arith.constant 0.707106769 : f32
    %79 = vector.broadcast %cst_20 : f32 to vector<64x512xf32>
    %80 = arith.mulf %76, %79 : vector<64x512xf32>
    %81 = math.erf %80 : vector<64x512xf32>
    %cst_21 = arith.constant 1.000000e+00 : f32
    %82 = vector.broadcast %cst_21 : f32 to vector<64x512xf32>
    %83 = arith.addf %82, %81 : vector<64x512xf32>
    %84 = arith.mulf %78, %83 : vector<64x512xf32>
    %c0_22 = arith.constant 0 : index
    %c0_23 = arith.constant 0 : index
    %85 = vector.load %arg6[%c0_22, %c0_23] : memref<32x64xf32, #tpu.memory_space<vmem>>, vector<32x64xf32>
    %cst_24 = arith.constant dense<0.000000e+00> : vector<32x512xf32>
    %86 = tpu.matmul %85, %84, %cst_24 {dimension_numbers = #tpu.dot_dimension_numbers<[1], [0], [0], [1], [0, 0, 1, 1], [], []>} : vector<32x64xf32>, vector<64x512xf32>, vector<32x512xf32> -> vector<32x512xf32>
    %c0_25 = arith.constant 0 : index
    %c0_26 = arith.constant 0 : index
    %87 = vector.load %arg7[%c0_25, %c0_26] : memref<32x1xf32, #tpu.memory_space<vmem>>, vector<32x1xf32>
    %88 = vector.broadcast %87 : vector<32x1xf32> to vector<32x512xf32>
    %89 = arith.addf %86, %88 : vector<32x512xf32>
    %c0_27 = arith.constant 0 : index
    %c0_28 = arith.constant 0 : index
    %90 = vector.load %arg8[%c0_27, %c0_28] : memref<32x512xf32, #tpu.memory_space<vmem>>, vector<32x512xf32>
    tpu.vector_store %arg8[%c0_27, %c0_28], %89 {strides = array<i32>} : memref<32x512xf32, #tpu.memory_space<vmem>>, vector<32x512xf32>,
    return
  }
}

</mosaic_0001>

<bundles_post_ra>
// kernel: dwmlp_forward.1
= control target key start
LH: loop header
LB: loop body
LE: loop exit
PB: predicated region body
PF: predicated region fallthrough
CT: control target
= control target key end

     0   :  { %v4094_v0 = vmov 4   ;;  %v9228_v1 = vmov 0   ;;  %vm101_vm0 = vcmask 261120   ;;  %s4101_s9 = smov 1   ;;  %s4103_s22 = smov 127   ;;  %s9219_s4 = inlined_call_operand.vmem [shape: f32[64,9], index: 4, kind: input, shape index: {}]   ;;  %s9220_s3 = inlined_call_operand.vmem [shape: f32[64,1], index: 3, kind: input, shape index: {}]   ;;  %s9221_s0 = inlined_call_operand.vmem [shape: f32[32,512], index: 0, kind: input, shape index: {}]   ;;  %s9222_s2 = inlined_call_operand.vmem [shape: f32[64,32], index: 2, kind: input, shape index: {}]   ;;  %s9223_s5 = inlined_call_operand.vmem [shape: f32[64,1], index: 5, kind: input, shape index: {}]   ;;  %s9224_s1 = inlined_call_operand.vmem [shape: f32[8,512], index: 1, kind: input, shape index: {}]   ;;  %s9225_s6 = inlined_call_operand.vmem [shape: f32[32,64], index: 6, kind: input, shape index: {}]   ;;  %s9226_s7 = inlined_call_operand.vmem [shape: f32[32,1], index: 7, kind: input, shape index: {}]   ;;  %s9227_s8 = inlined_call_operand.vmem [shape: f32[32,512], index: 8, kind: output, shape index: {}]  }
   0x1   :  { %3973 = vset.pattern.permute.xlu0 %v4094_v0  ;;  %3970 = vset.pattern.permute.xlu1 %v9228_v1  ;;  %v4161_v2 = vld [vmem:[%s9219_s4 + $0x8] sm:$0xff]  ;;  %v55_v3 = vld [vmem:[%s9220_s3 + $0x10] sm:$0xff]  ;;  %v49_v4 = vld [vmem:[%s9221_s0 + $0x60] sm:$0xff]  ;;  %s4107_s16 = smov 112   ;;  %s4109_s28 = smov 111  }
   0x2   :  { %309 = vperm.xlu0 %3973, %v4161_v2   ;;  %73 = vperm.xlu1 %3970, %v55_v3   ;;  %v50_v5 = vld [vmem:[%s9221_s0 + $0x68] sm:$0xff]  ;;  %v51_v6 = vld [vmem:[%s9221_s0 + $0x70] sm:$0xff]  ;;  %v52_v7 = vld [vmem:[%s9221_s0 + $0x78] sm:$0xff] }
   0x3   :  { %138 = vmatpush.msra.mxu0 %v49_v4  ;;  %179 = vmatpush.msra.mxu1 %v50_v5  ;;  %v45_v8 = vld [vmem:[%s9221_s0 + $0x40] sm:$0xff]  ;;  %v46_v9 = vld [vmem:[%s9221_s0 + $0x48] sm:$0xff]  ;;  %v47_v10 = vld [vmem:[%s9221_s0 + $0x50] sm:$0xff] }
   0x4   :  { %220 = vmatpush.msra.mxu2 %v51_v6  ;;  %261 = vmatpush.msra.mxu3 %v52_v7  ;;  %v48_v11 = vld [vmem:[%s9221_s0 + $0x58] sm:$0xff]  ;;  %v41_v12 = vld [vmem:[%s9221_s0 + $0x20] sm:$0xff]  ;;  %v42_v14 = vld [vmem:[%s9221_s0 + $0x28] sm:$0xff] }
   0x5   :  { %139 = vmatpush.msra.mxu0 %v45_v8  ;;  %180 = vmatpush.msra.mxu1 %v46_v9  ;;  %v57_v13 = vld [vmem:[%s9220_s3 + $0x20] sm:$0xff]  ;;  %v43_v15 = vld [vmem:[%s9221_s0 + $0x30] sm:$0xff]  ;;  %v44_v16 = vld [vmem:[%s9221_s0 + $0x38] sm:$0xff] }
   0x6   :  { %221 = vmatpush.msra.mxu2 %v47_v10  ;;  %262 = vmatpush.msra.mxu3 %v48_v11  ;;  %v37_v17 = vld [vmem:[%s9221_s0] sm:$0xff]  ;;  %v38_v18 = vld [vmem:[%s9221_s0 + $0x8] sm:$0xff]  ;;  %v39_v19 = vld [vmem:[%s9221_s0 + $0x10] sm:$0xff] }
   0x7   :  { %3971 = vset.pattern.permute.xlu2 %v9228_v1  ;;  %140 = vmatpush.msra.mxu0 %v41_v12  ;;  %v40_v20 = vld [vmem:[%s9221_s0 + $0x18] sm:$0xff]  ;;  %v29_v21 = vld [vmem:[%s9222_s2] sm:$0xff]  ;;  %v4225_v22 = vld [vmem:[%s9219_s4 + $0x30] sm:$0xff] }
   0x8   :  { %83 = vperm.xlu2 %3971, %v57_v13   ;;  %181 = vmatpush.msra.mxu1 %v42_v14  ;;  %v56_v23 = vld [vmem:[%s9220_s3 + $0x18] sm:$0xff]  ;;  %v58_v24 = vld [vmem:[%s9220_s3 + $0x28] sm:$0xff]  ;;  %v53_v27 = vld [vmem:[%s9220_s3] sm:$0xff] }
   0x9   :  { %222 = vmatpush.msra.mxu2 %v43_v15  ;;  %263 = vmatpush.msra.mxu3 %v44_v16  ;;  %v30_v25 = vld [vmem:[%s9222_s2 + $0x8] sm:$0xff]  ;;  %v60_v26 = vld [vmem:[%s9220_s3 + $0x38] sm:$0xff]  ;;  %v4255_v28 = vld [vmem:[%s9219_s4] sm:$0xff] }
   0xa   :  { %141 = vmatpush.msra.mxu0 %v37_v17  ;;  %182 = vmatpush.msra.mxu1 %v38_v18  ;;  %v31_v29 = vld [vmem:[%s9222_s2 + $0x10] sm:$0xff]  ;;  %v54_v31 = vld [vmem:[%s9220_s3 + $0x8] sm:$0xff]  ;;  %v4278_v32 = vld [vmem:[%s9219_s4 + $0x18] sm:$0xff] }
   0xb   :  { %223 = vmatpush.msra.mxu2 %v39_v19  ;;  %264 = vmatpush.msra.mxu3 %v40_v20  ;;  %v4267_v30 = vld [vmem:[%s9219_s4 + $0x10] sm:$0xff]  ;;  %v32_v33 = vld [vmem:[%s9222_s2 + $0x18] sm:$0xff]  ;;  %v4290_v34 = vld [vmem:[%s9219_s4 + $0x20] sm:$0xff] }
   0xc   :  { %3873 = vmatmul.msk.f32.vlgmr.msra.gmra.mxu0 %vm101_vm0, %v29_v21  ;;  %3881 = vmatmul.msk.f32.vlgmr.msra.gmra.mxu1 %vm101_vm0, %v29_v21  ;;  %v59_v35 = vld [vmem:[%s9220_s3 + $0x30] sm:$0xff]  ;;  %v4300_v36 = vld [vmem:[%s9219_s4 + $0x28] sm:$0xff]  ;;  %v33_v37 = vld [vmem:[%s9222_s2 + $0x20] sm:$0xff]  ;;  %s4099_s3 = smov 15  }
   0xd   :  { %3889 = vmatmul.msk.f32.vlgmr.msra.gmra.mxu2 %vm101_vm0, %v29_v21  ;;  %3897 = vmatmul.msk.f32.vlgmr.msra.gmra.mxu3 %vm101_vm0, %v29_v21  ;;  %v4312_v38 = vld [vmem:[%s9219_s4 + $0x38] sm:$0xff]  ;;  %v375_v39 = vld [vmem:[%s9223_s5 + $0x8] sm:$0xff]  ;;  %v374_v40 = vld [vmem:[%s9223_s5] sm:$0xff] }
   0xe   :  { %334 = vperm.xlu0 %3973, %v4225_v22   ;;  %78 = vperm.xlu1 %3970, %v56_v23   ;;  %v34_v41 = vld [vmem:[%s9222_s2 + $0x28] sm:$0xff]  ;;  %v380_v42 = vld [vmem:[%s9223_s5 + $0x30] sm:$0xff]  ;;  %v377_v44 = vld [vmem:[%s9223_s5 + $0x18] sm:$0xff] }
   0xf   :  { %v376_v43 = vld [vmem:[%s9223_s5 + $0x10] sm:$0xff]  ;;  %v378_v46 = vld [vmem:[%s9223_s5 + $0x20] sm:$0xff]  ;;  %v379_v47 = vld [vmem:[%s9223_s5 + $0x28] sm:$0xff] }
  0x10   :  { %88 = vperm.xlu2 %3971, %v58_v24   ;;  %v35_v45 = vld [vmem:[%s9222_s2 + $0x30] sm:$0xff]  ;;  %v36_v48 = vld [vmem:[%s9222_s2 + $0x38] sm:$0xff]  ;;  %s4096_s2 = smov 16  }
  0x11   :  { %v381_v49 = vld [vmem:[%s9223_s5 + $0x38] sm:$0xff]  ;;  %s4097_s5 = smov 17  }
  0x14   :  { %3874 = vmatmul.msk.f32.gmra.mxu0 %vm101_vm0, %v30_v25  ;;  %3882 = vmatmul.msk.f32.gmra.mxu1 %vm101_vm0, %v30_v25 }
  0x15   :  { %3890 = vmatmul.msk.f32.gmra.mxu2 %vm101_vm0, %v30_v25  ;;  %3898 = vmatmul.msk.f32.gmra.mxu3 %vm101_vm0, %v30_v25 }
  0x16   :  { %3975 = vset.pattern.permute.xlu0 %v9228_v1  ;;  %98 = vperm.xlu1 %3970, %v60_v26  }
  0x17   :  { %63 = vperm.xlu0 %3975, %v53_v27  }
  0x18   :  { %3972 = vset.pattern.permute.xlu2 %v4094_v0 }
  0x19   :  { %304 = vperm.xlu2 %3972, %v4255_v28  }
  0x1c   :  { %3875 = vmatmul.msk.f32.gmra.mxu0 %vm101_vm0, %v31_v29  ;;  %3883 = vmatmul.msk.f32.gmra.mxu1 %vm101_vm0, %v31_v29 }
  0x1d   :  { %3891 = vmatmul.msk.f32.gmra.mxu2 %vm101_vm0, %v31_v29  ;;  %3899 = vmatmul.msk.f32.gmra.mxu3 %vm101_vm0, %v31_v29 }
  0x1e   :  { %3974 = vset.pattern.permute.xlu1 %v4094_v0 }
  0x1f   :  { %314 = vperm.xlu1 %3974, %v4267_v30   ;;  %68 = vperm.xlu0 %3975, %v54_v31  }
  0x21   :  { %319 = vperm.xlu2 %3972, %v4278_v32  }
  0x24   :  { %3876 = vmatmul.msk.f32.gmra.mxu0 %vm101_vm0, %v32_v33  ;;  %3884 = vmatmul.msk.f32.gmra.mxu1 %vm101_vm0, %v32_v33 }
  0x25   :  { %3892 = vmatmul.msk.f32.gmra.mxu2 %vm101_vm0, %v32_v33  ;;  %3900 = vmatmul.msk.f32.gmra.mxu3 %vm101_vm0, %v32_v33 }
  0x27   :  { %324 = vperm.xlu1 %3974, %v4290_v34   ;;  %93 = vperm.xlu0 %3975, %v59_v35  }
  0x29   :  { %329 = vperm.xlu2 %3972, %v4300_v36  }
  0x2c   :  { %3877 = vmatmul.msk.f32.gmra.mxu0 %vm101_vm0, %v33_v37  ;;  %3885 = vmatmul.msk.f32.gmra.mxu1 %vm101_vm0, %v33_v37 }
  0x2d   :  { %3893 = vmatmul.msk.f32.gmra.mxu2 %vm101_vm0, %v33_v37  ;;  %3901 = vmatmul.msk.f32.gmra.mxu3 %vm101_vm0, %v33_v37 }
  0x2f   :  { %339 = vperm.xlu1 %3974, %v4312_v38   ;;  %389 = vperm.xlu0 %3975, %v375_v39  }
  0x31   :  { %3976 = vset.pattern.permute.xlu2 %v9228_v1 }
  0x32   :  { %384 = vperm.xlu2 %3976, %v374_v40  }
  0x34   :  { %3878 = vmatmul.msk.f32.gmra.mxu0 %vm101_vm0, %v34_v41  ;;  %3886 = vmatmul.msk.f32.gmra.mxu1 %vm101_vm0, %v34_v41 }
  0x35   :  { %3894 = vmatmul.msk.f32.gmra.mxu2 %vm101_vm0, %v34_v41  ;;  %3902 = vmatmul.msk.f32.gmra.mxu3 %vm101_vm0, %v34_v41 }
  0x37   :  { %3977 = vset.pattern.permute.xlu1 %v9228_v1  ;;  %414 = vperm.xlu0 %3975, %v380_v42  }
  0x38   :  { %394 = vperm.xlu1 %3977, %v376_v43  }
  0x3a   :  { %399 = vperm.xlu2 %3976, %v377_v44  }
  0x3c   :  { %3879 = vmatmul.msk.f32.gmra.mxu0 %vm101_vm0, %v35_v45  ;;  %3887 = vmatmul.msk.f32.gmra.mxu1 %vm101_vm0, %v35_v45 }
  0x3d   :  { %3895 = vmatmul.msk.f32.gmra.mxu2 %vm101_vm0, %v35_v45  ;;  %3903 = vmatmul.msk.f32.gmra.mxu3 %vm101_vm0, %v35_v45 }
  0x3f   :  { %598 = vperm.xlu0 %3975, %v4267_v30  }
  0x40   :  { %404 = vperm.xlu1 %3977, %v378_v46  }
  0x42   :  { %409 = vperm.xlu2 %3976, %v379_v47  }
  0x44   :  { %3880 = vmatmul.msk.f32.gmra.mxu0 %vm101_vm0, %v36_v48  ;;  %3888 = vmatmul.msk.f32.gmra.mxu1 %vm101_vm0, %v36_v48 }
  0x45   :  { %3896 = vmatmul.msk.f32.gmra.mxu2 %vm101_vm0, %v36_v48  ;;  %3904 = vmatmul.msk.f32.gmra.mxu3 %vm101_vm0, %v36_v48 }
  0x47   :  { %610 = vperm.xlu0 %3975, %v4300_v36  }
  0x48   :  { %419 = vperm.xlu1 %3977, %v381_v49  }
  0x4a   :  { %594 = vperm.xlu2 %3976, %v4161_v2  }
  0x50   :  { %590 = vperm.xlu1 %3977, %v4255_v28  }
  0x52   :  { %606 = vperm.xlu2 %3976, %v4290_v34  }
  0x58   :  { %602 = vperm.xlu1 %3977, %v4278_v32  }
  0x5a   :  { %618 = vperm.xlu2 %3976, %v4312_v38  }
  0x60   :  { %614 = vperm.xlu1 %3977, %v4225_v22  }
  0x62   :  { %v4374_v51 = vpop.permute.xlu2 %83 }
  0x6a   :  { %v4378_v53 = vpop.permute.xlu2 %88 }
  0x73   :  { %v4390_v62 = vpop.permute.xlu2 %304 }
  0x74   :  { %v4372_v50 = vpop.permute.xlu0 %309  ;;  %v74_v54 = vpop.permute.xlu1 %73  ;;  %9561 = vst [vmem:[#allocation6_spill] sm:$0xff] %v4390_v62 }
  0x75   :  { %9557 = vst [vmem:[#allocation2_spill] sm:$0xff] %v4372_v50 }
  0x7b   :  { %v4406_v9 = vpop.permute.xlu2 %319 }
  0x7c   :  { %9566 = vst [vmem:[#allocation11_spill] sm:$0xff] %v4406_v9 }
  0x80   :  { %v4376_v52 = vpop.permute.xlu0 %334  ;;  %v79_v3 = vpop.permute.xlu1 %78 }
  0x81   :  { %9558 = vst [vmem:[#allocation3_spill] sm:$0xff] %v4376_v52 }
  0x83   :  { %v4428_v17 = vpop.permute.xlu2 %329 }
  0x84   :  { %9570 = vst [vmem:[#allocation15_spill] sm:$0xff] %v4428_v17 }
  0x88   :  { %v4412_v11 = vpop.permute.xlu1 %98 }
  0x89   :  { %v64_v55 = vpop.permute.xlu0 %63  ;;  %v143_v56 = vpop.f32.mrf.mxu0 }
  0x8a   :  { %v4380_v57 = vadd.f32 %v143_v56, %v64_v55  ;;  %v184_v58 = vpop.f32.mrf.mxu1 }
  0x8b   :  { %v4382_v59 = vadd.f32 %v184_v58, %v64_v55 }
  0x8c   :  { %9559 = vst [vmem:[#allocation4_spill] sm:$0xff] %v4380_v57  ;;  %685 = vrot.lane.b32.xlu0 %v4380_v57, %s4096_s2  ;;  %454 = vrot.lane.b32.xlu2 %v4380_v57, %s4097_s5  ;;  %v4442_v26 = vpop.permute.xlu2 %384 }
  0x8d   :  { %9560 = vst [vmem:[#allocation5_spill] sm:$0xff] %v4382_v59  ;;  %470 = vrot.lane.b32.xlu1 %v4382_v59, %s4097_s5 }
  0x8e   :  { %9574 = vst [vmem:[#allocation19_spill] sm:$0xff] %v4442_v26 }
  0x90   :  { %v225_v60 = vpop.f32.mrf.mxu2  ;;  %v266_v5 = vpop.f32.mrf.mxu3 }
  0x91   :  { %v69_v61 = vpop.permute.xlu0 %68  ;;  %v4392_v63 = vadd.f32 %v225_v60, %v64_v55  ;;  %v146_v0 = vpop.f32.mrf.mxu0  ;;  %v4402_v7 = vadd.f32 %v266_v5, %v64_v55 }
  0x92   :  { %v4394_v4 = vadd.f32 %v146_v0, %v69_v61  ;;  %v187_v10 = vpop.f32.mrf.mxu1  ;;  %v4430_v19 = vpop.permute.xlu1 %314 }
  0x93   :  { %9562 = vst [vmem:[#allocation7_spill] sm:$0xff] %v4392_v63  ;;  %v4416_v13 = vadd.f32 %v187_v10, %v69_v61 }
  0x94   :  { %9563 = vst [vmem:[#allocation8_spill] sm:$0xff] %v4394_v4  ;;  %486 = vrot.lane.b32.xlu0 %v4392_v63, %s4097_s5  ;;  %701 = vrot.lane.b32.xlu2 %v4382_v59, %s4096_s2  ;;  %v4458_v39 = vpop.permute.xlu2 %399 }
  0x95   :  { %687 = vrot.lane.b32.xlu1 %v4394_v4, %s4096_s2  ;;  %9564 = vst [vmem:[#allocation9_spill] sm:$0xff] %v4402_v7 }
  0x96   :  { %9567 = vst [vmem:[#allocation12_spill] sm:$0xff] %v4416_v13 }
  0x97   :  { %9571 = vst [vmem:[#allocation16_spill] sm:$0xff] %v4430_v19 }
  0x98   :  { %v228_v6 = vpop.f32.mrf.mxu2  ;;  %v269_v12 = vpop.f32.mrf.mxu3  ;;  %9579 = vst [vmem:[#allocation24_spill] sm:$0xff] %v4458_v39 }
  0x99   :  { %v4404_v8 = vadd.f32 %v228_v6, %v69_v61  ;;  %v4418_v14 = vadd.f32 %v269_v12, %v69_v61  ;;  %v149_v15 = vpop.f32.mrf.mxu0 }
  0x9a   :  { %v4420_v16 = vadd.f32 %v149_v15, %v74_v54  ;;  %v190_v18 = vpop.f32.mrf.mxu1  ;;  %v4444_v29 = vpop.permute.xlu1 %324 }
  0x9b   :  { %9565 = vst [vmem:[#allocation10_spill] sm:$0xff] %v4404_v8  ;;  %v4432_v21 = vadd.f32 %v190_v18, %v74_v54 }
  0x9c   :  { %456 = vrot.lane.b32.xlu0 %v4394_v4, %s4097_s5  ;;  %502 = vrot.lane.b32.xlu2 %v4402_v7, %s4097_s5  ;;  %9568 = vst [vmem:[#allocation13_spill] sm:$0xff] %v4418_v14  ;;  %v4473_v46 = vpop.permute.xlu2 %409 }
  0x9d   :  { %488 = vrot.lane.b32.xlu1 %v4404_v8, %s4097_s5  ;;  %9569 = vst [vmem:[#allocation14_spill] sm:$0xff] %v4420_v16 }
  0x9e   :  { %9572 = vst [vmem:[#allocation17_spill] sm:$0xff] %v4432_v21 }
  0x9f   :  { %9575 = vst [vmem:[#allocation20_spill] sm:$0xff] %v4444_v29 }
  0xa0   :  { %v272_v20 = vpop.f32.mrf.mxu3  ;;  %v231_v24 = vpop.f32.mrf.mxu2  ;;  %9583 = vst [vmem:[#allocation28_spill] sm:$0xff] %v4473_v46 }
  0xa1   :  { %v4434_v23 = vadd.f32 %v272_v20, %v74_v54  ;;  %v152_v25 = vpop.f32.mrf.mxu0  ;;  %v4446_v31 = vadd.f32 %v231_v24, %v74_v54 }
  0xa2   :  { %v193_v27 = vpop.f32.mrf.mxu1  ;;  %v4448_v33 = vadd.f32 %v152_v25, %v79_v3  ;;  %v4462_v42 = vpop.permute.xlu1 %339 }
  0xa3   :  { %9573 = vst [vmem:[#allocation18_spill] sm:$0xff] %v4434_v23  ;;  %v4450_v35 = vadd.f32 %v193_v27, %v79_v3 }
  0xa4   :  { %504 = vrot.lane.b32.xlu0 %v4418_v14, %s4097_s5  ;;  %472 = vrot.lane.b32.xlu2 %v4416_v13, %s4097_s5  ;;  %9576 = vst [vmem:[#allocation21_spill] sm:$0xff] %v4446_v31  ;;  %v4494_v61 = vpop.permute.xlu2 %594 }
  0xa5   :  { %458 = vrot.lane.b32.xlu1 %v4420_v16, %s4097_s5  ;;  %9577 = vst [vmem:[#allocation22_spill] sm:$0xff] %v4448_v33 }
  0xa6   :  { %9578 = vst [vmem:[#allocation23_spill] sm:$0xff] %v4450_v35 }
  0xa7   :  { %9581 = vst [vmem:[#allocation26_spill] sm:$0xff] %v4462_v42 }
  0xa8   :  { %v234_v37 = vpop.f32.mrf.mxu2  ;;  %v275_v44 = vpop.f32.mrf.mxu3  ;;  %9589 = vst [vmem:[#allocation34_spill] sm:$0xff] %v4494_v61 }
  0xa9   :  { %v155_v40 = vpop.f32.mrf.mxu0  ;;  %v4460_v41 = vadd.f32 %v234_v37, %v79_v3  ;;  %v4475_v47 = vadd.f32 %v275_v44, %v79_v3  ;;  %v94_v3 = vpop.permute.xlu0 %93 }
  0xaa   :  { %v4465_v43 = vadd.f32 %v155_v40, %v4374_v51  ;;  %v196_v49 = vpop.f32.mrf.mxu1  ;;  %v4484_v54 = vpop.permute.xlu1 %394 }
  0xab   :  { %9580 = vst [vmem:[#allocation25_spill] sm:$0xff] %v4460_v41  ;;  %v4489_v58 = vadd.f32 %v196_v49, %v4374_v51 }
  0xac   :  { %474 = vrot.lane.b32.xlu0 %v4432_v21, %s4097_s5  ;;  %689 = vrot.lane.b32.xlu2 %v4420_v16, %s4096_s2  ;;  %9582 = vst [vmem:[#allocation27_spill] sm:$0xff] %v4465_v43  ;;  %v4513_v18 = vpop.permute.xlu2 %606 }
  0xad   :  { %506 = vrot.lane.b32.xlu1 %v4434_v23, %s4097_s5  ;;  %9584 = vst [vmem:[#allocation29_spill] sm:$0xff] %v4475_v47 }
  0xae   :  { %9586 = vst [vmem:[#allocation31_spill] sm:$0xff] %v4484_v54 }
  0xaf   :  { %9587 = vst [vmem:[#allocation32_spill] sm:$0xff] %v4489_v58 }
  0xb0   :  { %v237_v45 = vpop.f32.mrf.mxu2  ;;  %v278_v55 = vpop.f32.mrf.mxu3  ;;  %9594 = vst [vmem:[#allocation39_spill] sm:$0xff] %v4513_v18 }
  0xb1   :  { %v4478_v48 = vadd.f32 %v237_v45, %v4374_v51  ;;  %v158_v56 = vpop.f32.mrf.mxu0  ;;  %v4492_v60 = vadd.f32 %v278_v55, %v4374_v51  ;;  %v4521_v24 = vpop.permute.xlu0 %389 }
  0xb2   :  { %v4497_v0 = vadd.f32 %v158_v56, %v4378_v53  ;;  %v199_v5 = vpop.f32.mrf.mxu1  ;;  %v4505_v6 = vpop.permute.xlu1 %404  ;;  %9595 = vst [vmem:[#allocation40_spill] sm:$0xff] %v4521_v24 }
  0xb3   :  { %9585 = vst [vmem:[#allocation30_spill] sm:$0xff] %v4478_v48  ;;  %v4508_v10 = vadd.f32 %v199_v5, %v4378_v53 }
  0xb4   :  { %691 = vrot.lane.b32.xlu0 %v4448_v33, %s4096_s2  ;;  %490 = vrot.lane.b32.xlu2 %v4446_v31, %s4097_s5  ;;  %9588 = vst [vmem:[#allocation33_spill] sm:$0xff] %v4492_v60  ;;  %v4538_v49 = vpop.permute.xlu2 %618 }
  0xb5   :  { %476 = vrot.lane.b32.xlu1 %v4450_v35, %s4097_s5  ;;  %9590 = vst [vmem:[#allocation35_spill] sm:$0xff] %v4497_v0 }
  0xb6   :  { %9591 = vst [vmem:[#allocation36_spill] sm:$0xff] %v4505_v6 }
  0xb7   :  { %9592 = vst [vmem:[#allocation37_spill] sm:$0xff] %v4508_v10 }
  0xb8   :  { %v281_v51 = vpop.f32.mrf.mxu3  ;;  %v240_v15 = vpop.f32.mrf.mxu2  ;;  %9600 = vst [vmem:[#allocation45_spill] sm:$0xff] %v4538_v49 }
  0xb9   :  { %v4511_v12 = vadd.f32 %v281_v51, %v4378_v53  ;;  %v161_v20 = vpop.f32.mrf.mxu0  ;;  %v4526_v37 = vadd.f32 %v240_v15, %v4378_v53  ;;  %v4540_v56 = vpop.permute.xlu0 %414 }
  0xba   :  { %v202_v25 = vpop.f32.mrf.mxu1  ;;  %v4523_v27 = vpop.permute.xlu1 %419  ;;  %v4528_v40 = vadd.f32 %v161_v20, %v94_v3  ;;  %9601 = vst [vmem:[#allocation46_spill] sm:$0xff] %v4540_v56 }
  0xbb   :  { %9593 = vst [vmem:[#allocation38_spill] sm:$0xff] %v4511_v12  ;;  %v4530_v44 = vadd.f32 %v202_v25, %v94_v3 }
  0xbc   :  { %492 = vrot.lane.b32.xlu0 %v4460_v41, %s4097_s5  ;;  %460 = vrot.lane.b32.xlu2 %v4448_v33, %s4097_s5  ;;  %9596 = vst [vmem:[#allocation41_spill] sm:$0xff] %v4523_v27 }
  0xbd   :  { %693 = vrot.lane.b32.xlu1 %v4465_v43, %s4096_s2  ;;  %9597 = vst [vmem:[#allocation42_spill] sm:$0xff] %v4526_v37 }
  0xbe   :  { %9598 = vst [vmem:[#allocation43_spill] sm:$0xff] %v4528_v40 }
  0xbf   :  { %9599 = vst [vmem:[#allocation44_spill] sm:$0xff] %v4530_v44 }
  0xc0   :  { %v243_v45 = vpop.f32.mrf.mxu2  ;;  %v284_v15 = vpop.f32.mrf.mxu3 }
  0xc1   :  { %v164_v55 = vpop.f32.mrf.mxu0  ;;  %v4542_v53 = vadd.f32 %v243_v45, %v94_v3  ;;  %v4557_v45 = vadd.f32 %v284_v15, %v94_v3 }
  0xc2   :  { %v4544_v5 = vpop.permute.xlu1 %590  ;;  %v4547_v51 = vadd.f32 %v164_v55, %v4412_v11  ;;  %v4562_v55 = vpop.permute.xlu0 %598 }
  0xc3   :  { %9602 = vst [vmem:[#allocation47_spill] sm:$0xff] %v4542_v53  ;;  %v205_v3 = vpop.f32.mrf.mxu1 }
  0xc4   :  { %462 = vrot.lane.b32.xlu0 %v4465_v43, %s4097_s5  ;;  %508 = vrot.lane.b32.xlu2 %v4475_v47, %s4097_s5  ;;  %9603 = vst [vmem:[#allocation48_spill] sm:$0xff] %v4544_v5 }
  0xc5   :  { %494 = vrot.lane.b32.xlu1 %v4478_v48, %s4097_s5  ;;  %9604 = vst [vmem:[#allocation49_spill] sm:$0xff] %v4547_v51 }
  0xc6   :  { %9606 = vst [vmem:[#allocation51_spill] sm:$0xff] %v4557_v45 }
  0xc7   :  { %9608 = vst [vmem:[#allocation53_spill] sm:$0xff] %v4562_v55 }
  0xc8   :  { %v246_v25 = vpop.f32.mrf.mxu2  ;;  %v287_v15 = vpop.f32.mrf.mxu3 }
  0xc9   :  { %v4560_v1 = vadd.f32 %v246_v25, %v4412_v11  ;;  %v4575_v25 = vadd.f32 %v205_v3, %v4412_v11  ;;  %v4578_v42 = vadd.f32 %v287_v15, %v4412_v11 }
  0xca   :  { %v4568_v27 = vpop.permute.xlu1 %602  ;;  %v4586_v56 = vpop.permute.xlu0 %610 }
  0xcb   :  { %9607 = vst [vmem:[#allocation52_spill] sm:$0xff] %v4560_v1 }
  0xcc   :  { %510 = vrot.lane.b32.xlu0 %v4492_v60, %s4097_s5  ;;  %478 = vrot.lane.b32.xlu2 %v4489_v58, %s4097_s5  ;;  %9609 = vst [vmem:[#allocation54_spill] sm:$0xff] %v4568_v27 }
  0xcd   :  { %464 = vrot.lane.b32.xlu1 %v4497_v0, %s4097_s5  ;;  %9611 = vst [vmem:[#allocation56_spill] sm:$0xff] %v4575_v25 }
  0xce   :  { %9612 = vst [vmem:[#allocation57_spill] sm:$0xff] %v4578_v42 }
  0xcf   :  { %9613 = vst [vmem:[#allocation58_spill] sm:$0xff] %v4586_v56 }
  0xd2   :  { %v4590_v46 = vpop.permute.xlu1 %614 }
  0xd3   :  { %9614 = vst [vmem:[#allocation59_spill] sm:$0xff] %v4590_v46 }
  0xd4   :  { %480 = vrot.lane.b32.xlu0 %v4508_v10, %s4097_s5  ;;  %695 = vrot.lane.b32.xlu2 %v4497_v0, %s4096_s2 }
  0xd5   :  { %512 = vrot.lane.b32.xlu1 %v4511_v12, %s4097_s5 }
  0xdc   :  { %697 = vrot.lane.b32.xlu0 %v4528_v40, %s4096_s2  ;;  %496 = vrot.lane.b32.xlu2 %v4526_v37, %s4097_s5 }
  0xdd   :  { %482 = vrot.lane.b32.xlu1 %v4530_v44, %s4097_s5 }
  0xe4   :  { %498 = vrot.lane.b32.xlu0 %v4542_v53, %s4097_s5  ;;  %466 = vrot.lane.b32.xlu2 %v4528_v40, %s4097_s5 }
  0xe5   :  { %699 = vrot.lane.b32.xlu1 %v4547_v51, %s4096_s2 }
  0xe6   :  { %v4555_v20 = vpop.permute.xlu2 %454 }
  0xe7   :  { %9605 = vst [vmem:[#allocation50_spill] sm:$0xff] %v4555_v20 }
  0xec   :  { %468 = vrot.lane.b32.xlu0 %v4547_v51, %s4097_s5  ;;  %514 = vrot.lane.b32.xlu2 %v4557_v45, %s4097_s5 }
  0xed   :  { %500 = vrot.lane.b32.xlu1 %v4560_v1, %s4097_s5 }
  0xee   :  { %v4572_v49 = vpop.permute.xlu2 %701 }
  0xef   :  { %9610 = vst [vmem:[#allocation55_spill] sm:$0xff] %v4572_v49 }
  0xf4   :  { %516 = vrot.lane.b32.xlu0 %v4578_v42, %s4097_s5  ;;  %484 = vrot.lane.b32.xlu2 %v4575_v25, %s4097_s5 }
  0xf5   :  { %705 = vrot.lane.b32.xlu1 %v4432_v21, %s4096_s2 }
  0xf6   :  { %v4588_v52 = vpop.permute.xlu2 %502 }
  0xfc   :  { %703 = vrot.lane.b32.xlu0 %v4416_v13, %s4096_s2  ;;  %707 = vrot.lane.b32.xlu2 %v4450_v35, %s4096_s2 }
  0xfd   :  { %711 = vrot.lane.b32.xlu1 %v4508_v10, %s4096_s2 }
  0xfe   :  { %v4598_v11 = vpop.permute.xlu0 %685  ;;  %v4600_v3 = vpop.permute.xlu2 %472 }
  0xff   :  { %9615 = vst [vmem:[#allocation60_spill] sm:$0xff] %v4598_v11  ;;  %v4602_v15 = vpop.permute.xlu1 %470 }
 0x100   :  { %9616 = vst [vmem:[#allocation61_spill] sm:$0xff] %v4600_v3 }
 0x101   :  { %9617 = vst [vmem:[#allocation62_spill] sm:$0xff] %v4602_v15 }
 0x104   :  { %709 = vrot.lane.b32.xlu0 %v4489_v58, %s4096_s2  ;;  %713 = vrot.lane.b32.xlu2 %v4530_v44, %s4096_s2 }
 0x105   :  { %717 = vrot.lane.b32.xlu1 %v4392_v63, %s4096_s2 }
 0x106   :  { %v4610_v46 = vpop.permute.xlu0 %486  ;;  %v4612_v56 = vpop.permute.xlu2 %689 }
 0x107   :  { %9618 = vst [vmem:[#allocation63_spill] sm:$0xff] %v4612_v56  ;;  %v4614_v49 = vpop.permute.xlu1 %687  ;;  %v4098_v56 = vmov 1  }
 0x108   :  { %9619 = vst [vmem:[#allocation64_spill] sm:$0xff] %v4614_v49  ;;  %3978 = vset.pattern.permute.xlu2 %v4098_v56  ;;  %3980 = vset.pattern.permute.xlu1 %v4098_v56 }
 0x109   :  { %3979 = vset.pattern.permute.xlu0 %v4098_v56 }
 0x10c   :  { %715 = vrot.lane.b32.xlu0 %v4575_v25, %s4096_s2  ;;  %719 = vrot.lane.b32.xlu2 %v4404_v8, %s4096_s2 }
 0x10d   :  { %723 = vrot.lane.b32.xlu1 %v4460_v41, %s4096_s2 }
 0x10e   :  { %v4622_v11 = vpop.permute.xlu0 %456  ;;  %v4624_v18 = vpop.permute.xlu2 %490 }
 0x10f   :  { %9620 = vst [vmem:[#allocation65_spill] sm:$0xff] %v4622_v11  ;;  %v4626_v27 = vpop.permute.xlu1 %488 }
 0x110   :  { %9621 = vst [vmem:[#allocation66_spill] sm:$0xff] %v4624_v18 }
 0x114   :  { %721 = vrot.lane.b32.xlu0 %v4446_v31, %s4096_s2  ;;  %725 = vrot.lane.b32.xlu2 %v4478_v48, %s4096_s2 }
 0x115   :  { %729 = vrot.lane.b32.xlu1 %v4542_v53, %s4096_s2 }
 0x116   :  { %v4634_v49 = vpop.permute.xlu0 %504  ;;  %v4636_v55 = vpop.permute.xlu2 %460 }
 0x117   :  { %9622 = vst [vmem:[#allocation67_spill] sm:$0xff] %v4634_v49  ;;  %v4638_v61 = vpop.permute.xlu1 %458 }
 0x118   :  { %9623 = vst [vmem:[#allocation68_spill] sm:$0xff] %v4636_v55 }
 0x119   :  { %9624 = vst [vmem:[#allocation69_spill] sm:$0xff] %v4638_v61 }
 0x11c   :  { %727 = vrot.lane.b32.xlu0 %v4526_v37, %s4096_s2  ;;  %731 = vrot.lane.b32.xlu2 %v4560_v1, %s4096_s2 }
 0x11d   :  { %735 = vrot.lane.b32.xlu1 %v4418_v14, %s4096_s2 }
 0x11e   :  { %v4646_v17 = vpop.permute.xlu0 %474  ;;  %v4648_v18 = vpop.permute.xlu2 %508 }
 0x11f   :  { %9625 = vst [vmem:[#allocation70_spill] sm:$0xff] %v4646_v17  ;;  %v4650_v49 = vpop.permute.xlu1 %506 }
 0x120   :  { %9626 = vst [vmem:[#allocation71_spill] sm:$0xff] %v4648_v18 }
 0x121   :  { %9627 = vst [vmem:[#allocation72_spill] sm:$0xff] %v4650_v49 }
 0x124   :  { %733 = vrot.lane.b32.xlu0 %v4402_v7, %s4096_s2  ;;  %737 = vrot.lane.b32.xlu2 %v4434_v23, %s4096_s2 }
 0x125   :  { %741 = vrot.lane.b32.xlu1 %v4492_v60, %s4096_s2 }
 0x126   :  { %v4658_v56 = vpop.permute.xlu0 %691  ;;  %v4660_v55 = vpop.permute.xlu2 %478 }
 0x127   :  { %9628 = vst [vmem:[#allocation73_spill] sm:$0xff] %v4658_v56  ;;  %v4662_v61 = vpop.permute.xlu1 %476 }
 0x128   :  { %9629 = vst [vmem:[#allocation74_spill] sm:$0xff] %v4660_v55 }
 0x129   :  { %9630 = vst [vmem:[#allocation75_spill] sm:$0xff] %v4662_v61 }
 0x12c   :  { %739 = vrot.lane.b32.xlu0 %v4475_v47, %s4096_s2  ;;  %743 = vrot.lane.b32.xlu2 %v4511_v12, %s4096_s2 }
 0x12d   :  { %747 = vrot.lane.b32.xlu1 %v4578_v42, %s4096_s2 }
 0x12e   :  { %v4670_v18 = vpop.permute.xlu0 %492  ;;  %v4672_v17 = vpop.permute.xlu2 %695 }
 0x12f   :  { %9631 = vst [vmem:[#allocation76_spill] sm:$0xff] %v4670_v18  ;;  %v4674_v49 = vpop.permute.xlu1 %693 }
 0x130   :  { %9632 = vst [vmem:[#allocation77_spill] sm:$0xff] %v4672_v17 }
 0x131   :  { %9633 = vst [vmem:[#allocation78_spill] sm:$0xff] %v4674_v49 }
 0x134   :  { %745 = vrot.lane.b32.xlu0 %v4557_v45, %s4096_s2  ;;  %819 = vperm.xlu2 %3978, %v4255_v28  }
 0x135   :  { %827 = vperm.xlu1 %3980, %v4267_v30  }
 0x136   :  { %v4680_v56 = vpop.permute.xlu0 %462  ;;  %v4682_v55 = vpop.permute.xlu2 %496 }
 0x137   :  { %9634 = vst [vmem:[#allocation79_spill] sm:$0xff] %v4680_v56  ;;  %v4684_v61 = vpop.permute.xlu1 %494 }
 0x138   :  { %9635 = vst [vmem:[#allocation80_spill] sm:$0xff] %v4682_v55 }
 0x139   :  { %9636 = vst [vmem:[#allocation81_spill] sm:$0xff] %v4684_v61 }
 0x13c   :  { %823 = vperm.xlu0 %3979, %v4161_v2   ;;  %831 = vperm.xlu2 %3978, %v4278_v32  }
 0x13d   :  { %835 = vperm.xlu1 %3980, %v4290_v34  }
 0x13e   :  { %v4689_v17 = vpop.permute.xlu0 %510  ;;  %v4691_v49 = vpop.permute.xlu2 %466 }
 0x13f   :  { %9637 = vst [vmem:[#allocation82_spill] sm:$0xff] %v4689_v17  ;;  %v4693_v18 = vpop.permute.xlu1 %464 }
 0x140   :  { %9638 = vst [vmem:[#allocation83_spill] sm:$0xff] %v4691_v49 }
 0x141   :  { %9639 = vst [vmem:[#allocation84_spill] sm:$0xff] %v4693_v18 }
 0x144   :  { %843 = vperm.xlu0 %3979, %v4225_v22   ;;  %839 = vperm.xlu2 %3978, %v4300_v36  }
 0x145   :  { %847 = vperm.xlu1 %3980, %v4312_v38  }
 0x146   :  { %v4698_v55 = vpop.permute.xlu0 %480  ;;  %v4700_v56 = vpop.permute.xlu2 %514 }
 0x147   :  { %9640 = vst [vmem:[#allocation85_spill] sm:$0xff] %v4698_v55  ;;  %v4702_v61 = vpop.permute.xlu1 %512 }
 0x148   :  { %9641 = vst [vmem:[#allocation86_spill] sm:$0xff] %v4700_v56 }
 0x149   :  { %9642 = vst [vmem:[#allocation87_spill] sm:$0xff] %v4702_v61 }
 0x14c   :  { %916 = vrot.lane.b32.xlu0 %v4394_v4, %s4099_s3  ;;  %914 = vrot.lane.b32.xlu2 %v4380_v57, %s4099_s3 }
 0x14d   :  { %918 = vrot.lane.b32.xlu1 %v4420_v16, %s4099_s3 }
 0x14e   :  { %v4710_v49 = vpop.permute.xlu0 %697  ;;  %v4712_v18 = vpop.permute.xlu2 %484 }
 0x14f   :  { %9643 = vst [vmem:[#allocation88_spill] sm:$0xff] %v4710_v49  ;;  %v4714_v17 = vpop.permute.xlu1 %482 }
 0x150   :  { %9644 = vst [vmem:[#allocation89_spill] sm:$0xff] %v4712_v18 }
 0x151   :  { %9645 = vst [vmem:[#allocation90_spill] sm:$0xff] %v4714_v17 }
 0x154   :  { %922 = vrot.lane.b32.xlu0 %v4465_v43, %s4099_s3  ;;  %920 = vrot.lane.b32.xlu2 %v4448_v33, %s4099_s3 }
 0x155   :  { %924 = vrot.lane.b32.xlu1 %v4497_v0, %s4099_s3 }
 0x156   :  { %v4722_v56 = vpop.permute.xlu0 %498  ;;  %v4724_v55 = vpop.permute.xlu2 %707 }
 0x157   :  { %9646 = vst [vmem:[#allocation91_spill] sm:$0xff] %v4722_v56  ;;  %v4726_v61 = vpop.permute.xlu1 %699 }
 0x158   :  { %9647 = vst [vmem:[#allocation92_spill] sm:$0xff] %v4724_v55 }
 0x159   :  { %9648 = vst [vmem:[#allocation93_spill] sm:$0xff] %v4726_v61 }
 0x15c   :  { %928 = vrot.lane.b32.xlu0 %v4547_v51, %s4099_s3  ;;  %926 = vrot.lane.b32.xlu2 %v4528_v40, %s4099_s3 }
 0x15d   :  { %930 = vrot.lane.b32.xlu1 %v4382_v59, %s4099_s3 }
 0x15e   :  { %v4734_v18 = vpop.permute.xlu0 %468  ;;  %v4736_v49 = vpop.permute.xlu2 %713 }
 0x15f   :  { %9649 = vst [vmem:[#allocation94_spill] sm:$0xff] %v4734_v18  ;;  %v4738_v17 = vpop.permute.xlu1 %500 }
 0x160   :  { %9650 = vst [vmem:[#allocation95_spill] sm:$0xff] %v4736_v49 }
 0x161   :  { %9651 = vst [vmem:[#allocation96_spill] sm:$0xff] %v4738_v17 }
 0x164   :  { %934 = vrot.lane.b32.xlu0 %v4432_v21, %s4099_s3  ;;  %932 = vrot.lane.b32.xlu2 %v4416_v13, %s4099_s3 }
 0x165   :  { %936 = vrot.lane.b32.xlu1 %v4450_v35, %s4099_s3 }
 0x166   :  { %v4746_v56 = vpop.permute.xlu0 %516  ;;  %v4748_v61 = vpop.permute.xlu2 %719 }
 0x167   :  { %9652 = vst [vmem:[#allocation97_spill] sm:$0xff] %v4746_v56  ;;  %v4750_v55 = vpop.permute.xlu1 %705 }
 0x168   :  { %9653 = vst [vmem:[#allocation98_spill] sm:$0xff] %v4748_v61 }
 0x169   :  { %9654 = vst [vmem:[#allocation99_spill] sm:$0xff] %v4750_v55 }
 0x16c   :  { %940 = vrot.lane.b32.xlu0 %v4508_v10, %s4099_s3  ;;  %938 = vrot.lane.b32.xlu2 %v4489_v58, %s4099_s3 }
 0x16d   :  { %942 = vrot.lane.b32.xlu1 %v4530_v44, %s4099_s3 }
 0x16e   :  { %v4758_v17 = vpop.permute.xlu0 %703  ;;  %v4760_v18 = vpop.permute.xlu2 %725 }
 0x16f   :  { %9655 = vst [vmem:[#allocation100_spill] sm:$0xff] %v4758_v17  ;;  %v4762_v49 = vpop.permute.xlu1 %711 }
 0x170   :  { %9656 = vst [vmem:[#allocation101_spill] sm:$0xff] %v4760_v18 }
 0x171   :  { %9657 = vst [vmem:[#allocation102_spill] sm:$0xff] %v4762_v49  ;;  %v4100_v49 = vmov 2  }
 0x172   :  { %3983 = vset.pattern.permute.xlu0 %v4100_v49  ;;  %3981 = vset.pattern.permute.xlu1 %v4100_v49 }
 0x173   :  { %3982 = vset.pattern.permute.xlu2 %v4100_v49 }
 0x174   :  { %946 = vrot.lane.b32.xlu0 %v4392_v63, %s4099_s3  ;;  %944 = vrot.lane.b32.xlu2 %v4575_v25, %s4099_s3 }
 0x175   :  { %948 = vrot.lane.b32.xlu1 %v4404_v8, %s4099_s3 }
 0x176   :  { %v4770_v56 = vpop.permute.xlu0 %709  ;;  %v4772_v55 = vpop.permute.xlu2 %731 }
 0x177   :  { %9658 = vst [vmem:[#allocation103_spill] sm:$0xff] %v4770_v56  ;;  %v4774_v61 = vpop.permute.xlu1 %717 }
 0x178   :  { %9659 = vst [vmem:[#allocation104_spill] sm:$0xff] %v4772_v55 }
 0x179   :  { %9660 = vst [vmem:[#allocation105_spill] sm:$0xff] %v4774_v61 }
 0x17c   :  { %952 = vrot.lane.b32.xlu0 %v4460_v41, %s4099_s3  ;;  %950 = vrot.lane.b32.xlu2 %v4446_v31, %s4099_s3 }
 0x17d   :  { %954 = vrot.lane.b32.xlu1 %v4478_v48, %s4099_s3 }
 0x17e   :  { %v4782_v18 = vpop.permute.xlu0 %715  ;;  %v4784_v17 = vpop.permute.xlu2 %737 }
 0x17f   :  { %9661 = vst [vmem:[#allocation106_spill] sm:$0xff] %v4782_v18  ;;  %v4786_v55 = vpop.permute.xlu1 %723 }
 0x180   :  { %9662 = vst [vmem:[#allocation107_spill] sm:$0xff] %v4784_v17 }
 0x181   :  { %9663 = vst [vmem:[#allocation108_spill] sm:$0xff] %v4786_v55 }
 0x184   :  { %958 = vrot.lane.b32.xlu0 %v4542_v53, %s4099_s3  ;;  %956 = vrot.lane.b32.xlu2 %v4526_v37, %s4099_s3 }
 0x185   :  { %960 = vrot.lane.b32.xlu1 %v4560_v1, %s4099_s3 }
 0x186   :  { %v4794_v61 = vpop.permute.xlu0 %721  ;;  %v4796_v56 = vpop.permute.xlu2 %743 }
 0x187   :  { %9664 = vst [vmem:[#allocation109_spill] sm:$0xff] %v4794_v61  ;;  %v4798_v18 = vpop.permute.xlu1 %729 }
 0x188   :  { %9665 = vst [vmem:[#allocation110_spill] sm:$0xff] %v4796_v56 }
 0x189   :  { %9666 = vst [vmem:[#allocation111_spill] sm:$0xff] %v4798_v18 }
 0x18c   :  { %964 = vrot.lane.b32.xlu0 %v4418_v14, %s4099_s3  ;;  %962 = vrot.lane.b32.xlu2 %v4402_v7, %s4099_s3 }
 0x18d   :  { %966 = vrot.lane.b32.xlu1 %v4434_v23, %s4099_s3 }
 0x18e   :  { %v4806_v49 = vpop.permute.xlu0 %727  ;;  %v4808_v55 = vpop.permute.xlu2 %819 }
 0x18f   :  { %9667 = vst [vmem:[#allocation112_spill] sm:$0xff] %v4806_v49  ;;  %v4810_v17 = vpop.permute.xlu1 %735 }
 0x190   :  { %9668 = vst [vmem:[#allocation113_spill] sm:$0xff] %v4808_v55 }
 0x191   :  { %9669 = vst [vmem:[#allocation114_spill] sm:$0xff] %v4810_v17 }
 0x194   :  { %970 = vrot.lane.b32.xlu0 %v4492_v60, %s4099_s3  ;;  %968 = vrot.lane.b32.xlu2 %v4475_v47, %s4099_s3 }
 0x195   :  { %972 = vrot.lane.b32.xlu1 %v4511_v12, %s4099_s3 }
 0x196   :  { %v4818_v18 = vpop.permute.xlu0 %733  ;;  %v4820_v56 = vpop.permute.xlu2 %831 }
 0x197   :  { %9670 = vst [vmem:[#allocation115_spill] sm:$0xff] %v4818_v18  ;;  %v4822_v61 = vpop.permute.xlu1 %741 }
 0x198   :  { %9671 = vst [vmem:[#allocation116_spill] sm:$0xff] %v4820_v56 }
 0x19c   :  { %976 = vrot.lane.b32.xlu0 %v4578_v42, %s4099_s3  ;;  %974 = vrot.lane.b32.xlu2 %v4557_v45, %s4099_s3 }
 0x19d   :  { %1048 = vperm.xlu1 %3981, %v4255_v28  }
 0x19e   :  { %v4829_v49 = vpop.permute.xlu0 %739  ;;  %v4831_v55 = vpop.permute.xlu2 %839 }
 0x19f   :  { %9672 = vst [vmem:[#allocation117_spill] sm:$0xff] %v4829_v49  ;;  %v4833_v17 = vpop.permute.xlu1 %747  ;;  %v9724_v49 = vld [vmem:[#allocation82_spill] sm:$0xff] }
 0x1a0   :  { %9673 = vst [vmem:[#allocation118_spill] sm:$0xff] %v4831_v55 }
 0x1a1   :  { %9674 = vst [vmem:[#allocation119_spill] sm:$0xff] %v4833_v17 }
 0x1a4   :  { %1056 = vperm.xlu0 %3983, %v4267_v30   ;;  %1052 = vperm.xlu2 %3982, %v4161_v2  }
 0x1a5   :  { %1060 = vperm.xlu1 %3981, %v4278_v32  }
 0x1a6   :  { %v4838_v56 = vpop.permute.xlu0 %745  ;;  %v4840_v42 = vpop.permute.xlu2 %914 }
 0x1a7   :  { %9675 = vst [vmem:[#allocation120_spill] sm:$0xff] %v4838_v56  ;;  %v4842_v18 = vpop.permute.xlu1 %827 }
 0x1a8   :  { %9676 = vst [vmem:[#allocation121_spill] sm:$0xff] %v4840_v42  ;;  %v9713_v42 = vld [vmem:[#allocation71_spill] sm:$0xff] }
 0x1a9   :  { %9677 = vst [vmem:[#allocation122_spill] sm:$0xff] %v4842_v18 }
 0x1ac   :  { %1076 = vperm.xlu0 %3983, %v4312_v38   ;;  %1064 = vperm.xlu2 %3982, %v4290_v34  }
 0x1ad   :  { %1068 = vperm.xlu1 %3981, %v4300_v36  }
 0x1ae   :  { %v4847_v28 = vpop.permute.xlu0 %823  ;;  %v4849_v17 = vpop.permute.xlu2 %920 }
 0x1af   :  { %9678 = vst [vmem:[#allocation123_spill] sm:$0xff] %v4847_v28  ;;  %v4851_v30 = vpop.permute.xlu1 %835 }
 0x1b0   :  { %9679 = vst [vmem:[#allocation124_spill] sm:$0xff] %v4849_v17 }
 0x1b1   :  { %9680 = vst [vmem:[#allocation125_spill] sm:$0xff] %v4851_v30 }
 0x1b4   :  { %1147 = vrot.lane.b32.xlu0 %v4420_v16, %s4101_s9  ;;  %1072 = vperm.xlu2 %3982, %v4225_v22  }
 0x1b5   :  { %1143 = vrot.lane.b32.xlu1 %v4380_v57, %s4101_s9 }
 0x1b6   :  { %v4858_v2 = vpop.permute.xlu0 %843  ;;  %v4860_v32 = vpop.permute.xlu2 %926 }
 0x1b7   :  { %9681 = vst [vmem:[#allocation126_spill] sm:$0xff] %v4858_v2  ;;  %v4862_v34 = vpop.permute.xlu1 %847 }
 0x1b8   :  { %9682 = vst [vmem:[#allocation127_spill] sm:$0xff] %v4860_v32 }
 0x1b9   :  { %9683 = vst [vmem:[#allocation128_spill] sm:$0xff] %v4862_v34 }
 0x1bc   :  { %1153 = vrot.lane.b32.xlu0 %v4497_v0, %s4101_s9  ;;  %1145 = vrot.lane.b32.xlu2 %v4394_v4, %s4101_s9 }
 0x1bd   :  { %1149 = vrot.lane.b32.xlu1 %v4448_v33, %s4101_s9 }
 0x1be   :  { %v4870_v36 = vpop.permute.xlu0 %916  ;;  %v4872_v22 = vpop.permute.xlu2 %932 }
 0x1bf   :  { %9684 = vst [vmem:[#allocation129_spill] sm:$0xff] %v4870_v36  ;;  %v4874_v38 = vpop.permute.xlu1 %918 }
 0x1c0   :  { %9685 = vst [vmem:[#allocation130_spill] sm:$0xff] %v4872_v22 }
 0x1c1   :  { %9686 = vst [vmem:[#allocation131_spill] sm:$0xff] %v4874_v38 }
 0x1c4   :  { %1159 = vrot.lane.b32.xlu0 %v4382_v59, %s4101_s9  ;;  %1151 = vrot.lane.b32.xlu2 %v4465_v43, %s4101_s9 }
 0x1c5   :  { %1155 = vrot.lane.b32.xlu1 %v4528_v40, %s4101_s9 }
 0x1c6   :  { %v4882_v34 = vpop.permute.xlu0 %922  ;;  %v4884_v32 = vpop.permute.xlu2 %938 }
 0x1c7   :  { %9687 = vst [vmem:[#allocation132_spill] sm:$0xff] %v4882_v34  ;;  %v4886_v2 = vpop.permute.xlu1 %924  ;;  %v9725_v34 = vld [vmem:[#allocation79_spill] sm:$0xff] }
 0x1c8   :  { %9688 = vst [vmem:[#allocation133_spill] sm:$0xff] %v4884_v32 }
 0x1c9   :  { %9689 = vst [vmem:[#allocation134_spill] sm:$0xff] %v4886_v2 }
 0x1cc   :  { %1165 = vrot.lane.b32.xlu0 %v4450_v35, %s4101_s9  ;;  %1157 = vrot.lane.b32.xlu2 %v4547_v51, %s4101_s9 }
 0x1cd   :  { %1161 = vrot.lane.b32.xlu1 %v4416_v13, %s4101_s9 }
 0x1ce   :  { %v4894_v56 = vpop.permute.xlu0 %928  ;;  %v4896_v59 = vpop.permute.xlu2 %944 }
 0x1cf   :  { %9690 = vst [vmem:[#allocation135_spill] sm:$0xff] %v4894_v56  ;;  %v4898_v0 = vpop.permute.xlu1 %930  ;;  %v518_v56 = vlaneseq }
 0x1d0   :  { %9691 = vst [vmem:[#allocation136_spill] sm:$0xff] %v4896_v59  ;;  %v342_v59 = vmul.f32 %v4390_v62, %v4380_v57  ;;  %v349_v57 = vmul.f32 %v4372_v50, %v4418_v14 }
 0x1d1   :  { %9692 = vst [vmem:[#allocation137_spill] sm:$0xff] %v4898_v0  ;;  %v4912_v13 = vand.u32 127, %v518_v56  ;;  %v4931_v56 = vld [vmem:[%s9224_s1] sm:$0xff] }
 0x1d2   :  { %9698 = vst [vmem:[#allocation143_spill] sm:$0xff] %v4931_v56  ;;  %v4939_v55 = vadd.f32 %v4442_v26, %v342_v59 }
 0x1d3   :  { %vm520_vm1 = vcmp.lt.s32.totalorder %v4912_v13, 17  ;;  %vm749_vm2 = vcmp.lt.s32.totalorder %v4912_v13, 16  ;;  %vm978_vm3 = vcmp.lt.s32.totalorder %v4912_v13, 15  ;;  %vm1207_vm4 = vcmp.lt.s32.totalorder %v4912_v13, 1 }
 0x1d4   :  { %1171 = vrot.lane.b32.xlu0 %v4530_v44, %s4101_s9  ;;  %1163 = vrot.lane.b32.xlu2 %v4432_v21, %s4101_s9  ;;  %v344_v44 = vmul.f32 %v4390_v62, %v4392_v63  ;;  %vm1436_vm5 = vcmp.lt.s32.totalorder %v4912_v13, 127  ;;  %vm1665_vm6 = vcmp.lt.s32.totalorder %v4912_v13, 113  ;;  %vm1894_vm7 = vcmp.lt.s32.totalorder %v4912_v13, 112 }
 0x1d5   :  { %1167 = vrot.lane.b32.xlu1 %v4489_v58, %s4101_s9  ;;  %vm2123_vm8 = vcmp.lt.s32.totalorder %v4912_v13, 111 }
 0x1d6   :  { %v4906_v2 = vpop.permute.xlu0 %934  ;;  %v4908_v35 = vpop.permute.xlu2 %950 }
 0x1d7   :  { %9693 = vst [vmem:[#allocation138_spill] sm:$0xff] %v4906_v2  ;;  %v4910_v51 = vpop.permute.xlu1 %936 }
 0x1d8   :  { %9694 = vst [vmem:[#allocation139_spill] sm:$0xff] %v4908_v35  ;;  %v361_v35 = vmul.f32 %v4444_v29, %v4492_v60 }
 0x1d9   :  { %9695 = vst [vmem:[#allocation140_spill] sm:$0xff] %v4910_v51 }
 0x1dc   :  { %1177 = vrot.lane.b32.xlu0 %v4404_v8, %s4101_s9  ;;  %1169 = vrot.lane.b32.xlu2 %v4508_v10, %s4101_s9  ;;  %v345_v10 = vmul.f32 %v4390_v62, %v4402_v7  ;;  %v4953_v62 = vperm.slane %v4931_v56, 0 }
 0x1dd   :  { %1173 = vrot.lane.b32.xlu1 %v4575_v25, %s4101_s9  ;;  %v4944_v25 = vadd.f32 %v4442_v26, %v344_v44  ;;  %v545_v44 = vsel %vm520_vm1, %v4588_v52, %v4555_v20  ;;  %v356_v20 = vmul.f32 %v4406_v9, %v4460_v41 }
 0x1de   :  { %v4924_v21 = vpop.permute.xlu0 %940  ;;  %v4926_v58 = vpop.permute.xlu2 %956  ;;  %9700 = vst [vmem:[#allocation145_spill] sm:$0xff] %v4953_v62  ;;  %v557_v17 = vmul.f32 %v4953_v62, %v545_v44  ;;  %v529_v44 = vsel %vm520_vm1, %v4602_v15, %v4610_v46 }
 0x1df   :  { %9696 = vst [vmem:[#allocation141_spill] sm:$0xff] %v4924_v21  ;;  %v4935_v40 = vpop.permute.xlu1 %942  ;;  %v346_v21 = vmul.f32 %v4372_v50, %v4394_v4  ;;  %v350_v4 = vmul.f32 %v4430_v19, %v4420_v16  ;;  %v4981_v16 = vld [vmem:[%s9224_s1 + $0x18] sm:$0xff] }
 0x1e0   :  { %9697 = vst [vmem:[#allocation142_spill] sm:$0xff] %v4926_v58  ;;  %v348_v58 = vmul.f32 %v4372_v50, %v4404_v8  ;;  %v4967_v50 = vld [vmem:[%s9224_s1 + $0x10] sm:$0xff]  ;;  %v4970_v8 = vadd.f32 %v4442_v26, %v345_v10  ;;  %v357_v10 = vmul.f32 %v4406_v9, %v4475_v47 }
 0x1e1   :  { %9699 = vst [vmem:[#allocation144_spill] sm:$0xff] %v4935_v40  ;;  %v354_v40 = vmul.f32 %v4406_v9, %v4448_v33  ;;  %v4956_v59 = vadd.f32 %v4521_v24, %v346_v21  ;;  %v4976_v21 = vadd.f32 %v4521_v24, %v349_v57  ;;  %v360_v57 = vmul.f32 %v4444_v29, %v4478_v48 }
 0x1e2   :  { %9701 = vst [vmem:[#allocation146_spill] sm:$0xff] %v4967_v50  ;;  %v4973_v33 = vadd.f32 %v4521_v24, %v348_v58  ;;  %v352_v58 = vmul.f32 %v4430_v19, %v4446_v31  ;;  %v4102_v24 = vmov 3   ;;  %v5004_v51 = vperm.slane %v4967_v50, 0 }
 0x1e3   :  { %9702 = vst [vmem:[#allocation147_spill] sm:$0xff] %v4981_v16  ;;  %3984 = vset.pattern.permute.xlu0 %v4102_v24  ;;  %v4998_v26 = vadd.f32 %v4458_v39, %v354_v40  ;;  %3985 = vset.pattern.permute.xlu1 %v4102_v24  ;;  %v5011_v9 = vadd.f32 %v4484_v54, %v350_v4 }
 0x1e4   :  { %1183 = vrot.lane.b32.xlu0 %v4478_v48, %s4101_s9  ;;  %1175 = vrot.lane.b32.xlu2 %v4392_v63, %s4101_s9  ;;  %v353_v63 = vmul.f32 %v4430_v19, %v4434_v23  ;;  %9703 = vst [vmem:[#allocation148_spill] sm:$0xff] %v5004_v51  ;;  %v358_v40 = vmul.f32 %v4444_v29, %v4465_v43  ;;  %v9711_v29 = vld [vmem:[#allocation70_spill] sm:$0xff] }
 0x1e5   :  { %1179 = vrot.lane.b32.xlu1 %v4446_v31, %s4101_s9  ;;  %3986 = vset.pattern.permute.xlu2 %v4102_v24  ;;  %v5016_v31 = vperm.slane %v4981_v16, 0  ;;  %v5025_v2 = vadd.f32 %v4484_v54, %v352_v58  ;;  %v521_v4 = vsel %vm520_vm1, %v4610_v46, %v4588_v52  ;;  %v5035_v43 = vadd.f32 %v4458_v39, %v356_v20  ;;  %v9707_v46 = vld [vmem:[#allocation67_spill] sm:$0xff] }
 0x1e6   :  { %v5006_v48 = vpop.permute.xlu0 %946  ;;  %v5008_v38 = vpop.permute.xlu2 %962  ;;  %v5028_v24 = vadd.f32 %v4484_v54, %v353_v63  ;;  %v5040_v15 = vadd.f32 %v4505_v6, %v358_v40  ;;  %v5043_v58 = vadd.f32 %v4505_v6, %v360_v57  ;;  %v5046_v63 = vadd.f32 %v4458_v39, %v357_v10  ;;  %v9709_v40 = vld [vmem:[#allocation72_spill] sm:$0xff]  ;;  %v9710_v39 = vld [vmem:[#allocation66_spill] sm:$0xff] }
 0x1e7   :  { %9704 = vst [vmem:[#allocation149_spill] sm:$0xff] %v5006_v48  ;;  %v5022_v19 = vpop.permute.xlu1 %948  ;;  %v621_v54 = vmul.f32 %v4544_v5, %v557_v17  ;;  %v559_v18 = vmul.f32 %v5004_v51, %v529_v44  ;;  %v530_v52 = vsel %vm520_vm1, %v4600_v3, %v4626_v27  ;;  %v546_v20 = vsel %vm520_vm1, %v9707_v46, %v4622_v11  ;;  %v9708_v17 = vld [vmem:[#allocation69_spill] sm:$0xff]  ;;  %v9712_v11 = vld [vmem:[#allocation68_spill] sm:$0xff] }
 0x1e8   :  { %9705 = vst [vmem:[#allocation150_spill] sm:$0xff] %v5008_v38  ;;  %v560_v57 = vmul.f32 %v5016_v31, %v521_v4  ;;  %v522_v10 = vsel %vm520_vm1, %v4626_v27, %v9707_v46  ;;  %v547_v44 = vsel %vm520_vm1, %v9709_v40, %v9708_v17  ;;  %v531_v3 = vsel %vm520_vm1, %v9711_v29, %v9710_v39  ;;  %v9714_v46 = vld [vmem:[#allocation76_spill] sm:$0xff]  ;;  %v9715_v38 = vld [vmem:[#allocation75_spill] sm:$0xff] }
 0x1e9   :  { %9706 = vst [vmem:[#allocation151_spill] sm:$0xff] %v5016_v31  ;;  %v523_v4 = vsel %vm520_vm1, %v9710_v39, %v9709_v40  ;;  %v548_v27 = vsel %vm520_vm1, %v9713_v42, %v9712_v11  ;;  %v532_v17 = vsel %vm520_vm1, %v9715_v38, %v9714_v46  ;;  %v5088_v29 = vadd.f32 %v4505_v6, %v361_v35 }
 0x1ea   :  { %v563_v39 = vmul.f32 %v5004_v51, %v530_v52  ;;  %v561_v40 = vmul.f32 %v4953_v62, %v546_v20  ;;  %v524_v11 = vsel %vm520_vm1, %v9714_v46, %v9713_v42  ;;  %v564_v38 = vmul.f32 %v5016_v31, %v522_v10  ;;  %v9718_v46 = vld [vmem:[#allocation81_spill] sm:$0xff] }
 0x1eb   :  { %v567_v35 = vmul.f32 %v5004_v51, %v531_v3  ;;  %v568_v20 = vmul.f32 %v5016_v31, %v523_v4  ;;  %v569_v0 = vmul.f32 %v4953_v62, %v548_v27  ;;  %v571_v42 = vmul.f32 %v5004_v51, %v532_v17  ;;  %v9721_v4 = vld [vmem:[#allocation15_spill] sm:$0xff]  ;;  %v9723_v27 = vld [vmem:[#allocation34_spill] sm:$0xff] }
 0x1ec   :  { %1189 = vrot.lane.b32.xlu0 %v4560_v1, %s4101_s9  ;;  %1181 = vrot.lane.b32.xlu2 %v4460_v41, %s4101_s9  ;;  %v623_v1 = vmul.f32 %v4544_v5, %v559_v18  ;;  %v565_v41 = vmul.f32 %v4953_v62, %v547_v44  ;;  %v5116_v44 = vadd.f32 %v621_v54, %v4939_v55 }
 0x1ed   :  { %1185 = vrot.lane.b32.xlu1 %v4526_v37, %s4101_s9  ;;  %v9719_v37 = vld [vmem:[#allocation74_spill] sm:$0xff]  ;;  %v624_v3 = vmul.f32 %v4544_v5, %v560_v57  ;;  %v627_v17 = vmul.f32 %v9723_v27, %v563_v39  ;;  %v625_v48 = vmul.f32 %v9723_v27, %v561_v40  ;;  %v549_v54 = vsel %vm520_vm1, %v9724_v49, %v9725_v34  ;;  %v9726_v57 = vld [vmem:[#allocation53_spill] sm:$0xff] }
 0x1ee   :  { %v5102_v6 = vpop.permute.xlu0 %952  ;;  %v5104_v52 = vpop.permute.xlu2 %968  ;;  %v533_v18 = vsel %vm520_vm1, %v9719_v37, %v9718_v46  ;;  %9720 = vst [vmem:[#allocation66_spill] sm:$0xff] %v5116_v44  ;;  %v525_v37 = vsel %vm520_vm1, %v9718_v46, %v9724_v49  ;;  %v5135_v55 = vadd.f32 %v623_v1, %v4944_v25  ;;  %v631_v5 = vmul.f32 %v9726_v57, %v567_v35 }
 0x1ef   :  { %9716 = vst [vmem:[#allocation67_spill] sm:$0xff] %v5102_v6  ;;  %v5113_v10 = vpop.permute.xlu1 %954  ;;  %v5122_v6 = vmul.f32 %v9721_v4, %v4511_v12  ;;  %v575_v39 = vmul.f32 %v5004_v51, %v533_v18  ;;  %v629_v40 = vmul.f32 %v9726_v57, %v565_v41  ;;  %v632_v4 = vmul.f32 %v9726_v57, %v568_v20  ;;  %v9729_v20 = vld [vmem:[#allocation39_spill] sm:$0xff]  ;;  %v9730_v18 = vld [vmem:[#allocation98_spill] sm:$0xff] }
 0x1f0   :  { %9717 = vst [vmem:[#allocation72_spill] sm:$0xff] %v5104_v52  ;;  %v572_v52 = vmul.f32 %v5016_v31, %v524_v11  ;;  %v628_v11 = vmul.f32 %v9723_v27, %v564_v38  ;;  %v573_v1 = vmul.f32 %v4953_v62, %v549_v54  ;;  %v576_v25 = vmul.f32 %v5016_v31, %v525_v37 }
 0x1f1   :  { %9722 = vst [vmem:[#allocation71_spill] sm:$0xff] %v5122_v6  ;;  %v9727_v6 = vld [vmem:[#allocation54_spill] sm:$0xff]  ;;  %v5153_v41 = vadd.f32 %v624_v3, %v4970_v8  ;;  %v657_v38 = vadd.f32 %v625_v48, %v4956_v59  ;;  %v5158_v35 = vperm.slane %v4967_v50, 1  ;;  %v9731_v8 = vld [vmem:[#allocation100_spill] sm:$0xff]  ;;  %v5176_v59 = vadd.f32 %v629_v40, %v5011_v9 }
 0x1f2   :  { %v633_v46 = vmul.f32 %v9727_v6, %v569_v0  ;;  %v635_v44 = vmul.f32 %v9727_v6, %v571_v42  ;;  %v636_v49 = vmul.f32 %v9727_v6, %v572_v52  ;;  %v659_v0 = vadd.f32 %v627_v17, %v4973_v33  ;;  %v9735_v9 = vld [vmem:[#allocation64_spill] sm:$0xff]  ;;  %v9736_v40 = vld [vmem:[#allocation114_spill] sm:$0xff] }
 0x1f3   :  { %9728 = vst [vmem:[#allocation76_spill] sm:$0xff] %v5158_v35  ;;  %v660_v37 = vadd.f32 %v628_v11, %v4976_v21  ;;  %v5164_v52 = vadd.f32 %v631_v5, %v5025_v2  ;;  %v639_v42 = vmul.f32 %v9729_v20, %v575_v39  ;;  %v759_v33 = vsel %vm749_vm2, %v9731_v8, %v9730_v18 }
 0x1f4   :  { %1195 = vrot.lane.b32.xlu0 %v4434_v23, %s4101_s9  ;;  %1187 = vrot.lane.b32.xlu2 %v4542_v53, %s4101_s9  ;;  %v5179_v17 = vadd.f32 %v632_v4, %v5028_v24  ;;  %v5182_v5 = vadd.f32 %v633_v46, %v4998_v26  ;;  %v5185_v2 = vadd.f32 %v635_v44, %v5035_v43  ;;  %v5200_v4 = vperm.slane %v4931_v56, 1  ;;  %v9738_v44 = vld [vmem:[#allocation87_spill] sm:$0xff]  ;;  %v9739_v46 = vld [vmem:[#allocation80_spill] sm:$0xff] }
 0x1f5   :  { %1191 = vrot.lane.b32.xlu1 %v4402_v7, %s4101_s9  ;;  %v5190_v54 = vadd.f32 %v636_v49, %v5046_v63  ;;  %v637_v11 = vmul.f32 %v9729_v20, %v573_v1  ;;  %v640_v39 = vmul.f32 %v9729_v20, %v576_v25  ;;  %v775_v24 = vsel %vm749_vm2, %v9736_v40, %v9735_v9  ;;  %v9750_v23 = vld [vmem:[#allocation115_spill] sm:$0xff] }
 0x1f6   :  { %v5171_v3 = vpop.permute.xlu0 %958  ;;  %v5173_v48 = vpop.permute.xlu2 %974  ;;  %v792_v26 = vmul.f32 %v5158_v35, %v759_v33  ;;  %9737 = vst [vmem:[#allocation79_spill] sm:$0xff] %v5200_v4  ;;  %v751_v43 = vsel %vm749_vm2, %v9730_v18, %v9736_v40  ;;  %v671_v63 = vadd.f32 %v639_v42, %v5043_v58  ;;  %v526_v49 = vsel %vm520_vm1, %v9739_v46, %v9738_v44  ;;  %v9741_v33 = vld [vmem:[#allocation101_spill] sm:$0xff] }
 0x1f7   :  { %9732 = vst [vmem:[#allocation81_spill] sm:$0xff] %v5171_v3  ;;  %v5187_v21 = vpop.permute.xlu1 %960  ;;  %v5213_v1 = vperm.slane %v4981_v16, 1  ;;  %v988_v25 = vsel %vm978_vm3, %v4872_v22, %v5022_v19  ;;  %v9742_v3 = vld [vmem:[#allocation103_spill] sm:$0xff]  ;;  %v790_v58 = vmul.f32 %v5200_v4, %v775_v24  ;;  %v5226_v40 = vperm.slane %v4967_v50, 2  ;;  %v9749_v50 = vld [vmem:[#allocation78_spill] sm:$0xff] }
 0x1f8   :  { %9733 = vst [vmem:[#allocation34_spill] sm:$0xff] %v5173_v48  ;;  %v762_v18 = vsel %vm749_vm2, %v9742_v3, %v9741_v33  ;;  %v856_v42 = vmul.f32 %v4847_v28, %v792_v26  ;;  %v5229_v46 = vadd.f32 %v637_v11, %v5040_v15  ;;  %v5240_v24 = vmul.f32 %v5016_v31, %v526_v49  ;;  %v9744_v26 = vld [vmem:[#allocation105_spill] sm:$0xff]  ;;  %v9745_v48 = vld [vmem:[#allocation55_spill] sm:$0xff] }
 0x1f9   :  { %9734 = vst [vmem:[#allocation82_spill] sm:$0xff] %v5187_v21  ;;  %v5232_v21 = vadd.f32 %v640_v39, %v5088_v29  ;;  %v793_v51 = vmul.f32 %v5213_v1, %v751_v43  ;;  %v758_v15 = vsel %vm749_vm2, %v9745_v48, %v9744_v26  ;;  %v854_v11 = vmul.f32 %v4847_v28, %v790_v58 }
 0x1fa   :  { %9740 = vst [vmem:[#allocation53_spill] sm:$0xff] %v5213_v1  ;;  %v1021_v29 = vmul.f32 %v5226_v40, %v988_v25  ;;  %v804_v39 = vmul.f32 %v5158_v35, %v762_v18  ;;  %v5253_v62 = vperm.slane %v4931_v56, 2  ;;  %v5256_v49 = vperm.slane %v4981_v16, 2 }
 0x1fb   :  { %9743 = vst [vmem:[#allocation54_spill] sm:$0xff] %v5226_v40  ;;  %v857_v43 = vmul.f32 %v4847_v28, %v793_v51  ;;  %v778_v16 = vsel %vm749_vm2, %v4822_v61, %v9749_v50 }
 0x1fc   :  { %1201 = vrot.lane.b32.xlu0 %v4511_v12, %s4101_s9  ;;  %1193 = vrot.lane.b32.xlu2 %v4418_v14, %s4101_s9  ;;  %9746 = vst [vmem:[#allocation39_spill] sm:$0xff] %v5253_v62  ;;  %v888_v12 = vadd.f32 %v856_v42, %v659_v0  ;;  %v750_v0 = vsel %vm749_vm2, %v9744_v26, %v9750_v23  ;;  %v9754_v14 = vld [vmem:[#allocation107_spill] sm:$0xff] }
 0x1fd   :  { %1197 = vrot.lane.b32.xlu1 %v4475_v47, %s4101_s9  ;;  %9747 = vst [vmem:[#allocation98_spill] sm:$0xff] %v5256_v49  ;;  %v889_v28 = vadd.f32 %v857_v43, %v660_v37  ;;  %v991_v26 = vsel %vm978_vm3, %v4884_v32, %v5113_v10 }
 0x1fe   :  { %v965_v31 = vpop.permute.xlu0 %964  ;;  %v5258_v44 = vpop.permute.xlu2 %1052 }
 0x1ff   :  { %9748 = vst [vmem:[#allocation100_spill] sm:$0xff] %v5258_v44  ;;  %v5260_v58 = vpop.permute.xlu1 %966  ;;  %v980_v25 = vsel %vm978_vm3, %v5022_v19, %v965_v31  ;;  %v1004_v51 = vsel %vm978_vm3, %v965_v31, %v4870_v36  ;;  %v1085_v18 = vmul.f32 %v5258_v44, %v1021_v29  ;;  %v754_v31 = vsel %vm749_vm2, %v9741_v33, %v4822_v61  ;;  %v9751_v29 = vld [vmem:[#allocation60_spill] sm:$0xff]  ;;  %v9753_v33 = vld [vmem:[#allocation63_spill] sm:$0xff] }
 0x200   :  { %v1019_v42 = vmul.f32 %v5253_v62, %v1004_v51  ;;  %v1022_v19 = vmul.f32 %v5256_v49, %v980_v25  ;;  %v774_v56 = vsel %vm749_vm2, %v9750_v23, %v9751_v29  ;;  %v886_v36 = vadd.f32 %v854_v11, %v657_v38 }
 0x201   :  { %v5287_v22 = vadd.f32 %v1085_v18, %v888_v12  ;;  %v788_v61 = vmul.f32 %v5158_v35, %v758_v15  ;;  %v776_v23 = vsel %vm749_vm2, %v9754_v14, %v9753_v33  ;;  %v802_v12 = vmul.f32 %v5200_v4, %v778_v16  ;;  %v5310_v18 = vld [vmem:[%s9219_s4] sm:$0xff]  ;;  %v9758_v15 = vld [vmem:[#allocation108_spill] sm:$0xff] }
 0x202   :  { %v1083_v25 = vmul.f32 %v5258_v44, %v1019_v42  ;;  %v1086_v51 = vmul.f32 %v5258_v44, %v1022_v19  ;;  %v868_v38 = vmul.f32 %v4851_v30, %v804_v39  ;;  %v805_v37 = vmul.f32 %v5213_v1, %v754_v31  ;;  %9757 = vst [vmem:[#allocation105_spill] sm:$0xff] %v5310_v18  ;;  %v9759_v16 = vld [vmem:[#allocation92_spill] sm:$0xff]  ;;  %v9760_v31 = vld [vmem:[#allocation109_spill] sm:$0xff] }
 0x203   :  { %9752 = vst [vmem:[#allocation114_spill] sm:$0xff] %v5287_v22  ;;  %v761_v39 = vsel %vm749_vm2, %v9759_v16, %v9758_v15  ;;  %v1033_v42 = vmul.f32 %v5226_v40, %v991_v26  ;;  %v794_v19 = vmul.f32 %v5200_v4, %v776_v23  ;;  %v9763_v23 = vld [vmem:[#allocation132_spill] sm:$0xff]  ;;  %v9765_v44 = vld [vmem:[#allocation113_spill] sm:$0xff] }
 0x204   :  { %v5303_v11 = vadd.f32 %v1083_v25, %v886_v36  ;;  %v5305_v43 = vadd.f32 %v1086_v51, %v889_v28  ;;  %1277 = vperm.xlu0 %3984, %v5310_v18   ;;  %1199 = vrot.lane.b32.xlu2 %v4492_v60, %s4101_s9  ;;  %v786_v36 = vmul.f32 %v5200_v4, %v774_v56 }
 0x205   :  { %v789_v28 = vmul.f32 %v5213_v1, %v750_v0  ;;  %1203 = vrot.lane.b32.xlu1 %v4557_v45, %s4101_s9  ;;  %v752_v25 = vsel %vm749_vm2, %v9760_v31, %v9754_v14  ;;  %v866_v51 = vmul.f32 %v4851_v30, %v802_v12  ;;  %v900_v0 = vadd.f32 %v868_v38, %v671_v63  ;;  %v9764_v12 = vld [vmem:[#allocation99_spill] sm:$0xff]  ;;  %v9767_v45 = vld [vmem:[#allocation117_spill] sm:$0xff] }
 0x206   :  { %9755 = vst [vmem:[#allocation101_spill] sm:$0xff] %v5303_v11  ;;  %v971_v22 = vpop.permute.xlu0 %970  ;;  %v5331_v56 = vpop.permute.xlu2 %1064  ;;  %v852_v60 = vmul.f32 %v9765_v44, %v788_v61  ;;  %v850_v32 = vmul.f32 %v9765_v44, %v786_v36  ;;  %v753_v36 = vsel %vm749_vm2, %v9758_v15, %v9767_v45  ;;  %v5385_v15 = vld [vmem:[%s9219_s4 + $0x28] sm:$0xff] }
 0x207   :  { %9756 = vst [vmem:[#allocation103_spill] sm:$0xff] %v5305_v43  ;;  %v869_v43 = vmul.f32 %v4851_v30, %v805_v37  ;;  %v5333_v11 = vpop.permute.xlu1 %972  ;;  %v983_v26 = vsel %vm978_vm3, %v5113_v10, %v971_v22  ;;  %v1007_v18 = vsel %vm978_vm3, %v971_v22, %v9763_v23  ;;  %v1097_v14 = vmul.f32 %v5331_v56, %v1033_v42  ;;  %v9766_v30 = vld [vmem:[#allocation73_spill] sm:$0xff] }
 0x208   :  { %9761 = vst [vmem:[#allocation55_spill] sm:$0xff] %v5331_v56  ;;  %v760_v37 = vsel %vm749_vm2, %v9764_v12, %v9760_v31  ;;  %v1031_v63 = vmul.f32 %v5253_v62, %v1007_v18  ;;  %v1034_v38 = vmul.f32 %v5256_v49, %v983_v26  ;;  %v853_v10 = vmul.f32 %v9765_v44, %v789_v28  ;;  %v9769_v28 = vld [vmem:[#allocation149_spill] sm:$0xff] }
 0x209   :  { %9762 = vst [vmem:[#allocation78_spill] sm:$0xff] %v5333_v11  ;;  %v777_v22 = vsel %vm749_vm2, %v9767_v45, %v9766_v30  ;;  %v5355_v42 = vadd.f32 %v1097_v14, %v900_v0  ;;  %v898_v23 = vadd.f32 %v866_v51, %v5229_v46  ;;  %v901_v31 = vadd.f32 %v869_v43, %v5232_v21  ;;  %v9770_v26 = vld [vmem:[#allocation137_spill] sm:$0xff]  ;;  %v9771_v0 = vld [vmem:[#allocation150_spill] sm:$0xff] }
 0x20a   :  { %v1095_v61 = vmul.f32 %v5331_v56, %v1031_v63  ;;  %v1098_v18 = vmul.f32 %v5331_v56, %v1034_v38  ;;  %v987_v9 = vsel %vm978_vm3, %v9770_v26, %v9769_v28  ;;  %v979_v46 = vsel %vm978_vm3, %v9769_v28, %v9771_v0  ;;  %v9772_v21 = vld [vmem:[#allocation121_spill] sm:$0xff]  ;;  %9775 = vst [vmem:[#allocation107_spill] sm:$0xff] %v5385_v15  ;;  %v9794_v56 = vld [vmem:[#allocation72_spill] sm:$0xff] }
 0x20b   :  { %9768 = vst [vmem:[#allocation115_spill] sm:$0xff] %v5355_v42  ;;  %v1003_v43 = vsel %vm978_vm3, %v9771_v0, %v9772_v21  ;;  %v798_v51 = vmul.f32 %v5200_v4, %v777_v22  ;;  %v9776_v63 = vld [vmem:[#allocation57_spill] sm:$0xff]  ;;  %v800_v38 = vmul.f32 %v5158_v35, %v761_v39  ;;  %v796_v28 = vmul.f32 %v5158_v35, %v760_v37 }
 0x20c   :  { %v5378_v14 = vadd.f32 %v1095_v61, %v898_v23  ;;  %v5380_v45 = vadd.f32 %v1098_v18, %v901_v31  ;;  %1297 = vperm.xlu0 %3984, %v5385_v15   ;;  %1205 = vrot.lane.b32.xlu2 %v9776_v63, %s4101_s9  ;;  %v797_v22 = vmul.f32 %v5213_v1, %v752_v25  ;;  %v9777_v23 = vld [vmem:[#allocation110_spill] sm:$0xff]  ;;  %v9778_v61 = vld [vmem:[#allocation112_spill] sm:$0xff]  ;;  %v5400_v18 = vld [vmem:[%s9219_s4 + $0x8] sm:$0xff]  ;;  %s4105_s9 = smov 113  }
 0x20d   :  { %v755_v31 = vsel %vm749_vm2, %v9778_v61, %v9777_v23  ;;  %9779 = vst [vmem:[#allocation108_spill] sm:$0xff] %v5400_v18  ;;  %1281 = vperm.xlu1 %3985, %v5400_v18   ;;  %v884_v0 = vadd.f32 %v852_v60, %v5135_v55  ;;  %v1017_v39 = vmul.f32 %v5226_v40, %v987_v9  ;;  %v9782_v61 = vld [vmem:[#allocation66_spill] sm:$0xff]  ;;  %v9795_v18 = vld [vmem:[#allocation124_spill] sm:$0xff] }
 0x20e   :  { %9773 = vst [vmem:[#allocation60_spill] sm:$0xff] %v5378_v14  ;;  %v1015_v37 = vmul.f32 %v5253_v62, %v1003_v43  ;;  %v1018_v25 = vmul.f32 %v5256_v49, %v979_v46  ;;  %v5407_v35 = vpop.permute.xlu0 %976  ;;  %v5409_v4 = vpop.permute.xlu2 %1072  ;;  %v882_v23 = vadd.f32 %v850_v32, %v9782_v61  ;;  %v885_v15 = vadd.f32 %v853_v10, %v5153_v41  ;;  %v9785_v43 = vld [vmem:[#allocation122_spill] sm:$0xff]  ;;  %v9786_v61 = vld [vmem:[#allocation139_spill] sm:$0xff] }
 0x20f   :  { %9774 = vst [vmem:[#allocation63_spill] sm:$0xff] %v5380_v45  ;;  %v9783_v45 = vld [vmem:[#allocation116_spill] sm:$0xff]  ;;  %v801_v14 = vmul.f32 %v5213_v1, %v753_v36  ;;  %v5415_v63 = vpop.permute.xlu1 %1048  ;;  %v860_v32 = vmul.f32 %v9785_v43, %v796_v28  ;;  %v9787_v41 = vld [vmem:[#allocation138_spill] sm:$0xff]  ;;  %v981_v36 = vsel %vm978_vm3, %v9786_v61, %v5260_v58 }
 0x210   :  { %9780 = vst [vmem:[#allocation92_spill] sm:$0xff] %v5407_v35  ;;  %v864_v42 = vmul.f32 %v9783_v45, %v800_v38  ;;  %v862_v60 = vmul.f32 %v9783_v45, %v798_v51  ;;  %v1079_v55 = vmul.f32 %v5415_v63, %v1015_v37  ;;  %v1081_v9 = vmul.f32 %v5415_v63, %v1017_v39  ;;  %v9788_v51 = vld [vmem:[#allocation131_spill] sm:$0xff] }
 0x211   :  { %9781 = vst [vmem:[#allocation109_spill] sm:$0xff] %v5409_v4  ;;  %v1082_v46 = vmul.f32 %v5415_v63, %v1018_v25  ;;  %v858_v35 = vmul.f32 %v9785_v43, %v794_v19  ;;  %v989_v10 = vsel %vm978_vm3, %v9787_v41, %v9786_v61  ;;  %v1005_v38 = vsel %vm978_vm3, %v5260_v58, %v9788_v51  ;;  %v9792_v25 = vld [vmem:[#allocation67_spill] sm:$0xff]  ;;  %v9793_v4 = vld [vmem:[#allocation140_spill] sm:$0xff] }
 0x212   :  { %9784 = vst [vmem:[#allocation99_spill] sm:$0xff] %v5415_v63  ;;  %v5435_v39 = vadd.f32 %v1079_v55, %v882_v23  ;;  %v5437_v19 = vadd.f32 %v1081_v9, %v884_v0  ;;  %v861_v37 = vmul.f32 %v9785_v43, %v797_v22  ;;  %v990_v63 = vsel %vm978_vm3, %v9793_v4, %v9792_v25  ;;  %v9796_v0 = vld [vmem:[#allocation4_spill] sm:$0xff] }
 0x213   :  { %v5439_v28 = vadd.f32 %v1082_v46, %v885_v15  ;;  %v982_v61 = vsel %vm978_vm3, %v9792_v25, %v9794_v56  ;;  %v1006_v58 = vsel %vm978_vm3, %v9794_v56, %v9795_v18  ;;  %v896_v15 = vadd.f32 %v864_v42, %v5185_v2  ;;  %v5462_v55 = vld [vmem:[%s9219_s4 + $0x10] sm:$0xff]  ;;  %v9853_v18 = vld [vmem:[#allocation50_spill] sm:$0xff] }
 0x214   :  { %9789 = vst [vmem:[#allocation113_spill] sm:$0xff] %v5435_v39  ;;  %v865_v23 = vmul.f32 %v9783_v45, %v801_v14  ;;  %v894_v22 = vadd.f32 %v862_v60, %v5182_v5  ;;  %1372 = vrot.lane.b32.xlu0 %v9796_v0, %s4103_s22  ;;  %1285 = vperm.xlu2 %3986, %v5462_v55   ;;  %v5472_v5 = vld [vmem:[%s9219_s4 + $0x18] sm:$0xff]  ;;  %v9854_v39 = vld [vmem:[#allocation19_spill] sm:$0xff] }
 0x215   :  { %9790 = vst [vmem:[#allocation73_spill] sm:$0xff] %v5437_v19  ;;  %v890_v9 = vadd.f32 %v858_v35, %v5176_v59  ;;  %v1025_v56 = vmul.f32 %v5226_v40, %v989_v10  ;;  %v1023_v2 = vmul.f32 %v5253_v62, %v1005_v38  ;;  %v1026_v42 = vmul.f32 %v5256_v49, %v981_v36 }
 0x216   :  { %9791 = vst [vmem:[#allocation117_spill] sm:$0xff] %v5439_v28  ;;  %1289 = vperm.xlu1 %3985, %v5472_v5   ;;  %v892_v14 = vadd.f32 %v860_v32, %v5164_v52  ;;  %v1029_v60 = vmul.f32 %v5226_v40, %v990_v63  ;;  %v1027_v46 = vmul.f32 %v5253_v62, %v1006_v58  ;;  %v5479_v59 = vpop.permute.xlu0 %1056  ;;  %v5481_v10 = vpop.permute.xlu2 %1145  ;;  %v9801_v40 = vld [vmem:[#allocation58_spill] sm:$0xff] }
 0x217   :  { %9797 = vst [vmem:[#allocation149_spill] sm:$0xff] %v5462_v55  ;;  %v1030_v35 = vmul.f32 %v5256_v49, %v982_v61  ;;  %v893_v36 = vadd.f32 %v861_v37, %v5179_v17  ;;  %v5484_v38 = vpop.permute.xlu1 %1060  ;;  %v1087_v25 = vmul.f32 %v5479_v59, %v1023_v2  ;;  %v1089_v0 = vmul.f32 %v5479_v59, %v1025_v56 }
 0x218   :  { %9798 = vst [vmem:[#allocation137_spill] sm:$0xff] %v5472_v5  ;;  %v1090_v52 = vmul.f32 %v5479_v59, %v1026_v42  ;;  %v897_v63 = vadd.f32 %v865_v23, %v5190_v54  ;;  %v1091_v32 = vmul.f32 %v5484_v38, %v1027_v46  ;;  %v1093_v61 = vmul.f32 %v5484_v38, %v1029_v60  ;;  %v9807_v60 = vld [vmem:[#allocation142_spill] sm:$0xff] }
 0x219   :  { %9799 = vst [vmem:[#allocation150_spill] sm:$0xff] %v5481_v10  ;;  %v1094_v58 = vmul.f32 %v5484_v38, %v1030_v35  ;;  %v644_v62 = vmul.f32 %v9801_v40, %v5240_v24  ;;  %v5495_v17 = vadd.f32 %v1087_v25, %v890_v9  ;;  %v5497_v37 = vadd.f32 %v1089_v0, %v892_v14  ;;  %v9808_v24 = vld [vmem:[#allocation71_spill] sm:$0xff]  ;;  %v9809_v9 = vld [vmem:[#allocation28_spill] sm:$0xff]  ;;  %v9810_v0 = vld [vmem:[#allocation118_spill] sm:$0xff] }
 0x21a   :  { %9800 = vst [vmem:[#allocation121_spill] sm:$0xff] %v5484_v38  ;;  %v5499_v2 = vadd.f32 %v1090_v52, %v893_v36  ;;  %v809_v56 = vmul.f32 %v5213_v1, %v755_v31  ;;  %v5502_v42 = vadd.f32 %v1091_v32, %v894_v22  ;;  %v5504_v54 = vadd.f32 %v1093_v61, %v896_v15  ;;  %v9811_v36 = vld [vmem:[#allocation22_spill] sm:$0xff]  ;;  %v5526_v15 = vld [vmem:[%s9219_s4 + $0x30] sm:$0xff]  ;;  %v9843_v38 = vld [vmem:[#allocation7_spill] sm:$0xff] }
 0x21b   :  { %9802 = vst [vmem:[#allocation66_spill] sm:$0xff] %v5497_v37  ;;  %v5506_v23 = vadd.f32 %v1094_v58, %v897_v63  ;;  %v984_v46 = vsel %vm978_vm3, %v9807_v60, %v5333_v11  ;;  %v445_v35 = vadd.f32 %v9809_v9, %v9808_v24  ;;  %v5520_v31 = vld [vmem:[%s9219_s4 + $0x20] sm:$0xff]  ;;  %v9817_v24 = vld [vmem:[#allocation43_spill] sm:$0xff]  ;;  %v9828_v11 = vld [vmem:[#allocation49_spill] sm:$0xff] }
 0x21c   :  { %9803 = vst [vmem:[#allocation116_spill] sm:$0xff] %v5499_v2  ;;  %v873_v14 = vmul.f32 %v9810_v0, %v809_v56  ;;  %1378 = vrot.lane.b32.xlu0 %v9811_v36, %s4103_s22  ;;  %1293 = vperm.xlu2 %3986, %v5520_v31   ;;  %v1038_v25 = vmul.f32 %v5256_v49, %v984_v46  ;;  %v9819_v46 = vld [vmem:[#allocation8_spill] sm:$0xff]  ;;  %v9859_v10 = vld [vmem:[#allocation69_spill] sm:$0xff]  ;;  %v9875_v2 = vld [vmem:[#allocation102_spill] sm:$0xff] }
 0x21d   :  { %9804 = vst [vmem:[#allocation122_spill] sm:$0xff] %v5502_v42  ;;  %v676_v22 = vadd.f32 %v644_v62, %v445_v35  ;;  %v5544_v62 = vld [vmem:[%s9219_s4 + $0x38] sm:$0xff] }
 0x21e   :  { %9805 = vst [vmem:[#allocation139_spill] sm:$0xff] %v5504_v54  ;;  %1301 = vperm.xlu1 %3985, %v5526_v15   ;;  %v5530_v52 = vpop.permute.xlu0 %1076  ;;  %v5532_v63 = vpop.permute.xlu2 %1151  ;;  %v9833_v54 = vld [vmem:[#allocation17_spill] sm:$0xff] }
 0x21f   :  { %9806 = vst [vmem:[#allocation138_spill] sm:$0xff] %v5506_v23  ;;  %v5534_v32 = vpop.permute.xlu1 %1068  ;;  %v905_v61 = vadd.f32 %v873_v14, %v676_v22  ;;  %v9832_v23 = vld [vmem:[#allocation5_spill] sm:$0xff] }
 0x220   :  { %9812 = vst [vmem:[#allocation131_spill] sm:$0xff] %v5520_v31  ;;  %v1102_v58 = vmul.f32 %v5534_v32, %v1038_v25  ;;  %v9821_v25 = vld [vmem:[#allocation12_spill] sm:$0xff]  ;;  %v9836_v31 = vld [vmem:[#allocation21_spill] sm:$0xff] }
 0x221   :  { %9813 = vst [vmem:[#allocation67_spill] sm:$0xff] %v5526_v15  ;;  %v9861_v15 = vld [vmem:[#allocation75_spill] sm:$0xff]  ;;  %v9876_v37 = vld [vmem:[#allocation77_spill] sm:$0xff] }
 0x222   :  { %9814 = vst [vmem:[#allocation72_spill] sm:$0xff] %v5530_v52  ;;  %v5537_v56 = vadd.f32 %v1102_v58, %v905_v61  ;;  %v9822_v61 = vld [vmem:[#allocation14_spill] sm:$0xff]  ;;  %v9823_v58 = vld [vmem:[#allocation27_spill] sm:$0xff]  ;;  %v9826_v52 = vld [vmem:[#allocation32_spill] sm:$0xff] }
 0x223   :  { %9815 = vst [vmem:[#allocation71_spill] sm:$0xff] %v5534_v32 }
 0x224   :  { %9816 = vst [vmem:[#allocation152_spill] sm:$0xff] %v5537_v56  ;;  %1384 = vrot.lane.b32.xlu0 %v9817_v24, %s4103_s22  ;;  %1305 = vperm.xlu2 %3986, %v5544_v62  }
 0x225   :  { %9818 = vst [vmem:[#allocation153_spill] sm:$0xff] %v5544_v62  ;;  %v9831_v62 = vld [vmem:[#allocation56_spill] sm:$0xff] }
 0x226   :  { %1374 = vrot.lane.b32.xlu1 %v9819_v46, %s4103_s22  ;;  %v5549_v35 = vpop.permute.xlu0 %1147  ;;  %v5551_v14 = vpop.permute.xlu2 %1157 }
 0x227   :  { %9820 = vst [vmem:[#allocation154_spill] sm:$0xff] %v5551_v14  ;;  %v5553_v22 = vpop.permute.xlu1 %1143  ;;  %v9827_v14 = vld [vmem:[#allocation35_spill] sm:$0xff] }
 0x22c   :  { %1390 = vrot.lane.b32.xlu0 %v9821_v25, %s4103_s22  ;;  %1376 = vrot.lane.b32.xlu2 %v9822_v61, %s4103_s22 }
 0x22e   :  { %1380 = vrot.lane.b32.xlu1 %v9823_v58, %s4103_s22  ;;  %v5561_v60 = vpop.permute.xlu0 %1153  ;;  %v5563_v49 = vpop.permute.xlu2 %1163 }
 0x22f   :  { %9824 = vst [vmem:[#allocation155_spill] sm:$0xff] %v5561_v60  ;;  %v5565_v1 = vpop.permute.xlu1 %1149  ;;  %v9860_v60 = vld [vmem:[#allocation11_spill] sm:$0xff] }
 0x230   :  { %9825 = vst [vmem:[#allocation156_spill] sm:$0xff] %v5565_v1  ;;  %v4104_v1 = vmov 5  }
 0x231   :  { %3988 = vset.pattern.permute.xlu0 %v4104_v1  ;;  %3989 = vset.pattern.permute.xlu1 %v4104_v1 }
 0x232   :  { %3987 = vset.pattern.permute.xlu2 %v4104_v1  ;;  %v9847_v1 = vld [vmem:[#allocation10_spill] sm:$0xff] }
 0x234   :  { %1396 = vrot.lane.b32.xlu0 %v9826_v52, %s4103_s22  ;;  %1382 = vrot.lane.b32.xlu2 %v9827_v14, %s4103_s22 }
 0x236   :  { %1386 = vrot.lane.b32.xlu1 %v9828_v11, %s4103_s22  ;;  %v5573_v24 = vpop.permute.xlu0 %1159  ;;  %v5575_v36 = vpop.permute.xlu2 %1169 }
 0x237   :  { %9829 = vst [vmem:[#allocation157_spill] sm:$0xff] %v5575_v36  ;;  %v5577_v61 = vpop.permute.xlu1 %1155 }
 0x238   :  { %9830 = vst [vmem:[#allocation158_spill] sm:$0xff] %v5577_v61  ;;  %v9837_v61 = vld [vmem:[#allocation23_spill] sm:$0xff] }
 0x239   :  { %v355_v36 = vmul.f32 %v9860_v60, %v9837_v61  ;;  %v9867_v60 = vld [vmem:[#allocation20_spill] sm:$0xff] }
 0x23c   :  { %1402 = vrot.lane.b32.xlu0 %v9831_v62, %s4103_s22  ;;  %1388 = vrot.lane.b32.xlu2 %v9832_v23, %s4103_s22  ;;  %v9838_v62 = vld [vmem:[#allocation37_spill] sm:$0xff] }
 0x23e   :  { %1392 = vrot.lane.b32.xlu1 %v9833_v54, %s4103_s22  ;;  %v5585_v42 = vpop.permute.xlu0 %1165  ;;  %v5587_v14 = vpop.permute.xlu2 %1175 }
 0x23f   :  { %9834 = vst [vmem:[#allocation159_spill] sm:$0xff] %v5585_v42  ;;  %v5589_v11 = vpop.permute.xlu1 %1161  ;;  %v9841_v42 = vld [vmem:[#allocation42_spill] sm:$0xff] }
 0x240   :  { %9835 = vst [vmem:[#allocation160_spill] sm:$0xff] %v5589_v11 }
 0x244   :  { %1408 = vrot.lane.b32.xlu0 %v9836_v31, %s4103_s22  ;;  %1394 = vrot.lane.b32.xlu2 %v9837_v61, %s4103_s22  ;;  %v9842_v31 = vld [vmem:[#allocation44_spill] sm:$0xff]  ;;  %v359_v61 = vmul.f32 %v9867_v60, %v9826_v52 }
 0x245   :  { %v9873_v52 = vld [vmem:[#allocation24_spill] sm:$0xff] }
 0x246   :  { %1398 = vrot.lane.b32.xlu1 %v9838_v62, %s4103_s22  ;;  %v5597_v5 = vpop.permute.xlu0 %1171  ;;  %v5599_v58 = vpop.permute.xlu2 %1181 }
 0x247   :  { %9839 = vst [vmem:[#allocation161_spill] sm:$0xff] %v5597_v5  ;;  %v5601_v56 = vpop.permute.xlu1 %1167 }
 0x248   :  { %9840 = vst [vmem:[#allocation162_spill] sm:$0xff] %v5599_v58 }
 0x24c   :  { %1414 = vrot.lane.b32.xlu0 %v9841_v42, %s4103_s22  ;;  %1400 = vrot.lane.b32.xlu2 %v9842_v31, %s4103_s22  ;;  %v5622_v42 = vld [vmem:[%s9224_s1 + $0x8] sm:$0xff]  ;;  %v9848_v31 = vld [vmem:[#allocation25_spill] sm:$0xff] }
 0x24e   :  { %1404 = vrot.lane.b32.xlu1 %v9843_v38, %s4103_s22  ;;  %v5609_v55 = vpop.permute.xlu0 %1177  ;;  %v5611_v5 = vpop.permute.xlu2 %1187  ;;  %v9849_v38 = vld [vmem:[#allocation6_spill] sm:$0xff] }
 0x24f   :  { %9844 = vst [vmem:[#allocation163_spill] sm:$0xff] %v5609_v55  ;;  %v5613_v58 = vpop.permute.xlu1 %1173  ;;  %v343_v32 = vmul.f32 %v9849_v38, %v9832_v23  ;;  %v9856_v38 = vld [vmem:[#allocation61_spill] sm:$0xff]  ;;  %v9858_v55 = vld [vmem:[#allocation70_spill] sm:$0xff] }
 0x250   :  { %9845 = vst [vmem:[#allocation164_spill] sm:$0xff] %v5611_v5  ;;  %v9857_v23 = vld [vmem:[#allocation65_spill] sm:$0xff]  ;;  %v539_v11 = vsel %vm520_vm1, %v9859_v10, %v9858_v55  ;;  %v9866_v55 = vld [vmem:[#allocation16_spill] sm:$0xff] }
 0x251   :  { %9846 = vst [vmem:[#allocation165_spill] sm:$0xff] %v5613_v58  ;;  %v423_v28 = vadd.f32 %v9854_v39, %v343_v32  ;;  %v9863_v32 = vld [vmem:[#allocation74_spill] sm:$0xff]  ;;  %v351_v10 = vmul.f32 %v9866_v55, %v9833_v54 }
 0x254   :  { %1420 = vrot.lane.b32.xlu0 %v4402_v7, %s4103_s22  ;;  %1406 = vrot.lane.b32.xlu2 %v9847_v1, %s4103_s22  ;;  %v5635_v7 = vperm.slane %v5622_v42, 0  ;;  %v9852_v1 = vld [vmem:[#allocation62_spill] sm:$0xff] }
 0x255   :  { %v537_v4 = vsel %vm520_vm1, %v9853_v18, %v9852_v1  ;;  %v9862_v18 = vld [vmem:[#allocation68_spill] sm:$0xff]  ;;  %v9864_v1 = vld [vmem:[#allocation85_spill] sm:$0xff] }
 0x256   :  { %1410 = vrot.lane.b32.xlu1 %v9848_v31, %s4103_s22  ;;  %v5628_v5 = vpop.permute.xlu0 %1183  ;;  %v5630_v58 = vpop.permute.xlu2 %1193  ;;  %9851 = vst [vmem:[#allocation166_spill] sm:$0xff] %v5635_v7  ;;  %v9855_v31 = vld [vmem:[#allocation2_spill] sm:$0xff]  ;;  %v540_v39 = vsel %vm520_vm1, %v9862_v18, %v9861_v15  ;;  %v566_v55 = vmul.f32 %v5635_v7, %v539_v11 }
 0x257   :  { %9850 = vst [vmem:[#allocation6_spill] sm:$0xff] %v5630_v58  ;;  %v5632_v46 = vpop.permute.xlu1 %1179  ;;  %v347_v19 = vmul.f32 %v9855_v31, %v9821_v25  ;;  %v538_v58 = vsel %vm520_vm1, %v9857_v23, %v9856_v38  ;;  %v541_v31 = vsel %vm520_vm1, %v9725_v34, %v9863_v32  ;;  %v9865_v23 = vld [vmem:[#allocation84_spill] sm:$0xff]  ;;  %v558_v25 = vmul.f32 %v5635_v7, %v537_v4  ;;  %v9868_v15 = vld [vmem:[#allocation30_spill] sm:$0xff]  ;;  %v9869_v34 = vld [vmem:[#allocation15_spill] sm:$0xff] }
 0x258   :  { %v542_v38 = vsel %vm520_vm1, %v9865_v23, %v9864_v1  ;;  %v363_v18 = vmul.f32 %v9869_v34, %v9838_v62  ;;  %v5678_v32 = vperm.slane %v5622_v42, 1  ;;  %v562_v1 = vmul.f32 %v5635_v7, %v538_v58  ;;  %v9872_v58 = vld [vmem:[#allocation40_spill] sm:$0xff] }
 0x259   :  { %v766_v4 = vsel %vm749_vm2, %v9751_v29, %v9745_v48  ;;  %v570_v60 = vmul.f32 %v5635_v7, %v540_v39  ;;  %v578_v34 = vmul.f32 %v5635_v7, %v542_v38  ;;  %v427_v11 = vadd.f32 %v9872_v58, %v347_v19  ;;  %v9878_v39 = vld [vmem:[#allocation36_spill] sm:$0xff] }
 0x25a   :  { %9870 = vst [vmem:[#allocation62_spill] sm:$0xff] %v5678_v32  ;;  %v435_v62 = vadd.f32 %v9873_v52, %v355_v36  ;;  %v771_v48 = vsel %vm749_vm2, %v9876_v37, %v9875_v2  ;;  %v9879_v38 = vld [vmem:[#allocation48_spill] sm:$0xff]  ;;  %v768_v19 = vsel %vm749_vm2, %v9753_v33, %v9764_v12  ;;  %v443_v36 = vadd.f32 %v9809_v9, %v363_v18  ;;  %v9921_v2 = vld [vmem:[#allocation117_spill] sm:$0xff] }
 0x25b   :  { %v787_v52 = vmul.f32 %v5678_v32, %v766_v4  ;;  %v807_v33 = vmul.f32 %v5678_v32, %v771_v48 }
 0x25c   :  { %1426 = vrot.lane.b32.xlu0 %v4475_v47, %s4103_s22  ;;  %1412 = vrot.lane.b32.xlu2 %v9868_v15, %s4103_s22  ;;  %v574_v47 = vmul.f32 %v5635_v7, %v541_v31  ;;  %v439_v31 = vadd.f32 %v9878_v39, %v359_v61  ;;  %v622_v7 = vmul.f32 %v9879_v38, %v558_v25 }
 0x25d   :  { %v630_v61 = vmul.f32 %v9726_v57, %v566_v55  ;;  %v634_v25 = vmul.f32 %v9727_v6, %v570_v60  ;;  %v642_v39 = vmul.f32 %v9801_v40, %v578_v34  ;;  %v9880_v6 = vld [vmem:[#allocation64_spill] sm:$0xff] }
 0x25e   :  { %1416 = vrot.lane.b32.xlu1 %v4542_v53, %s4103_s22  ;;  %v5691_v23 = vpop.permute.xlu0 %1189  ;;  %v5693_v15 = vpop.permute.xlu2 %1199  ;;  %v9874_v53 = vld [vmem:[#allocation31_spill] sm:$0xff]  ;;  %v638_v58 = vmul.f32 %v9729_v20, %v574_v47  ;;  %v654_v57 = vadd.f32 %v622_v7, %v423_v28  ;;  %v767_v47 = vsel %vm749_vm2, %v9880_v6, %v9731_v8  ;;  %v871_v20 = vmul.f32 %v9810_v0, %v807_v33  ;;  %v9882_v34 = vld [vmem:[#allocation52_spill] sm:$0xff]  ;;  %v9884_v28 = vld [vmem:[#allocation13_spill] sm:$0xff] }
 0x25f   :  { %9871 = vst [vmem:[#allocation50_spill] sm:$0xff] %v5691_v23  ;;  %v431_v54 = vadd.f32 %v9874_v53, %v351_v10  ;;  %v5702_v29 = vpop.permute.xlu1 %1185  ;;  %v770_v53 = vsel %vm749_vm2, %v9749_v50, %v9742_v3  ;;  %v626_v10 = vmul.f32 %v9723_v27, %v562_v1  ;;  %v769_v50 = vsel %vm749_vm2, %v9766_v30, %v9759_v16  ;;  %v9881_v1 = vld [vmem:[#allocation51_spill] sm:$0xff]  ;;  %v9891_v6 = vld [vmem:[#allocation141_spill] sm:$0xff] }
 0x260   :  { %9877 = vst [vmem:[#allocation19_spill] sm:$0xff] %v5702_v29  ;;  %v795_v3 = vmul.f32 %v5678_v32, %v768_v19  ;;  %v803_v12 = vmul.f32 %v5678_v32, %v770_v53  ;;  %v851_v27 = vmul.f32 %v9765_v44, %v787_v52  ;;  %v9883_v44 = vld [vmem:[#allocation125_spill] sm:$0xff]  ;;  %v5744_v55 = vadd.f32 %v634_v25, %v435_v62  ;;  %v9887_v52 = vld [vmem:[#allocation132_spill] sm:$0xff] }
 0x261   :  { %v5738_v30 = vadd.f32 %v626_v10, %v427_v11  ;;  %v662_v16 = vadd.f32 %v630_v61, %v431_v54  ;;  %v670_v8 = vadd.f32 %v638_v58, %v439_v31  ;;  %v674_v4 = vadd.f32 %v642_v39, %v443_v36  ;;  %v9886_v36 = vld [vmem:[#allocation133_spill] sm:$0xff]  ;;  %v9888_v58 = vld [vmem:[#allocation123_spill] sm:$0xff] }
 0x262   :  { %v859_v18 = vmul.f32 %v9785_v43, %v795_v3  ;;  %v867_v7 = vmul.f32 %v9883_v44, %v803_v12  ;;  %v799_v60 = vmul.f32 %v5678_v32, %v769_v50  ;;  %v791_v11 = vmul.f32 %v5678_v32, %v767_v47  ;;  %v9890_v39 = vld [vmem:[#allocation129_spill] sm:$0xff]  ;;  %v9892_v47 = vld [vmem:[#allocation134_spill] sm:$0xff] }
 0x263   :  { %v883_v19 = vadd.f32 %v851_v27, %v654_v57  ;;  %v997_v43 = vsel %vm978_vm3, %v9788_v51, %v9787_v41  ;;  %v5758_v31 = vadd.f32 %v871_v20, %v674_v4  ;;  %v5761_v53 = vperm.slane %v5622_v42, 2  ;;  %v9896_v4 = vld [vmem:[#allocation146_spill] sm:$0xff] }
 0x264   :  { %1432 = vrot.lane.b32.xlu0 %v9881_v1, %s4103_s22  ;;  %1418 = vrot.lane.b32.xlu2 %v9882_v34, %s4103_s22  ;;  %v5756_v62 = vmul.f32 %v9783_v45, %v799_v60  ;;  %v999_v10 = vsel %vm978_vm3, %v9887_v52, %v9886_v36  ;;  %v891_v61 = vadd.f32 %v859_v18, %v662_v16  ;;  %v5771_v51 = vperm.slane %v5622_v42, 3  ;;  %v9889_v45 = vld [vmem:[#allocation130_spill] sm:$0xff]  ;;  %v9893_v16 = vld [vmem:[#allocation143_spill] sm:$0xff]  ;;  %v9987_v1 = vld [vmem:[#allocation32_spill] sm:$0xff] }
 0x265   :  { %v899_v25 = vadd.f32 %v867_v7, %v670_v8  ;;  %v5768_v41 = vmul.f32 %v9888_v58, %v791_v11  ;;  %v996_v33 = vsel %vm978_vm3, %v9890_v39, %v9889_v45  ;;  %v1024_v50 = vmul.f32 %v5761_v53, %v997_v43  ;;  %v9901_v52 = vld [vmem:[#allocation55_spill] sm:$0xff] }
 0x266   :  { %1422 = vrot.lane.b32.xlu1 %v9884_v28, %s4103_s22  ;;  %v1196_v48 = vpop.permute.xlu0 %1195  ;;  %v5747_v38 = vpop.permute.xlu2 %1205  ;;  %v1226_v3 = vsel %vm1207_vm4, %v5549_v35, %v5563_v49  ;;  %v1032_v27 = vmul.f32 %v5761_v53, %v999_v10  ;;  %v995_v57 = vsel %vm978_vm3, %v9772_v21, %v9770_v26  ;;  %v1000_v20 = vsel %vm978_vm3, %v9892_v47, %v9891_v6  ;;  %v9894_v26 = vld [vmem:[#allocation108_spill] sm:$0xff]  ;;  %v9895_v21 = vld [vmem:[#allocation18_spill] sm:$0xff] }
 0x267   :  { %9885 = vst [vmem:[#allocation2_spill] sm:$0xff] %v5747_v38  ;;  %v1192_v54 = vpop.permute.xlu1 %1191  ;;  %v1234_v12 = vsel %vm1207_vm4, %v1196_v48, %v5549_v35  ;;  %v5795_v18 = vperm.slane %v9893_v16, 3  ;;  %v1088_v44 = vmul.f32 %v5479_v59, %v1024_v50  ;;  %v1218_v35 = vsel %vm1207_vm4, %v5563_v49, %v5632_v46  ;;  %v9898_v59 = vld [vmem:[#allocation147_spill] sm:$0xff]  ;;  %v9900_v49 = vld [vmem:[#allocation33_spill] sm:$0xff]  ;;  %v9927_v38 = vld [vmem:[#allocation124_spill] sm:$0xff] }
 0x268   :  { %v1210_v7 = vsel %vm1207_vm4, %v5632_v46, %v1196_v48  ;;  %v1253_v8 = vmul.f32 %v5771_v51, %v1226_v3  ;;  %v5810_v60 = vperm.slane %v9896_v4, 3  ;;  %v5813_v11 = vperm.slane %v9898_v59, 3 }
 0x269   :  { %v1252_v43 = vmul.f32 %v5795_v18, %v1234_v12  ;;  %v1020_v46 = vmul.f32 %v5761_v53, %v996_v33  ;;  %v1016_v48 = vmul.f32 %v5761_v53, %v995_v57  ;;  %v5821_v36 = vmul.f32 %v5761_v53, %v1000_v20 }
 0x26a   :  { %9897 = vst [vmem:[#allocation61_spill] sm:$0xff] %v5810_v60  ;;  %v1096_v10 = vmul.f32 %v9901_v52, %v1032_v27  ;;  %v1254_v39 = vmul.f32 %v5810_v60, %v1218_v35  ;;  %v1255_v50 = vmul.f32 %v5813_v11, %v1210_v7  ;;  %v1120_v4 = vadd.f32 %v1088_v44, %v891_v61  ;;  %v9907_v52 = vld [vmem:[#allocation116_spill] sm:$0xff] }
 0x26b   :  { %9899 = vst [vmem:[#allocation65_spill] sm:$0xff] %v5813_v11  ;;  %v1224_v57 = vsel %vm1207_vm4, %v5553_v22, %v5573_v24  ;;  %v1216_v27 = vsel %vm1207_vm4, %v5573_v24, %v5587_v14  ;;  %v1228_v20 = vsel %vm1207_vm4, %v5532_v63, %v5601_v56  ;;  %v1220_v61 = vsel %vm1207_vm4, %v5601_v56, %v5628_v5 }
 0x26c   :  { %1510 = vperm.xlu0 %3988, %v9894_v26   ;;  %1424 = vrot.lane.b32.xlu2 %v9895_v21, %s4103_s22  ;;  %v9902_v26 = vld [vmem:[#allocation99_spill] sm:$0xff]  ;;  %v1208_v7 = vsel %vm1207_vm4, %v5587_v14, %v1192_v54  ;;  %v1232_v24 = vsel %vm1207_vm4, %v1192_v54, %v5553_v22  ;;  %v1212_v56 = vsel %vm1207_vm4, %v5628_v5, %v5693_v15  ;;  %v9905_v14 = vld [vmem:[#allocation66_spill] sm:$0xff] }
 0x26d   :  { %v1080_v33 = vmul.f32 %v9902_v26, %v1016_v48  ;;  %v1245_v5 = vmul.f32 %v5771_v51, %v1224_v57  ;;  %v9912_v26 = vld [vmem:[#allocation57_spill] sm:$0xff] }
 0x26e   :  { %1428 = vrot.lane.b32.xlu1 %v9900_v49, %s4103_s22  ;;  %v5824_v58 = vpop.permute.xlu0 %1201  ;;  %v1286_v45 = vpop.permute.xlu2 %1285 }
 0x26f   :  { %v5828_v3 = vpop.permute.xlu1 %1197  ;;  %v1316_v12 = vmul.f32 %v1286_v45, %v1252_v43  ;;  %v1317_v16 = vmul.f32 %v1286_v45, %v1253_v8  ;;  %v1318_v44 = vmul.f32 %v1286_v45, %v1254_v39  ;;  %v1319_v35 = vmul.f32 %v1286_v45, %v1255_v50  ;;  %v9910_v50 = vld [vmem:[#allocation67_spill] sm:$0xff] }
 0x270   :  { %v1236_v43 = vsel %vm1207_vm4, %v5693_v15, %v5532_v63  ;;  %v1128_v45 = vadd.f32 %v1096_v10, %v899_v25  ;;  %v1112_v39 = vadd.f32 %v1080_v33, %v883_v19  ;;  %v1244_v63 = vmul.f32 %v5795_v18, %v1232_v24 }
 0x271   :  { %v5854_v8 = vadd.f32 %v1316_v12, %v5495_v17  ;;  %v5856_v59 = vadd.f32 %v1317_v16, %v1120_v4  ;;  %v5867_v48 = vadd.f32 %v1318_v44, %v9905_v14  ;;  %v5870_v22 = vadd.f32 %v1319_v35, %v9907_v52  ;;  %v9909_v17 = vld [vmem:[#allocation100_spill] sm:$0xff]  ;;  %v9911_v12 = vld [vmem:[#allocation38_spill] sm:$0xff]  ;;  %v9915_v14 = vld [vmem:[#allocation155_spill] sm:$0xff] }
 0x272   :  { %v1084_v54 = vmul.f32 %v9909_v17, %v1020_v46  ;;  %v1246_v16 = vmul.f32 %v5810_v60, %v1216_v27  ;;  %v1247_v15 = vmul.f32 %v5813_v11, %v1208_v7  ;;  %v1261_v46 = vmul.f32 %v5771_v51, %v1228_v20  ;;  %v9914_v7 = vld [vmem:[#allocation157_spill] sm:$0xff]  ;;  %v9916_v20 = vld [vmem:[#allocation160_spill] sm:$0xff]  ;;  %v9917_v17 = vld [vmem:[#allocation150_spill] sm:$0xff] }
 0x273   :  { %9903 = vst [vmem:[#allocation70_spill] sm:$0xff] %v5854_v8  ;;  %v1262_v19 = vmul.f32 %v5810_v60, %v1220_v61  ;;  %v1260_v25 = vmul.f32 %v5795_v18, %v1236_v43  ;;  %v1263_v10 = vmul.f32 %v5813_v11, %v1212_v56  ;;  %v1229_v52 = vsel %vm1207_vm4, %v9915_v14, %v9914_v7  ;;  %v9981_v8 = vld [vmem:[#allocation12_spill] sm:$0xff] }
 0x274   :  { %9904 = vst [vmem:[#allocation69_spill] sm:$0xff] %v5856_v59  ;;  %1530 = vperm.xlu0 %3988, %v9910_v50   ;;  %1430 = vrot.lane.b32.xlu2 %v9911_v12, %s4103_s22  ;;  %v1225_v61 = vsel %vm1207_vm4, %v9917_v17, %v9916_v20  ;;  %v9918_v50 = vld [vmem:[#allocation163_spill] sm:$0xff] }
 0x275   :  { %9906 = vst [vmem:[#allocation11_spill] sm:$0xff] %v5867_v48 }
 0x276   :  { %9908 = vst [vmem:[#allocation75_spill] sm:$0xff] %v5870_v22  ;;  %1434 = vrot.lane.b32.xlu1 %v9912_v26, %s4103_s22  ;;  %v1278_v33 = vpop.permute.xlu0 %1277  ;;  %v1294_v4 = vpop.permute.xlu2 %1293 }
 0x277   :  { %v5886_v57 = vpop.permute.xlu1 %1203  ;;  %v1308_v27 = vmul.f32 %v1278_v33, %v1244_v63  ;;  %v1309_v44 = vmul.f32 %v1278_v33, %v1245_v5  ;;  %v1310_v35 = vmul.f32 %v1278_v33, %v1246_v16  ;;  %v1311_v24 = vmul.f32 %v1278_v33, %v1247_v15  ;;  %v9919_v5 = vld [vmem:[#allocation6_spill] sm:$0xff] }
 0x278   :  { %9913 = vst [vmem:[#allocation68_spill] sm:$0xff] %v5886_v57  ;;  %v1324_v43 = vmul.f32 %v1294_v4, %v1260_v25  ;;  %v1325_v56 = vmul.f32 %v1294_v4, %v1261_v46  ;;  %v1217_v63 = vsel %vm1207_vm4, %v9916_v20, %v9918_v50  ;;  %v1209_v16 = vsel %vm1207_vm4, %v9918_v50, %v9919_v5  ;;  %v9920_v20 = vld [vmem:[#allocation73_spill] sm:$0xff] }
 0x279   :  { %v1326_v15 = vmul.f32 %v1294_v4, %v1262_v19  ;;  %v1327_v33 = vmul.f32 %v1294_v4, %v1263_v10  ;;  %v1233_v7 = vsel %vm1207_vm4, %v9919_v5, %v9917_v17  ;;  %v1213_v46 = vsel %vm1207_vm4, %v5702_v29, %v5824_v58  ;;  %v9922_v19 = vld [vmem:[#allocation113_spill] sm:$0xff]  ;;  %v9923_v4 = vld [vmem:[#allocation60_spill] sm:$0xff] }
 0x27a   :  { %v5912_v25 = vadd.f32 %v1309_v44, %v1112_v39  ;;  %v5915_v6 = vadd.f32 %v1310_v35, %v9920_v20  ;;  %v5918_v23 = vadd.f32 %v1311_v24, %v9921_v2  ;;  %v5921_v10 = vadd.f32 %v1308_v27, %v9922_v19  ;;  %v9926_v5 = vld [vmem:[#allocation140_spill] sm:$0xff]  ;;  %v9929_v35 = vld [vmem:[#allocation105_spill] sm:$0xff]  ;;  %v9930_v2 = vld [vmem:[#allocation115_spill] sm:$0xff] }
 0x27b   :  { %v5924_v50 = vadd.f32 %v1324_v43, %v9923_v4  ;;  %v5926_v17 = vadd.f32 %v1325_v56, %v1128_v45  ;;  %v998_v39 = vsel %vm978_vm3, %v9927_v38, %v9926_v5  ;;  %v9928_v44 = vld [vmem:[#allocation8_spill] sm:$0xff]  ;;  %v5936_v24 = vadd.f32 %v1326_v15, %v9930_v2  ;;  %v9932_v27 = vld [vmem:[#allocation63_spill] sm:$0xff]  ;;  %v9935_v4 = vld [vmem:[#allocation149_spill] sm:$0xff] }
 0x27c   :  { %1603 = vrot.lane.b32.xlu0 %v9928_v44, %s4105_s9  ;;  %1506 = vperm.xlu2 %3987, %v9929_v35   ;;  %v5939_v20 = vadd.f32 %v1327_v33, %v9932_v27  ;;  %v887_v45 = vadd.f32 %v5768_v41, %v5738_v30  ;;  %v9934_v43 = vld [vmem:[#allocation71_spill] sm:$0xff]  ;;  %v1265_v38 = vmul.f32 %v5771_v51, %v1229_v52 }
 0x27d   :  { %9924 = vst [vmem:[#allocation74_spill] sm:$0xff] %v5924_v50  ;;  %v1100_v56 = vmul.f32 %v9934_v43, %v5821_v36  ;;  %v1267_v19 = vmul.f32 %v5813_v11, %v1213_v46  ;;  %v1249_v5 = vmul.f32 %v5771_v51, %v1225_v61  ;;  %v1250_v15 = vmul.f32 %v5810_v60, %v1217_v63 }
 0x27e   :  { %9925 = vst [vmem:[#allocation16_spill] sm:$0xff] %v5926_v17  ;;  %1514 = vperm.xlu1 %3989, %v9935_v4   ;;  %v1248_v35 = vmul.f32 %v5795_v18, %v1233_v7  ;;  %v1251_v33 = vmul.f32 %v5813_v11, %v1209_v16  ;;  %v5952_v2 = vpop.permute.xlu0 %1297  ;;  %v5954_v30 = vpop.permute.xlu2 %1305  ;;  %v1028_v41 = vmul.f32 %v5761_v53, %v998_v39  ;;  %v9940_v17 = vld [vmem:[#allocation156_spill] sm:$0xff]  ;;  %v9941_v39 = vld [vmem:[#allocation162_spill] sm:$0xff] }
 0x27f   :  { %9931 = vst [vmem:[#allocation20_spill] sm:$0xff] %v5936_v24  ;;  %v1116_v36 = vadd.f32 %v1084_v54, %v887_v45  ;;  %v1282_v52 = vpop.permute.xlu1 %1281  ;;  %v1329_v46 = vmul.f32 %v5952_v2, %v1265_v38  ;;  %v1331_v27 = vmul.f32 %v5952_v2, %v1267_v19  ;;  %v1132_v16 = vadd.f32 %v1100_v56, %v5758_v31  ;;  %v9939_v24 = vld [vmem:[#allocation159_spill] sm:$0xff]  ;;  %v9942_v45 = vld [vmem:[#allocation101_spill] sm:$0xff] }
 0x280   :  { %9933 = vst [vmem:[#allocation40_spill] sm:$0xff] %v5939_v20  ;;  %v1312_v29 = vmul.f32 %v1282_v52, %v1248_v35  ;;  %v1313_v61 = vmul.f32 %v1282_v52, %v1249_v5  ;;  %v1314_v44 = vmul.f32 %v1282_v52, %v1250_v15  ;;  %v1315_v63 = vmul.f32 %v1282_v52, %v1251_v33  ;;  %v9938_v20 = vld [vmem:[#allocation121_spill] sm:$0xff]  ;;  %v9945_v5 = vld [vmem:[#allocation114_spill] sm:$0xff]  ;;  %v9950_v35 = vld [vmem:[#allocation152_spill] sm:$0xff] }
 0x281   :  { %9936 = vst [vmem:[#allocation24_spill] sm:$0xff] %v5952_v2  ;;  %v1092_v7 = vmul.f32 %v9938_v20, %v1028_v41  ;;  %v1219_v54 = vsel %vm1207_vm4, %v9939_v24, %v9941_v39  ;;  %v9947_v20 = vld [vmem:[#allocation103_spill] sm:$0xff]  ;;  %v1211_v56 = vsel %vm1207_vm4, %v9941_v39, %v5828_v3  ;;  %v5991_v33 = vadd.f32 %v1331_v27, %v9950_v35  ;;  %v9953_v41 = vld [vmem:[#allocation137_spill] sm:$0xff] }
 0x282   :  { %9937 = vst [vmem:[#allocation31_spill] sm:$0xff] %v5954_v30  ;;  %v1227_v30 = vsel %vm1207_vm4, %v9940_v17, %v9939_v24  ;;  %v5970_v38 = vadd.f32 %v1312_v29, %v9942_v45  ;;  %v5972_v19 = vadd.f32 %v1313_v61, %v1116_v36  ;;  %v5975_v15 = vadd.f32 %v1314_v44, %v9945_v5  ;;  %v9952_v44 = vld [vmem:[#allocation27_spill] sm:$0xff] }
 0x283   :  { %v5978_v31 = vadd.f32 %v1315_v63, %v9947_v20  ;;  %v1235_v24 = vsel %vm1207_vm4, %v5828_v3, %v9940_v17  ;;  %v5988_v29 = vadd.f32 %v1329_v46, %v1132_v16  ;;  %9951 = vst [vmem:[#allocation133_spill] sm:$0xff] %v5991_v33  ;;  %v895_v36 = vadd.f32 %v5756_v62, %v5744_v55  ;;  %v9954_v52 = vld [vmem:[#allocation131_spill] sm:$0xff]  ;;  %v9956_v62 = vld [vmem:[#allocation122_spill] sm:$0xff] }
 0x284   :  { %9943 = vst [vmem:[#allocation77_spill] sm:$0xff] %v5970_v38  ;;  %1609 = vrot.lane.b32.xlu0 %v9952_v44, %s4105_s9  ;;  %1518 = vperm.xlu2 %3987, %v9953_v41   ;;  %v1257_v61 = vmul.f32 %v5771_v51, %v1227_v30  ;;  %v1258_v63 = vmul.f32 %v5810_v60, %v1219_v54  ;;  %v9959_v54 = vld [vmem:[#allocation139_spill] sm:$0xff] }
 0x285   :  { %9944 = vst [vmem:[#allocation36_spill] sm:$0xff] %v5972_v19  ;;  %v1256_v3 = vmul.f32 %v5795_v18, %v1235_v24  ;;  %v1259_v17 = vmul.f32 %v5813_v11, %v1211_v56  ;;  %v1124_v16 = vadd.f32 %v1092_v7, %v895_v36  ;;  %v9961_v24 = vld [vmem:[#allocation138_spill] sm:$0xff]  ;;  %v9964_v7 = vld [vmem:[#allocation107_spill] sm:$0xff]  ;;  %v9965_v36 = vld [vmem:[#allocation153_spill] sm:$0xff] }
 0x286   :  { %9946 = vst [vmem:[#allocation48_spill] sm:$0xff] %v5975_v15  ;;  %1522 = vperm.xlu1 %3989, %v9954_v52   ;;  %v6003_v46 = vpop.permute.xlu0 %1372  ;;  %v6005_v27 = vpop.permute.xlu2 %1376  ;;  %v9963_v52 = vld [vmem:[#allocation49_spill] sm:$0xff] }
 0x287   :  { %9948 = vst [vmem:[#allocation64_spill] sm:$0xff] %v5978_v31 }
 0x288   :  { %9949 = vst [vmem:[#allocation125_spill] sm:$0xff] %v5988_v29  ;;  %v1290_v39 = vpop.permute.xlu1 %1289 }
 0x289   :  { %9955 = vst [vmem:[#allocation132_spill] sm:$0xff] %v6005_v27  ;;  %v1320_v45 = vmul.f32 %v1290_v39, %v1256_v3  ;;  %v1321_v5 = vmul.f32 %v1290_v39, %v1257_v61  ;;  %v1322_v20 = vmul.f32 %v1290_v39, %v1258_v63  ;;  %v1323_v55 = vmul.f32 %v1290_v39, %v1259_v17  ;;  %v9967_v17 = vld [vmem:[#allocation17_spill] sm:$0xff]  ;;  %v9969_v39 = vld [vmem:[#allocation14_spill] sm:$0xff] }
 0x28b   :  { %v6008_v35 = vadd.f32 %v1320_v45, %v9956_v62  ;;  %v6010_v30 = vadd.f32 %v1321_v5, %v1124_v16  ;;  %v6013_v41 = vadd.f32 %v1322_v20, %v9959_v54  ;;  %v6016_v56 = vadd.f32 %v1323_v55, %v9961_v24  ;;  %v9968_v16 = vld [vmem:[#allocation4_spill] sm:$0xff]  ;;  %v9970_v55 = vld [vmem:[#allocation37_spill] sm:$0xff]  ;;  %v9971_v62 = vld [vmem:[#allocation22_spill] sm:$0xff] }
 0x28c   :  { %1615 = vrot.lane.b32.xlu0 %v9963_v52, %s4105_s9  ;;  %1526 = vperm.xlu2 %3987, %v9964_v7   ;;  %v9972_v54 = vld [vmem:[#allocation35_spill] sm:$0xff]  ;;  %v6050_v24 = vld [vmem:[%s9224_s1] sm:$0xff] }
 0x28d   :  { %9957 = vst [vmem:[#allocation123_spill] sm:$0xff] %v6008_v35  ;;  %v6053_v7 = vperm.slane %v6050_v24, 4  ;;  %v9982_v52 = vld [vmem:[#allocation23_spill] sm:$0xff] }
 0x28e   :  { %9958 = vst [vmem:[#allocation130_spill] sm:$0xff] %v6010_v30  ;;  %1534 = vperm.xlu1 %3989, %v9965_v36   ;;  %v6022_v61 = vpop.permute.xlu0 %1378  ;;  %v6024_v63 = vpop.permute.xlu2 %1382 }
 0x28f   :  { %9960 = vst [vmem:[#allocation129_spill] sm:$0xff] %v6013_v41 }
 0x290   :  { %9962 = vst [vmem:[#allocation134_spill] sm:$0xff] %v6016_v56  ;;  %v6026_v3 = vpop.permute.xlu1 %1301  ;;  %v9994_v56 = vld [vmem:[#allocation10_spill] sm:$0xff] }
 0x291   :  { %9966 = vst [vmem:[#allocation143_spill] sm:$0xff] %v6026_v3 }
 0x292   :  { %9973 = vst [vmem:[#allocation108_spill] sm:$0xff] %v6050_v24  ;;  %v9977_v24 = vld [vmem:[#allocation5_spill] sm:$0xff] }
 0x294   :  { %1621 = vrot.lane.b32.xlu0 %v9967_v17, %s4105_s9  ;;  %1601 = vrot.lane.b32.xlu2 %v9968_v16, %s4105_s9  ;;  %v9976_v16 = vld [vmem:[#allocation43_spill] sm:$0xff] }
 0x296   :  { %1605 = vrot.lane.b32.xlu1 %v9969_v39, %s4105_s9  ;;  %v6034_v45 = vpop.permute.xlu0 %1384  ;;  %v6036_v5 = vpop.permute.xlu2 %1388 }
 0x298   :  { %v6038_v20 = vpop.permute.xlu1 %1374 }
 0x29c   :  { %1627 = vrot.lane.b32.xlu0 %v9970_v55, %s4105_s9  ;;  %1607 = vrot.lane.b32.xlu2 %v9971_v62, %s4105_s9  ;;  %v9975_v62 = vld [vmem:[#allocation7_spill] sm:$0xff] }
 0x29e   :  { %1611 = vrot.lane.b32.xlu1 %v9972_v54, %s4105_s9  ;;  %v1391_v11 = vpop.permute.xlu0 %1390  ;;  %v6055_v60 = vpop.permute.xlu2 %1394 }
 0x29f   :  { %v1454_v17 = vsel %vm1436_vm5, %v6038_v20, %v1391_v11 }
 0x2a0   :  { %v6057_v55 = vpop.permute.xlu1 %1380  ;;  %v6063_v44 = vmul.f32 %v6053_v7, %v1454_v17 }
 0x2a1   :  { %9974 = vst [vmem:[#allocation146_spill] sm:$0xff] %v6057_v55 }
 0x2a4   :  { %1633 = vrot.lane.b32.xlu0 %v9975_v62, %s4105_s9  ;;  %1613 = vrot.lane.b32.xlu2 %v9976_v16, %s4105_s9  ;;  %v9980_v62 = vld [vmem:[#allocation25_spill] sm:$0xff] }
 0x2a6   :  { %1617 = vrot.lane.b32.xlu1 %v9977_v24, %s4105_s9  ;;  %v1397_v50 = vpop.permute.xlu0 %1396  ;;  %v6071_v22 = vpop.permute.xlu2 %1400  ;;  %v6086_v24 = vperm.slane %v5622_v42, 4 }
 0x2a7   :  { %v1457_v59 = vsel %vm1436_vm5, %v6057_v55, %v1397_v50 }
 0x2a8   :  { %v6073_v48 = vpop.permute.xlu1 %1386  ;;  %v6079_v17 = vmul.f32 %v6053_v7, %v1457_v59 }
 0x2a9   :  { %9978 = vst [vmem:[#allocation147_spill] sm:$0xff] %v6073_v48 }
 0x2aa   :  { %9979 = vst [vmem:[#allocation55_spill] sm:$0xff] %v6079_v17  ;;  %v9986_v17 = vld [vmem:[#allocation47_spill] sm:$0xff] }
 0x2ac   :  { %1639 = vrot.lane.b32.xlu0 %v9980_v62, %s4105_s9  ;;  %1619 = vrot.lane.b32.xlu2 %v9981_v8, %s4105_s9 }
 0x2ae   :  { %1623 = vrot.lane.b32.xlu1 %v9982_v52, %s4105_s9  ;;  %v1403_v33 = vpop.permute.xlu0 %1402  ;;  %v6090_v29 = vpop.permute.xlu2 %1406  ;;  %v4106_v52 = vmov 6  }
 0x2af   :  { %v1460_v59 = vsel %vm1436_vm5, %v6073_v48, %v1403_v33  ;;  %v1446_v62 = vsel %vm1436_vm5, %v1391_v11, %v6090_v29  ;;  %3992 = vset.pattern.permute.xlu0 %v4106_v52  ;;  %3990 = vset.pattern.permute.xlu1 %v4106_v52  ;;  %v9988_v48 = vld [vmem:[#allocation44_spill] sm:$0xff] }
 0x2b0   :  { %v6092_v2 = vpop.permute.xlu1 %1392  ;;  %v6101_v8 = vmul.f32 %v6053_v7, %v1460_v59  ;;  %v6104_v42 = vmul.f32 %v6086_v24, %v1446_v62  ;;  %3991 = vset.pattern.permute.xlu2 %v4106_v52 }
 0x2b1   :  { %9983 = vst [vmem:[#allocation99_spill] sm:$0xff] %v6092_v2 }
 0x2b2   :  { %9984 = vst [vmem:[#allocation66_spill] sm:$0xff] %v6101_v8  ;;  %v9993_v8 = vld [vmem:[#allocation56_spill] sm:$0xff] }
 0x2b3   :  { %9985 = vst [vmem:[#allocation116_spill] sm:$0xff] %v6104_v42 }
 0x2b4   :  { %1645 = vrot.lane.b32.xlu0 %v9986_v17, %s4105_s9  ;;  %1625 = vrot.lane.b32.xlu2 %v9987_v1, %s4105_s9 }
 0x2b6   :  { %1629 = vrot.lane.b32.xlu1 %v9988_v48, %s4105_s9  ;;  %v1409_v11 = vpop.permute.xlu0 %1408  ;;  %v6112_v39 = vpop.permute.xlu2 %1412 }
 0x2b7   :  { %9989 = vst [vmem:[#allocation100_spill] sm:$0xff] %v6112_v39  ;;  %v1447_v62 = vsel %vm1436_vm5, %v6092_v2, %v1409_v11  ;;  %v1449_v52 = vsel %vm1436_vm5, %v1397_v50, %v6112_v39 }
 0x2b8   :  { %v6114_v59 = vpop.permute.xlu1 %1398  ;;  %v6123_v17 = vmul.f32 %v6086_v24, %v1447_v62  ;;  %v6126_v1 = vmul.f32 %v6086_v24, %v1449_v52 }
 0x2b9   :  { %9990 = vst [vmem:[#allocation67_spill] sm:$0xff] %v6114_v59 }
 0x2ba   :  { %9991 = vst [vmem:[#allocation155_spill] sm:$0xff] %v6123_v17 }
 0x2bb   :  { %9992 = vst [vmem:[#allocation160_spill] sm:$0xff] %v6126_v1  ;;  %v6157_v1 = vld [vmem:[%s9224_s1 + $0x10] sm:$0xff] }
 0x2bc   :  { %1651 = vrot.lane.b32.xlu0 %v9884_v28, %s4105_s9  ;;  %1631 = vrot.lane.b32.xlu2 %v9993_v8, %s4105_s9  ;;  %9999 = vst [vmem:[#allocation73_spill] sm:$0xff] %v6157_v1  ;;  %v6160_v17 = vperm.slane %v6157_v1, 4  ;;  %v10004_v8 = vld [vmem:[#allocation83_spill] sm:$0xff] }
 0x2be   :  { %1635 = vrot.lane.b32.xlu1 %v9994_v56, %s4105_s9  ;;  %v1415_v2 = vpop.permute.xlu0 %1414  ;;  %v6134_v41 = vpop.permute.xlu2 %1418  ;;  %v9998_v56 = vld [vmem:[#allocation21_spill] sm:$0xff] }
 0x2bf   :  { %9995 = vst [vmem:[#allocation150_spill] sm:$0xff] %v6134_v41  ;;  %v1450_v50 = vsel %vm1436_vm5, %v6114_v59, %v1415_v2  ;;  %v1452_v62 = vsel %vm1436_vm5, %v1403_v33, %v6134_v41  ;;  %v6165_v33 = vld [vmem:[%s9224_s1 + $0x18] sm:$0xff]  ;;  %v10006_v41 = vld [vmem:[#allocation90_spill] sm:$0xff] }
 0x2c0   :  { %v6136_v30 = vpop.permute.xlu1 %1404  ;;  %v6145_v52 = vmul.f32 %v6086_v24, %v1450_v50  ;;  %v6148_v28 = vmul.f32 %v6086_v24, %v1452_v62  ;;  %10000 = vst [vmem:[#allocation117_spill] sm:$0xff] %v6165_v33  ;;  %v6168_v50 = vperm.slane %v6165_v33, 4  ;;  %v10001_v62 = vld [vmem:[#allocation30_spill] sm:$0xff]  ;;  %v543_v35 = vsel %vm520_vm1, %v10004_v8, %v10006_v41 }
 0x2c2   :  { %9996 = vst [vmem:[#allocation163_spill] sm:$0xff] %v6145_v52  ;;  %v10005_v52 = vld [vmem:[#allocation86_spill] sm:$0xff] }
 0x2c3   :  { %9997 = vst [vmem:[#allocation6_spill] sm:$0xff] %v6148_v28  ;;  %v551_v1 = vsel %vm520_vm1, %v10005_v52, %v10004_v8  ;;  %v10007_v8 = vld [vmem:[#allocation15_spill] sm:$0xff] }
 0x2c4   :  { %1657 = vrot.lane.b32.xlu0 %v9900_v49, %s4105_s9  ;;  %1637 = vrot.lane.b32.xlu2 %v9998_v56, %s4105_s9  ;;  %v10002_v56 = vld [vmem:[#allocation84_spill] sm:$0xff]  ;;  %v10003_v49 = vld [vmem:[#allocation87_spill] sm:$0xff]  ;;  %v362_v41 = vmul.f32 %v10007_v8, %v9972_v54 }
 0x2c5   :  { %v550_v28 = vsel %vm520_vm1, %v10003_v49, %v10002_v56 }
 0x2c6   :  { %1641 = vrot.lane.b32.xlu1 %v10001_v62, %s4105_s9  ;;  %v1421_v33 = vpop.permute.xlu0 %1420  ;;  %v1425_v59 = vpop.permute.xlu2 %1424 }
 0x2c7   :  { %v1437_v62 = vsel %vm1436_vm5, %v6136_v30, %v1421_v33  ;;  %v1461_v49 = vsel %vm1436_vm5, %v1421_v33, %v6003_v46  ;;  %v1439_v56 = vsel %vm1436_vm5, %v1409_v11, %v1425_v59  ;;  %v1463_v52 = vsel %vm1436_vm5, %v1425_v59, %v6005_v27  ;;  %v10009_v33 = vld [vmem:[#allocation145_spill] sm:$0xff]  ;;  %v10010_v11 = vld [vmem:[#allocation110_spill] sm:$0xff]  ;;  %v10013_v27 = vld [vmem:[#allocation79_spill] sm:$0xff] }
 0x2c8   :  { %v6184_v31 = vpop.permute.xlu1 %1410  ;;  %v6200_v15 = vmul.f32 %v6160_v17, %v1437_v62  ;;  %v6203_v19 = vmul.f32 %v6168_v50, %v1461_v49  ;;  %v6206_v38 = vmul.f32 %v6160_v17, %v1439_v56  ;;  %v577_v55 = vmul.f32 %v10009_v33, %v550_v28  ;;  %v10012_v62 = vld [vmem:[#allocation166_spill] sm:$0xff] }
 0x2c9   :  { %v779_v39 = vsel %vm749_vm2, %v10010_v11, %v9876_v37  ;;  %v6214_v59 = vmul.f32 %v6168_v50, %v1463_v52  ;;  %v581_v8 = vmul.f32 %v10009_v33, %v551_v1  ;;  %v582_v54 = vmul.f32 %v10012_v62, %v543_v35  ;;  %v10014_v28 = vld [vmem:[#allocation42_spill] sm:$0xff]  ;;  %v10015_v37 = vld [vmem:[#allocation3_spill] sm:$0xff]  ;;  %v10016_v11 = vld [vmem:[#allocation88_spill] sm:$0xff] }
 0x2ca   :  { %10008 = vst [vmem:[#allocation113_spill] sm:$0xff] %v6206_v38  ;;  %v442_v49 = vadd.f32 %v9809_v9, %v362_v41  ;;  %v806_v42 = vmul.f32 %v10013_v27, %v779_v39  ;;  %v641_v56 = vmul.f32 %v9801_v40, %v577_v55  ;;  %v366_v52 = vmul.f32 %v10015_v37, %v9976_v16  ;;  %v10017_v35 = vld [vmem:[#allocation120_spill] sm:$0xff]  ;;  %v10018_v39 = vld [vmem:[#allocation59_spill] sm:$0xff] }
 0x2cb   :  { %10011 = vst [vmem:[#allocation60_spill] sm:$0xff] %v6214_v59  ;;  %v367_v1 = vmul.f32 %v10015_v37, %v9988_v48  ;;  %v780_v41 = vsel %vm749_vm2, %v10017_v35, %v10016_v11  ;;  %v645_v9 = vmul.f32 %v10018_v39, %v581_v8 }
 0x2cc   :  { %1663 = vrot.lane.b32.xlu0 %v9912_v26, %s4105_s9  ;;  %1643 = vrot.lane.b32.xlu2 %v10014_v28, %s4105_s9  ;;  %v646_v28 = vmul.f32 %v10018_v39, %v582_v54  ;;  %v10019_v26 = vld [vmem:[#allocation95_spill] sm:$0xff]  ;;  %v870_v40 = vmul.f32 %v9810_v0, %v806_v42  ;;  %v810_v42 = vmul.f32 %v10013_v27, %v780_v41  ;;  %v10021_v27 = vld [vmem:[#allocation126_spill] sm:$0xff] }
 0x2cd   :  { %v772_v55 = vsel %vm749_vm2, %v10016_v11, %v10019_v26  ;;  %v673_v41 = vadd.f32 %v641_v56, %v442_v49  ;;  %v10024_v49 = vld [vmem:[#allocation34_spill] sm:$0xff] }
 0x2ce   :  { %1647 = vrot.lane.b32.xlu1 %v9882_v34, %s4105_s9  ;;  %v1427_v48 = vpop.permute.xlu0 %1426  ;;  %v1431_v37 = vpop.permute.xlu2 %1430  ;;  %v874_v38 = vmul.f32 %v10021_v27, %v810_v42 }
 0x2cf   :  { %v1440_v35 = vsel %vm1436_vm5, %v6184_v31, %v1427_v48  ;;  %v1464_v8 = vsel %vm1436_vm5, %v1427_v48, %v6022_v61  ;;  %v6250_v54 = vsel %vm1436_vm5, %v1415_v2, %v1431_v37  ;;  %v1466_v11 = vsel %vm1436_vm5, %v1431_v37, %v6024_v63  ;;  %v10020_v48 = vld [vmem:[#allocation46_spill] sm:$0xff] }
 0x2d0   :  { %v1417_v16 = vpop.permute.xlu1 %1416  ;;  %v6260_v26 = vmul.f32 %v6160_v17, %v1440_v35  ;;  %v6263_v39 = vmul.f32 %v6168_v50, %v1464_v8  ;;  %v446_v34 = vadd.f32 %v10020_v48, %v366_v52  ;;  %v447_v2 = vadd.f32 %v10020_v48, %v367_v1  ;;  %v10023_v8 = vld [vmem:[#allocation127_spill] sm:$0xff] }
 0x2d1   :  { %v1451_v0 = vsel %vm1436_vm5, %v6071_v22, %v1417_v16  ;;  %v6271_v37 = vmul.f32 %v6168_v50, %v1466_v11  ;;  %v1453_v35 = vsel %vm1436_vm5, %v6003_v46, %v6036_v5  ;;  %v1445_v52 = vsel %vm1436_vm5, %v6036_v5, %v6136_v30  ;;  %v10025_v30 = vld [vmem:[#allocation9_spill] sm:$0xff] }
 0x2d2   :  { %v6268_v59 = vmul.f32 %v6086_v24, %v1451_v0  ;;  %v811_v1 = vmul.f32 %v5678_v32, %v772_v55  ;;  %v10022_v0 = vld [vmem:[#allocation144_spill] sm:$0xff]  ;;  %v1009_v56 = vsel %vm978_vm3, %v10024_v49, %v10023_v8  ;;  %v677_v42 = vadd.f32 %v645_v9, %v446_v34  ;;  %v10026_v55 = vld [vmem:[#allocation78_spill] sm:$0xff]  ;;  %v10027_v34 = vld [vmem:[#allocation39_spill] sm:$0xff] }
 0x2d3   :  { %v1001_v11 = vsel %vm978_vm3, %v10023_v8, %v10022_v0  ;;  %v678_v48 = vadd.f32 %v646_v28, %v447_v2  ;;  %v6291_v46 = vadd.f32 %v870_v40, %v673_v41  ;;  %v1008_v0 = vsel %vm978_vm3, %v10026_v55, %v9892_v47  ;;  %v10028_v28 = vld [vmem:[#allocation161_spill] sm:$0xff]  ;;  %v10029_v2 = vld [vmem:[#allocation158_spill] sm:$0xff] }
 0x2d4   :  { %1743 = vperm.xlu0 %3992, %v9935_v4   ;;  %1649 = vrot.lane.b32.xlu2 %v10025_v30, %s4105_s9  ;;  %v875_v5 = vmul.f32 %v10021_v27, %v811_v1  ;;  %v1473_v32 = vmul.f32 %v6053_v7, %v1453_v35  ;;  %v1474_v8 = vmul.f32 %v6086_v24, %v1445_v52 }
 0x2d5   :  { %v906_v40 = vadd.f32 %v874_v38, %v677_v42  ;;  %v1040_v9 = vmul.f32 %v5761_v53, %v1001_v11  ;;  %v1039_v4 = vmul.f32 %v10027_v34, %v1009_v56  ;;  %v1230_v41 = vsel %vm1207_vm4, %v10029_v2, %v10028_v28  ;;  %v10030_v42 = vld [vmem:[#allocation109_spill] sm:$0xff] }
 0x2d6   :  { %1653 = vrot.lane.b32.xlu1 %v9895_v21, %s4105_s9  ;;  %v1433_v1 = vpop.permute.xlu0 %1432  ;;  %v1507_v30 = vpop.permute.xlu2 %1506  ;;  %v1238_v47 = vsel %vm1207_vm4, %v5886_v57, %v10029_v2  ;;  %v1035_v56 = vmul.f32 %v10027_v34, %v1008_v0  ;;  %v1269_v0 = vmul.f32 %v5771_v51, %v1230_v41  ;;  %v10036_v41 = vld [vmem:[#allocation116_spill] sm:$0xff] }
 0x2d7   :  { %v6317_v38 = vsel %vm1436_vm5, %v1417_v16, %v1433_v1  ;;  %v1537_v52 = vmul.f32 %v1507_v30, %v1473_v32  ;;  %v1538_v11 = vmul.f32 %v1507_v30, %v1474_v8  ;;  %v1103_v55 = vmul.f32 %v10030_v42, %v1039_v4 }
 0x2d8   :  { %v1423_v35 = vpop.permute.xlu1 %1422  ;;  %v1539_v16 = vmul.f32 %v1507_v30, %v6200_v15  ;;  %v1540_v32 = vmul.f32 %v1507_v30, %v6203_v19  ;;  %v1268_v8 = vmul.f32 %v5795_v18, %v1238_v47  ;;  %v1448_v19 = vsel %vm1436_vm5, %v6055_v60, %v6184_v31 }
 0x2d9   :  { %v1438_v21 = vsel %vm1436_vm5, %v6090_v29, %v1423_v35  ;;  %v1462_v28 = vsel %vm1436_vm5, %v1423_v35, %v6038_v20  ;;  %v6334_v4 = vadd.f32 %v1537_v52, %v5921_v10  ;;  %v6337_v29 = vadd.f32 %v1538_v11, %v5912_v25  ;;  %v10037_v11 = vld [vmem:[#allocation100_spill] sm:$0xff] }
 0x2da   :  { %v1479_v2 = vmul.f32 %v6160_v17, %v1438_v21  ;;  %v1480_v57 = vmul.f32 %v6168_v50, %v1462_v28  ;;  %v1456_v21 = vsel %vm1436_vm5, %v6022_v61, %v6055_v60  ;;  %v6348_v15 = vadd.f32 %v1539_v16, %v5915_v6  ;;  %v10035_v28 = vld [vmem:[#allocation29_spill] sm:$0xff] }
 0x2db   :  { %10031 = vst [vmem:[#allocation140_spill] sm:$0xff] %v6334_v4  ;;  %v6351_v20 = vadd.f32 %v1540_v32, %v5918_v23  ;;  %v907_v10 = vadd.f32 %v875_v5, %v678_v48  ;;  %v1104_v25 = vmul.f32 %v10030_v42, %v1040_v9  ;;  %v1135_v30 = vadd.f32 %v1103_v55, %v906_v40  ;;  %v10107_v4 = vld [vmem:[#allocation55_spill] sm:$0xff] }
 0x2dc   :  { %10032 = vst [vmem:[#allocation124_spill] sm:$0xff] %v6337_v29  ;;  %1763 = vperm.xlu0 %3992, %v9965_v36   ;;  %1655 = vrot.lane.b32.xlu2 %v10035_v28, %s4105_s9  ;;  %v1099_v61 = vmul.f32 %v9934_v43, %v1035_v56  ;;  %v1237_v6 = vsel %vm1207_vm4, %v5824_v58, %v9915_v14  ;;  %v10097_v43 = vld [vmem:[#allocation128_spill] sm:$0xff] }
 0x2dd   :  { %10033 = vst [vmem:[#allocation105_spill] sm:$0xff] %v6348_v15  ;;  %v1332_v60 = vmul.f32 %v6026_v3, %v1268_v8  ;;  %v1333_v23 = vmul.f32 %v6026_v3, %v1269_v0  ;;  %v1485_v31 = vmul.f32 %v6053_v7, %v1456_v21  ;;  %v1459_v36 = vsel %vm1436_vm5, %v6034_v45, %v6071_v22  ;;  %v10038_v22 = vld [vmem:[#allocation146_spill] sm:$0xff]  ;;  %v10043_v0 = vld [vmem:[#allocation48_spill] sm:$0xff] }
 0x2de   :  { %10034 = vst [vmem:[#allocation115_spill] sm:$0xff] %v6351_v20  ;;  %1659 = vrot.lane.b32.xlu1 %v9911_v12, %s4105_s9  ;;  %v1486_v48 = vmul.f32 %v6086_v24, %v1448_v19  ;;  %v1467_v58 = vsel %vm1436_vm5, %v1433_v1, %v6034_v45  ;;  %v1511_v14 = vpop.permute.xlu0 %1510  ;;  %v1519_v5 = vpop.permute.xlu2 %1518  ;;  %v10045_v21 = vld [vmem:[#allocation64_spill] sm:$0xff] }
 0x2df   :  { %v1541_v9 = vmul.f32 %v1511_v14, %v6063_v44  ;;  %v1542_v47 = vmul.f32 %v1511_v14, %v10036_v41  ;;  %v1543_v35 = vmul.f32 %v1511_v14, %v1479_v2  ;;  %v1544_v52 = vmul.f32 %v1511_v14, %v1480_v57  ;;  %v10039_v44 = vld [vmem:[#allocation77_spill] sm:$0xff]  ;;  %v10041_v57 = vld [vmem:[#allocation36_spill] sm:$0xff]  ;;  %v10048_v41 = vld [vmem:[#allocation123_spill] sm:$0xff] }
 0x2e0   :  { %v1429_v40 = vpop.permute.xlu1 %1428  ;;  %v1549_v55 = vmul.f32 %v1519_v5, %v1485_v31  ;;  %v1550_v16 = vmul.f32 %v1519_v5, %v1486_v48  ;;  %v1551_v31 = vmul.f32 %v1519_v5, %v6260_v26  ;;  %v1552_v48 = vmul.f32 %v1519_v5, %v6263_v39  ;;  %v10054_v26 = vld [vmem:[#allocation134_spill] sm:$0xff]  ;;  %v10098_v15 = vld [vmem:[#allocation136_spill] sm:$0xff] }
 0x2e1   :  { %v1441_v56 = vsel %vm1436_vm5, %v10037_v11, %v1429_v40  ;;  %v1465_v24 = vsel %vm1436_vm5, %v1429_v40, %v10038_v22  ;;  %v6390_v32 = vadd.f32 %v1541_v9, %v10039_v44  ;;  %v6393_v2 = vadd.f32 %v1542_v47, %v10041_v57  ;;  %v10047_v40 = vld [vmem:[#allocation67_spill] sm:$0xff]  ;;  %v10050_v11 = vld [vmem:[#allocation130_spill] sm:$0xff]  ;;  %v10109_v3 = vld [vmem:[#allocation72_spill] sm:$0xff] }
 0x2e2   :  { %v6384_v45 = vmul.f32 %v6160_v17, %v1441_v56  ;;  %v6387_v1 = vmul.f32 %v6168_v50, %v1465_v24  ;;  %v6396_v8 = vadd.f32 %v1543_v35, %v10043_v0  ;;  %v6399_v19 = vadd.f32 %v1544_v52, %v10045_v21  ;;  %v10052_v52 = vld [vmem:[#allocation129_spill] sm:$0xff]  ;;  %v10056_v39 = vld [vmem:[#allocation14_spill] sm:$0xff] }
 0x2e3   :  { %10040 = vst [vmem:[#allocation63_spill] sm:$0xff] %v6390_v32  ;;  %v1264_v14 = vmul.f32 %v5795_v18, %v1237_v6  ;;  %v1458_v9 = vsel %vm1436_vm5, %v6024_v63, %v10047_v40  ;;  %v6409_v47 = vadd.f32 %v1549_v55, %v10048_v41  ;;  %v6412_v35 = vadd.f32 %v1550_v16, %v10050_v11  ;;  %v10057_v6 = vld [vmem:[#allocation51_spill] sm:$0xff]  ;;  %v10058_v63 = vld [vmem:[#allocation24_spill] sm:$0xff]  ;;  %v4080_v16 = vld [vmem:[%s9219_s4] sm:$0xff] }
 0x2e4   :  { %10042 = vst [vmem:[#allocation149_spill] sm:$0xff] %v6393_v2  ;;  %v1136_v56 = vadd.f32 %v1104_v25, %v907_v10  ;;  %v6415_v22 = vadd.f32 %v1551_v31, %v10052_v52  ;;  %v6418_v24 = vadd.f32 %v1552_v48, %v10054_v26  ;;  %1834 = vrot.lane.b32.xlu0 %v10056_v39, %s4107_s16  ;;  %v10066_v52 = vld [vmem:[#allocation94_spill] sm:$0xff]  ;;  %v10085_v39 = vld [vmem:[#allocation113_spill] sm:$0xff] }
 0x2e5   :  { %10044 = vst [vmem:[#allocation121_spill] sm:$0xff] %v6396_v8  ;;  %1661 = vrot.lane.b32.xlu2 %v10057_v6, %s4105_s9  ;;  %v1328_v5 = vmul.f32 %v10058_v63, %v1264_v14  ;;  %v1497_v55 = vmul.f32 %v6053_v7, %v1459_v36  ;;  %v1499_v10 = vmul.f32 %v6160_v17, %v6317_v38 }
 0x2e6   :  { %10046 = vst [vmem:[#allocation159_spill] sm:$0xff] %v6399_v19  ;;  %v1500_v25 = vmul.f32 %v6168_v50, %v1467_v58  ;;  %1735 = vperm.xlu1 %3990, %v4080_v16   ;;  %v1131_v44 = vadd.f32 %v1099_v61, %v6291_v46  ;;  %v1493_v57 = vmul.f32 %v6053_v7, %v1458_v9  ;;  %v1531_v0 = vpop.permute.xlu0 %1530  ;;  %v1527_v48 = vpop.permute.xlu2 %1526  ;;  %v10061_v46 = vld [vmem:[#allocation150_spill] sm:$0xff]  ;;  %v10069_v16 = vld [vmem:[#allocation99_spill] sm:$0xff] }
 0x2e7   :  { %10049 = vst [vmem:[#allocation156_spill] sm:$0xff] %v6409_v47  ;;  %v1364_v21 = vadd.f32 %v1332_v60, %v1135_v30  ;;  %v1365_v31 = vadd.f32 %v1333_v23, %v1136_v56  ;;  %v1561_v36 = vmul.f32 %v1531_v0, %v1497_v55  ;;  %v1562_v38 = vmul.f32 %v1531_v0, %v6268_v59  ;;  %v10062_v60 = vld [vmem:[#allocation163_spill] sm:$0xff]  ;;  %v10065_v56 = vld [vmem:[#allocation89_spill] sm:$0xff] }
 0x2e8   :  { %10051 = vst [vmem:[#allocation162_spill] sm:$0xff] %v6412_v35  ;;  %v6434_v14 = vpop.permute.xlu1 %1434  ;;  %v6437_v40 = vmul.f32 %v1531_v0, %v1499_v10  ;;  %v6439_v58 = vmul.f32 %v1531_v0, %v1500_v25  ;;  %v1495_v41 = vmul.f32 %v6160_v17, %v6250_v54  ;;  %v1557_v30 = vmul.f32 %v1527_v48, %v1493_v57  ;;  %v10067_v54 = vld [vmem:[#allocation97_spill] sm:$0xff]  ;;  %v10070_v57 = vld [vmem:[#allocation132_spill] sm:$0xff]  ;;  %v10090_v35 = vld [vmem:[#allocation70_spill] sm:$0xff] }
 0x2e9   :  { %10053 = vst [vmem:[#allocation101_spill] sm:$0xff] %v6415_v22  ;;  %v6447_v61 = vsel %vm1436_vm5, %v10061_v46, %v6434_v14  ;;  %v1558_v23 = vmul.f32 %v1527_v48, %v10062_v60  ;;  %v6450_v9 = vadd.f32 %v1561_v36, %v1364_v21  ;;  %v6452_v11 = vadd.f32 %v1562_v38, %v1365_v31  ;;  %v10074_v31 = vld [vmem:[#allocation133_spill] sm:$0xff]  ;;  %v10076_v38 = vld [vmem:[#allocation35_spill] sm:$0xff] }
 0x2ea   :  { %10055 = vst [vmem:[#allocation114_spill] sm:$0xff] %v6418_v24  ;;  %v1360_v59 = vadd.f32 %v1328_v5, %v1131_v44  ;;  %v544_v26 = vsel %vm520_vm1, %v10066_v52, %v10065_v56  ;;  %v552_v55 = vsel %vm520_vm1, %v10067_v54, %v10066_v52  ;;  %v6462_v10 = vmul.f32 %v1527_v48, %v1495_v41  ;;  %v10072_v44 = vld [vmem:[#allocation125_spill] sm:$0xff]  ;;  %v10080_v60 = vld [vmem:[#allocation119_spill] sm:$0xff] }
 0x2eb   :  { %10059 = vst [vmem:[#allocation103_spill] sm:$0xff] %v6437_v40  ;;  %v1560_v25 = vmul.f32 %v1527_v48, %v6271_v37  ;;  %v1455_v0 = vsel %vm1436_vm5, %v10070_v57, %v10069_v16  ;;  %v6472_v21 = vadd.f32 %v1558_v23, %v10072_v44  ;;  %v6482_v37 = vld [vmem:[%s9219_s4 + $0x8] sm:$0xff]  ;;  %v586_v48 = vmul.f32 %v10012_v62, %v544_v26  ;;  %v6490_v46 = vld [vmem:[%s9219_s4 + $0x18] sm:$0xff]  ;;  %v10081_v62 = vld [vmem:[#allocation56_spill] sm:$0xff] }
 0x2ec   :  { %10060 = vst [vmem:[#allocation152_spill] sm:$0xff] %v6439_v58  ;;  %v6469_v5 = vadd.f32 %v1557_v30, %v1360_v59  ;;  %1840 = vrot.lane.b32.xlu0 %v10076_v38, %s4107_s16  ;;  %v585_v41 = vmul.f32 %v10009_v33, %v552_v55  ;;  %v10079_v30 = vld [vmem:[#allocation93_spill] sm:$0xff]  ;;  %v1481_v59 = vmul.f32 %v6053_v7, %v1455_v0  ;;  %v10082_v33 = vld [vmem:[#allocation26_spill] sm:$0xff]  ;;  %v10089_v24 = vld [vmem:[#allocation79_spill] sm:$0xff] }
 0x2ed   :  { %10063 = vst [vmem:[#allocation137_spill] sm:$0xff] %v6450_v9  ;;  %v6475_v36 = vadd.f32 %v1560_v25, %v10074_v31  ;;  %1739 = vperm.xlu2 %3991, %v6482_v37   ;;  %v781_v23 = vsel %vm749_vm2, %v10080_v60, %v10079_v30  ;;  %v371_v26 = vmul.f32 %v10082_v33, %v10081_v62  ;;  %v10083_v55 = vld [vmem:[#allocation49_spill] sm:$0xff]  ;;  %v10084_v31 = vld [vmem:[#allocation155_spill] sm:$0xff]  ;;  %v10108_v9 = vld [vmem:[#allocation160_spill] sm:$0xff] }
 0x2ee   :  { %10064 = vst [vmem:[#allocation131_spill] sm:$0xff] %v6452_v11  ;;  %1747 = vperm.xlu1 %3990, %v6490_v46   ;;  %v6498_v52 = vpop.permute.xlu0 %1603  ;;  %v6500_v25 = vpop.permute.xlu2 %1601  ;;  %v370_v16 = vmul.f32 %v10082_v33, %v10083_v55  ;;  %v814_v22 = vmul.f32 %v10089_v24, %v781_v23  ;;  %v10099_v24 = vld [vmem:[#allocation135_spill] sm:$0xff]  ;;  %v10101_v23 = vld [vmem:[#allocation5_spill] sm:$0xff] }
 0x2ef   :  { %10068 = vst [vmem:[#allocation122_spill] sm:$0xff] %v6462_v10  ;;  %v10088_v10 = vld [vmem:[#allocation106_spill] sm:$0xff] }
 0x2f0   :  { %10071 = vst [vmem:[#allocation139_spill] sm:$0xff] %v6469_v5  ;;  %v1515_v57 = vpop.permute.xlu1 %1514  ;;  %v10087_v5 = vld [vmem:[#allocation45_spill] sm:$0xff]  ;;  %v878_v20 = vmul.f32 %v10097_v43, %v814_v22 }
 0x2f1   :  { %10073 = vst [vmem:[#allocation138_spill] sm:$0xff] %v6472_v21  ;;  %v1545_v44 = vmul.f32 %v1515_v57, %v1481_v59  ;;  %v1547_v28 = vmul.f32 %v1515_v57, %v10085_v39  ;;  %v650_v7 = vmul.f32 %v10087_v5, %v586_v48  ;;  %v649_v0 = vmul.f32 %v10087_v5, %v585_v41  ;;  %v10091_v59 = vld [vmem:[#allocation69_spill] sm:$0xff]  ;;  %v10092_v39 = vld [vmem:[#allocation11_spill] sm:$0xff] }
 0x2f2   :  { %10075 = vst [vmem:[#allocation107_spill] sm:$0xff] %v6475_v36  ;;  %v10086_v36 = vld [vmem:[#allocation60_spill] sm:$0xff]  ;;  %v10096_v41 = vld [vmem:[#allocation41_spill] sm:$0xff] }
 0x2f3   :  { %10077 = vst [vmem:[#allocation153_spill] sm:$0xff] %v6482_v37  ;;  %v1546_v37 = vmul.f32 %v1515_v57, %v10084_v31  ;;  %v1548_v21 = vmul.f32 %v1515_v57, %v10086_v36  ;;  %v6517_v47 = vadd.f32 %v1545_v44, %v10090_v35  ;;  %v6523_v63 = vadd.f32 %v1547_v28, %v10092_v39  ;;  %v10094_v36 = vld [vmem:[#allocation75_spill] sm:$0xff]  ;;  %v10104_v39 = vld [vmem:[#allocation165_spill] sm:$0xff] }
 0x2f4   :  { %10078 = vst [vmem:[#allocation84_spill] sm:$0xff] %v6490_v46  ;;  %v773_v46 = vsel %vm749_vm2, %v10079_v30, %v10088_v10  ;;  %v450_v57 = vadd.f32 %v10096_v41, %v370_v16  ;;  %v451_v30 = vadd.f32 %v10096_v41, %v371_v26  ;;  %v1002_v35 = vsel %vm978_vm3, %v10099_v24, %v10098_v15  ;;  %v10103_v26 = vld [vmem:[#allocation62_spill] sm:$0xff]  ;;  %v6551_v44 = vld [vmem:[%s9219_s4 + $0x28] sm:$0xff] }
 0x2f5   :  { %v6520_v31 = vadd.f32 %v1546_v37, %v10091_v59  ;;  %10093 = vst [vmem:[#allocation87_spill] sm:$0xff] %v6523_v63  ;;  %v6526_v48 = vadd.f32 %v1548_v21, %v10094_v36  ;;  %v10100_v37 = vld [vmem:[#allocation92_spill] sm:$0xff]  ;;  %1846 = vrot.lane.b32.xlu0 %v10101_v23, %s4107_s16  ;;  %v6544_v21 = vld [vmem:[%s9219_s4 + $0x20] sm:$0xff]  ;;  %v815_v16 = vmul.f32 %v10103_v26, %v773_v46 }
 0x2f6   :  { %v1010_v28 = vsel %vm978_vm3, %v10100_v37, %v10099_v24  ;;  %10102 = vst [vmem:[#allocation145_spill] sm:$0xff] %v6544_v21  ;;  %1751 = vperm.xlu2 %3991, %v6544_v21   ;;  %v681_v22 = vadd.f32 %v649_v0, %v450_v57  ;;  %1755 = vperm.xlu1 %3990, %v6551_v44   ;;  %v10105_v36 = vld [vmem:[#allocation154_spill] sm:$0xff]  ;;  %v6562_v57 = vpop.permute.xlu0 %1609  ;;  %v6564_v46 = vpop.permute.xlu2 %1607 }
 0x2f7   :  { %10095 = vst [vmem:[#allocation83_spill] sm:$0xff] %v6526_v48  ;;  %v682_v59 = vadd.f32 %v650_v7, %v451_v30  ;;  %v1231_v24 = vsel %vm1207_vm4, %v10105_v36, %v10104_v39  ;;  %v10106_v23 = vld [vmem:[#allocation2_spill] sm:$0xff]  ;;  %v879_v26 = vmul.f32 %v10097_v43, %v815_v16  ;;  %v1044_v29 = vmul.f32 %v5761_v53, %v1002_v35 }
 0x2f8   :  { %v1239_v0 = vsel %vm1207_vm4, %v10106_v23, %v10105_v36  ;;  %v910_v21 = vadd.f32 %v878_v20, %v681_v22  ;;  %v1043_v7 = vmul.f32 %v10027_v34, %v1010_v28  ;;  %v1523_v30 = vpop.permute.xlu1 %1522  ;;  %v1273_v16 = vmul.f32 %v5771_v51, %v1231_v24  ;;  %v10110_v53 = vld [vmem:[#allocation74_spill] sm:$0xff]  ;;  %v10112_v34 = vld [vmem:[#allocation16_spill] sm:$0xff]  ;;  %v10119_v51 = vld [vmem:[#allocation147_spill] sm:$0xff] }
 0x2f9   :  { %v1553_v11 = vmul.f32 %v1523_v30, %v10107_v4  ;;  %v1554_v58 = vmul.f32 %v1523_v30, %v10108_v9  ;;  %v1555_v40 = vmul.f32 %v1523_v30, %v6384_v45  ;;  %v1556_v36 = vmul.f32 %v1523_v30, %v6387_v1  ;;  %v10114_v4 = vld [vmem:[#allocation20_spill] sm:$0xff] }
 0x2fa   :  { %v1107_v48 = vmul.f32 %v10109_v3, %v1043_v7  ;;  %v1108_v63 = vmul.f32 %v10109_v3, %v1044_v29  ;;  %v1272_v20 = vmul.f32 %v5795_v18, %v1239_v0  ;;  %v10116_v45 = vld [vmem:[#allocation40_spill] sm:$0xff]  ;;  %v911_v1 = vadd.f32 %v879_v26, %v682_v59  ;;  %v10118_v7 = vld [vmem:[#allocation31_spill] sm:$0xff] }
 0x2fb   :  { %v6578_v35 = vadd.f32 %v1553_v11, %v10110_v53  ;;  %v6581_v28 = vadd.f32 %v1554_v58, %v10112_v34  ;;  %v6584_v9 = vadd.f32 %v1555_v40, %v10114_v4  ;;  %v6587_v22 = vadd.f32 %v1556_v36, %v10116_v45  ;;  %v10120_v11 = vld [vmem:[#allocation23_spill] sm:$0xff]  ;;  %v6600_v40 = vld [vmem:[%s9219_s4 + $0x30] sm:$0xff]  ;;  %v10122_v34 = vld [vmem:[#allocation66_spill] sm:$0xff] }
 0x2fc   :  { %v1336_v30 = vmul.f32 %v10118_v7, %v1272_v20  ;;  %v1337_v29 = vmul.f32 %v10118_v7, %v1273_v16  ;;  %v1468_v18 = vsel %vm1436_vm5, %v6434_v14, %v10119_v51  ;;  %v1139_v58 = vadd.f32 %v1107_v48, %v910_v21  ;;  %v10121_v24 = vld [vmem:[#allocation4_spill] sm:$0xff]  ;;  %v10123_v45 = vld [vmem:[#allocation6_spill] sm:$0xff] }
 0x2fd   :  { %10111 = vst [vmem:[#allocation110_spill] sm:$0xff] %v6578_v35  ;;  %1852 = vrot.lane.b32.xlu0 %v10120_v11, %s4107_s16  ;;  %v1140_v59 = vadd.f32 %v1108_v63, %v911_v1  ;;  %v1503_v0 = vmul.f32 %v6160_v17, %v6447_v61  ;;  %v1504_v14 = vmul.f32 %v6168_v50, %v1468_v18  ;;  %v10128_v50 = vld [vmem:[#allocation52_spill] sm:$0xff]  ;;  %v10131_v51 = vld [vmem:[#allocation22_spill] sm:$0xff] }
 0x2fe   :  { %10113 = vst [vmem:[#allocation166_spill] sm:$0xff] %v6581_v28  ;;  %1759 = vperm.xlu2 %3991, %v6600_v40   ;;  %1830 = vrot.lane.b32.xlu1 %v10121_v24, %s4107_s16  ;;  %v6608_v26 = vpop.permute.xlu0 %1615  ;;  %v6610_v36 = vpop.permute.xlu2 %1613  ;;  %v1368_v20 = vadd.f32 %v1336_v30, %v1139_v58  ;;  %v10129_v61 = vld [vmem:[#allocation8_spill] sm:$0xff]  ;;  %v9519_v24 = vmov 7  }
 0x2ff   :  { %10115 = vst [vmem:[#allocation88_spill] sm:$0xff] %v6584_v9  ;;  %v1369_v53 = vadd.f32 %v1337_v29, %v1140_v59  ;;  %v10130_v30 = vld [vmem:[#allocation108_spill] sm:$0xff]  ;;  %3993 = vset.pattern.permute.xlu1 %v9519_v24  ;;  %3995 = vset.pattern.permute.xlu0 %v9519_v24 }
 0x300   :  { %10117 = vst [vmem:[#allocation126_spill] sm:$0xff] %v6587_v22  ;;  %v1535_v16 = vpop.permute.xlu1 %1534  ;;  %v1698_v29 = vperm.slane %v10130_v30, 5 }
 0x301   :  { %v1565_v4 = vmul.f32 %v1535_v16, %v10122_v34  ;;  %v1566_v48 = vmul.f32 %v1535_v16, %v10123_v45  ;;  %v6614_v63 = vmul.f32 %v1535_v16, %v1503_v0  ;;  %v6616_v21 = vmul.f32 %v1535_v16, %v1504_v14  ;;  %v10133_v34 = vld [vmem:[#allocation43_spill] sm:$0xff] }
 0x303   :  { %10124 = vst [vmem:[#allocation127_spill] sm:$0xff] %v6614_v63  ;;  %v6618_v1 = vadd.f32 %v1565_v4, %v1368_v20  ;;  %v6620_v17 = vadd.f32 %v1566_v48, %v1369_v53  ;;  %v10132_v53 = vld [vmem:[#allocation27_spill] sm:$0xff]  ;;  %v10154_v63 = vld [vmem:[#allocation117_spill] sm:$0xff] }
 0x304   :  { %10125 = vst [vmem:[#allocation34_spill] sm:$0xff] %v6616_v21  ;;  %v6762_v19 = vperm.slane %v10154_v63, 5  ;;  %v9527_v63 = vmov 8  }
 0x305   :  { %10126 = vst [vmem:[#allocation78_spill] sm:$0xff] %v6618_v1  ;;  %1876 = vrot.lane.b32.xlu0 %v10128_v50, %s4107_s16  ;;  %v10143_v1 = vld [vmem:[#allocation17_spill] sm:$0xff] }
 0x306   :  { %10127 = vst [vmem:[#allocation39_spill] sm:$0xff] %v6620_v17  ;;  %1832 = vrot.lane.b32.xlu2 %v10129_v61, %s4107_s16  ;;  %1836 = vrot.lane.b32.xlu1 %v10131_v51, %s4107_s16  ;;  %v1622_v18 = vpop.permute.xlu0 %1621  ;;  %v6630_v58 = vpop.permute.xlu2 %1619  ;;  %v10137_v61 = vld [vmem:[#allocation57_spill] sm:$0xff]  ;;  %v10138_v51 = vld [vmem:[#allocation12_spill] sm:$0xff] }
 0x307   :  { %v1683_v0 = vsel %vm1665_vm6, %v6498_v52, %v6630_v58  ;;  %3994 = vset.pattern.permute.xlu2 %v9527_v63 }
 0x308   :  { %v6632_v59 = vpop.permute.xlu1 %1605  ;;  %v6641_v16 = vmul.f32 %v1698_v29, %v1683_v0 }
 0x309   :  { %v1684_v14 = vsel %vm1665_vm6, %v6632_v59, %v1622_v18 }
 0x30a   :  { %v6643_v20 = vmul.f32 %v1698_v29, %v1684_v14 }
 0x30d   :  { %1890 = vrot.lane.b32.xlu0 %v10057_v6, %s4107_s16 }
 0x30e   :  { %1838 = vrot.lane.b32.xlu2 %v10132_v53, %s4107_s16  ;;  %1842 = vrot.lane.b32.xlu1 %v10133_v34, %s4107_s16  ;;  %v1628_v4 = vpop.permute.xlu0 %1627  ;;  %v6651_v45 = vpop.permute.xlu2 %1625 }
 0x30f   :  { %v1686_v30 = vsel %vm1665_vm6, %v6562_v57, %v6651_v45 }
 0x310   :  { %v6653_v48 = vpop.permute.xlu1 %1611  ;;  %v6662_v14 = vmul.f32 %v1698_v29, %v1686_v30  ;;  %v6677_v30 = vld [vmem:[%s9224_s1 + $0x8] sm:$0xff] }
 0x311   :  { %10134 = vst [vmem:[#allocation158_spill] sm:$0xff] %v6653_v48  ;;  %v1687_v0 = vsel %vm1665_vm6, %v6653_v48, %v1628_v4 }
 0x312   :  { %10135 = vst [vmem:[#allocation109_spill] sm:$0xff] %v6662_v14  ;;  %v6664_v11 = vmul.f32 %v1698_v29, %v1687_v0  ;;  %v6680_v0 = vperm.slane %v6677_v30, 5  ;;  %v10144_v14 = vld [vmem:[#allocation32_spill] sm:$0xff] }
 0x313   :  { %10139 = vst [vmem:[#allocation100_spill] sm:$0xff] %v6677_v30 }
 0x314   :  { %10136 = vst [vmem:[#allocation116_spill] sm:$0xff] %v6664_v11 }
 0x315   :  { %2121 = vrot.lane.b32.xlu0 %v10137_v61, %s4109_s28 }
 0x316   :  { %1844 = vrot.lane.b32.xlu2 %v10083_v55, %s4107_s16  ;;  %1848 = vrot.lane.b32.xlu1 %v10138_v51, %s4107_s16  ;;  %v1634_v11 = vpop.permute.xlu0 %1633  ;;  %v6682_v24 = vpop.permute.xlu2 %1631 }
 0x317   :  { %v1689_v9 = vsel %vm1665_vm6, %v6608_v26, %v6682_v24 }
 0x318   :  { %v1618_v22 = vpop.permute.xlu1 %1617  ;;  %v6693_v35 = vmul.f32 %v1698_v29, %v1689_v9 }
 0x319   :  { %v1682_v51 = vsel %vm1665_vm6, %v6500_v25, %v1618_v22  ;;  %v1674_v28 = vsel %vm1665_vm6, %v1618_v22, %v1634_v11 }
 0x31a   :  { %10140 = vst [vmem:[#allocation146_spill] sm:$0xff] %v6693_v35  ;;  %v6695_v30 = vmul.f32 %v1698_v29, %v1682_v51  ;;  %v6698_v17 = vmul.f32 %v6680_v0, %v1674_v28 }
 0x31c   :  { %10141 = vst [vmem:[#allocation77_spill] sm:$0xff] %v6695_v30 }
 0x31d   :  { %10142 = vst [vmem:[#allocation36_spill] sm:$0xff] %v6698_v17  ;;  %1888 = vrot.lane.b32.xlu0 %v9911_v12, %s4107_s16 }
 0x31e   :  { %1850 = vrot.lane.b32.xlu2 %v10143_v1, %s4107_s16  ;;  %1854 = vrot.lane.b32.xlu1 %v10144_v14, %s4107_s16  ;;  %v6706_v48 = vpop.permute.xlu0 %1639  ;;  %v6708_v21 = vpop.permute.xlu2 %1637 }
 0x31f   :  { %v1676_v22 = vsel %vm1665_vm6, %v1622_v18, %v6708_v21  ;;  %v10147_v18 = vld [vmem:[#allocation37_spill] sm:$0xff] }
 0x320   :  { %v1624_v9 = vpop.permute.xlu1 %1623  ;;  %v6720_v1 = vmul.f32 %v6680_v0, %v1676_v22 }
 0x321   :  { %v1685_v28 = vsel %vm1665_vm6, %v6564_v46, %v1624_v9  ;;  %v1677_v51 = vsel %vm1665_vm6, %v1624_v9, %v6706_v48 }
 0x322   :  { %v6722_v14 = vmul.f32 %v1698_v29, %v1685_v28  ;;  %v6725_v12 = vmul.f32 %v6680_v0, %v1677_v51 }
 0x324   :  { %10145 = vst [vmem:[#allocation48_spill] sm:$0xff] %v6722_v14 }
 0x325   :  { %10146 = vst [vmem:[#allocation64_spill] sm:$0xff] %v6725_v12  ;;  %2119 = vrot.lane.b32.xlu0 %v10057_v6, %s4109_s28 }
 0x326   :  { %1856 = vrot.lane.b32.xlu2 %v10147_v18, %s4107_s16  ;;  %1892 = vrot.lane.b32.xlu1 %v10137_v61, %s4107_s16  ;;  %v6733_v17 = vpop.permute.xlu0 %1645  ;;  %v6735_v9 = vpop.permute.xlu2 %1643 }
 0x327   :  { %10148 = vst [vmem:[#allocation67_spill] sm:$0xff] %v6735_v9  ;;  %v1679_v28 = vsel %vm1665_vm6, %v1628_v4, %v6735_v9  ;;  %v10152_v4 = vld [vmem:[#allocation47_spill] sm:$0xff]  ;;  %v10153_v9 = vld [vmem:[#allocation73_spill] sm:$0xff] }
 0x328   :  { %v1630_v22 = vpop.permute.xlu1 %1629  ;;  %v6747_v12 = vmul.f32 %v6680_v0, %v1679_v28  ;;  %v6759_v35 = vperm.slane %v10153_v9, 5  ;;  %v10157_v28 = vld [vmem:[#allocation90_spill] sm:$0xff] }
 0x329   :  { %v1688_v51 = vsel %vm1665_vm6, %v6610_v36, %v1630_v22  ;;  %v1680_v18 = vsel %vm1665_vm6, %v1630_v22, %v6733_v17 }
 0x32a   :  { %10149 = vst [vmem:[#allocation123_spill] sm:$0xff] %v6747_v12  ;;  %v6749_v14 = vmul.f32 %v1698_v29, %v1688_v51  ;;  %v6752_v30 = vmul.f32 %v6680_v0, %v1680_v18  ;;  %v10155_v29 = vld [vmem:[#allocation3_spill] sm:$0xff] }
 0x32b   :  { %v368_v22 = vmul.f32 %v10155_v29, %v10152_v4  ;;  %v10156_v18 = vld [vmem:[#allocation91_spill] sm:$0xff] }
 0x32c   :  { %10150 = vst [vmem:[#allocation130_spill] sm:$0xff] %v6749_v14  ;;  %v535_v51 = vsel %vm520_vm1, %v10157_v28, %v10156_v18 }
 0x32d   :  { %10151 = vst [vmem:[#allocation129_spill] sm:$0xff] %v6752_v30  ;;  %1860 = vrot.lane.b32.xlu0 %v10081_v62, %s4107_s16  ;;  %v10158_v62 = vld [vmem:[#allocation96_spill] sm:$0xff] }
 0x32e   :  { %1874 = vrot.lane.b32.xlu2 %v10152_v4, %s4107_s16  ;;  %2073 = vrot.lane.b32.xlu1 %v10083_v55, %s4109_s28  ;;  %v536_v9 = vsel %vm520_vm1, %v10065_v56, %v10158_v62  ;;  %v1652_v12 = vpop.permute.xlu0 %1651  ;;  %v1650_v30 = vpop.permute.xlu2 %1649  ;;  %v528_v55 = vsel %vm520_vm1, %v10158_v62, %v10067_v54 }
 0x32f   :  { %v1691_v28 = vsel %vm1665_vm6, %v1652_v12, %v6498_v52  ;;  %v1666_v8 = vsel %vm1665_vm6, %v1634_v11, %v1650_v30  ;;  %v1690_v56 = vsel %vm1665_vm6, %v1650_v30, %v6500_v25  ;;  %v10160_v52 = vld [vmem:[#allocation148_spill] sm:$0xff] }
 0x330   :  { %v1636_v14 = vpop.permute.xlu1 %1635  ;;  %v6795_v54 = vmul.f32 %v6762_v19, %v1691_v28  ;;  %v6798_v62 = vmul.f32 %v6759_v35, %v1666_v8  ;;  %v583_v32 = vmul.f32 %v10160_v52, %v535_v51  ;;  %v6808_v30 = vmul.f32 %v6762_v19, %v1690_v56  ;;  %v10163_v8 = vld [vmem:[#allocation151_spill] sm:$0xff] }
 0x331   :  { %v1675_v63 = vsel %vm1665_vm6, %v6630_v58, %v1636_v14  ;;  %v1667_v2 = vsel %vm1665_vm6, %v1636_v14, %v1652_v12  ;;  %v10162_v58 = vld [vmem:[#allocation86_spill] sm:$0xff]  ;;  %v587_v14 = vmul.f32 %v10160_v52, %v536_v9  ;;  %v588_v28 = vmul.f32 %v10163_v8, %v528_v55  ;;  %v10165_v56 = vld [vmem:[#allocation59_spill] sm:$0xff]  ;;  %v10172_v52 = vld [vmem:[#allocation76_spill] sm:$0xff] }
 0x332   :  { %10159 = vst [vmem:[#allocation134_spill] sm:$0xff] %v6798_v62  ;;  %v6802_v11 = vmul.f32 %v6680_v0, %v1675_v63  ;;  %v6805_v25 = vmul.f32 %v6759_v35, %v1667_v2  ;;  %v527_v12 = vsel %vm520_vm1, %v10156_v18, %v10162_v58  ;;  %v369_v51 = vmul.f32 %v10155_v29, %v10057_v6  ;;  %v10164_v63 = vld [vmem:[#allocation46_spill] sm:$0xff]  ;;  %v6832_v6 = vld [vmem:[%s9219_s4 + $0x38] sm:$0xff]  ;;  %v10168_v55 = vld [vmem:[#allocation95_spill] sm:$0xff] }
 0x333   :  { %10161 = vst [vmem:[#allocation51_spill] sm:$0xff] %v6808_v30  ;;  %v448_v62 = vadd.f32 %v10164_v63, %v368_v22  ;;  %v584_v2 = vmul.f32 %v10163_v8, %v527_v12  ;;  %v647_v30 = vmul.f32 %v10165_v56, %v583_v32  ;;  %v372_v18 = vmul.f32 %v10082_v33, %v10128_v50  ;;  %v10166_v22 = vld [vmem:[#allocation104_spill] sm:$0xff] }
 0x334   :  { %v373_v9 = vmul.f32 %v10082_v33, %v10137_v61  ;;  %v652_v29 = vmul.f32 %v10087_v5, %v588_v28  ;;  %v765_v32 = vsel %vm749_vm2, %v10088_v10, %v10166_v22  ;;  %v10169_v12 = vld [vmem:[#allocation120_spill] sm:$0xff] }
 0x335   :  { %2069 = vrot.lane.b32.xlu0 %v10076_v38, %s4109_s28  ;;  %v651_v38 = vmul.f32 %v10087_v5, %v587_v14 }
 0x336   :  { %2105 = vrot.lane.b32.xlu2 %v10128_v50, %s4109_s28  ;;  %1992 = vperm.xlu1 %3993, %v6832_v6   ;;  %v10167_v50 = vld [vmem:[#allocation111_spill] sm:$0xff]  ;;  %v1658_v61 = vpop.permute.xlu0 %1657  ;;  %v1656_v58 = vpop.permute.xlu2 %1655 }
 0x337   :  { %v764_v33 = vsel %vm749_vm2, %v10168_v55, %v10167_v50  ;;  %v756_v8 = vsel %vm749_vm2, %v10167_v50, %v10169_v12  ;;  %v1694_v5 = vsel %vm1665_vm6, %v1658_v61, %v6562_v57  ;;  %v1669_v10 = vsel %vm1665_vm6, %v6706_v48, %v1656_v58 }
 0x338   :  { %v1642_v14 = vpop.permute.xlu1 %1641  ;;  %v1693_v28 = vsel %vm1665_vm6, %v1656_v58, %v6564_v46  ;;  %v6864_v12 = vmul.f32 %v6762_v19, %v1694_v5  ;;  %v6867_v57 = vmul.f32 %v6759_v35, %v1669_v10  ;;  %v757_v48 = vsel %vm749_vm2, %v10166_v22, %v10080_v60  ;;  %v10173_v22 = vld [vmem:[#allocation53_spill] sm:$0xff] }
 0x339   :  { %v1678_v55 = vsel %vm1665_vm6, %v6651_v45, %v1642_v14  ;;  %v1670_v50 = vsel %vm1665_vm6, %v1642_v14, %v1658_v61  ;;  %v6880_v45 = vmul.f32 %v6762_v19, %v1693_v28  ;;  %v449_v61 = vadd.f32 %v10164_v63, %v369_v51 }
 0x33a   :  { %10170 = vst [vmem:[#allocation150_spill] sm:$0xff] %v6864_v12  ;;  %v6874_v46 = vmul.f32 %v6680_v0, %v1678_v55  ;;  %v6877_v58 = vmul.f32 %v6759_v35, %v1670_v50  ;;  %v648_v14 = vmul.f32 %v10165_v56, %v584_v2  ;;  %v452_v5 = vadd.f32 %v10096_v41, %v372_v18  ;;  %v10174_v12 = vld [vmem:[#allocation82_spill] sm:$0xff] }
 0x33b   :  { %10171 = vst [vmem:[#allocation163_spill] sm:$0xff] %v6867_v57  ;;  %v453_v10 = vadd.f32 %v10096_v41, %v373_v9  ;;  %v679_v57 = vadd.f32 %v647_v30, %v448_v62  ;;  %v812_v60 = vmul.f32 %v10172_v52, %v764_v33  ;;  %v813_v55 = vmul.f32 %v10173_v22, %v756_v8  ;;  %v10175_v41 = vld [vmem:[#allocation42_spill] sm:$0xff]  ;;  %v10178_v33 = vld [vmem:[#allocation144_spill] sm:$0xff] }
 0x33c   :  { %v994_v50 = vsel %vm978_vm3, %v10098_v15, %v10174_v12  ;;  %v816_v28 = vmul.f32 %v10172_v52, %v765_v32  ;;  %v817_v51 = vmul.f32 %v10173_v22, %v757_v48  ;;  %v986_v63 = vsel %vm978_vm3, %v10174_v12, %v10100_v37  ;;  %v10176_v9 = vld [vmem:[#allocation54_spill] sm:$0xff]  ;;  %v10177_v32 = vld [vmem:[#allocation81_spill] sm:$0xff] }
 0x33d   :  { %1984 = vperm.xlu0 %3995, %v6551_v44   ;;  %v683_v62 = vadd.f32 %v651_v38, %v452_v5  ;;  %v684_v30 = vadd.f32 %v652_v29, %v453_v10  ;;  %v876_v2 = vmul.f32 %v10021_v27, %v812_v60  ;;  %v877_v15 = vmul.f32 %v10021_v27, %v813_v55  ;;  %v10179_v12 = vld [vmem:[#allocation98_spill] sm:$0xff] }
 0x33e   :  { %1872 = vrot.lane.b32.xlu2 %v10175_v41, %s4107_s16  ;;  %2071 = vrot.lane.b32.xlu1 %v10133_v34, %s4109_s28  ;;  %v880_v56 = vmul.f32 %v10097_v43, %v816_v28  ;;  %v881_v18 = vmul.f32 %v10097_v43, %v817_v51  ;;  %v1045_v37 = vmul.f32 %v10176_v9, %v994_v50  ;;  %v1664_v38 = vpop.permute.xlu0 %1663  ;;  %v10180_v55 = vld [vmem:[#allocation50_spill] sm:$0xff]  ;;  %v10181_v28 = vld [vmem:[#allocation80_spill] sm:$0xff] }
 0x33f   :  { %v993_v8 = vsel %vm978_vm3, %v10178_v33, %v10177_v32  ;;  %v1662_v29 = vpop.permute.xlu2 %1661  ;;  %v1046_v48 = vmul.f32 %v10179_v12, %v986_v63  ;;  %v1697_v27 = vsel %vm1665_vm6, %v1664_v38, %v6608_v26  ;;  %v985_v10 = vsel %vm978_vm3, %v10177_v32, %v10024_v49 }
 0x340   :  { %v1648_v5 = vpop.permute.xlu1 %1647  ;;  %v6919_v43 = vsel %vm1665_vm6, %v6733_v17, %v1662_v29  ;;  %v6924_v34 = vsel %vm1665_vm6, %v1662_v29, %v6610_v36  ;;  %v1109_v60 = vmul.f32 %v10109_v3, %v1045_v37  ;;  %v1223_v36 = vsel %vm1207_vm4, %v10104_v39, %v10180_v55 }
 0x341   :  { %v1681_v26 = vsel %vm1665_vm6, %v6682_v24, %v1648_v5  ;;  %v1673_v17 = vsel %vm1665_vm6, %v1648_v5, %v1664_v38  ;;  %v1110_v22 = vmul.f32 %v10109_v3, %v1046_v48  ;;  %v1215_v49 = vsel %vm1207_vm4, %v10180_v55, %v10106_v23  ;;  %v10182_v24 = vld [vmem:[#allocation85_spill] sm:$0xff] }
 0x342   :  { %v6946_v50 = vmul.f32 %v6680_v0, %v1681_v26  ;;  %v6952_v51 = vsel %vm520_vm1, %v10182_v24, %v10181_v28  ;;  %v680_v3 = vadd.f32 %v648_v14, %v449_v61  ;;  %v908_v63 = vadd.f32 %v876_v2, %v679_v57  ;;  %v10183_v23 = vld [vmem:[#allocation61_spill] sm:$0xff] }
 0x343   :  { %v912_v37 = vadd.f32 %v880_v56, %v683_v62  ;;  %v913_v32 = vadd.f32 %v881_v18, %v684_v30  ;;  %v1041_v39 = vmul.f32 %v10176_v9, %v993_v8  ;;  %v1042_v33 = vmul.f32 %v10179_v12, %v985_v10  ;;  %v10184_v0 = vld [vmem:[#allocation65_spill] sm:$0xff]  ;;  %v10185_v30 = vld [vmem:[#allocation164_spill] sm:$0xff] }
 0x344   :  { %v6956_v38 = vadd.f32 %v877_v15, %v680_v3  ;;  %v1274_v29 = vmul.f32 %v10183_v23, %v1223_v36  ;;  %v1275_v48 = vmul.f32 %v10184_v0, %v1215_v49  ;;  %v10186_v2 = vld [vmem:[#allocation161_spill] sm:$0xff]  ;;  %v10187_v56 = vld [vmem:[#allocation68_spill] sm:$0xff]  ;;  %v10190_v49 = vld [vmem:[#allocation63_spill] sm:$0xff] }
 0x345   :  { %2067 = vrot.lane.b32.xlu0 %v10132_v53, %s4109_s28  ;;  %v1105_v57 = vmul.f32 %v10030_v42, %v1041_v39  ;;  %v1106_v61 = vmul.f32 %v10030_v42, %v1042_v33  ;;  %v1141_v14 = vadd.f32 %v1109_v60, %v912_v37  ;;  %v1142_v62 = vadd.f32 %v1110_v22, %v913_v32  ;;  %v10192_v28 = vld [vmem:[#allocation149_spill] sm:$0xff] }
 0x346   :  { %2103 = vrot.lane.b32.xlu2 %v10152_v4, %s4109_s28  ;;  %1988 = vperm.xlu1 %3993, %v6600_v40   ;;  %v1222_v15 = vsel %vm1207_vm4, %v10186_v2, %v10185_v30  ;;  %v1214_v53 = vsel %vm1207_vm4, %v10185_v30, %v10187_v56  ;;  %v1338_v4 = vmul.f32 %v10118_v7, %v1274_v29  ;;  %v1744_v8 = vpop.permute.xlu0 %1743  ;;  %v10199_v56 = vld [vmem:[#allocation87_spill] sm:$0xff] }
 0x347   :  { %v1339_v18 = vmul.f32 %v10118_v7, %v1275_v48  ;;  %v1740_v42 = vpop.permute.xlu2 %1739  ;;  %v1774_v5 = vmul.f32 %v1744_v8, %v6643_v20  ;;  %v1775_v10 = vmul.f32 %v1744_v8, %v6720_v1  ;;  %v1137_v37 = vadd.f32 %v1105_v57, %v908_v63  ;;  %v10198_v48 = vld [vmem:[#allocation33_spill] sm:$0xff]  ;;  %v10201_v63 = vld [vmem:[#allocation83_spill] sm:$0xff] }
 0x348   :  { %v1654_v12 = vpop.permute.xlu1 %1653  ;;  %v1770_v60 = vmul.f32 %v1740_v42, %v6641_v16  ;;  %v1771_v26 = vmul.f32 %v1740_v42, %v6802_v11  ;;  %v1772_v7 = vmul.f32 %v1740_v42, %v6805_v25  ;;  %v1773_v36 = vmul.f32 %v1740_v42, %v6795_v54  ;;  %v10196_v54 = vld [vmem:[#allocation159_spill] sm:$0xff] }
 0x349   :  { %v1668_v22 = vsel %vm1665_vm6, %v6708_v21, %v1654_v12  ;;  %v1692_v55 = vsel %vm1665_vm6, %v1654_v12, %v6632_v59  ;;  %v6992_v16 = vadd.f32 %v1774_v5, %v6517_v47  ;;  %v6995_v11 = vadd.f32 %v1775_v10, %v6520_v31  ;;  %v10194_v59 = vld [vmem:[#allocation121_spill] sm:$0xff]  ;;  %v10208_v5 = vld [vmem:[#allocation146_spill] sm:$0xff] }
 0x34a   :  { %v1712_v20 = vmul.f32 %v6759_v35, %v1668_v22  ;;  %v1713_v1 = vmul.f32 %v6762_v19, %v1692_v55  ;;  %v6998_v21 = vadd.f32 %v1770_v60, %v10190_v49  ;;  %v7001_v24 = vadd.f32 %v1771_v26, %v10192_v28  ;;  %v10209_v55 = vld [vmem:[#allocation67_spill] sm:$0xff] }
 0x34b   :  { %10188 = vst [vmem:[#allocation89_spill] sm:$0xff] %v6992_v16  ;;  %v7004_v25 = vadd.f32 %v1772_v7, %v10194_v59  ;;  %v7007_v3 = vadd.f32 %v1773_v36, %v10196_v54  ;;  %v1270_v32 = vmul.f32 %v10183_v23, %v1222_v15  ;;  %v1271_v31 = vmul.f32 %v10184_v0, %v1214_v53  ;;  %v10203_v15 = vld [vmem:[#allocation30_spill] sm:$0xff]  ;;  %v10204_v0 = vld [vmem:[#allocation143_spill] sm:$0xff] }
 0x34c   :  { %10189 = vst [vmem:[#allocation94_spill] sm:$0xff] %v6995_v11  ;;  %v1776_v47 = vmul.f32 %v1744_v8, %v1712_v20  ;;  %v1777_v39 = vmul.f32 %v1744_v8, %v1713_v1  ;;  %v1370_v33 = vadd.f32 %v1338_v4, %v1141_v14  ;;  %v1371_v29 = vadd.f32 %v1339_v18, %v1142_v62  ;;  %v10205_v53 = vld [vmem:[#allocation127_spill] sm:$0xff]  ;;  %v10210_v36 = vld [vmem:[#allocation158_spill] sm:$0xff]  ;;  %v10211_v1 = vld [vmem:[#allocation109_spill] sm:$0xff] }
 0x34d   :  { %10191 = vst [vmem:[#allocation97_spill] sm:$0xff] %v6998_v21  ;;  %2115 = vrot.lane.b32.xlu0 %v10198_v48, %s4109_s28  ;;  %v1732_v30 = vmul.f32 %v6759_v35, %v1673_v17  ;;  %v1733_v2 = vmul.f32 %v6762_v19, %v1697_v27  ;;  %v1334_v14 = vmul.f32 %v10204_v0, %v1270_v32  ;;  %v10207_v27 = vmov 8   ;;  %v10296_v21 = vld [vmem:[#allocation37_spill] sm:$0xff]  ;;  %v7272_v16 = vld [vmem:[%s9224_s1] sm:$0xff] }
 0x34e   :  { %10193 = vst [vmem:[#allocation99_spill] sm:$0xff] %v7001_v24  ;;  %2221 = vperm.xlu2 %3994, %v6832_v6   ;;  %v7017_v42 = vadd.f32 %v1776_v47, %v10199_v56  ;;  %v7020_v57 = vadd.f32 %v1777_v39, %v10201_v63  ;;  %1870 = vrot.lane.b32.xlu1 %v10203_v15, %s4107_s16  ;;  %v10206_v6 = vld [vmem:[#allocation34_spill] sm:$0xff]  ;;  %v1764_v17 = vpop.permute.xlu0 %1763  ;;  %v10213_v47 = vld [vmem:[#allocation39_spill] sm:$0xff]  ;;  %v10295_v24 = vld [vmem:[#allocation153_spill] sm:$0xff] }
 0x34f   :  { %10195 = vst [vmem:[#allocation132_spill] sm:$0xff] %v7004_v25  ;;  %v1335_v62 = vmul.f32 %v10204_v0, %v1271_v31  ;;  %v1599_v4 = vadd.f32 %v10205_v53, %v1370_v33  ;;  %v1600_v18 = vadd.f32 %v10206_v6, %v1371_v29  ;;  %3996 = vset.pattern.permute.xlu1 %v10207_v27  ;;  %v10215_v56 = vld [vmem:[#allocation110_spill] sm:$0xff]  ;;  %v10219_v53 = vld [vmem:[#allocation88_spill] sm:$0xff] }
 0x350   :  { %10197 = vst [vmem:[#allocation125_spill] sm:$0xff] %v7007_v3  ;;  %v1752_v8 = vpop.permute.xlu2 %1751  ;;  %v1660_v12 = vpop.permute.xlu1 %1659  ;;  %v1794_v10 = vmul.f32 %v1764_v17, %v10208_v5  ;;  %v1795_v60 = vmul.f32 %v1764_v17, %v6946_v50  ;;  %v1796_v26 = vmul.f32 %v1764_v17, %v1732_v30  ;;  %v1797_v22 = vmul.f32 %v1764_v17, %v1733_v2  ;;  %v10212_v50 = vld [vmem:[#allocation78_spill] sm:$0xff]  ;;  %v10226_v5 = vld [vmem:[#allocation112_spill] sm:$0xff] }
 0x351   :  { %10200 = vst [vmem:[#allocation133_spill] sm:$0xff] %v7017_v42  ;;  %v7034_v7 = vsel %vm1665_vm6, %v10209_v55, %v1660_v12  ;;  %v1695_v20 = vsel %vm1665_vm6, %v1660_v12, %v10210_v36  ;;  %v1782_v49 = vmul.f32 %v1752_v8, %v10211_v1  ;;  %v1783_v28 = vmul.f32 %v1752_v8, %v6874_v46  ;;  %v10214_v30 = vld [vmem:[#allocation150_spill] sm:$0xff]  ;;  %v10231_v36 = vld [vmem:[#allocation152_spill] sm:$0xff] }
 0x352   :  { %10202 = vst [vmem:[#allocation35_spill] sm:$0xff] %v7020_v57  ;;  %v1138_v59 = vadd.f32 %v1106_v61, %v6956_v38  ;;  %v7043_v54 = vmul.f32 %v6762_v19, %v1695_v20  ;;  %v7046_v32 = vadd.f32 %v1794_v10, %v10212_v50  ;;  %v7049_v39 = vadd.f32 %v1795_v60, %v10213_v47  ;;  %v10217_v61 = vld [vmem:[#allocation166_spill] sm:$0xff]  ;;  %v10235_v47 = vld [vmem:[#allocation77_spill] sm:$0xff] }
 0x353   :  { %v7051_v31 = vadd.f32 %v1796_v26, %v1599_v4  ;;  %v7053_v33 = vadd.f32 %v1797_v22, %v1600_v18  ;;  %v1784_v29 = vmul.f32 %v1752_v8, %v6877_v58  ;;  %v1785_v2 = vmul.f32 %v1752_v8, %v10214_v30  ;;  %v10221_v17 = vld [vmem:[#allocation126_spill] sm:$0xff]  ;;  %v10223_v18 = vld [vmem:[#allocation21_spill] sm:$0xff]  ;;  %v10224_v58 = vld [vmem:[#allocation15_spill] sm:$0xff] }
 0x354   :  { %v1366_v46 = vadd.f32 %v1334_v14, %v1137_v37  ;;  %v7058_v38 = vadd.f32 %v1782_v49, %v10215_v56  ;;  %v7061_v63 = vadd.f32 %v1783_v28, %v10217_v61  ;;  %v1367_v0 = vadd.f32 %v1335_v62, %v1138_v59  ;;  %v10225_v14 = vld [vmem:[#allocation148_spill] sm:$0xff]  ;;  %v10227_v10 = vld [vmem:[#allocation102_spill] sm:$0xff]  ;;  %v10229_v26 = vld [vmem:[#allocation141_spill] sm:$0xff] }
 0x355   :  { %v7064_v6 = vadd.f32 %v1784_v29, %v10219_v53  ;;  %v7067_v4 = vadd.f32 %v1785_v2, %v10221_v17  ;;  %1866 = vrot.lane.b32.xlu0 %v10223_v18, %s4107_s16  ;;  %v364_v37 = vmul.f32 %v10224_v58, %v10175_v41  ;;  %v579_v8 = vmul.f32 %v10225_v14, %v6952_v51  ;;  %v10228_v60 = vld [vmem:[#allocation142_spill] sm:$0xff]  ;;  %v10230_v51 = vld [vmem:[#allocation103_spill] sm:$0xff]  ;;  %v10234_v49 = vld [vmem:[#allocation129_spill] sm:$0xff] }
 0x356   :  { %10216 = vst [vmem:[#allocation93_spill] sm:$0xff] %v7058_v38  ;;  %1886 = vrot.lane.b32.xlu2 %v10198_v48, %s4107_s16  ;;  %v1728_v62 = vmul.f32 %v6759_v35, %v6919_v43  ;;  %v1729_v12 = vmul.f32 %v6762_v19, %v6924_v34  ;;  %2101 = vrot.lane.b32.xlu1 %v10175_v41, %s4109_s28  ;;  %v7093_v20 = vpop.permute.xlu0 %1834  ;;  %v10233_v1 = vld [vmem:[#allocation130_spill] sm:$0xff]  ;;  %v10236_v30 = vld [vmem:[#allocation36_spill] sm:$0xff]  ;;  %v10238_v53 = vld [vmem:[#allocation51_spill] sm:$0xff] }
 0x357   :  { %10218 = vst [vmem:[#allocation119_spill] sm:$0xff] %v7061_v63  ;;  %v763_v48 = vsel %vm749_vm2, %v10227_v10, %v10226_v5  ;;  %v992_v22 = vsel %vm978_vm3, %v10229_v26, %v10228_v60  ;;  %v1595_v55 = vadd.f32 %v10230_v51, %v1366_v46  ;;  %v1596_v43 = vadd.f32 %v10231_v36, %v1367_v0  ;;  %v10237_v56 = vld [vmem:[#allocation134_spill] sm:$0xff]  ;;  %v10239_v17 = vld [vmem:[#allocation137_spill] sm:$0xff]  ;;  %v10240_v58 = vld [vmem:[#allocation131_spill] sm:$0xff] }
 0x358   :  { %10220 = vst [vmem:[#allocation26_spill] sm:$0xff] %v7064_v6  ;;  %v1760_v19 = vpop.permute.xlu2 %1759  ;;  %v1736_v34 = vpop.permute.xlu1 %1735  ;;  %v10243_v60 = vld [vmem:[#allocation124_spill] sm:$0xff]  ;;  %v10245_v51 = vld [vmem:[#allocation105_spill] sm:$0xff] }
 0x359   :  { %10222 = vst [vmem:[#allocation49_spill] sm:$0xff] %v7067_v4  ;;  %v1790_v41 = vmul.f32 %v1760_v19, %v10233_v1  ;;  %v1791_v28 = vmul.f32 %v1760_v19, %v10234_v49  ;;  %v1792_v59 = vmul.f32 %v1760_v19, %v1728_v62  ;;  %v1793_v50 = vmul.f32 %v1760_v19, %v1729_v12  ;;  %v10241_v62 = vld [vmem:[#allocation140_spill] sm:$0xff]  ;;  %v10247_v19 = vld [vmem:[#allocation115_spill] sm:$0xff]  ;;  %v10249_v1 = vld [vmem:[#allocation58_spill] sm:$0xff] }
 0x35a   :  { %10232 = vst [vmem:[#allocation155_spill] sm:$0xff] %v7093_v20  ;;  %v1766_v29 = vmul.f32 %v1736_v34, %v10235_v47  ;;  %v1767_v2 = vmul.f32 %v1736_v34, %v10236_v30  ;;  %v1768_v61 = vmul.f32 %v1736_v34, %v10237_v56  ;;  %v1769_v46 = vmul.f32 %v1736_v34, %v10238_v53  ;;  %v10254_v47 = vld [vmem:[#allocation28_spill] sm:$0xff]  ;;  %v10255_v30 = vld [vmem:[#allocation118_spill] sm:$0xff] }
 0x35b   :  { %v7102_v0 = vadd.f32 %v1790_v41, %v10239_v17  ;;  %v7105_v14 = vadd.f32 %v1791_v28, %v10240_v58  ;;  %v7107_v5 = vadd.f32 %v1792_v59, %v1595_v55  ;;  %v7109_v10 = vadd.f32 %v1793_v50, %v1596_v43  ;;  %v10250_v55 = vld [vmem:[#allocation19_spill] sm:$0xff]  ;;  %v10251_v28 = vld [vmem:[#allocation157_spill] sm:$0xff]  ;;  %v10252_v59 = vld [vmem:[#allocation44_spill] sm:$0xff] }
 0x35c   :  { %v7112_v12 = vadd.f32 %v1766_v29, %v10241_v62  ;;  %v7115_v26 = vadd.f32 %v1767_v2, %v10243_v60  ;;  %v7118_v36 = vadd.f32 %v1768_v61, %v10245_v51  ;;  %v7121_v34 = vadd.f32 %v1769_v46, %v10247_v19  ;;  %v10253_v50 = vld [vmem:[#allocation38_spill] sm:$0xff]  ;;  %v10257_v61 = vld [vmem:[#allocation71_spill] sm:$0xff]  ;;  %v10258_v58 = vld [vmem:[#allocation48_spill] sm:$0xff] }
 0x35d   :  { %v643_v41 = vmul.f32 %v10249_v1, %v579_v8  ;;  %v808_v49 = vmul.f32 %v10172_v52, %v763_v48  ;;  %v1221_v43 = vsel %vm1207_vm4, %v10251_v28, %v10250_v55  ;;  %2087 = vrot.lane.b32.xlu0 %v10252_v59, %s4109_s28  ;;  %v444_v29 = vadd.f32 %v10254_v47, %v364_v37  ;;  %v10259_v60 = vld [vmem:[#allocation64_spill] sm:$0xff]  ;;  %v10260_v51 = vld [vmem:[#allocation163_spill] sm:$0xff] }
 0x35e   :  { %10242 = vst [vmem:[#allocation113_spill] sm:$0xff] %v7112_v12  ;;  %2117 = vrot.lane.b32.xlu2 %v10253_v50, %s4109_s28  ;;  %v1037_v56 = vmul.f32 %v10176_v9, %v992_v22  ;;  %2217 = vperm.xlu1 %3996, %v6600_v40   ;;  %v7137_v52 = vpop.permute.xlu0 %1840  ;;  %v1266_v46 = vmul.f32 %v10183_v23, %v1221_v43  ;;  %v10261_v40 = vld [vmem:[#allocation24_spill] sm:$0xff]  ;;  %v10266_v50 = vld [vmem:[#allocation101_spill] sm:$0xff]  ;;  %v10268_v43 = vld [vmem:[#allocation114_spill] sm:$0xff] }
 0x35f   :  { %10244 = vst [vmem:[#allocation60_spill] sm:$0xff] %v7115_v26  ;;  %v872_v2 = vmul.f32 %v10255_v30, %v808_v49  ;;  %v675_v48 = vadd.f32 %v643_v41, %v444_v29  ;;  %v10262_v49 = vld [vmem:[#allocation156_spill] sm:$0xff]  ;;  %v10264_v41 = vld [vmem:[#allocation162_spill] sm:$0xff] }
 0x360   :  { %10246 = vst [vmem:[#allocation45_spill] sm:$0xff] %v7118_v36  ;;  %v7139_v8 = vpop.permute.xlu2 %1832  ;;  %v1101_v53 = vmul.f32 %v10257_v61, %v1037_v56  ;;  %v1748_v17 = vpop.permute.xlu1 %1747  ;;  %v1330_v1 = vmul.f32 %v10261_v40, %v1266_v46  ;;  %v10270_v30 = vld [vmem:[#allocation84_spill] sm:$0xff]  ;;  %v1724_v56 = vmul.f32 %v6759_v35, %v7034_v7  ;;  %v10273_v46 = vmov 7   ;;  %v10279_v35 = vld [vmem:[#allocation138_spill] sm:$0xff] }
 0x361   :  { %10248 = vst [vmem:[#allocation106_spill] sm:$0xff] %v7121_v34  ;;  %v1778_v62 = vmul.f32 %v1748_v17, %v10258_v58  ;;  %v1779_v37 = vmul.f32 %v1748_v17, %v10259_v60  ;;  %v1780_v19 = vmul.f32 %v1748_v17, %v10260_v51  ;;  %v1781_v9 = vmul.f32 %v1748_v17, %v6880_v45  ;;  %v10274_v17 = vld [vmem:[#allocation122_spill] sm:$0xff] }
 0x362   :  { %10256 = vst [vmem:[#allocation79_spill] sm:$0xff] %v7139_v8  ;;  %v904_v22 = vadd.f32 %v872_v2, %v675_v48  ;;  %v10271_v2 = vld [vmem:[#allocation25_spill] sm:$0xff] }
 0x363   :  { %v7149_v55 = vadd.f32 %v1778_v62, %v10262_v49  ;;  %v7152_v28 = vadd.f32 %v1779_v37, %v10264_v41  ;;  %v7155_v23 = vadd.f32 %v1780_v19, %v10266_v50  ;;  %v7158_v47 = vadd.f32 %v1781_v9, %v10268_v43  ;;  %v10275_v62 = vld [vmem:[#allocation116_spill] sm:$0xff]  ;;  %v10276_v37 = vld [vmem:[#allocation123_spill] sm:$0xff]  ;;  %v10282_v41 = vld [vmem:[#allocation13_spill] sm:$0xff] }
 0x364   :  { %v1133_v29 = vadd.f32 %v1101_v53, %v904_v22  ;;  %v10277_v9 = vld [vmem:[#allocation139_spill] sm:$0xff]  ;;  %v10283_v50 = vld [vmem:[#allocation29_spill] sm:$0xff]  ;;  %v10284_v43 = vld [vmem:[#allocation56_spill] sm:$0xff] }
 0x365   :  { %10263 = vst [vmem:[#allocation70_spill] sm:$0xff] %v7149_v55  ;;  %1976 = vperm.xlu0 %3995, %v10270_v30  }
 0x366   :  { %10265 = vst [vmem:[#allocation69_spill] sm:$0xff] %v7152_v28  ;;  %1858 = vrot.lane.b32.xlu2 %v10252_v59, %s4107_s16  ;;  %v1362_v45 = vadd.f32 %v1330_v1, %v1133_v29  ;;  %1868 = vrot.lane.b32.xlu1 %v10271_v2, %s4107_s16  ;;  %v10281_v1 = vld [vmem:[#allocation107_spill] sm:$0xff] }
 0x367   :  { %10267 = vst [vmem:[#allocation11_spill] sm:$0xff] %v7155_v23  ;;  %v7167_v48 = vpop.permute.xlu0 %1846  ;;  %3997 = vset.pattern.permute.xlu1 %v10273_v46 }
 0x368   :  { %10269 = vst [vmem:[#allocation75_spill] sm:$0xff] %v7158_v47  ;;  %v7169_v61 = vpop.permute.xlu2 %1838  ;;  %v1591_v53 = vadd.f32 %v10274_v17, %v1362_v45  ;;  %v1756_v58 = vpop.permute.xlu1 %1755 }
 0x369   :  { %10272 = vst [vmem:[#allocation41_spill] sm:$0xff] %v7167_v48  ;;  %v1786_v60 = vmul.f32 %v1756_v58, %v10275_v62  ;;  %v1787_v59 = vmul.f32 %v1756_v58, %v10276_v37  ;;  %v1788_v51 = vmul.f32 %v1756_v58, %v1724_v56  ;;  %v1789_v19 = vmul.f32 %v1756_v58, %v7043_v54  ;;  %v10286_v56 = vld [vmem:[#allocation145_spill] sm:$0xff]  ;;  %v10288_v62 = vld [vmem:[#allocation18_spill] sm:$0xff] }
 0x36b   :  { %v7177_v22 = vadd.f32 %v1786_v60, %v10277_v9  ;;  %v7180_v7 = vadd.f32 %v1787_v59, %v10279_v35  ;;  %v7182_v40 = vadd.f32 %v1788_v51, %v1591_v53  ;;  %v7185_v49 = vadd.f32 %v1789_v19, %v10281_v1  ;;  %v4088_v9 = vld [vmem:[%s9219_s4 + $0x10] sm:$0xff]  ;;  %v10292_v1 = vld [vmem:[#allocation7_spill] sm:$0xff] }
 0x36d   :  { %10278 = vst [vmem:[#allocation128_spill] sm:$0xff] %v7177_v22  ;;  %1880 = vrot.lane.b32.xlu0 %v10282_v41, %s4107_s16 }
 0x36e   :  { %10280 = vst [vmem:[#allocation136_spill] sm:$0xff] %v7180_v7  ;;  %1884 = vrot.lane.b32.xlu2 %v10283_v50, %s4107_s16  ;;  %2089 = vrot.lane.b32.xlu1 %v10284_v43, %s4109_s28  ;;  %v10293_v43 = vld [vmem:[#allocation14_spill] sm:$0xff] }
 0x36f   :  { %4000 = vset.pattern.permute.xlu0 %v10207_v27  ;;  %v7194_v54 = vpop.permute.xlu0 %1852 }
 0x370   :  { %v1845_v29 = vpop.permute.xlu2 %1844  ;;  %v7196_v45 = vpop.permute.xlu1 %1830 }
 0x371   :  { %10285 = vst [vmem:[#allocation135_spill] sm:$0xff] %v7196_v45 }
 0x375   :  { %2095 = vrot.lane.b32.xlu0 %v10223_v18, %s4109_s28 }
 0x376   :  { %2099 = vrot.lane.b32.xlu2 %v10203_v15, %s4109_s28  ;;  %1980 = vperm.xlu1 %3997, %v10286_v56  }
 0x377   :  { %v1877_v17 = vpop.permute.xlu0 %1876 }
 0x378   :  { %v7203_v53 = vpop.permute.xlu2 %1850  ;;  %v7205_v58 = vpop.permute.xlu1 %1836 }
 0x379   :  { %10287 = vst [vmem:[#allocation92_spill] sm:$0xff] %v7205_v58 }
 0x37d   :  { %2205 = vperm.xlu0 %4000, %v10270_v30   ;;  %v10289_v30 = vld [vmem:[#allocation10_spill] sm:$0xff] }
 0x37e   :  { %2213 = vperm.xlu2 %3994, %v6551_v44   ;;  %1882 = vrot.lane.b32.xlu1 %v10288_v62, %s4107_s16  ;;  %v10290_v44 = vld [vmem:[#allocation22_spill] sm:$0xff] }
 0x37f   :  { %v7212_v18 = vpop.permute.xlu0 %1890  ;;  %3998 = vset.pattern.permute.xlu1 %v10207_v27 }
 0x380   :  { %v1857_v60 = vpop.permute.xlu2 %1856  ;;  %v7215_v15 = vpop.permute.xlu1 %1842 }
 0x381   :  { %v7220_v37 = vsel %vm1894_vm7, %v7137_v52, %v1857_v60 }
 0x385   :  { %2093 = vrot.lane.b32.xlu0 %v10289_v30, %s4109_s28 }
 0x386   :  { %2065 = vrot.lane.b32.xlu2 %v10290_v44, %s4109_s28  ;;  %2097 = vrot.lane.b32.xlu1 %v10271_v2, %s4109_s28 }
 0x387   :  { %3999 = vset.pattern.permute.xlu2 %v10273_v46  ;;  %v2122_v59 = vpop.permute.xlu0 %2121 }
 0x388   :  { %v7229_v51 = vpop.permute.xlu2 %1874  ;;  %v7231_v19 = vpop.permute.xlu1 %1848 }
 0x389   :  { %10291 = vst [vmem:[#allocation62_spill] sm:$0xff] %v7231_v19 }
 0x38d   :  { %2201 = vperm.xlu0 %4000, %v4088_v9  }
 0x38e   :  { %2113 = vrot.lane.b32.xlu2 %v10283_v50, %s4109_s28  ;;  %2209 = vperm.xlu1 %3998, %v10286_v56   ;;  %v10294_v56 = vmov 0  }
 0x38f   :  { %v7239_v35 = vpop.permute.xlu0 %1888 }
 0x390   :  { %v7241_v2 = vpop.permute.xlu2 %2105  ;;  %v7243_v46 = vpop.permute.xlu1 %1854 }
 0x391   :  { %v2131_v55 = vsel %vm2123_vm8, %v7241_v2, %v2122_v59 }
 0x395   :  { %2091 = vrot.lane.b32.xlu0 %v10292_v1, %s4109_s28 }
 0x396   :  { %1864 = vrot.lane.b32.xlu2 %v10289_v30, %s4107_s16  ;;  %2063 = vrot.lane.b32.xlu1 %v10293_v43, %s4109_s28 }
 0x397   :  { %v7251_v44 = vpop.permute.xlu0 %2119  ;;  %4004 = vset.pattern.permute.xlu1 %v10294_v56 }
 0x398   :  { %v7253_v50 = vpop.permute.xlu2 %1872  ;;  %v1893_v26 = vpop.permute.xlu1 %1892 }
 0x399   :  { %v1908_v12 = vsel %vm1894_vm7, %v1857_v60, %v7253_v50  ;;  %v4091_v60 = vld [vmem:[%s9224_s1 + $0x10] sm:$0xff]  ;;  %v1902_v3 = vsel %vm1894_vm7, %v1877_v17, %v1893_v26  ;;  %v1926_v25 = vsel %vm1894_vm7, %v1893_v26, %v1845_v29 }
 0x39a   :  { %v7285_v34 = vperm.slane %v4091_v60, 7  ;;  %v7297_v28 = vperm.slane %v4091_v60, 6  ;;  %v10301_v26 = vld [vmem:[#allocation12_spill] sm:$0xff] }
 0x39c   :  { %10298 = vst [vmem:[#allocation154_spill] sm:$0xff] %v7285_v34 }
 0x39d   :  { %2197 = vperm.xlu0 %4000, %v10295_v24   ;;  %v7275_v24 = vperm.slane %v7272_v16, 6  ;;  %10299 = vst [vmem:[#allocation2_spill] sm:$0xff] %v7297_v28 }
 0x39e   :  { %2085 = vrot.lane.b32.xlu2 %v10296_v21, %s4109_s28  ;;  %2111 = vrot.lane.b32.xlu1 %v10288_v62, %s4109_s28  ;;  %v4090_v21 = vld [vmem:[%s9224_s1 + $0x18] sm:$0xff] }
 0x39f   :  { %v1861_v30 = vpop.permute.xlu0 %1860  ;;  %v7280_v62 = vperm.slane %v4090_v21, 6  ;;  %v7287_v36 = vperm.slane %v4090_v21, 7  ;;  %v10300_v21 = vld [vmem:[#allocation100_spill] sm:$0xff] }
 0x3a0   :  { %v7264_v43 = vpop.permute.xlu2 %2103  ;;  %v7266_v11 = vpop.permute.xlu1 %2073  ;;  %v1910_v57 = vsel %vm1894_vm7, %v1861_v30, %v1877_v17  ;;  %v1918_v42 = vsel %vm1894_vm7, %v1845_v29, %v1861_v30  ;;  %v7303_v63 = vperm.slane %v10300_v21, 6  ;;  %v1961_v29 = vmul.f32 %v7297_v28, %v1902_v3 }
 0x3a1   :  { %10297 = vst [vmem:[#allocation165_spill] sm:$0xff] %v7280_v62  ;;  %v2155_v38 = vsel %vm2123_vm8, %v2122_v59, %v7266_v11  ;;  %v1962_v17 = vmul.f32 %v7280_v62, %v1926_v25  ;;  %v1959_v30 = vmul.f32 %v7275_v24, %v1918_v42  ;;  %v1924_v25 = vsel %vm1894_vm7, %v7239_v35, %v7137_v52 }
 0x3a2   :  { %v1960_v60 = vmul.f32 %v7303_v63, %v1910_v57  ;;  %v1951_v52 = vmul.f32 %v7275_v24, %v7220_v37 }
 0x3a5   :  { %2077 = vrot.lane.b32.xlu0 %v10301_v26, %s4109_s28  ;;  %v2190_v26 = vmul.f32 %v7285_v34, %v2131_v55 }
 0x3a6   :  { %1972 = vperm.xlu2 %3999, %v4088_v9   ;;  %1862 = vrot.lane.b32.xlu1 %v10292_v1, %s4107_s16  ;;  %v2191_v9 = vmul.f32 %v7287_v36, %v2155_v38 }
 0x3a7   :  { %4003 = vset.pattern.permute.xlu0 %v10294_v56  ;;  %v7317_v4 = vpop.permute.xlu0 %2069 }
 0x3a8   :  { %10302 = vst [vmem:[#allocation55_spill] sm:$0xff] %v7317_v4  ;;  %v7319_v59 = vpop.permute.xlu2 %2221  ;;  %v1993_v6 = vpop.permute.xlu1 %1992 }
 0x3a9   :  { %v2023_v1 = vmul.f32 %v1993_v6, %v1959_v30  ;;  %v2024_v23 = vmul.f32 %v1993_v6, %v1960_v60  ;;  %v2025_v47 = vmul.f32 %v1993_v6, %v1961_v29  ;;  %v2026_v7 = vmul.f32 %v1993_v6, %v1962_v17  ;;  %v10303_v30 = vld [vmem:[#allocation9_spill] sm:$0xff] }
 0x3aa   :  { %v2254_v3 = vmul.f32 %v7319_v59, %v2190_v26  ;;  %v2255_v42 = vmul.f32 %v7319_v59, %v2191_v9  ;;  %v1954_v17 = vmul.f32 %v7280_v62, %v1924_v25  ;;  %v1952_v60 = vmul.f32 %v7303_v63, %v1908_v12 }
 0x3ab   :  { %v2057_v57 = vadd.f32 %v2025_v47, %v7051_v31  ;;  %v2058_v55 = vadd.f32 %v2026_v7, %v7053_v33  ;;  %v7332_v38 = vadd.f32 %v2023_v1, %v7046_v32  ;;  %v10304_v31 = vld [vmem:[#allocation8_spill] sm:$0xff] }
 0x3ad   :  { %v7336_v6 = vadd.f32 %v2254_v3, %v2057_v57  ;;  %v7338_v29 = vadd.f32 %v2255_v42, %v2058_v55  ;;  %v7373_v42 = vadd.f32 %v2024_v23, %v7049_v39  ;;  %v1925_v57 = vsel %vm1894_vm7, %v7212_v18, %v7215_v15 }
 0x3ae   :  { %1878 = vrot.lane.b32.xlu2 %v10303_v30, %s4107_s16  ;;  %2061 = vrot.lane.b32.xlu1 %v10304_v31, %s4109_s28  ;;  %v1901_v55 = vsel %vm1894_vm7, %v7229_v51, %v7212_v18  ;;  %v1958_v31 = vmul.f32 %v7280_v62, %v1925_v57 }
 0x3af   :  { %v7346_v33 = vpop.permute.xlu0 %1984  ;;  %v7351_v47 = vmul.f32 0.70710677, %v7336_v6  ;;  %v7354_v7 = vmul.f32 0.70710677, %v7338_v29  ;;  %v1957_v18 = vmul.f32 %v7297_v28, %v1901_v55 }
 0x3b0   :  { %v7348_v32 = vpop.permute.xlu2 %1886  ;;  %v7356_v26 = vpop.permute.xlu1 %2071  ;;  %v7359_v37 = vmul.f32 %v7346_v33, %v1951_v52  ;;  %v7362_v12 = vmul.f32 %v7346_v33, %v1952_v60  ;;  %v2018_v9 = vmul.f32 %v7346_v33, %v1954_v17 }
 0x3b1   :  { %v3552_v1 = vmul.f32 %v7351_v47, %v7351_v47  ;;  %v3592_v25 = vmul.f32 %v7354_v7, %v7354_v7 }
 0x3b2   :  { %10305 = vst [vmem:[#allocation160_spill] sm:$0xff] %v7359_v37  ;;  %v7370_v3 = vadd.f32 %v2018_v9, %v7185_v49  ;;  %v10307_v49 = vld [vmem:[#allocation32_spill] sm:$0xff] }
 0x3b3   :  { %10306 = vst [vmem:[#allocation72_spill] sm:$0xff] %v7362_v12  ;;  %v7383_v52 = vmin.f32 %v3552_v1, 16.0  ;;  %v7385_v17 = vmin.f32 %v3592_v25, 16.0 }
 0x3b5   :  { %v3554_v39 = vmul.f32 2.1237322e-06, %v7383_v52  ;;  %v3565_v23 = vmul.f32 3.8918573e-05, %v7383_v52  ;;  %v3594_v60 = vmul.f32 2.1237322e-06, %v7385_v17 }
 0x3b6   :  { %2083 = vrot.lane.b32.xlu2 %v10307_v49, %s4109_s28  ;;  %2109 = vrot.lane.b32.xlu1 %v10282_v41, %s4109_s28  ;;  %v3605_v25 = vmul.f32 3.8918573e-05, %v7385_v17 }
 0x3b7   :  { %v7396_v9 = vpop.permute.xlu0 %2067  ;;  %v3555_v12 = vadd.f32 0.00028619796, %v3554_v39  ;;  %v3566_v37 = vadd.f32 0.001143296, %v3565_v23  ;;  %v3595_v41 = vadd.f32 0.00028619796, %v3594_v60 }
 0x3b8   :  { %10308 = vst [vmem:[#allocation74_spill] sm:$0xff] %v7396_v9  ;;  %v7398_v1 = vpop.permute.xlu2 %2117  ;;  %v1989_v49 = vpop.permute.xlu1 %1988  ;;  %v3606_v19 = vadd.f32 0.001143296, %v3605_v25 }
 0x3b9   :  { %v2021_v22 = vmul.f32 %v1989_v49, %v1957_v18  ;;  %v2022_v8 = vmul.f32 %v1989_v49, %v1958_v31  ;;  %v3556_v58 = vmul.f32 %v3555_v12, %v7383_v52  ;;  %v3567_v20 = vmul.f32 %v3566_v37, %v7383_v52  ;;  %v4092_v31 = vld [vmem:[%s9219_s4 + $0x8] sm:$0xff]  ;;  %v10309_v37 = vld [vmem:[#allocation4_spill] sm:$0xff] }
 0x3ba   :  { %v3596_v57 = vmul.f32 %v3595_v41, %v7385_v17  ;;  %v3607_v55 = vmul.f32 %v3606_v19, %v7385_v17 }
 0x3bb   :  { %v7406_v9 = vadd.f32 %v2021_v22, %v7107_v5  ;;  %v7409_v62 = vadd.f32 %v2022_v8, %v7109_v10  ;;  %v3557_v39 = vadd.f32 0.0036580483, %v3556_v58  ;;  %v3568_v23 = vadd.f32 0.014752088, %v3567_v20 }
 0x3bc   :  { %v3597_v60 = vadd.f32 0.0036580483, %v3596_v57  ;;  %v3608_v12 = vadd.f32 0.014752088, %v3607_v55 }
 0x3bd   :  { %v3558_v19 = vmul.f32 %v3557_v39, %v7383_v52  ;;  %v3569_v10 = vmul.f32 %v3568_v23, %v7383_v52 }
 0x3be   :  { %1968 = vperm.xlu2 %3999, %v4092_v31   ;;  %2059 = vrot.lane.b32.xlu1 %v10309_v37, %s4109_s28  ;;  %v3598_v8 = vmul.f32 %v3597_v60, %v7385_v17  ;;  %v3609_v20 = vmul.f32 %v3608_v12, %v7385_v17 }
 0x3bf   :  { %v7417_v18 = vpop.permute.xlu0 %2115  ;;  %v3559_v41 = vadd.f32 0.05243302, %v3558_v19  ;;  %v3570_v31 = vadd.f32 0.112945676, %v3569_v10 }
 0x3c0   :  { %v1859_v5 = vpop.permute.xlu2 %1858  ;;  %v1871_v22 = vpop.permute.xlu1 %1870  ;;  %v3610_v12 = vadd.f32 0.112945676, %v3609_v20 }
 0x3c1   :  { %v1909_v58 = vsel %vm1894_vm7, %v1859_v5, %v7229_v51  ;;  %v1917_v25 = vsel %vm1894_vm7, %v7215_v15, %v1859_v5  ;;  %v7431_v57 = vsel %vm1894_vm7, %v1871_v22, %v7348_v32  ;;  %v7436_v55 = vsel %vm1894_vm7, %v7243_v46, %v1871_v22  ;;  %v10311_v5 = vld [vmem:[#allocation23_spill] sm:$0xff] }
 0x3c2   :  { %10310 = vst [vmem:[#allocation16_spill] sm:$0xff] %v7431_v57  ;;  %v1955_v39 = vmul.f32 %v7275_v24, %v1917_v25  ;;  %v1956_v23 = vmul.f32 %v7303_v63, %v1909_v58  ;;  %v3560_v51 = vmul.f32 %v3559_v41, %v7383_v52  ;;  %v3599_v15 = vadd.f32 0.05243302, %v3598_v8 }
 0x3c3   :  { %v3571_v22 = vmul.f32 %v3570_v31, %v7383_v52  ;;  %v3611_v57 = vmul.f32 %v3610_v12, %v7385_v17  ;;  %v7487_v12 = vperm.slane %v10300_v21, 7 }
 0x3c4   :  { %v2019_v60 = vmul.f32 %v1989_v49, %v1955_v39  ;;  %v2020_v37 = vmul.f32 %v1989_v49, %v1956_v23  ;;  %v3600_v10 = vmul.f32 %v3599_v15, %v7385_v17  ;;  %v7484_v15 = vperm.slane %v7272_v16, 7 }
 0x3c5   :  { %v3572_v20 = vadd.f32 0.4994258, %v3571_v22  ;;  %v3612_v58 = vadd.f32 0.4994258, %v3611_v57  ;;  %v2130_v57 = vsel %vm2123_vm8, %v7264_v43, %v7251_v44  ;;  %10314 = vst [vmem:[#allocation31_spill] sm:$0xff] %v7487_v12 }
 0x3c6   :  { %v7442_v19 = vadd.f32 %v2019_v60, %v7102_v0  ;;  %2081 = vrot.lane.b32.xlu2 %v10311_v5, %s4109_s28  ;;  %v7449_v25 = vadd.f32 %v2020_v37, %v7105_v14  ;;  %2107 = vrot.lane.b32.xlu1 %v10303_v30, %s4109_s28  ;;  %v3561_v0 = vadd.f32 0.18741608, %v3560_v51  ;;  %v1900_v14 = vsel %vm1894_vm7, %v7253_v50, %v7239_v35  ;;  %v10315_v5 = vld [vmem:[#allocation17_spill] sm:$0xff] }
 0x3c7   :  { %v7454_v8 = vpop.permute.xlu0 %1866  ;;  %v3573_v39 = vmul.f32 %v3572_v20, %v7383_v52  ;;  %v3601_v23 = vadd.f32 0.18741608, %v3600_v10  ;;  %v3613_v30 = vmul.f32 %v3612_v58, %v7385_v17  ;;  %v1953_v51 = vmul.f32 %v7297_v28, %v1900_v14  ;;  %10313 = vst [vmem:[#allocation40_spill] sm:$0xff] %v7484_v15 }
 0x3c8   :  { %10312 = vst [vmem:[#allocation20_spill] sm:$0xff] %v7449_v25  ;;  %v7456_v49 = vpop.permute.xlu2 %1884  ;;  %v7458_v41 = vpop.permute.xlu1 %2101  ;;  %v3562_v60 = vmul.f32 %v3561_v0, %v7383_v52  ;;  %v2154_v35 = vsel %vm2123_vm8, %v7251_v44, %v7356_v26  ;;  %v4093_v52 = vld [vmem:[%s9219_s4] sm:$0xff]  ;;  %v2186_v22 = vmul.f32 %v7285_v34, %v2130_v57 }
 0x3c9   :  { %v7467_v31 = vadd.f32 1.0, %v3573_v39  ;;  %v7478_v50 = vadd.f32 1.0, %v3613_v30  ;;  %v2017_v37 = vmul.f32 %v7346_v33, %v1953_v51  ;;  %v3602_v44 = vmul.f32 %v3601_v23, %v7385_v17 }
 0x3ca   :  { %v2187_v10 = vmul.f32 %v7287_v36, %v2154_v35  ;;  %v3563_v21 = vadd.f32 1.1283791, %v3562_v60  ;;  %v2129_v33 = vsel %vm2123_vm8, %v7458_v41, %v7398_v1 }
 0x3cb   :  { %4005 = vrcp.f32 %v7467_v31  ;;  %v3603_v51 = vadd.f32 1.1283791, %v3602_v44  ;;  %v2182_v44 = vmul.f32 %v7285_v34, %v2129_v33  ;;  %vm3580_vm9 = vweird.f32 %v7467_v31 }
 0x3cc   :  { %4007 = vrcp.f32 %v7478_v50  ;;  %vm3620_vm10 = vweird.f32 %v7478_v50 }
 0x3ce   :  { %1964 = vperm.xlu2 %3999, %v4093_v52   ;;  %2079 = vrot.lane.b32.xlu1 %v10315_v5, %s4109_s28 }
 0x3cf   :  { %v2088_v16 = vpop.permute.xlu0 %2087 }
 0x3d0   :  { %v7497_v0 = vpop.permute.xlu2 %2099  ;;  %v2218_v20 = vpop.permute.xlu1 %2217  ;;  %v2138_v17 = vsel %vm2123_vm8, %v2088_v16, %v7264_v43  ;;  %v2146_v58 = vsel %vm2123_vm8, %v7356_v26, %v2088_v16  ;;  %v7521_v43 = vsel %vm1894_vm7, %v7169_v61, %v7243_v46  ;;  %v2049_v26 = vadd.f32 %v2017_v37, %v7182_v40 }
 0x3d1   :  { %10316 = vst [vmem:[#allocation147_spill] sm:$0xff] %v7497_v0  ;;  %v7513_v14 = vsel %vm2123_vm8, %v7497_v0, %v7417_v18  ;;  %v2250_v39 = vmul.f32 %v2218_v20, %v2186_v22  ;;  %v2251_v23 = vmul.f32 %v2218_v20, %v2187_v10  ;;  %v2184_v30 = vmul.f32 %v7484_v15, %v2146_v58  ;;  %v4006_v57 = vpop.eup %4005 }
 0x3d2   :  { %10317 = vst [vmem:[#allocation66_spill] sm:$0xff] %v7513_v14  ;;  %v2185_v60 = vmul.f32 %v7487_v12, %v2138_v17  ;;  %v4008_v16 = vpop.eup %4007  ;;  %v2153_v46 = vsel %vm2123_vm8, %v7398_v1, %v7317_v4  ;;  %v3564_v40 = vmul.f32 %v3563_v21, %v7351_v47  ;;  %v3576_v37 = vmul.f32 %v4006_v57, %v7467_v31  ;;  %v10319_v17 = vld [vmem:[#allocation5_spill] sm:$0xff] }
 0x3d3   :  { %v7524_v35 = vmul.f32 %v2218_v20, %v2184_v30  ;;  %v7529_v22 = vadd.f32 %v2250_v39, %v7406_v9  ;;  %v7532_v10 = vadd.f32 %v2251_v23, %v7409_v62  ;;  %v3584_v9 = vand.u32 2147483647, %v7467_v31 }
 0x3d4   :  { %v7526_v5 = vmul.f32 %v2218_v20, %v2185_v60  ;;  %v3616_v62 = vmul.f32 %v4008_v16, %v7478_v50  ;;  %v3577_v1 = vsub.f32 1.0, %v3576_v37  ;;  %v3586_v47 = vand.u32 2147483648, %v7467_v31 }
 0x3d5   :  { %v7546_v20 = vmul.f32 0.70710677, %v7529_v22  ;;  %v3604_v21 = vmul.f32 %v3603_v51, %v7354_v7  ;;  %v3626_v39 = vand.u32 2147483648, %v7478_v50  ;;  %vm3581_vm11 = vweird.f32 %v4006_v57 }
 0x3d6   :  { %10318 = vst [vmem:[#allocation6_spill] sm:$0xff] %v7526_v5  ;;  %4001 = vset.pattern.permute.xlu2 %v10207_v27  ;;  %2075 = vrot.lane.b32.xlu1 %v10319_v17, %s4109_s28  ;;  %v7553_v27 = vmul.f32 0.70710677, %v7532_v10  ;;  %v3617_v58 = vsub.f32 1.0, %v3616_v62  ;;  %vm3621_vm12 = vweird.f32 %v4008_v16  ;;  %v3624_v7 = vand.u32 2147483647, %v7478_v50  ;;  %vm3582_vm14 = vmor %vm3580_vm9, %vm3581_vm11 }
 0x3d7   :  { %2193 = vperm.xlu2 %4001, %v4093_v52   ;;  %v3392_v23 = vmul.f32 %v7546_v20, %v7546_v20  ;;  %v3578_v37 = vmul.f32 %v4006_v57, %v3577_v1  ;;  %vm7572_vm13 = vcmp.eq.f32.partialorder %v3584_v9, 8.507059e+37  ;;  %v7580_v5 = vpop.permute.xlu0 %1976  ;;  %vm3622_vm15 = vmor %vm3620_vm10, %vm3621_vm12 }
 0x3d8   :  { %v7555_v33 = vpop.permute.xlu2 %2213  ;;  %v1869_v30 = vpop.permute.xlu1 %1868  ;;  %v3618_v62 = vmul.f32 %v4008_v16, %v3617_v58  ;;  %v3432_v4 = vmul.f32 %v7553_v27, %v7553_v27  ;;  %10322 = vst [vmem:[#allocation52_spill] sm:$0xff] %v7580_v5  ;;  %v3627_v58 = vor.u32 1.1754944e-38, %v3626_v39  ;;  %vm3625_vm0 = vcmp.eq.f32.partialorder %v3624_v7, 8.507059e+37 }
 0x3d9   :  { %v2246_v52 = vmul.f32 %v7555_v33, %v2182_v44  ;;  %v7566_v60 = vsel %vm1894_vm7, %v1869_v30, %v7456_v49  ;;  %v1906_v51 = vsel %vm1894_vm7, %v7194_v54, %v1869_v30  ;;  %v7576_v44 = vmin.f32 %v3392_v23, 16.0 }
 0x3da   :  { %v1944_v17 = vmul.f32 %v7303_v63, %v1906_v51  ;;  %v3579_v25 = vadd.f32 %v4006_v57, %v3578_v37  ;;  %v3587_v30 = vor.u32 1.1754944e-38, %v3586_v47  ;;  %v3619_v1 = vadd.f32 %v4008_v16, %v3618_v62 }
 0x3db   :  { %v3394_v9 = vmul.f32 2.1237322e-06, %v7576_v44  ;;  %v3405_v23 = vmul.f32 3.8918573e-05, %v7576_v44  ;;  %v7592_v34 = vadd.f32 %v2246_v52, %v2049_v26  ;;  %v7594_v31 = vmin.f32 %v3432_v4, 16.0 }
 0x3dc   :  { %v7585_v51 = vmul.f32 %v7580_v5, %v1944_v17  ;;  %v3583_v37 = vsel %vm3582_vm14, %v4006_v57, %v3579_v25  ;;  %v3623_v14 = vsel %vm3622_vm15, %v4008_v16, %v3619_v1  ;;  %v1947_v25 = vmul.f32 %v7275_v24, %v7521_v43 }
 0x3dd   :  { %v3588_v47 = vsel %vm7572_vm13, %v3587_v30, %v3583_v37  ;;  %v3628_v39 = vsel %vm3625_vm0, %v3627_v58, %v3623_v14  ;;  %v3395_v62 = vadd.f32 0.00028619796, %v3394_v9  ;;  %v3406_v17 = vadd.f32 0.001143296, %v3405_v23 }
 0x3de   :  { %10323 = vst [vmem:[#allocation108_spill] sm:$0xff] %v7585_v51  ;;  %v3589_v51 = vmul.f32 %v3588_v47, %v3564_v40  ;;  %v3629_v5 = vmul.f32 %v3628_v39, %v3604_v21  ;;  %v3434_v26 = vmul.f32 2.1237322e-06, %v7594_v31  ;;  %v2183_v4 = vmul.f32 %v7287_v36, %v2153_v46 }
 0x3df   :  { %4002 = vset.pattern.permute.xlu2 %v10294_v56  ;;  %v3407_v0 = vmul.f32 %v3406_v17, %v7576_v44  ;;  %v7607_v14 = vmul.f32 0.70710677, %v7592_v34  ;;  %v2318_v16 = vmul.f32 0.5, %v7336_v6  ;;  %v3445_v21 = vmul.f32 3.8918573e-05, %v7594_v31 }
 0x3e0   :  { %v7599_v50 = vpop.permute.xlu2 %2065  ;;  %v2090_v57 = vpop.permute.xlu1 %2089  ;;  %v3935_v40 = vclamps-f32 %v3589_v51, 1.0  ;;  %v2247_v52 = vmul.f32 %v7555_v33, %v2183_v4  ;;  %v3936_v46 = vclamps-f32 %v3629_v5, 1.0  ;;  %v3396_v7 = vmul.f32 %v3395_v62, %v7576_v44 }
 0x3e1   :  { %10324 = vst [vmem:[#allocation27_spill] sm:$0xff] %v7599_v50  ;;  %v2147_v56 = vsel %vm2123_vm8, %v7266_v11, %v2090_v57  ;;  %v3408_v1 = vadd.f32 0.014752088, %v3407_v0  ;;  %v3435_v58 = vadd.f32 0.00028619796, %v3434_v26  ;;  %v3232_v9 = vmul.f32 %v7607_v14, %v7607_v14 }
 0x3e2   :  { %v2188_v43 = vmul.f32 %v7484_v15, %v2147_v56  ;;  %v3662_v30 = vadd.f32 1.0, %v3935_v40  ;;  %v2139_v11 = vsel %vm2123_vm8, %v2090_v57, %v7241_v2  ;;  %v2319_v51 = vmul.f32 0.5, %v7338_v29 }
 0x3e3   :  { %v3663_v23 = vadd.f32 1.0, %v3936_v46  ;;  %v3409_v5 = vmul.f32 %v3408_v1, %v7576_v44  ;;  %v3436_v47 = vmul.f32 %v3435_v58, %v7594_v31  ;;  %v3446_v39 = vadd.f32 0.001143296, %v3445_v21 }
 0x3e4   :  { %v2252_v6 = vmul.f32 %v7319_v59, %v2188_v43  ;;  %v3694_v37 = vmul.f32 %v3662_v30, %v2318_v16  ;;  %v3397_v17 = vadd.f32 0.0036580483, %v3396_v7  ;;  %v7626_v26 = vmin.f32 %v3232_v9, 16.0 }
 0x3e5   :  { %v3695_v62 = vmul.f32 %v3663_v23, %v2319_v51  ;;  %v7629_v4 = vadd.f32 %v2247_v52, %v7370_v3  ;;  %v1948_v2 = vmul.f32 %v7303_v63, %v7436_v55  ;;  %v2189_v57 = vmul.f32 %v7487_v12, %v2139_v11 }
 0x3e6   :  { %3803 = vmatpush.msrb.mxu2 %v3694_v37  ;;  %v3410_v0 = vadd.f32 0.112945676, %v3409_v5  ;;  %v3447_v56 = vmul.f32 %v3446_v39, %v7594_v31  ;;  %v3437_v40 = vadd.f32 0.0036580483, %v3436_v47  ;;  %v3234_v21 = vmul.f32 2.1237322e-06, %v7626_v26 }
 0x3e7   :  { %3832 = vmatpush.msrb.mxu3 %v3695_v62  ;;  %v3245_v3 = vmul.f32 3.8918573e-05, %v7626_v26  ;;  %v3398_v43 = vmul.f32 %v3397_v17, %v7576_v44  ;;  %v7650_v7 = vmul.f32 0.70710677, %v7629_v4  ;;  %v2253_v30 = vmul.f32 %v7319_v59, %v2189_v57  ;;  %v7663_v62 = vpop.permute.xlu0 %1880 }
 0x3e8   :  { %v7634_v29 = vpop.permute.xlu2 %2113  ;;  %v7637_v16 = vpop.permute.xlu1 %1980  ;;  %v3411_v46 = vmul.f32 %v3410_v0, %v7576_v44  ;;  %v3448_v1 = vadd.f32 0.014752088, %v3447_v56  ;;  %v3235_v58 = vadd.f32 0.00028619796, %v3234_v21  ;;  %v3438_v51 = vmul.f32 %v3437_v40, %v7594_v31 }
 0x3e9   :  { %v7642_v52 = vmul.f32 %v7637_v16, %v1947_v25  ;;  %v7645_v55 = vmul.f32 %v7637_v16, %v1948_v2  ;;  %v3246_v9 = vadd.f32 0.001143296, %v3245_v3  ;;  %v7655_v25 = vadd.f32 %v2252_v6, %v7332_v38 }
 0x3ea   :  { %v3412_v11 = vadd.f32 0.4994258, %v3411_v46  ;;  %v3449_v23 = vmul.f32 %v3448_v1, %v7594_v31  ;;  %v3236_v37 = vmul.f32 %v3235_v58, %v7626_v26  ;;  %v3399_v47 = vadd.f32 0.05243302, %v3398_v43  ;;  %v10329_v58 = vld [vmem:[#allocation155_spill] sm:$0xff] }
 0x3eb   :  { %10325 = vst [vmem:[#allocation43_spill] sm:$0xff] %v7642_v52  ;;  %v3247_v5 = vmul.f32 %v3246_v9, %v7626_v26  ;;  %v3272_v59 = vmul.f32 %v7650_v7, %v7650_v7  ;;  %v7668_v38 = vadd.f32 %v2253_v30, %v7373_v42  ;;  %v3439_v56 = vadd.f32 0.05243302, %v3438_v51 }
 0x3ec   :  { %10326 = vst [vmem:[#allocation57_spill] sm:$0xff] %v7645_v55  ;;  %v3413_v39 = vmul.f32 %v3412_v11, %v7576_v44  ;;  %v3450_v2 = vadd.f32 0.112945676, %v3449_v23  ;;  %v3237_v21 = vadd.f32 0.0036580483, %v3236_v37  ;;  %v3400_v3 = vmul.f32 %v3399_v47, %v7576_v44  ;;  %v10331_v47 = vld [vmem:[#allocation92_spill] sm:$0xff] }
 0x3ed   :  { %v3248_v57 = vadd.f32 0.014752088, %v3247_v5  ;;  %v7687_v43 = vmin.f32 %v3272_v59, 16.0  ;;  %v1911_v46 = vsel %vm1894_vm7, %v7196_v45, %v7167_v48  ;;  %v1913_v9 = vsel %vm1894_vm7, %v10329_v58, %v7203_v53  ;;  %v10333_v55 = vld [vmem:[#allocation62_spill] sm:$0xff] }
 0x3ee   :  { %v7685_v42 = vadd.f32 1.0, %v3413_v39  ;;  %v3451_v30 = vmul.f32 %v3450_v2, %v7594_v31  ;;  %v3440_v11 = vmul.f32 %v3439_v56, %v7594_v31  ;;  %v3238_v23 = vmul.f32 %v3237_v21, %v7626_v26  ;;  %v10334_v56 = vld [vmem:[#allocation79_spill] sm:$0xff] }
 0x3ef   :  { %v3249_v1 = vmul.f32 %v3248_v57, %v7626_v26  ;;  %v7703_v5 = vmul.f32 %v7275_v24, %v1911_v46  ;;  %v1914_v39 = vsel %vm1894_vm7, %v10331_v47, %v7194_v54  ;;  %v3401_v59 = vadd.f32 0.18741608, %v3400_v3 }
 0x3f0   :  { %v7665_v17 = vpop.permute.xlu2 %1864  ;;  %v7670_v6 = vpop.permute.xlu1 %1882  ;;  %4009 = vrcp.f32 %v7685_v42  ;;  %v3452_v51 = vadd.f32 0.4994258, %v3451_v30  ;;  %v3274_v2 = vmul.f32 2.1237322e-06, %v7687_v43  ;;  %v7711_v57 = vmul.f32 %v7275_v24, %v1913_v9 }
 0x3f1   :  { %v7676_v0 = vsel %vm1894_vm7, %v7665_v17, %v7663_v62  ;;  %v7682_v40 = vsel %vm1894_vm7, %v7454_v8, %v7670_v6  ;;  %v3250_v37 = vadd.f32 0.112945676, %v3249_v1  ;;  %10330 = vst [vmem:[#allocation117_spill] sm:$0xff] %v7703_v5  ;;  %v1912_v21 = vsel %vm1894_vm7, %v10334_v56, %v10333_v55 }
 0x3f2   :  { %10327 = vst [vmem:[#allocation47_spill] sm:$0xff] %v7676_v0  ;;  %v3453_v46 = vmul.f32 %v3452_v51, %v7594_v31  ;;  %v1923_v54 = vsel %vm1894_vm7, %v7348_v32, %v7169_v61  ;;  %v3441_v9 = vadd.f32 0.18741608, %v3440_v11  ;;  %v3285_v5 = vmul.f32 3.8918573e-05, %v7687_v43 }
 0x3f3   :  { %10328 = vst [vmem:[#allocation73_spill] sm:$0xff] %v7682_v40  ;;  %v3251_v1 = vmul.f32 %v3250_v37, %v7626_v26  ;;  %v7731_v52 = vmul.f32 %v7275_v24, %v1914_v39  ;;  %v1905_v51 = vsel %vm1894_vm7, %v7203_v53, %v7454_v8  ;;  %v3239_v48 = vadd.f32 0.05243302, %v3238_v23  ;;  %v10336_v39 = vld [vmem:[#allocation165_spill] sm:$0xff]  ;;  %v10338_v8 = vld [vmem:[#allocation74_spill] sm:$0xff] }
 0x3f4   :  { %10332 = vst [vmem:[#allocation3_spill] sm:$0xff] %v7711_v57  ;;  %v3402_v32 = vmul.f32 %v3401_v59, %v7576_v44  ;;  %v7739_v45 = vadd.f32 1.0, %v3453_v46  ;;  %v3275_v11 = vadd.f32 0.00028619796, %v3274_v2  ;;  %v7742_v57 = vmul.f32 %v7275_v24, %v1912_v21 }
 0x3f5   :  { %v7745_v40 = vmul.f32 %v10336_v39, %v1923_v54  ;;  %v7755_v44 = vsel %vm2123_vm8, %v7417_v18, %v10338_v8  ;;  %v3442_v23 = vmul.f32 %v3441_v9, %v7594_v31  ;;  %v3286_v24 = vadd.f32 0.001143296, %v3285_v5 }
 0x3f6   :  { %v4010_v61 = vpop.eup %4009  ;;  %10335 = vst [vmem:[#allocation91_spill] sm:$0xff] %v7742_v57  ;;  %4011 = vrcp.f32 %v7739_v45  ;;  %v1940_v59 = vmul.f32 %v7303_v63, %v1905_v51  ;;  %v1922_v2 = vsel %vm1894_vm7, %v7456_v49, %v10331_v47  ;;  %v3426_v54 = vand.u32 2147483648, %v7685_v42 }
 0x3f7   :  { %v3416_v53 = vmul.f32 %v4010_v61, %v7685_v42  ;;  %v3240_v18 = vmul.f32 %v3239_v48, %v7626_v26  ;;  %v3276_v31 = vmul.f32 %v3275_v11, %v7687_v43  ;;  %vm3421_vm1 = vweird.f32 %v4010_v61 }
 0x3f8   :  { %v7717_v30 = vpop.permute.xlu2 %2085  ;;  %v3424_v9 = vand.u32 2147483647, %v7685_v42  ;;  %v7774_v49 = vmul.f32 %v10336_v39, %v1922_v2  ;;  %v2314_v48 = vmul.f32 0.5, %v7529_v22  ;;  %vm3420_vm2 = vweird.f32 %v7685_v42 }
 0x3f9   :  { %v2137_v3 = vsel %vm2123_vm8, %v7717_v30, %v7458_v41  ;;  %v3252_v41 = vadd.f32 0.4994258, %v3251_v1  ;;  %v3417_v21 = vsub.f32 1.0, %v3416_v53  ;;  %v3403_v1 = vadd.f32 1.1283791, %v3402_v32  ;;  %vm3422_vm3 = vmor %vm3420_vm2, %vm3421_vm1 }
 0x3fa   :  { %v2181_v37 = vmul.f32 %v7487_v12, %v2137_v3  ;;  %v3287_v32 = vmul.f32 %v3286_v24, %v7687_v43  ;;  %v7783_v11 = vmul.f32 0.70710677, %v7655_v25  ;;  %v3277_v2 = vadd.f32 0.0036580483, %v3276_v31 }
 0x3fb   :  { %v3253_v46 = vmul.f32 %v3252_v41, %v7626_v26  ;;  %v3418_v5 = vmul.f32 %v4010_v61, %v3417_v21  ;;  %v3427_v21 = vor.u32 1.1754944e-38, %v3426_v54  ;;  %vm3425_vm4 = vcmp.eq.f32.partialorder %v3424_v9, 8.507059e+37 }
 0x3fc   :  { %v7748_v0 = vmul.f32 %v7555_v33, %v2181_v37  ;;  %v3443_v37 = vadd.f32 1.1283791, %v3442_v23  ;;  %v4012_v53 = vpop.eup %4011  ;;  %v3464_v42 = vand.u32 2147483647, %v7739_v45  ;;  %v3466_v54 = vand.u32 2147483648, %v7739_v45 }
 0x3fd   :  { %v7771_v51 = vadd.f32 1.0, %v3253_v46  ;;  %v3419_v41 = vadd.f32 %v4010_v61, %v3418_v5  ;;  %v3241_v46 = vadd.f32 0.18741608, %v3240_v18  ;;  %v3456_v24 = vmul.f32 %v4012_v53, %v7739_v45 }
 0x3fe   :  { %10337 = vst [vmem:[#allocation90_spill] sm:$0xff] %v7748_v0  ;;  %v3444_v5 = vmul.f32 %v3443_v37, %v7553_v27  ;;  %v3472_v18 = vmul.f32 %v7783_v11, %v7783_v11  ;;  %vm3461_vm5 = vweird.f32 %v4012_v53  ;;  %vm3460_vm6 = vweird.f32 %v7739_v45 }
 0x3ff   :  { %4013 = vrcp.f32 %v7771_v51  ;;  %v3423_v23 = vsel %vm3422_vm3, %v4010_v61, %v3419_v41  ;;  %v3457_v0 = vsub.f32 1.0, %v3456_v24  ;;  %v3242_v31 = vmul.f32 %v3241_v46, %v7626_v26  ;;  %vm3462_vm10 = vmor %vm3460_vm6, %vm3461_vm5 }
 0x400   :  { %v7768_v3 = vpop.permute.xlu2 %1972  ;;  %v3428_v22 = vsel %vm3425_vm4, %v3427_v21, %v3423_v23  ;;  %vm7805_vm9 = vcmp.eq.f32.partialorder %v3464_v42, 8.507059e+37  ;;  %vm3260_vm12 = vweird.f32 %v7771_v51 }
 0x401   :  { %v7777_v47 = vmul.f32 %v7768_v3, %v1940_v59  ;;  %v3404_v59 = vmul.f32 %v3403_v1, %v7546_v20  ;;  %v3278_v20 = vmul.f32 %v3277_v2, %v7687_v43  ;;  %v7798_v1 = vadd.f32 %v7524_v35, %v7442_v19 }
 0x402   :  { %v3458_v9 = vmul.f32 %v4012_v53, %v3457_v0  ;;  %v3243_v46 = vadd.f32 1.1283791, %v3242_v31 }
 0x403   :  { %10339 = vst [vmem:[#allocation96_spill] sm:$0xff] %v7777_v47  ;;  %v3288_v47 = vadd.f32 0.014752088, %v3287_v32  ;;  %v3429_v57 = vmul.f32 %v3428_v22, %v3404_v59  ;;  %v7802_v32 = vmin.f32 %v3472_v18, 16.0  ;;  %v3279_v2 = vadd.f32 0.05243302, %v3278_v20 }
 0x404   :  { %v3459_v35 = vadd.f32 %v4012_v53, %v3458_v9  ;;  %v3264_v9 = vand.u32 2147483647, %v7771_v51 }
 0x405   :  { %v3289_v61 = vmul.f32 %v3288_v47, %v7687_v43  ;;  %v3931_v27 = vclamps-f32 %v3429_v57, 1.0  ;;  %v4014_v41 = vpop.eup %4013  ;;  %v7810_v47 = vmul.f32 0.70710677, %v7668_v38  ;;  %v3467_v57 = vor.u32 1.1754944e-38, %v3466_v54 }
 0x406   :  { %v3256_v0 = vmul.f32 %v4014_v41, %v7771_v51  ;;  %v3474_v45 = vmul.f32 2.1237322e-06, %v7802_v32  ;;  %v3463_v24 = vsel %vm3462_vm10, %v4012_v53, %v3459_v35  ;;  %v3485_v42 = vmul.f32 3.8918573e-05, %v7802_v32 }
 0x407   :  { %v3290_v21 = vadd.f32 0.112945676, %v3289_v61  ;;  %v3658_v19 = vadd.f32 1.0, %v3931_v27  ;;  %v3468_v18 = vsel %vm7805_vm9, %v3467_v57, %v3463_v24  ;;  %v3266_v61 = vand.u32 2147483648, %v7771_v51 }
 0x408   :  { %v7800_v37 = vpop.permute.xlu2 %1878  ;;  %v3257_v22 = vsub.f32 1.0, %v3256_v0  ;;  %v3512_v27 = vmul.f32 %v7810_v47, %v7810_v47  ;;  %v3469_v31 = vmul.f32 %v3468_v18, %v3444_v5  ;;  %vm3261_vm11 = vweird.f32 %v4014_v41 }
 0x409   :  { %v3291_v59 = vmul.f32 %v3290_v21, %v7687_v43  ;;  %v3690_v23 = vmul.f32 %v3658_v19, %v2314_v48  ;;  %v2315_v48 = vmul.f32 0.5, %v7532_v10  ;;  %v3280_v53 = vmul.f32 %v3279_v2, %v7687_v43  ;;  %vm3262_vm13 = vmor %vm3260_vm12, %vm3261_vm11 }
 0x40a   :  { %v3258_v20 = vmul.f32 %v4014_v41, %v3257_v22  ;;  %v3475_v26 = vadd.f32 0.00028619796, %v3474_v45  ;;  %v3932_v19 = vclamps-f32 %v3469_v31, 1.0  ;;  %v3486_v0 = vadd.f32 0.001143296, %v3485_v42  ;;  %v7835_v22 = vpop.permute.xlu0 %2095 }
 0x40b   :  { %v3292_v54 = vadd.f32 0.4994258, %v3291_v59  ;;  %3804 = vmatpush.msrb.mxu2 %v3690_v23  ;;  %v1945_v5 = vmul.f32 %v7297_v28, %v7566_v60  ;;  %v3267_v59 = vor.u32 1.1754944e-38, %v3266_v61  ;;  %v7832_v10 = vmin.f32 %v3512_v27, 16.0 }
 0x40c   :  { %v3259_v35 = vadd.f32 %v4014_v41, %v3258_v20  ;;  %v3659_v2 = vadd.f32 1.0, %v3932_v19  ;;  %v3244_v24 = vmul.f32 %v3243_v46, %v7607_v14  ;;  %vm3265_vm14 = vcmp.eq.f32.partialorder %v3264_v9, 8.507059e+37  ;;  %v10342_v14 = vld [vmem:[#allocation16_spill] sm:$0xff]  ;;  %v10343_v9 = vld [vmem:[#allocation66_spill] sm:$0xff] }
 0x40d   :  { %v3293_v21 = vmul.f32 %v3292_v54, %v7687_v43  ;;  %v3281_v18 = vadd.f32 0.18741608, %v3280_v53  ;;  %v3476_v42 = vmul.f32 %v3475_v26, %v7802_v32  ;;  %v1904_v60 = vsel %vm1894_vm7, %v10333_v55, %v7665_v17  ;;  %v10344_v55 = vld [vmem:[#allocation154_spill] sm:$0xff] }
 0x40e   :  { %v3263_v45 = vsel %vm3262_vm13, %v4014_v41, %v3259_v35  ;;  %v3691_v61 = vmul.f32 %v3659_v2, %v2315_v48  ;;  %v3487_v27 = vmul.f32 %v3486_v0, %v7802_v32  ;;  %v1949_v41 = vmul.f32 %v7297_v28, %v10342_v14  ;;  %v10345_v48 = vld [vmem:[#allocation52_spill] sm:$0xff] }
 0x40f   :  { %v7830_v23 = vadd.f32 1.0, %v3293_v21  ;;  %v3268_v51 = vsel %vm3265_vm14, %v3267_v59, %v3263_v45  ;;  %v7848_v46 = vmul.f32 %v7287_v36, %v7755_v44  ;;  %v1920_v31 = vsel %vm1894_vm7, %v7663_v62, %v10334_v56  ;;  %v7867_v44 = vpop.permute.xlu1 %2097 }
 0x410   :  { %v7826_v57 = vpop.permute.xlu2 %2083  ;;  %v3269_v54 = vmul.f32 %v3268_v51, %v3244_v24  ;;  %v3514_v20 = vmul.f32 2.1237322e-06, %v7832_v10  ;;  %v7857_v17 = vmul.f32 %v10344_v55, %v10343_v9  ;;  %v7861_v53 = vmul.f32 %v10345_v48, %v7731_v52  ;;  %3833 = vmatpush.msrb.mxu3 %v3691_v61 }
 0x411   :  { %4015 = vrcp.f32 %v7830_v23  ;;  %v7865_v21 = vmul.f32 %v10345_v48, %v7774_v49  ;;  %v7870_v62 = vmul.f32 %v10345_v48, %v1945_v5  ;;  %v1936_v56 = vmul.f32 %v7303_v63, %v1904_v60 }
 0x412   :  { %v3927_v26 = vclamps-f32 %v3269_v54, 1.0  ;;  %v3282_v19 = vmul.f32 %v3281_v18, %v7687_v43  ;;  %v3477_v35 = vadd.f32 0.0036580483, %v3476_v42  ;;  %v7875_v0 = vmul.f32 %v10336_v39, %v1920_v31  ;;  %v7906_v9 = vpop.permute.xlu0 %2205 }
 0x413   :  { %v2310_v52 = vmul.f32 0.5, %v7592_v34  ;;  %v3488_v2 = vadd.f32 0.014752088, %v3487_v27  ;;  %v3515_v5 = vadd.f32 0.00028619796, %v3514_v20  ;;  %v2151_v43 = vsel %vm2123_vm8, %v7634_v29, %v7599_v50  ;;  %10349 = vst [vmem:[#allocation59_spill] sm:$0xff] %v7906_v9 }
 0x414   :  { %10346 = vst [vmem:[#allocation86_spill] sm:$0xff] %v7875_v0  ;;  %v3654_v59 = vadd.f32 1.0, %v3927_v26  ;;  %v3525_v51 = vmul.f32 3.8918573e-05, %v7832_v10  ;;  %v7885_v60 = vmul.f32 0.70710677, %v7798_v1  ;;  %v7896_v61 = vmul.f32 %v7637_v16, %v1949_v41 }
 0x415   :  { %v7892_v18 = vmul.f32 0.5, %v7629_v4  ;;  %v7900_v54 = vmul.f32 %v7637_v16, %v7745_v40  ;;  %v3283_v27 = vadd.f32 1.1283791, %v3282_v19  ;;  %v3478_v14 = vmul.f32 %v3477_v35, %v7802_v32  ;;  %v10350_v19 = vld [vmem:[#allocation20_spill] sm:$0xff]  ;;  %v10351_v35 = vld [vmem:[#allocation6_spill] sm:$0xff] }
 0x416   :  { %v3686_v34 = vmul.f32 %v3654_v59, %v2310_v52  ;;  %vm3300_vm15 = vweird.f32 %v7830_v23  ;;  %v3306_v20 = vand.u32 2147483648, %v7830_v23  ;;  %v3489_v4 = vmul.f32 %v3488_v2, %v7802_v32 }
 0x417   :  { %v4016_v24 = vpop.eup %4015  ;;  %v3304_v41 = vand.u32 2147483647, %v7830_v23  ;;  %v3516_v48 = vmul.f32 %v3515_v5, %v7832_v10  ;;  %v3526_v26 = vadd.f32 0.001143296, %v3525_v51  ;;  %v3312_v16 = vmul.f32 %v7885_v60, %v7885_v60  ;;  %v7923_v5 = vpop.permute.xlu1 %2209 }
 0x418   :  { %v7878_v49 = vpop.permute.xlu2 %1968  ;;  %v3296_v42 = vmul.f32 %v4016_v24, %v7830_v23  ;;  %3805 = vmatpush.msrb.mxu2 %v3686_v34  ;;  %vm3301_vm0 = vweird.f32 %v4016_v24  ;;  %v7914_v52 = vadd.f32 %v10351_v35, %v10350_v19  ;;  %v3479_v59 = vadd.f32 0.05243302, %v3478_v14 }
 0x419   :  { %10347 = vst [vmem:[#allocation151_spill] sm:$0xff] %v7878_v49  ;;  %v7881_v45 = vmul.f32 %v7878_v49, %v1936_v56  ;;  %v3490_v56 = vadd.f32 0.112945676, %v3489_v4  ;;  %v3527_v2 = vmul.f32 %v3526_v26, %v7832_v10  ;;  %v7917_v34 = vmin.f32 %v3312_v16, 16.0  ;;  %vm3302_vm1 = vmor %vm3300_vm15, %vm3301_vm0 }
 0x41a   :  { %v3297_v31 = vsub.f32 1.0, %v3296_v42  ;;  %v10352_v42 = vld [vmem:[#allocation128_spill] sm:$0xff]  ;;  %v3307_v49 = vor.u32 1.1754944e-38, %v3306_v20  ;;  %v3517_v4 = vadd.f32 0.0036580483, %v3516_v48  ;;  %v3284_v50 = vmul.f32 %v3283_v27, %v7650_v7 }
 0x41b   :  { %10348 = vst [vmem:[#allocation46_spill] sm:$0xff] %v7881_v45  ;;  %v10353_v45 = vld [vmem:[#allocation160_spill] sm:$0xff]  ;;  %v3528_v14 = vadd.f32 0.014752088, %v3527_v2  ;;  %v3314_v26 = vmul.f32 2.1237322e-06, %v7917_v34  ;;  %v2175_v23 = vmul.f32 %v7287_v36, %v2151_v43 }
 0x41c   :  { %v3298_v40 = vmul.f32 %v4016_v24, %v3297_v31  ;;  %v7921_v0 = vadd.f32 %v10353_v45, %v10352_v42  ;;  %v3491_v31 = vmul.f32 %v3490_v56, %v7802_v32  ;;  %v3325_v16 = vmul.f32 3.8918573e-05, %v7917_v34  ;;  %v10354_v42 = vld [vmem:[#allocation55_spill] sm:$0xff] }
 0x41d   :  { %vm3305_vm2 = vcmp.eq.f32.partialorder %v3304_v41, 8.507059e+37  ;;  %v7932_v35 = vmul.f32 0.70710677, %v7914_v52  ;;  %v3529_v48 = vmul.f32 %v3528_v14, %v7832_v10  ;;  %v3315_v7 = vadd.f32 0.00028619796, %v3314_v26  ;;  %v7949_v14 = vpop.permute.xlu0 %2093 }
 0x41e   :  { %v3299_v51 = vadd.f32 %v4016_v24, %v3298_v40  ;;  %v3492_v45 = vadd.f32 0.4994258, %v3491_v31  ;;  %v3480_v40 = vmul.f32 %v3479_v59, %v7802_v32  ;;  %v3326_v2 = vadd.f32 0.001143296, %v3325_v16 }
 0x41f   :  { %v3518_v41 = vmul.f32 %v3517_v4, %v7832_v10  ;;  %v3316_v43 = vmul.f32 %v3315_v7, %v7917_v34  ;;  %v7952_v26 = vmul.f32 0.5, %v7655_v25  ;;  %v1921_v25 = vsel %vm1894_vm7, %v7670_v6, %v10329_v58 }
 0x420   :  { %v3303_v19 = vsel %vm3302_vm1, %v4016_v24, %v3299_v51  ;;  %v3493_v56 = vmul.f32 %v3492_v45, %v7802_v32  ;;  %v2145_v24 = vsel %vm2123_vm8, %v10354_v42, %v7717_v30  ;;  %v3530_v51 = vadd.f32 0.112945676, %v3529_v48  ;;  %v10355_v42 = vld [vmem:[#allocation47_spill] sm:$0xff] }
 0x421   :  { %v3308_v20 = vsel %vm3305_vm2, %v3307_v49, %v3303_v19  ;;  %v3352_v49 = vmul.f32 %v7932_v35, %v7932_v35  ;;  %v3481_v16 = vadd.f32 0.18741608, %v3480_v40  ;;  %v7958_v19 = vmul.f32 %v7906_v9, %v2175_v23 }
 0x422   :  { %v3309_v27 = vmul.f32 %v3308_v20, %v3284_v50  ;;  %v7945_v31 = vadd.f32 1.0, %v3493_v56  ;;  %v3327_v50 = vmul.f32 %v3326_v2, %v7917_v34  ;;  %v3531_v30 = vmul.f32 %v3530_v51, %v7832_v10 }
 0x423   :  { %v7955_v4 = vmin.f32 %v3352_v49, 16.0  ;;  %v2127_v45 = vsel %vm2123_vm8, %v7867_v44, %v7634_v29  ;;  %v2180_v40 = vmul.f32 %v7484_v15, %v2145_v24  ;;  %v3519_v48 = vadd.f32 0.05243302, %v3518_v41 }
 0x424   :  { %v3928_v59 = vclamps-f32 %v3309_v27, 1.0  ;;  %4017 = vrcp.f32 %v7945_v31  ;;  %v3532_v7 = vadd.f32 0.4994258, %v3531_v30  ;;  %v7970_v27 = vpop.permute.xlu1 %2063  ;;  %v3317_v56 = vadd.f32 0.0036580483, %v3316_v43  ;;  %v10358_v43 = vld [vmem:[#allocation72_spill] sm:$0xff] }
 0x425   :  { %v3328_v2 = vadd.f32 0.014752088, %v3327_v50  ;;  %v3354_v29 = vmul.f32 2.1237322e-06, %v7955_v4  ;;  %v7976_v51 = vmul.f32 %v7297_v28, %v10355_v42  ;;  %v2174_v49 = vmul.f32 %v10344_v55, %v2127_v45  ;;  %v10359_v30 = vld [vmem:[#allocation73_spill] sm:$0xff] }
 0x426   :  { %v3655_v20 = vadd.f32 1.0, %v3928_v59  ;;  %v3482_v6 = vmul.f32 %v3481_v16, %v7802_v32  ;;  %v3533_v58 = vmul.f32 %v3532_v7, %v7832_v10  ;;  %v10357_v59 = vld [vmem:[#allocation136_spill] sm:$0xff]  ;;  %v1942_v42 = vmul.f32 %v10336_v39, %v1921_v25 }
 0x427   :  { %10356 = vst [vmem:[#allocation104_spill] sm:$0xff] %v7976_v51  ;;  %v3329_v24 = vmul.f32 %v3328_v2, %v7917_v34  ;;  %v3355_v41 = vadd.f32 0.00028619796, %v3354_v29  ;;  %v7985_v50 = vadd.f32 %v10358_v43, %v10357_v59  ;;  %v3520_v45 = vmul.f32 %v3519_v48, %v7832_v10  ;;  %v10360_v48 = vld [vmem:[#allocation3_spill] sm:$0xff] }
 0x428   :  { %v3687_v23 = vmul.f32 %v3655_v20, %v7892_v18  ;;  %v3365_v18 = vmul.f32 3.8918573e-05, %v7955_v4  ;;  %v1941_v20 = vmul.f32 %v7297_v28, %v10359_v30  ;;  %v7991_v32 = vadd.f32 1.0, %v3533_v58 }
 0x429   :  { %v7994_v7 = vmul.f32 %v7555_v33, %v2180_v40  ;;  %v3330_v2 = vadd.f32 0.112945676, %v3329_v24  ;;  %v7998_v59 = vmul.f32 %v7906_v9, %v2174_v49  ;;  %v3356_v25 = vmul.f32 %v3355_v41, %v7955_v4  ;;  %v8011_v24 = vpop.permute.xlu0 %2201 }
 0x42a   :  { %3834 = vmatpush.msrb.mxu3 %v3687_v23  ;;  %v4018_v16 = vpop.eup %4017  ;;  %v3318_v23 = vmul.f32 %v3317_v56, %v7917_v34  ;;  %v3366_v29 = vadd.f32 0.001143296, %v3365_v18  ;;  %4019 = vrcp.f32 %v7991_v32  ;;  %v8005_v58 = vmul.f32 %v7768_v3, %v10360_v48  ;;  %10363 = vst [vmem:[#allocation120_spill] sm:$0xff] %v8011_v24 }
 0x42b   :  { %v3496_v43 = vmul.f32 %v4018_v16, %v7945_v31  ;;  %v8008_v33 = vmul.f32 %v7768_v3, %v1941_v20  ;;  %v3483_v40 = vadd.f32 1.1283791, %v3482_v6  ;;  %v3331_v56 = vmul.f32 %v3330_v2, %v7917_v34 }
 0x42c   :  { %10361 = vst [vmem:[#allocation111_spill] sm:$0xff] %v8005_v58  ;;  %v3504_v18 = vand.u32 2147483647, %v7945_v31  ;;  %v3521_v30 = vadd.f32 0.18741608, %v3520_v45  ;;  %v3367_v9 = vmul.f32 %v3366_v29, %v7955_v4  ;;  %v8016_v41 = vmul.f32 %v7768_v3, %v1942_v42  ;;  %v2112_v2 = vpop.permute.xlu1 %2111 }
 0x42d   :  { %10362 = vst [vmem:[#allocation95_spill] sm:$0xff] %v8008_v33  ;;  %v3497_v49 = vsub.f32 1.0, %v3496_v43  ;;  %v3506_v48 = vand.u32 2147483648, %v7945_v31  ;;  %v3319_v58 = vadd.f32 0.05243302, %v3318_v23  ;;  %vm3501_vm3 = vweird.f32 %v4018_v16  ;;  %v10364_v43 = vld [vmem:[#allocation75_spill] sm:$0xff] }
 0x42e   :  { %v3332_v28 = vadd.f32 0.4994258, %v3331_v56  ;;  %v3357_v6 = vadd.f32 0.0036580483, %v3356_v25  ;;  %v3368_v33 = vadd.f32 0.014752088, %v3367_v9  ;;  %v3484_v51 = vmul.f32 %v3483_v40, %v7783_v11 }
 0x42f   :  { %v3498_v20 = vmul.f32 %v4018_v16, %v3497_v49  ;;  %vm3500_vm4 = vweird.f32 %v7945_v31  ;;  %v8024_v29 = vadd.f32 %v7865_v21, %v10364_v43  ;;  %vm3505_vm5 = vcmp.eq.f32.partialorder %v3504_v18, 8.507059e+37  ;;  %v10365_v49 = vld [vmem:[#allocation11_spill] sm:$0xff] }
 0x430   :  { %v3333_v45 = vmul.f32 %v3332_v28, %v7917_v34  ;;  %v4020_v3 = vpop.eup %4019  ;;  %v3522_v23 = vmul.f32 %v3521_v30, %v7832_v10  ;;  %v3369_v56 = vmul.f32 %v3368_v33, %v7955_v4  ;;  %vm3502_vm6 = vmor %vm3500_vm4, %vm3501_vm3  ;;  %v3507_v9 = vor.u32 1.1754944e-38, %v3506_v48 }
 0x431   :  { %v3499_v42 = vadd.f32 %v4018_v16, %v3498_v20  ;;  %v3536_v25 = vmul.f32 %v4020_v3, %v7991_v32  ;;  %v3320_v11 = vmul.f32 %v3319_v58, %v7917_v34  ;;  %v3358_v40 = vmul.f32 %v3357_v6, %v7955_v4 }
 0x432   :  { %v8030_v31 = vadd.f32 1.0, %v3333_v45  ;;  %v3370_v21 = vadd.f32 0.112945676, %v3369_v56  ;;  %v8035_v20 = vadd.f32 %v7870_v62, %v10365_v49  ;;  %v8039_v10 = vmul.f32 %v7923_v5, %v7857_v17  ;;  %v8049_v17 = vpop.permute.xlu0 %2091 }
 0x433   :  { %v3503_v28 = vsel %vm3502_vm6, %v4018_v16, %v3499_v42  ;;  %v3537_v18 = vsub.f32 1.0, %v3536_v25  ;;  %v3523_v58 = vadd.f32 1.1283791, %v3522_v23  ;;  %v3544_v48 = vand.u32 2147483647, %v7991_v32  ;;  %v8052_v23 = vpop.permute.xlu2 %2081 }
 0x434   :  { %v3508_v33 = vsel %vm3505_vm5, %v3507_v9, %v3503_v28  ;;  %4021 = vrcp.f32 %v8030_v31  ;;  %v3546_v16 = vand.u32 2147483648, %v7991_v32  ;;  %vm3541_vm9 = vweird.f32 %v4020_v3  ;;  %v10366_v9 = vld [vmem:[#allocation135_spill] sm:$0xff] }
 0x435   :  { %v3509_v30 = vmul.f32 %v3508_v33, %v3484_v51  ;;  %v3538_v6 = vmul.f32 %v4020_v3, %v3537_v18  ;;  %v3321_v45 = vadd.f32 0.18741608, %v3320_v11  ;;  %v3371_v62 = vmul.f32 %v3370_v21, %v7955_v4  ;;  %v8064_v33 = vpop.permute.xlu1 %1862 }
 0x436   :  { %v8047_v43 = vmul.f32 %v7923_v5, %v7848_v46  ;;  %v2317_v56 = vmul.f32 0.5, %v7668_v38  ;;  %v3359_v51 = vadd.f32 0.05243302, %v3358_v40  ;;  %v1919_v25 = vsel %vm1894_vm7, %v7800_v37, %v10366_v9 }
 0x437   :  { %v3933_v42 = vclamps-f32 %v3509_v30, 1.0  ;;  %v3539_v11 = vadd.f32 %v4020_v3, %v3538_v6  ;;  %vm3540_vm10 = vweird.f32 %v7991_v32  ;;  %v3372_v28 = vadd.f32 0.4994258, %v3371_v62 }
 0x438   :  { %v3524_v46 = vmul.f32 %v3523_v58, %v7810_v47  ;;  %vm3542_vm11 = vmor %vm3540_vm10, %vm3541_vm9  ;;  %v3547_v49 = vor.u32 1.1754944e-38, %v3546_v16  ;;  %v8062_v38 = vmul.f32 0.5, %v7798_v1  ;;  %vm3545_vm12 = vcmp.eq.f32.partialorder %v3544_v48, 8.507059e+37 }
 0x439   :  { %v3660_v21 = vadd.f32 1.0, %v3933_v42  ;;  %v3543_v18 = vsel %vm3542_vm11, %v4020_v3, %v3539_v11  ;;  %v3322_v30 = vmul.f32 %v3321_v45, %v7917_v34  ;;  %v3373_v6 = vmul.f32 %v3372_v28, %v7955_v4 }
 0x43a   :  { %v4022_v40 = vpop.eup %4021  ;;  %v3548_v62 = vsel %vm3545_vm12, %v3547_v49, %v3543_v18  ;;  %v3360_v58 = vmul.f32 %v3359_v51, %v7955_v4  ;;  %v8072_v16 = vmul.f32 %v10336_v39, %v1919_v25  ;;  %v2126_v1 = vsel %vm2123_vm8, %v7835_v22, %v2112_v2 }
 0x43b   :  { %v3692_v32 = vmul.f32 %v3660_v21, %v7952_v26  ;;  %v3336_v47 = vmul.f32 %v4022_v40, %v8030_v31  ;;  %v3549_v3 = vmul.f32 %v3548_v62, %v3524_v46  ;;  %v8077_v48 = vadd.f32 1.0, %v3373_v6  ;;  %v10367_v26 = vld [vmem:[#allocation41_spill] sm:$0xff]  ;;  %v8093_v21 = vpop.permute.xlu2 %1964  ;;  %v10368_v46 = vld [vmem:[#allocation147_spill] sm:$0xff]  ;;  %v8104_v6 = vpop.permute.xlu0 %2197 }
 0x43c   :  { %v2150_v34 = vsel %vm2123_vm8, %v2112_v2, %v7970_v27  ;;  %v1903_v45 = vsel %vm1894_vm7, %v10367_v26, %v8064_v33  ;;  %v8088_v39 = vadd.f32 %v7994_v7, %v7921_v0  ;;  %v3323_v9 = vadd.f32 1.1283791, %v3322_v30 }
 0x43d   :  { %3745 = vmatpush.msrb.mxu0 %v3692_v32  ;;  %v3337_v42 = vsub.f32 1.0, %v3336_v47  ;;  %v3934_v51 = vclamps-f32 %v3549_v3, 1.0  ;;  %v3346_v25 = vand.u32 2147483648, %v8030_v31  ;;  %4023 = vrcp.f32 %v8077_v48 }
 0x43e   :  { %vm3341_vm13 = vweird.f32 %v4022_v40  ;;  %v3344_v2 = vand.u32 2147483647, %v8030_v31  ;;  %v3361_v28 = vadd.f32 0.18741608, %v3360_v58  ;;  %v2136_v49 = vsel %vm2123_vm8, %v7826_v57, %v10368_v46  ;;  %v10374_v46 = vld [vmem:[#allocation119_spill] sm:$0xff] }
 0x43f   :  { %v3338_v11 = vmul.f32 %v4022_v40, %v3337_v42  ;;  %v1932_v0 = vmul.f32 %v7303_v63, %v1903_v45  ;;  %v3661_v7 = vadd.f32 1.0, %v3934_v51  ;;  %v8101_v18 = vmul.f32 0.70710677, %v8088_v39 }
 0x440   :  { %v2170_v30 = vmul.f32 %v10344_v55, %v2126_v1  ;;  %v2144_v32 = vsel %vm2123_vm8, %v10338_v8, %v7826_v57  ;;  %vm3340_vm14 = vweird.f32 %v8030_v31  ;;  %v2171_v47 = vmul.f32 %v7287_v36, %v2150_v34  ;;  %v10370_v31 = vld [vmem:[#allocation26_spill] sm:$0xff]  ;;  %v10371_v34 = vld [vmem:[#allocation49_spill] sm:$0xff] }
 0x441   :  { %v3339_v62 = vadd.f32 %v4022_v40, %v3338_v11  ;;  %v3693_v58 = vmul.f32 %v3661_v7, %v2317_v56  ;;  %vm3342_vm15 = vmor %vm3340_vm14, %vm3341_vm13  ;;  %v3347_v63 = vor.u32 1.1754944e-38, %v3346_v25  ;;  %v8114_v3 = vmul.f32 %v8093_v21, %v1932_v0  ;;  %v10373_v25 = vld [vmem:[#allocation43_spill] sm:$0xff] }
 0x442   :  { %v3324_v1 = vmul.f32 %v3323_v9, %v7885_v60  ;;  %vm3345_vm0 = vcmp.eq.f32.partialorder %v3344_v2, 8.507059e+37  ;;  %v3362_v45 = vmul.f32 %v3361_v28, %v7955_v4  ;;  %v3152_v57 = vmul.f32 %v8101_v18, %v8101_v18  ;;  %v10372_v9 = vld [vmem:[#allocation93_spill] sm:$0xff] }
 0x443   :  { %10369 = vst [vmem:[#allocation76_spill] sm:$0xff] %v8114_v3  ;;  %v3343_v26 = vsel %vm3342_vm15, %v4022_v40, %v3339_v62  ;;  %v4024_v42 = vpop.eup %4023  ;;  %3774 = vmatpush.msrb.mxu1 %v3693_v58  ;;  %v8122_v56 = vadd.f32 %v7896_v61, %v10370_v31  ;;  %v8126_v51 = vadd.f32 %v7900_v54, %v10371_v34  ;;  %v10375_v54 = vld [vmem:[#allocation57_spill] sm:$0xff]  ;;  %v3384_v58 = vand.u32 2147483647, %v8077_v48 }
 0x444   :  { %v3348_v8 = vsel %vm3345_vm0, %v3347_v63, %v3343_v26  ;;  %v8129_v60 = vmul.f32 %v8011_v24, %v2170_v30  ;;  %v3376_v4 = vmul.f32 %v4024_v42, %v8077_v48  ;;  %v8134_v11 = vadd.f32 %v10373_v25, %v10372_v9  ;;  %v2078_v9 = vpop.permute.xlu0 %2077 }
 0x445   :  { %v3349_v40 = vmul.f32 %v3348_v8, %v3324_v1  ;;  %v8137_v2 = vmul.f32 %v8011_v24, %v2171_v47  ;;  %v2176_v61 = vmul.f32 %v7484_v15, %v2144_v32  ;;  %v8140_v28 = vmin.f32 %v3152_v57, 16.0  ;;  %v10376_v57 = vld [vmem:[#allocation70_spill] sm:$0xff] }
 0x446   :  { %v8144_v0 = vadd.f32 %v10375_v54, %v10374_v46  ;;  %v3363_v30 = vadd.f32 1.1283791, %v3362_v45  ;;  %v3377_v62 = vsub.f32 1.0, %v3376_v4  ;;  %v3386_v63 = vand.u32 2147483648, %v8077_v48 }
 0x447   :  { %v3929_v7 = vclamps-f32 %v3349_v40, 1.0  ;;  %v3154_v1 = vmul.f32 2.1237322e-06, %v8140_v28  ;;  %v3165_v47 = vmul.f32 3.8918573e-05, %v8140_v28  ;;  %v8152_v32 = vadd.f32 %v7958_v19, %v8024_v29 }
 0x448   :  { %v3378_v8 = vmul.f32 %v4024_v42, %v3377_v62  ;;  %vm3381_vm1 = vweird.f32 %v4024_v42  ;;  %v8156_v31 = vadd.f32 %v7861_v53, %v10376_v57  ;;  %v2177_v45 = vmul.f32 %v7487_v12, %v2136_v49  ;;  %v2062_v53 = vpop.permute.xlu1 %2061 }
 0x449   :  { %v3656_v26 = vadd.f32 1.0, %v3929_v7  ;;  %v8160_v34 = vmul.f32 %v7923_v5, %v2176_v61  ;;  %v3155_v40 = vadd.f32 0.00028619796, %v3154_v1  ;;  %v3166_v4 = vadd.f32 0.001143296, %v3165_v47  ;;  %v10378_v61 = vld [vmem:[#allocation69_spill] sm:$0xff] }
 0x44a   :  { %10377 = vst [vmem:[#allocation53_spill] sm:$0xff] %v8156_v31  ;;  %v3379_v46 = vadd.f32 %v4024_v42, %v3378_v8  ;;  %vm3380_vm2 = vweird.f32 %v8077_v48  ;;  %v8165_v19 = vmul.f32 0.70710677, %v8152_v32  ;;  %v3387_v29 = vor.u32 1.1754944e-38, %v3386_v63  ;;  %v10379_v7 = vld [vmem:[#allocation108_spill] sm:$0xff] }
 0x44b   :  { %v3688_v25 = vmul.f32 %v3656_v26, %v8062_v38  ;;  %vm3382_vm3 = vmor %vm3380_vm2, %vm3381_vm1  ;;  %v3156_v54 = vmul.f32 %v3155_v40, %v8140_v28  ;;  %v3167_v49 = vmul.f32 %v3166_v4, %v8140_v28  ;;  %v8171_v62 = vadd.f32 %v10379_v7, %v10378_v61  ;;  %v10381_v4 = vld [vmem:[#allocation27_spill] sm:$0xff]  ;;  %v10382_v7 = vld [vmem:[#allocation90_spill] sm:$0xff] }
 0x44c   :  { %v3364_v38 = vmul.f32 %v3363_v30, %v7932_v35  ;;  %v3383_v1 = vsel %vm3382_vm3, %v4024_v42, %v3379_v46  ;;  %vm3385_vm4 = vcmp.eq.f32.partialorder %v3384_v58, 8.507059e+37  ;;  %v2952_v48 = vmul.f32 %v8165_v19, %v8165_v19 }
 0x44d   :  { %10380 = vst [vmem:[#allocation82_spill] sm:$0xff] %v8171_v62  ;;  %3746 = vmatpush.msrb.mxu0 %v3688_v25  ;;  %v2133_v63 = vsel %vm2123_vm8, %v2078_v9, %v7949_v14  ;;  %v3388_v47 = vsel %vm3385_vm4, %v3387_v29, %v3383_v1  ;;  %v3157_v26 = vadd.f32 0.0036580483, %v3156_v54  ;;  %v3168_v8 = vadd.f32 0.014752088, %v3167_v49 }
 0x44e   :  { %v3389_v57 = vmul.f32 %v3388_v47, %v3364_v38  ;;  %v2141_v40 = vsel %vm2123_vm8, %v2062_v53, %v2078_v9  ;;  %v2143_v35 = vsel %vm2123_vm8, %v10381_v4, %v8052_v23  ;;  %v8185_v42 = vmin.f32 %v2952_v48, 16.0  ;;  %v10383_v48 = vld [vmem:[#allocation91_spill] sm:$0xff] }
 0x44f   :  { %v8188_v30 = vmul.f32 %v7923_v5, %v2177_v45  ;;  %v1895_v58 = vsel %vm1894_vm7, %v8064_v33, %v7800_v37  ;;  %v3158_v25 = vmul.f32 %v3157_v26, %v8140_v28  ;;  %v3169_v46 = vmul.f32 %v3168_v8, %v8140_v28 }
 0x450   :  { %v2165_v9 = vmul.f32 %v7487_v12, %v2133_v63  ;;  %v2313_v29 = vmul.f32 0.5, %v7914_v52  ;;  %v3930_v54 = vclamps-f32 %v3389_v57, 1.0  ;;  %v2135_v5 = vsel %vm2123_vm8, %v8052_v23, %v7867_v44  ;;  %v10384_v63 = vld [vmem:[#allocation151_spill] sm:$0xff]  ;;  %v10386_v23 = vld [vmem:[#allocation104_spill] sm:$0xff] }
 0x451   :  { %v2164_v45 = vmul.f32 %v7484_v15, %v2141_v40  ;;  %v2172_v49 = vmul.f32 %v7484_v15, %v2143_v35  ;;  %v3159_v61 = vadd.f32 0.05243302, %v3158_v25  ;;  %v3170_v37 = vadd.f32 0.112945676, %v3169_v46  ;;  %v10389_v35 = vld [vmem:[#allocation86_spill] sm:$0xff]  ;;  %v2110_v46 = vpop.permute.xlu1 %2109 }
 0x452   :  { %v3657_v33 = vadd.f32 1.0, %v3930_v54  ;;  %v8206_v38 = vadd.f32 %v10382_v7, %v7985_v50  ;;  %v8210_v52 = vadd.f32 %v7998_v59, %v8035_v20  ;;  %v2954_v1 = vmul.f32 2.1237322e-06, %v8185_v42  ;;  %v10387_v50 = vld [vmem:[#allocation2_spill] sm:$0xff] }
 0x453   :  { %v8215_v44 = vmul.f32 %v10384_v63, %v10383_v48  ;;  %v8219_v47 = vmul.f32 %v10384_v63, %v10386_v23  ;;  %v3160_v26 = vmul.f32 %v3159_v61, %v8140_v28  ;;  %v3171_v8 = vmul.f32 %v3170_v37, %v8140_v28 }
 0x454   :  { %v1933_v57 = vmul.f32 %v10387_v50, %v1895_v58  ;;  %v3689_v40 = vmul.f32 %v3657_v33, %v2313_v29  ;;  %v2173_v59 = vmul.f32 %v7487_v12, %v2135_v5  ;;  %v8226_v20 = vmul.f32 0.70710677, %v8206_v38  ;;  %v10391_v29 = vld [vmem:[#allocation59_spill] sm:$0xff] }
 0x455   :  { %10385 = vst [vmem:[#allocation42_spill] sm:$0xff] %v8215_v44  ;;  %v8229_v4 = vmul.f32 %v8104_v6, %v2165_v9  ;;  %v8233_v25 = vmul.f32 %v10384_v63, %v10389_v35  ;;  %v3172_v54 = vadd.f32 0.4994258, %v3171_v8  ;;  %v8236_v61 = vmul.f32 0.70710677, %v8210_v52 }
 0x456   :  { %3775 = vmatpush.msrb.mxu1 %v3689_v40  ;;  %v8239_v58 = vmul.f32 %v8104_v6, %v2164_v45  ;;  %v8242_v5 = vmul.f32 %v10391_v29, %v2172_v49  ;;  %v3192_v9 = vmul.f32 %v8226_v20, %v8226_v20  ;;  %v2955_v37 = vadd.f32 0.00028619796, %v2954_v1 }
 0x457   :  { %10388 = vst [vmem:[#allocation54_spill] sm:$0xff] %v8229_v4  ;;  %v3161_v33 = vadd.f32 0.18741608, %v3160_v26  ;;  %v3173_v7 = vmul.f32 %v3172_v54, %v8140_v28  ;;  %v8249_v48 = vadd.f32 %v8039_v10, %v8122_v56  ;;  %v8253_v63 = vadd.f32 %v8047_v43, %v8126_v51 }
 0x458   :  { %10390 = vst [vmem:[#allocation81_spill] sm:$0xff] %v8239_v58  ;;  %v8256_v45 = vmul.f32 %v10391_v29, %v2173_v59  ;;  %v2125_v49 = vsel %vm2123_vm8, %v7949_v14, %v2110_v46  ;;  %v8261_v23 = vmin.f32 %v3192_v9, 16.0  ;;  %v2912_v1 = vmul.f32 %v8236_v61, %v8236_v61  ;;  %v10394_v29 = vld [vmem:[#allocation117_spill] sm:$0xff] }
 0x459   :  { %10392 = vst [vmem:[#allocation144_spill] sm:$0xff] %v8242_v5  ;;  %v2149_v10 = vsel %vm2123_vm8, %v2110_v46, %v2062_v53  ;;  %v8267_v56 = vadd.f32 1.0, %v3173_v7  ;;  %v8270_v43 = vmul.f32 0.70710677, %v8249_v48  ;;  %v2965_v51 = vmul.f32 3.8918573e-05, %v8185_v42 }
 0x45a   :  { %10393 = vst [vmem:[#allocation98_spill] sm:$0xff] %v8256_v45  ;;  %v8274_v26 = vmul.f32 0.5, %v8088_v39  ;;  %v3194_v14 = vmul.f32 2.1237322e-06, %v8261_v23  ;;  %v3205_v8 = vmul.f32 3.8918573e-05, %v8261_v23  ;;  %v2166_v40 = vmul.f32 %v10344_v55, %v2125_v49 }
 0x45b   :  { %v8278_v50 = vmin.f32 %v2912_v1, 16.0  ;;  %v3162_v53 = vmul.f32 %v3161_v33, %v8140_v28  ;;  %4025 = vrcp.f32 %v8267_v56  ;;  %v2956_v59 = vmul.f32 %v2955_v37, %v8185_v42 }
 0x45c   :  { %v8285_v35 = vmul.f32 %v7287_v36, %v2149_v10  ;;  %v3195_v46 = vadd.f32 0.00028619796, %v3194_v14  ;;  %v3206_v39 = vadd.f32 0.001143296, %v3205_v8  ;;  %v3072_v54 = vmul.f32 %v8270_v43, %v8270_v43 }
 0x45d   :  { %v8291_v9 = vmul.f32 %v8093_v21, %v10394_v29  ;;  %v8294_v7 = vmul.f32 0.70710677, %v8253_v63  ;;  %v2914_v28 = vmul.f32 2.1237322e-06, %v8278_v50  ;;  %v2966_v33 = vadd.f32 0.001143296, %v2965_v51 }
 0x45e   :  { %v8298_v37 = vmul.f32 %v8093_v21, %v1933_v57  ;;  %v3196_v49 = vmul.f32 %v3195_v46, %v8261_v23  ;;  %v3207_v1 = vmul.f32 %v3206_v39, %v8261_v23  ;;  %v8302_v10 = vmin.f32 %v3072_v54, 16.0 }
 0x45f   :  { %10395 = vst [vmem:[#allocation50_spill] sm:$0xff] %v8291_v9  ;;  %v3163_v14 = vadd.f32 1.1283791, %v3162_v53  ;;  %v3184_v8 = vand.u32 2147483647, %v8267_v56  ;;  %v3112_v29 = vmul.f32 %v8294_v7, %v8294_v7  ;;  %v8308_v9 = vmul.f32 %v8104_v6, %v2166_v40 }
 0x460   :  { %10396 = vst [vmem:[#allocation80_spill] sm:$0xff] %v8298_v37  ;;  %v2957_v3 = vadd.f32 0.0036580483, %v2956_v59  ;;  %v3197_v51 = vadd.f32 0.0036580483, %v3196_v49  ;;  %v2967_v53 = vmul.f32 %v2966_v33, %v8185_v42  ;;  %vm3180_vm5 = vweird.f32 %v8267_v56 }
 0x461   :  { %10397 = vst [vmem:[#allocation85_spill] sm:$0xff] %v8308_v9  ;;  %v3208_v4 = vadd.f32 0.014752088, %v3207_v1  ;;  %v3074_v57 = vmul.f32 2.1237322e-06, %v8302_v10  ;;  %v4026_v58 = vpop.eup %4025  ;;  %v8312_v39 = vmin.f32 %v3112_v29, 16.0  ;;  %v3164_v49 = vmul.f32 %v3163_v14, %v8101_v18 }
 0x462   :  { %v3085_v46 = vmul.f32 3.8918573e-05, %v8302_v10  ;;  %v2915_v54 = vadd.f32 0.00028619796, %v2914_v28  ;;  %v3176_v44 = vmul.f32 %v4026_v58, %v8267_v56  ;;  %v3198_v24 = vmul.f32 %v3197_v51, %v8261_v23 }
 0x463   :  { %v3209_v59 = vmul.f32 %v3208_v4, %v8261_v23  ;;  %v2925_v40 = vmul.f32 3.8918573e-05, %v8278_v50  ;;  %v3075_v1 = vadd.f32 0.00028619796, %v3074_v57  ;;  %v3114_v37 = vmul.f32 2.1237322e-06, %v8312_v39 }
 0x464   :  { %v3086_v15 = vadd.f32 0.001143296, %v3085_v46  ;;  %v3177_v9 = vsub.f32 1.0, %v3176_v44  ;;  %v3186_v29 = vand.u32 2147483648, %v8267_v56  ;;  %v3199_v28 = vadd.f32 0.05243302, %v3198_v24 }
 0x465   :  { %v3210_v45 = vadd.f32 0.112945676, %v3209_v59  ;;  %v3076_v33 = vmul.f32 %v3075_v1, %v8302_v10  ;;  %v3115_v51 = vadd.f32 0.00028619796, %v3114_v37  ;;  %v3125_v4 = vmul.f32 3.8918573e-05, %v8312_v39  ;;  %v8330_v37 = vpop.permute.xlu1 %2059 }
 0x466   :  { %v3087_v62 = vmul.f32 %v3086_v15, %v8302_v10  ;;  %v3178_v5 = vmul.f32 %v4026_v58, %v3177_v9  ;;  %vm3181_vm7 = vweird.f32 %v4026_v58  ;;  %v3200_v18 = vmul.f32 %v3199_v28, %v8261_v23 }
 0x467   :  { %v3211_v14 = vmul.f32 %v3210_v45, %v8261_v23  ;;  %v3077_v57 = vadd.f32 0.0036580483, %v3076_v33  ;;  %v3116_v44 = vmul.f32 %v3115_v51, %v8312_v39  ;;  %v2916_v24 = vmul.f32 %v2915_v54, %v8278_v50  ;;  %vm3182_vm9 = vmor %vm3180_vm5, %vm3181_vm7 }
 0x468   :  { %v3088_v46 = vadd.f32 0.014752088, %v3087_v62  ;;  %v3179_v59 = vadd.f32 %v4026_v58, %v3178_v5  ;;  %vm3185_vm6 = vcmp.eq.f32.partialorder %v3184_v8, 8.507059e+37  ;;  %v3187_v9 = vor.u32 1.1754944e-38, %v3186_v29 }
 0x469   :  { %v3212_v15 = vadd.f32 0.4994258, %v3211_v14  ;;  %v3078_v1 = vmul.f32 %v3077_v57, %v8302_v10  ;;  %v3126_v45 = vadd.f32 0.001143296, %v3125_v4  ;;  %v3201_v62 = vadd.f32 0.18741608, %v3200_v18 }
 0x46a   :  { %v3089_v28 = vmul.f32 %v3088_v46, %v8302_v10  ;;  %v3183_v33 = vsel %vm3182_vm9, %v4026_v58, %v3179_v59  ;;  %v2926_v31 = vadd.f32 0.001143296, %v2925_v40  ;;  %v3117_v12 = vadd.f32 0.0036580483, %v3116_v44 }
 0x46b   :  { %v3213_v51 = vmul.f32 %v3212_v15, %v8261_v23  ;;  %v3188_v54 = vsel %vm3185_vm6, %v3187_v9, %v3183_v33  ;;  %v2917_v56 = vadd.f32 0.0036580483, %v2916_v24  ;;  %v8337_v8 = vmul.f32 %v8104_v6, %v8285_v35 }
 0x46c   :  { %v3090_v5 = vadd.f32 0.112945676, %v3089_v28  ;;  %v3189_v14 = vmul.f32 %v3188_v54, %v3164_v49  ;;  %v3079_v57 = vadd.f32 0.05243302, %v3078_v1  ;;  %v3118_v58 = vmul.f32 %v3117_v12, %v8312_v39 }
 0x46d   :  { %v8339_v29 = vadd.f32 1.0, %v3213_v51  ;;  %v3127_v4 = vmul.f32 %v3126_v45, %v8312_v39  ;;  %v2958_v40 = vmul.f32 %v2957_v3, %v8185_v42  ;;  %v3202_v44 = vmul.f32 %v3201_v62, %v8261_v23  ;;  %v8367_v33 = vpop.permute.xlu1 %2107 }
 0x46e   :  { %v3091_v46 = vmul.f32 %v3090_v5, %v8302_v10  ;;  %v3925_v18 = vclamps-f32 %v3189_v14, 1.0  ;;  %v2968_v24 = vadd.f32 0.014752088, %v2967_v53  ;;  %v8348_v6 = vmul.f32 0.5, %v8206_v38 }
 0x46f   :  { %4027 = vrcp.f32 %v8339_v29  ;;  %v2918_v35 = vmul.f32 %v2917_v56, %v8278_v50  ;;  %v2927_v49 = vmul.f32 %v2926_v31, %v8278_v50  ;;  %v8353_v59 = vmul.f32 0.5, %v8152_v32 }
 0x470   :  { %v3652_v12 = vadd.f32 1.0, %v3925_v18  ;;  %v3080_v15 = vmul.f32 %v3079_v57, %v8302_v10  ;;  %v3092_v3 = vadd.f32 0.4994258, %v3091_v46  ;;  %v8358_v23 = vadd.f32 %v8188_v30, %v8144_v0 }
 0x471   :  { %v8362_v53 = vmul.f32 %v8093_v21, %v8072_v16  ;;  %v3119_v38 = vadd.f32 0.05243302, %v3118_v58  ;;  %v3128_v9 = vadd.f32 0.014752088, %v3127_v4  ;;  %v2959_v1 = vadd.f32 0.05243302, %v2958_v40 }
 0x472   :  { %v3684_v31 = vmul.f32 %v3652_v12, %v8274_v26  ;;  %v3203_v28 = vadd.f32 1.1283791, %v3202_v44  ;;  %v3093_v32 = vmul.f32 %v3092_v3, %v8302_v10  ;;  %v2969_v45 = vmul.f32 %v2968_v24, %v8185_v42 }
 0x473   :  { %v8370_v62 = vmul.f32 0.5, %v8249_v48  ;;  %v3129_v0 = vmul.f32 %v3128_v9, %v8312_v39  ;;  %v8374_v16 = vmul.f32 0.5, %v8210_v52  ;;  %v2919_v21 = vadd.f32 0.05243302, %v2918_v35 }
 0x474   :  { %3747 = vmatpush.msrb.mxu0 %v3684_v31  ;;  %v3081_v51 = vadd.f32 0.18741608, %v3080_v15  ;;  %v8376_v26 = vadd.f32 1.0, %v3093_v32  ;;  %v8379_v54 = vmul.f32 0.5, %v8253_v63  ;;  %v2928_v5 = vadd.f32 0.014752088, %v2927_v49 }
 0x475   :  { %v4028_v30 = vpop.eup %4027  ;;  %v3120_v48 = vmul.f32 %v3119_v38, %v8312_v39  ;;  %v3130_v14 = vadd.f32 0.112945676, %v3129_v0  ;;  %v2960_v57 = vmul.f32 %v2959_v1, %v8185_v42  ;;  %v3204_v52 = vmul.f32 %v3203_v28, %v8226_v20 }
 0x476   :  { %v3216_v56 = vmul.f32 %v4028_v30, %v8339_v29  ;;  %v8389_v46 = vsel %vm2123_vm8, %v8049_v17, %v8367_v33  ;;  %4029 = vrcp.f32 %v8376_v26  ;;  %v2970_v63 = vadd.f32 0.112945676, %v2969_v45 }
 0x477   :  { %v3224_v4 = vand.u32 2147483647, %v8339_v29  ;;  %v3131_v40 = vmul.f32 %v3130_v14, %v8312_v39  ;;  %v2920_v18 = vmul.f32 %v2919_v21, %v8278_v50  ;;  %vm3220_vm10 = vweird.f32 %v8339_v29 }
 0x478   :  { %v3217_v58 = vsub.f32 1.0, %v3216_v56  ;;  %v3226_v20 = vand.u32 2147483648, %v8339_v29  ;;  %v3082_v44 = vmul.f32 %v3081_v51, %v8302_v10  ;;  %v2929_v24 = vmul.f32 %v2928_v5, %v8278_v50 }
 0x479   :  { %vm3221_vm11 = vweird.f32 %v4028_v30  ;;  %v3121_v49 = vadd.f32 0.18741608, %v3120_v48  ;;  %v3132_v12 = vadd.f32 0.4994258, %v3131_v40  ;;  %v2961_v3 = vadd.f32 0.18741608, %v2960_v57 }
 0x47a   :  { %v3218_v35 = vmul.f32 %v4028_v30, %v3217_v58  ;;  %v2930_v15 = vadd.f32 0.112945676, %v2929_v24  ;;  %v2971_v38 = vmul.f32 %v2970_v63, %v8185_v42  ;;  %v8402_v9 = vadd.f32 %v8160_v34, %v8134_v11  ;;  %vm3222_vm13 = vmor %vm3220_vm10, %vm3221_vm11 }
 0x47b   :  { %vm3225_vm12 = vcmp.eq.f32.partialorder %v3224_v4, 8.507059e+37  ;;  %v3133_v31 = vmul.f32 %v3132_v12, %v8312_v39  ;;  %v2921_v28 = vadd.f32 0.18741608, %v2920_v18  ;;  %v3227_v32 = vor.u32 1.1754944e-38, %v3226_v20 }
 0x47c   :  { %v3219_v1 = vadd.f32 %v4028_v30, %v3218_v35  ;;  %v4030_v10 = vpop.eup %4029  ;;  %v3083_v45 = vadd.f32 1.1283791, %v3082_v44  ;;  %v2931_v0 = vmul.f32 %v2930_v15, %v8278_v50  ;;  %v2972_v21 = vadd.f32 0.4994258, %v2971_v38 }
 0x47d   :  { %v3096_v5 = vmul.f32 %v4030_v10, %v8376_v26  ;;  %v3122_v11 = vmul.f32 %v3121_v49, %v8312_v39  ;;  %v8410_v34 = vadd.f32 1.0, %v3133_v31  ;;  %v2962_v14 = vmul.f32 %v2961_v3, %v8185_v42 }
 0x47e   :  { %v3223_v51 = vsel %vm3222_vm13, %v4028_v30, %v3219_v1  ;;  %v2932_v48 = vadd.f32 0.4994258, %v2931_v0  ;;  %v2973_v57 = vmul.f32 %v2972_v21, %v8185_v42  ;;  %v2922_v58 = vmul.f32 %v2921_v28, %v8278_v50 }
 0x47f   :  { %v3228_v56 = vsel %vm3225_vm12, %v3227_v32, %v3223_v51  ;;  %v3097_v63 = vsub.f32 1.0, %v3096_v5  ;;  %4031 = vrcp.f32 %v8410_v34  ;;  %v3104_v30 = vand.u32 2147483647, %v8376_v26 }
 0x480   :  { %v3229_v29 = vmul.f32 %v3228_v56, %v3204_v52  ;;  %v3106_v4 = vand.u32 2147483648, %v8376_v26  ;;  %v2933_v39 = vmul.f32 %v2932_v48, %v8278_v50  ;;  %v8419_v40 = vadd.f32 1.0, %v2973_v57 }
 0x481   :  { %v3098_v20 = vmul.f32 %v4030_v10, %v3097_v63  ;;  %vm3101_vm14 = vweird.f32 %v4030_v10  ;;  %v3123_v44 = vadd.f32 1.1283791, %v3122_v11  ;;  %v3084_v42 = vmul.f32 %v3083_v45, %v8270_v43 }
 0x482   :  { %v3926_v18 = vclamps-f32 %v3229_v29, 1.0  ;;  %v8422_v52 = vadd.f32 1.0, %v2933_v39  ;;  %v2963_v24 = vadd.f32 1.1283791, %v2962_v14  ;;  %4033 = vrcp.f32 %v8419_v40 }
 0x483   :  { %v3099_v49 = vadd.f32 %v4030_v10, %v3098_v20  ;;  %vm3100_vm15 = vweird.f32 %v8376_v26  ;;  %v2923_v12 = vadd.f32 1.1283791, %v2922_v58  ;;  %vm3105_vm1 = vcmp.eq.f32.partialorder %v3104_v30, 8.507059e+37 }
 0x484   :  { %v3653_v35 = vadd.f32 1.0, %v3926_v18  ;;  %vm3102_vm0 = vmor %vm3100_vm15, %vm3101_vm14  ;;  %v3107_v50 = vor.u32 1.1754944e-38, %v3106_v4  ;;  %v3144_v15 = vand.u32 2147483647, %v8410_v34  ;;  %4035 = vrcp.f32 %v8422_v52 }
 0x485   :  { %v4032_v3 = vpop.eup %4031  ;;  %v3103_v38 = vsel %vm3102_vm0, %v4030_v10, %v3099_v49  ;;  %v3124_v1 = vmul.f32 %v3123_v44, %v8294_v7  ;;  %v3146_v31 = vand.u32 2147483648, %v8410_v34  ;;  %v2964_v26 = vmul.f32 %v2963_v24, %v8165_v19 }
 0x486   :  { %v3685_v43 = vmul.f32 %v3653_v35, %v8348_v6  ;;  %v3108_v28 = vsel %vm3105_vm1, %v3107_v50, %v3103_v38  ;;  %v3136_v32 = vmul.f32 %v4032_v3, %v8410_v34  ;;  %v8434_v45 = vmul.f32 0.70710677, %v8402_v9  ;;  %v10404_v38 = vld [vmem:[#allocation133_spill] sm:$0xff] }
 0x487   :  { %v3109_v0 = vmul.f32 %v3108_v28, %v3084_v42  ;;  %vm3140_vm2 = vweird.f32 %v8410_v34  ;;  %v2924_v21 = vmul.f32 %v2923_v12, %v8236_v61  ;;  %v2984_v6 = vand.u32 2147483647, %v8419_v40 }
 0x488   :  { %3776 = vmatpush.msrb.mxu1 %v3685_v43  ;;  %v4034_v10 = vpop.eup %4033  ;;  %v3137_v7 = vsub.f32 1.0, %v3136_v32  ;;  %vm8439_vm3 = vcmp.eq.f32.partialorder %v3144_v15, 8.507059e+37  ;;  %v2944_v5 = vand.u32 2147483647, %v8422_v52  ;;  %v2946_v19 = vand.u32 2147483648, %v8422_v52  ;;  %v10406_v32 = vld [vmem:[#allocation35_spill] sm:$0xff] }
 0x489   :  { %v3923_v11 = vclamps-f32 %v3109_v0, 1.0  ;;  %v3147_v56 = vor.u32 1.1754944e-38, %v3146_v31  ;;  %v2976_v48 = vmul.f32 %v4034_v10, %v8419_v40  ;;  %vm2980_vm4 = vweird.f32 %v8419_v40  ;;  %v10405_v31 = vld [vmem:[#allocation95_spill] sm:$0xff] }
 0x48a   :  { %v4036_v14 = vpop.eup %4035  ;;  %v3138_v61 = vmul.f32 %v4032_v3, %v3137_v7  ;;  %vm3141_vm7 = vweird.f32 %v4032_v3  ;;  %vm2940_vm5 = vweird.f32 %v8422_v52  ;;  %v2986_v57 = vand.u32 2147483648, %v8419_v40 }
 0x48b   :  { %v3650_v29 = vadd.f32 1.0, %v3923_v11  ;;  %v2936_v63 = vmul.f32 %v4036_v14, %v8422_v52  ;;  %v2977_v58 = vsub.f32 1.0, %v2976_v48  ;;  %vm8450_vm6 = vcmp.eq.f32.partialorder %v2984_v6, 8.507059e+37  ;;  %vm3142_vm11 = vmor %vm3140_vm2, %vm3141_vm7 }
 0x48c   :  { %v3139_v4 = vadd.f32 %v4032_v3, %v3138_v61  ;;  %vm8454_vm9 = vcmp.eq.f32.partialorder %v2944_v5, 8.507059e+37  ;;  %v2947_v18 = vor.u32 1.1754944e-38, %v2946_v19  ;;  %vm2981_vm10 = vweird.f32 %v4034_v10 }
 0x48d   :  { %v3682_v20 = vmul.f32 %v3650_v29, %v8370_v62  ;;  %v2937_v44 = vsub.f32 1.0, %v2936_v63  ;;  %v2978_v42 = vmul.f32 %v4034_v10, %v2977_v58  ;;  %v2992_v24 = vmul.f32 %v8434_v45, %v8434_v45  ;;  %vm2982_vm13 = vmor %vm2980_vm4, %vm2981_vm10 }
 0x48e   :  { %v3143_v35 = vsel %vm3142_vm11, %v4032_v3, %v3139_v4  ;;  %vm2941_vm12 = vweird.f32 %v4036_v14  ;;  %v2987_v49 = vor.u32 1.1754944e-38, %v2986_v57  ;;  %v8464_v12 = vmul.f32 0.70710677, %v8358_v23 }
 0x48f   :  { %3806 = vmatpush.msrb.mxu2 %v3682_v20  ;;  %v3148_v50 = vsel %vm8439_vm3, %v3147_v56, %v3143_v35  ;;  %v2938_v15 = vmul.f32 %v4036_v14, %v2937_v44  ;;  %v2979_v62 = vadd.f32 %v4034_v10, %v2978_v42  ;;  %v8468_v43 = vmin.f32 %v2992_v24, 16.0  ;;  %vm2942_vm14 = vmor %vm2940_vm5, %vm2941_vm12 }
 0x490   :  { %v3149_v34 = vmul.f32 %v3148_v50, %v3124_v1  ;;  %v3032_v3 = vmul.f32 %v8464_v12, %v8464_v12  ;;  %v2037_v28 = vadd.f32 %v10405_v31, %v10404_v38  ;;  %v2038_v0 = vadd.f32 %v8016_v41, %v10406_v32 }
 0x491   :  { %v2939_v6 = vadd.f32 %v4036_v14, %v2938_v15  ;;  %v2983_v7 = vsel %vm2982_vm13, %v4034_v10, %v2979_v62  ;;  %v2994_v51 = vmul.f32 2.1237322e-06, %v8468_v43  ;;  %v3005_v5 = vmul.f32 3.8918573e-05, %v8468_v43 }
 0x492   :  { %v3924_v1 = vclamps-f32 %v3149_v34, 1.0  ;;  %v2988_v40 = vsel %vm8450_vm6, %v2987_v49, %v2983_v7  ;;  %v8486_v19 = vmin.f32 %v3032_v3, 16.0  ;;  %v8489_v11 = vadd.f32 %v8129_v60, %v2037_v28 }
 0x493   :  { %v2943_v41 = vsel %vm2942_vm14, %v4036_v14, %v2939_v6  ;;  %v2989_v56 = vmul.f32 %v2988_v40, %v2964_v26  ;;  %v2995_v10 = vadd.f32 0.00028619796, %v2994_v51  ;;  %v3006_v48 = vadd.f32 0.001143296, %v3005_v5  ;;  %v8533_v5 = vpop.permute.xlu2 %2193 }
 0x494   :  { %v3651_v61 = vadd.f32 1.0, %v3924_v1  ;;  %v2948_v57 = vsel %vm8454_vm9, %v2947_v18, %v2943_v41  ;;  %v3034_v29 = vmul.f32 2.1237322e-06, %v8486_v19  ;;  %v3045_v52 = vmul.f32 3.8918573e-05, %v8486_v19  ;;  %v10407_v41 = vld [vmem:[#allocation132_spill] sm:$0xff] }
 0x495   :  { %v2949_v63 = vmul.f32 %v2948_v57, %v2924_v21  ;;  %v3920_v58 = vclamps-f32 %v2989_v56, 1.0  ;;  %v2996_v30 = vmul.f32 %v2995_v10, %v8468_v43  ;;  %v3007_v4 = vmul.f32 %v3006_v48, %v8468_v43 }
 0x496   :  { %v2148_v60 = vsel %vm2123_vm8, %v8367_v33, %v8330_v37  ;;  %v3683_v26 = vmul.f32 %v3651_v61, %v8379_v54  ;;  %v3035_v14 = vadd.f32 0.00028619796, %v3034_v29  ;;  %v3046_v39 = vadd.f32 0.001143296, %v3045_v52  ;;  %v10408_v61 = vld [vmem:[#allocation125_spill] sm:$0xff]  ;;  %v2080_v29 = vpop.permute.xlu1 %2079 }
 0x497   :  { %v3919_v18 = vclamps-f32 %v2949_v63, 1.0  ;;  %v3647_v20 = vadd.f32 1.0, %v3920_v58  ;;  %v2997_v44 = vadd.f32 0.0036580483, %v2996_v30  ;;  %v3008_v42 = vadd.f32 0.014752088, %v3007_v4 }
 0x498   :  { %3835 = vmatpush.msrb.mxu3 %v3683_v26  ;;  %v3036_v21 = vmul.f32 %v3035_v14, %v8486_v19  ;;  %v3047_v24 = vmul.f32 %v3046_v39, %v8486_v19  ;;  %v8505_v35 = vmul.f32 0.70710677, %v8489_v11  ;;  %v8508_v49 = vadd.f32 %v8137_v2, %v2038_v0 }
 0x499   :  { %v3646_v33 = vadd.f32 1.0, %v3919_v18  ;;  %v3679_v54 = vmul.f32 %v3647_v20, %v8353_v59  ;;  %v2998_v50 = vmul.f32 %v2997_v44, %v8468_v43  ;;  %v3009_v15 = vmul.f32 %v3008_v42, %v8468_v43 }
 0x49a   :  { %v2162_v62 = vmul.f32 %v10344_v55, %v8389_v46  ;;  %v3037_v34 = vadd.f32 0.0036580483, %v3036_v21  ;;  %v3048_v3 = vadd.f32 0.014752088, %v3047_v24  ;;  %v2752_v38 = vmul.f32 %v8505_v35, %v8505_v35 }
 0x49b   :  { %v3678_v31 = vmul.f32 %v3646_v33, %v8374_v16  ;;  %3836 = vmatpush.msrb.mxu3 %v3679_v54  ;;  %v2999_v2 = vadd.f32 0.05243302, %v2998_v50  ;;  %v3010_v28 = vadd.f32 0.112945676, %v3009_v15  ;;  %v8519_v32 = vmul.f32 0.70710677, %v8508_v49 }
 0x49c   :  { %v2163_v59 = vmul.f32 %v7287_v36, %v2148_v60  ;;  %v3038_v0 = vmul.f32 %v3037_v34, %v8486_v19  ;;  %v3049_v6 = vmul.f32 %v3048_v3, %v8486_v19  ;;  %v8524_v55 = vmin.f32 %v2752_v38, 16.0  ;;  %v10410_v38 = vld [vmem:[#allocation53_spill] sm:$0xff] }
 0x49d   :  { %3807 = vmatpush.msrb.mxu2 %v3678_v31  ;;  %v8527_v46 = vmul.f32 0.5, %v8402_v9  ;;  %v3000_v16 = vmul.f32 %v2999_v2, %v8468_v43  ;;  %v3011_v7 = vmul.f32 %v3010_v28, %v8468_v43  ;;  %v2792_v51 = vmul.f32 %v8519_v32, %v8519_v32  ;;  %v10411_v31 = vld [vmem:[#allocation144_spill] sm:$0xff] }
 0x49e   :  { %v3039_v36 = vadd.f32 0.05243302, %v3038_v0  ;;  %v3050_v1 = vadd.f32 0.112945676, %v3049_v6  ;;  %v2754_v40 = vmul.f32 2.1237322e-06, %v8524_v55  ;;  %v8538_v56 = vadd.f32 %v8219_v47, %v10407_v41 }
 0x49f   :  { %v3001_v10 = vadd.f32 0.18741608, %v3000_v16  ;;  %v3012_v9 = vadd.f32 0.4994258, %v3011_v7  ;;  %v2765_v48 = vmul.f32 3.8918573e-05, %v8524_v55  ;;  %v8543_v57 = vadd.f32 %v8233_v25, %v10408_v61 }
 0x4a0   :  { %v3040_v52 = vmul.f32 %v3039_v36, %v8486_v19  ;;  %v3051_v63 = vmul.f32 %v3050_v1, %v8486_v19  ;;  %v2755_v58 = vadd.f32 0.00028619796, %v2754_v40  ;;  %v8547_v30 = vmin.f32 %v2792_v51, 16.0  ;;  %v10412_v40 = vld [vmem:[#allocation82_spill] sm:$0xff] }
 0x4a1   :  { %v8550_v4 = vmul.f32 %v8533_v5, %v2162_v62  ;;  %v3002_v47 = vmul.f32 %v3001_v10, %v8468_v43  ;;  %v3013_v60 = vmul.f32 %v3012_v9, %v8468_v43  ;;  %v2766_v26 = vadd.f32 0.001143296, %v2765_v48  ;;  %v10409_v62 = vld [vmem:[#allocation31_spill] sm:$0xff]  ;;  %v10413_v41 = vld [vmem:[#allocation98_spill] sm:$0xff] }
 0x4a2   :  { %v3041_v14 = vadd.f32 0.18741608, %v3040_v52  ;;  %v3052_v39 = vadd.f32 0.4994258, %v3051_v63  ;;  %v2756_v25 = vmul.f32 %v2755_v58, %v8524_v55  ;;  %v2794_v18 = vmul.f32 2.1237322e-06, %v8547_v30 }
 0x4a3   :  { %v2134_v20 = vsel %vm2123_vm8, %v2080_v29, %v7835_v22  ;;  %v8559_v44 = vadd.f32 1.0, %v3013_v60  ;;  %v2767_v42 = vmul.f32 %v2766_v26, %v8524_v55  ;;  %v2805_v21 = vmul.f32 3.8918573e-05, %v8547_v30 }
 0x4a4   :  { %v3042_v24 = vmul.f32 %v3041_v14, %v8486_v19  ;;  %v3053_v43 = vmul.f32 %v3052_v39, %v8486_v19  ;;  %v2757_v33 = vadd.f32 0.0036580483, %v2756_v25  ;;  %v2795_v54 = vadd.f32 0.00028619796, %v2794_v18 }
 0x4a5   :  { %v8566_v50 = vmul.f32 %v8533_v5, %v2163_v59  ;;  %v8571_v15 = vsel %vm2123_vm8, %v7970_v27, %v2080_v29  ;;  %v3003_v22 = vadd.f32 1.1283791, %v3002_v47  ;;  %4037 = vrcp.f32 %v8559_v44 }
 0x4a6   :  { %v8575_v34 = vmul.f32 %v10409_v62, %v2134_v20  ;;  %v8577_v3 = vadd.f32 1.0, %v3053_v43  ;;  %v2758_v19 = vmul.f32 %v2757_v33, %v8524_v55  ;;  %v8582_v2 = vadd.f32 %v10411_v31, %v10410_v38 }
 0x4a7   :  { %v3026_v28 = vand.u32 2147483648, %v8559_v44  ;;  %v2768_v59 = vadd.f32 0.014752088, %v2767_v42  ;;  %v2796_v27 = vmul.f32 %v2795_v54, %v8547_v30  ;;  %v2806_v0 = vadd.f32 0.001143296, %v2805_v21 }
 0x4a8   :  { %v3024_v6 = vand.u32 2147483647, %v8559_v44  ;;  %v8588_v16 = vmul.f32 0.5, %v8358_v23  ;;  %v3043_v7 = vadd.f32 1.1283791, %v3042_v24  ;;  %4039 = vrcp.f32 %v8577_v3 }
 0x4a9   :  { %v3004_v51 = vmul.f32 %v3003_v22, %v8434_v45  ;;  %v2759_v36 = vadd.f32 0.05243302, %v2758_v19  ;;  %v2769_v1 = vmul.f32 %v2768_v59, %v8524_v55  ;;  %v8595_v10 = vadd.f32 %v10413_v41, %v10412_v40 }
 0x4aa   :  { %vm3020_vm15 = vweird.f32 %v8559_v44  ;;  %v2797_v9 = vadd.f32 0.0036580483, %v2796_v27  ;;  %v2807_v48 = vmul.f32 %v2806_v0, %v8547_v30  ;;  %v8600_v23 = vmul.f32 0.70710677, %v8582_v2 }
 0x4ab   :  { %v4038_v61 = vpop.eup %4037  ;;  %v3027_v29 = vor.u32 1.1754944e-38, %v3026_v28  ;;  %v3064_v52 = vand.u32 2147483647, %v8577_v3  ;;  %v2760_v45 = vmul.f32 %v2759_v36, %v8524_v55  ;;  %v2770_v63 = vadd.f32 0.112945676, %v2769_v1 }
 0x4ac   :  { %v3016_v58 = vmul.f32 %v4038_v61, %v8559_v44  ;;  %vm8605_vm0 = vcmp.eq.f32.partialorder %v3024_v6, 8.507059e+37  ;;  %v3044_v60 = vmul.f32 %v3043_v7, %v8464_v12  ;;  %v2798_v26 = vmul.f32 %v2797_v9, %v8547_v30 }
 0x4ad   :  { %v2808_v14 = vadd.f32 0.014752088, %v2807_v48  ;;  %vm3060_vm1 = vweird.f32 %v8577_v3  ;;  %v2761_v39 = vadd.f32 0.18741608, %v2760_v45  ;;  %v2771_v25 = vmul.f32 %v2770_v63, %v8524_v55 }
 0x4ae   :  { %v2832_v18 = vmul.f32 %v8600_v23, %v8600_v23  ;;  %v4040_v20 = vpop.eup %4039  ;;  %v3017_v42 = vsub.f32 1.0, %v3016_v58  ;;  %v3066_v21 = vand.u32 2147483648, %v8577_v3  ;;  %v2799_v24 = vadd.f32 0.05243302, %v2798_v26 }
 0x4af   :  { %v2809_v43 = vmul.f32 %v2808_v14, %v8547_v30  ;;  %vm3021_vm2 = vweird.f32 %v4038_v61  ;;  %v3056_v12 = vmul.f32 %v4040_v20, %v8577_v3  ;;  %vm8618_vm3 = vcmp.eq.f32.partialorder %v3064_v52, 8.507059e+37 }
 0x4b0   :  { %v2772_v54 = vadd.f32 0.4994258, %v2771_v25  ;;  %v3018_v22 = vmul.f32 %v4038_v61, %v3017_v42  ;;  %v2800_v19 = vmul.f32 %v2799_v24, %v8547_v30  ;;  %v8623_v31 = vmin.f32 %v2832_v18, 16.0  ;;  %vm3022_vm4 = vmor %vm3020_vm15, %vm3021_vm2 }
 0x4b1   :  { %v2810_v38 = vadd.f32 0.112945676, %v2809_v43  ;;  %v3057_v28 = vsub.f32 1.0, %v3056_v12  ;;  %v2762_v59 = vmul.f32 %v2761_v39, %v8524_v55  ;;  %v8628_v0 = vmul.f32 0.70710677, %v8595_v10 }
 0x4b2   :  { %v2773_v27 = vmul.f32 %v2772_v54, %v8524_v55  ;;  %v3019_v6 = vadd.f32 %v4038_v61, %v3018_v22  ;;  %v2801_v7 = vadd.f32 0.18741608, %v2800_v19  ;;  %v2834_v1 = vmul.f32 2.1237322e-06, %v8623_v31  ;;  %v10418_v19 = vld [vmem:[#allocation85_spill] sm:$0xff] }
 0x4b3   :  { %v2811_v36 = vmul.f32 %v2810_v38, %v8547_v30  ;;  %v3058_v40 = vmul.f32 %v4040_v20, %v3057_v28  ;;  %vm3061_vm7 = vweird.f32 %v4040_v20  ;;  %v2845_v9 = vmul.f32 3.8918573e-05, %v8623_v31 }
 0x4b4   :  { %v8635_v41 = vadd.f32 1.0, %v2773_v27  ;;  %v3023_v55 = vsel %vm3022_vm4, %v4038_v61, %v3019_v6  ;;  %v2802_v48 = vmul.f32 %v2801_v7, %v8547_v30  ;;  %v2835_v45 = vadd.f32 0.00028619796, %v2834_v1  ;;  %vm3062_vm5 = vmor %vm3060_vm1, %vm3061_vm7  ;;  %v8717_v27 = vpop.permute.xlu1 %2075 }
 0x4b5   :  { %v2812_v52 = vadd.f32 0.4994258, %v2811_v36  ;;  %v3028_v63 = vsel %vm8605_vm0, %v3027_v29, %v3023_v55  ;;  %v3059_v58 = vadd.f32 %v4040_v20, %v3058_v40  ;;  %v3067_v26 = vor.u32 1.1754944e-38, %v3066_v21 }
 0x4b6   :  { %4041 = vrcp.f32 %v8635_v41  ;;  %v3029_v44 = vmul.f32 %v3028_v63, %v3004_v51  ;;  %v2763_v14 = vadd.f32 1.1283791, %v2762_v59  ;;  %v2784_v39 = vand.u32 2147483647, %v8635_v41 }
 0x4b7   :  { %v2872_v61 = vmul.f32 %v8628_v0, %v8628_v0  ;;  %v3063_v25 = vsel %vm3062_vm5, %v4040_v20, %v3059_v58  ;;  %v2813_v18 = vmul.f32 %v2812_v52, %v8547_v30  ;;  %v2836_v47 = vmul.f32 %v2835_v45, %v8623_v31 }
 0x4b8   :  { %v2846_v29 = vadd.f32 0.001143296, %v2845_v9  ;;  %v3921_v42 = vclamps-f32 %v3029_v44, 1.0  ;;  %v3068_v21 = vsel %vm8618_vm3, %v3067_v26, %v3063_v25  ;;  %v2786_v51 = vand.u32 2147483648, %v8635_v41  ;;  %v10422_v25 = vld [vmem:[#allocation80_spill] sm:$0xff] }
 0x4b9   :  { %v2803_v3 = vadd.f32 1.1283791, %v2802_v48  ;;  %v3069_v24 = vmul.f32 %v3068_v21, %v3044_v60  ;;  %v8653_v43 = vmul.f32 0.5, %v8489_v11  ;;  %v8655_v12 = vadd.f32 1.0, %v2813_v18 }
 0x4ba   :  { %v2837_v54 = vadd.f32 0.0036580483, %v2836_v47  ;;  %v3648_v20 = vadd.f32 1.0, %v3921_v42  ;;  %v2847_v30 = vmul.f32 %v2846_v29, %v8623_v31  ;;  %v8658_v22 = vmin.f32 %v2872_v61, 16.0  ;;  %v10421_v61 = vld [vmem:[#allocation45_spill] sm:$0xff] }
 0x4bb   :  { %v8662_v38 = vadd.f32 %v10418_v19, %v8538_v56  ;;  %v3922_v28 = vclamps-f32 %v3069_v24, 1.0  ;;  %v2764_v59 = vmul.f32 %v2763_v14, %v8505_v35  ;;  %vm2780_vm6 = vweird.f32 %v8635_v41 }
 0x4bc   :  { %v4042_v33 = vpop.eup %4041  ;;  %4043 = vrcp.f32 %v8655_v12  ;;  %v3680_v11 = vmul.f32 %v3648_v20, %v8527_v46  ;;  %vm8669_vm9 = vcmp.eq.f32.partialorder %v2784_v39, 8.507059e+37  ;;  %v2787_v6 = vor.u32 1.1754944e-38, %v2786_v51 }
 0x4bd   :  { %v2776_v60 = vmul.f32 %v4042_v33, %v8635_v41  ;;  %v8674_v56 = vmul.f32 %v2803_v3, %v8519_v32  ;;  %v3649_v7 = vadd.f32 1.0, %v3922_v28  ;;  %v2824_v36 = vand.u32 2147483647, %v8655_v12 }
 0x4be   :  { %v2838_v35 = vmul.f32 %v2837_v54, %v8623_v31  ;;  %v2848_v1 = vadd.f32 0.014752088, %v2847_v30  ;;  %3748 = vmatpush.msrb.mxu0 %v3680_v11  ;;  %v2826_v46 = vand.u32 2147483648, %v8655_v12  ;;  %v2874_v9 = vmul.f32 2.1237322e-06, %v8658_v22 }
 0x4bf   :  { %v2777_v40 = vsub.f32 1.0, %v2776_v60  ;;  %v2885_v55 = vmul.f32 3.8918573e-05, %v8658_v22  ;;  %v3681_v48 = vmul.f32 %v3649_v7, %v8588_v16  ;;  %v8684_v45 = vmul.f32 0.70710677, %v8662_v38 }
 0x4c0   :  { %v2839_v52 = vadd.f32 0.05243302, %v2838_v35  ;;  %v2849_v32 = vmul.f32 %v2848_v1, %v8623_v31  ;;  %vm2781_vm10 = vweird.f32 %v4042_v33  ;;  %vm2820_vm11 = vweird.f32 %v8655_v12 }
 0x4c1   :  { %v2778_v63 = vmul.f32 %v4042_v33, %v2777_v40  ;;  %v2875_v58 = vadd.f32 0.00028619796, %v2874_v9  ;;  %v2886_v26 = vadd.f32 0.001143296, %v2885_v55  ;;  %3777 = vmatpush.msrb.mxu1 %v3681_v48  ;;  %v2592_v16 = vmul.f32 %v8684_v45, %v8684_v45  ;;  %vm2782_vm13 = vmor %vm2780_vm6, %vm2781_vm10 }
 0x4c2   :  { %v4044_v44 = vpop.eup %4043  ;;  %v2840_v14 = vmul.f32 %v2839_v52, %v8623_v31  ;;  %v2850_v39 = vadd.f32 0.112945676, %v2849_v32  ;;  %v8692_v18 = vadd.f32 %v10422_v25, %v10421_v61  ;;  %vm8695_vm12 = vcmp.eq.f32.partialorder %v2824_v36, 8.507059e+37 }
 0x4c3   :  { %v2779_v47 = vadd.f32 %v4042_v33, %v2778_v63  ;;  %v2816_v29 = vmul.f32 %v4044_v44, %v8655_v12  ;;  %v2876_v21 = vmul.f32 %v2875_v58, %v8658_v22  ;;  %v2827_v51 = vor.u32 1.1754944e-38, %v2826_v46 }
 0x4c4   :  { %v2851_v3 = vmul.f32 %v2850_v39, %v8623_v31  ;;  %v2887_v24 = vmul.f32 %v2886_v26, %v8658_v22  ;;  %v8704_v54 = vmin.f32 %v2592_v16, 16.0  ;;  %vm2821_vm14 = vweird.f32 %v4044_v44  ;;  %v10425_v39 = vld [vmem:[#allocation40_spill] sm:$0xff] }
 0x4c5   :  { %v2783_v20 = vsel %vm2782_vm13, %v4042_v33, %v2779_v47  ;;  %v2817_v30 = vsub.f32 1.0, %v2816_v29  ;;  %v2877_v19 = vadd.f32 0.0036580483, %v2876_v21  ;;  %v2841_v11 = vadd.f32 0.18741608, %v2840_v14  ;;  %vm2822_vm15 = vmor %vm2820_vm11, %vm2821_vm14 }
 0x4c6   :  { %v2788_v28 = vsel %vm8669_vm9, %v2787_v6, %v2783_v20  ;;  %v2852_v60 = vadd.f32 0.4994258, %v2851_v3  ;;  %v2888_v7 = vadd.f32 0.014752088, %v2887_v24  ;;  %v2594_v1 = vmul.f32 2.1237322e-06, %v8704_v54 }
 0x4c7   :  { %v2789_v36 = vmul.f32 %v2788_v28, %v2764_v59  ;;  %v2818_v41 = vmul.f32 %v4044_v44, %v2817_v30  ;;  %v2878_v35 = vmul.f32 %v2877_v19, %v8658_v22  ;;  %v2605_v33 = vmul.f32 3.8918573e-05, %v8704_v54 }
 0x4c8   :  { %v2853_v40 = vmul.f32 %v2852_v60, %v8623_v31  ;;  %v2889_v46 = vmul.f32 %v2888_v7, %v8658_v22  ;;  %v8715_v9 = vadd.f32 %v8337_v8, %v8543_v57  ;;  %v2595_v48 = vadd.f32 0.00028619796, %v2594_v1 }
 0x4c9   :  { %v3915_v6 = vclamps-f32 %v2789_v36, 1.0  ;;  %v2819_v55 = vadd.f32 %v4044_v44, %v2818_v41  ;;  %v2879_v59 = vadd.f32 0.05243302, %v2878_v35  ;;  %v2842_v52 = vmul.f32 %v2841_v11, %v8623_v31 }
 0x4ca   :  { %v8723_v32 = vadd.f32 1.0, %v2853_v40  ;;  %v2890_v63 = vadd.f32 0.112945676, %v2889_v46  ;;  %v2606_v58 = vadd.f32 0.001143296, %v2605_v33  ;;  %v2596_v57 = vmul.f32 %v2595_v48, %v8704_v54 }
 0x4cb   :  { %v3642_v26 = vadd.f32 1.0, %v3915_v6  ;;  %v2823_v14 = vsel %vm2822_vm15, %v4044_v44, %v2819_v55  ;;  %v2880_v8 = vmul.f32 %v2879_v59, %v8658_v22  ;;  %v8729_v16 = vmul.f32 %v10425_v39, %v8571_v15  ;;  %v10426_v44 = vld [vmem:[#allocation120_spill] sm:$0xff]  ;;  %v10428_v55 = vld [vmem:[#allocation89_spill] sm:$0xff] }
 0x4cc   :  { %v8735_v12 = vsel %vm2123_vm8, %v8717_v27, %v8049_v17  ;;  %v2828_v31 = vsel %vm8695_vm12, %v2827_v51, %v2823_v14  ;;  %4045 = vrcp.f32 %v8723_v32  ;;  %v8742_v61 = vmul.f32 %v10426_v44, %v8575_v34 }
 0x4cd   :  { %v3674_v25 = vmul.f32 %v3642_v26, %v8653_v43  ;;  %v2299_v15 = vmul.f32 0.5, %v8508_v49  ;;  %v2829_v47 = vmul.f32 %v2828_v31, %v8674_v56  ;;  %v2881_v29 = vadd.f32 0.18741608, %v2880_v8 }
 0x4ce   :  { %v2891_v21 = vmul.f32 %v2890_v63, %v8658_v22  ;;  %v2597_v17 = vadd.f32 0.0036580483, %v2596_v57  ;;  %v2607_v3 = vmul.f32 %v2606_v58, %v8704_v54  ;;  %v8750_v51 = vmul.f32 0.5, %v8582_v2  ;;  %v10427_v2 = vld [vmem:[#allocation106_spill] sm:$0xff] }
 0x4cf   :  { %3808 = vmatpush.msrb.mxu2 %v3674_v25  ;;  %v3916_v42 = vclamps-f32 %v2829_v47, 1.0  ;;  %v2843_v24 = vadd.f32 1.1283791, %v2842_v52  ;;  %v8753_v34 = vmul.f32 0.70710677, %v8715_v9  ;;  %v8756_v43 = vmul.f32 0.5, %v8595_v10 }
 0x4d0   :  { %v2892_v49 = vadd.f32 0.4994258, %v2891_v21  ;;  %v2598_v56 = vmul.f32 %v2597_v17, %v8704_v54  ;;  %v2608_v20 = vadd.f32 0.014752088, %v2607_v3  ;;  %v8763_v28 = vadd.f32 %v8550_v4, %v8692_v18 }
 0x4d1   :  { %v3643_v30 = vadd.f32 1.0, %v3916_v42  ;;  %v2632_v19 = vmul.f32 %v8753_v34, %v8753_v34  ;;  %v2030_v11 = vadd.f32 %v8362_v53, %v10427_v2  ;;  %v2882_v7 = vmul.f32 %v2881_v29, %v8658_v22 }
 0x4d2   :  { %v4046_v60 = vpop.eup %4045  ;;  %v2893_v10 = vmul.f32 %v2892_v49, %v8658_v22  ;;  %v2599_v36 = vadd.f32 0.05243302, %v2598_v56  ;;  %v2609_v41 = vmul.f32 %v2608_v20, %v8704_v54  ;;  %v2844_v1 = vmul.f32 %v2843_v24, %v8600_v23  ;;  %v10429_v23 = vld [vmem:[#allocation111_spill] sm:$0xff] }
 0x4d3   :  { %v3675_v35 = vmul.f32 %v3643_v30, %v2299_v15  ;;  %v2856_v40 = vmul.f32 %v4046_v60, %v8723_v32  ;;  %v2864_v46 = vand.u32 2147483647, %v8723_v32  ;;  %v2866_v4 = vand.u32 2147483648, %v8723_v32 }
 0x4d4   :  { %v8774_v18 = vadd.f32 1.0, %v2893_v10  ;;  %v2610_v53 = vadd.f32 0.112945676, %v2609_v41  ;;  %v8776_v33 = vmin.f32 %v2632_v19, 16.0  ;;  %vm2860_vm0 = vweird.f32 %v8723_v32 }
 0x4d5   :  { %3837 = vmatpush.msrb.mxu3 %v3675_v35  ;;  %v2857_v6 = vsub.f32 1.0, %v2856_v40  ;;  %v8780_v22 = vmul.f32 0.70710677, %v8763_v28  ;;  %v8784_v59 = vadd.f32 %v10429_v23, %v10428_v55  ;;  %vm2861_vm1 = vweird.f32 %v4046_v60 }
 0x4d6   :  { %v2883_v48 = vadd.f32 1.1283791, %v2882_v7  ;;  %4047 = vrcp.f32 %v8774_v18  ;;  %v2600_v52 = vmul.f32 %v2599_v36, %v8704_v54  ;;  %v2611_v58 = vmul.f32 %v2610_v53, %v8704_v54  ;;  %vm2862_vm3 = vmor %vm2860_vm0, %vm2861_vm1 }
 0x4d7   :  { %v2858_v63 = vmul.f32 %v4046_v60, %v2857_v6  ;;  %v2634_v26 = vmul.f32 2.1237322e-06, %v8776_v33  ;;  %v8791_v14 = vadd.f32 %v8566_v50, %v2030_v11  ;;  %vm8793_vm2 = vcmp.eq.f32.partialorder %v2864_v46, 8.507059e+37 }
 0x4d8   :  { %v2867_v57 = vor.u32 1.1754944e-38, %v2866_v4  ;;  %v2645_v31 = vmul.f32 3.8918573e-05, %v8776_v33  ;;  %v2432_v25 = vmul.f32 %v8780_v22, %v8780_v22  ;;  %v2904_v47 = vand.u32 2147483647, %v8774_v18 }
 0x4d9   :  { %v2859_v15 = vadd.f32 %v4046_v60, %v2858_v63  ;;  %v2612_v29 = vadd.f32 0.4994258, %v2611_v58  ;;  %v2635_v21 = vadd.f32 0.00028619796, %v2634_v26  ;;  %v2884_v50 = vmul.f32 %v2883_v48, %v8628_v0 }
 0x4da   :  { %v2601_v17 = vadd.f32 0.18741608, %v2600_v52  ;;  %v2646_v3 = vadd.f32 0.001143296, %v2645_v31  ;;  %v8805_v42 = vmin.f32 %v2432_v25, 16.0  ;;  %vm2900_vm4 = vweird.f32 %v8774_v18 }
 0x4db   :  { %v2863_v24 = vsel %vm2862_vm3, %v4046_v60, %v2859_v15  ;;  %v2613_v49 = vmul.f32 %v2612_v29, %v8704_v54  ;;  %v2636_v56 = vmul.f32 %v2635_v21, %v8776_v33  ;;  %v8810_v20 = vmul.f32 0.70710677, %v8791_v14  ;;  %v10434_v21 = vld [vmem:[#allocation94_spill] sm:$0xff] }
 0x4dc   :  { %v4048_v30 = vpop.eup %4047  ;;  %v2868_v19 = vsel %vm8793_vm2, %v2867_v57, %v2863_v24  ;;  %v2647_v32 = vmul.f32 %v2646_v3, %v8776_v33  ;;  %v2434_v0 = vmul.f32 2.1237322e-06, %v8805_v42  ;;  %v2445_v2 = vmul.f32 3.8918573e-05, %v8805_v42 }
 0x4dd   :  { %v2869_v11 = vmul.f32 %v2868_v19, %v2844_v1  ;;  %v2896_v60 = vmul.f32 %v4048_v30, %v8774_v18  ;;  %v2906_v7 = vand.u32 2147483648, %v8774_v18  ;;  %v2602_v10 = vmul.f32 %v2601_v17, %v8704_v54  ;;  %v10435_v17 = vld [vmem:[#allocation96_spill] sm:$0xff]  ;;  %v10437_v19 = vld [vmem:[#allocation42_spill] sm:$0xff] }
 0x4de   :  { %v8821_v36 = vadd.f32 1.0, %v2613_v49  ;;  %v2637_v41 = vadd.f32 0.0036580483, %v2636_v56  ;;  %v2648_v35 = vadd.f32 0.014752088, %v2647_v32  ;;  %vm2901_vm7 = vweird.f32 %v4048_v30  ;;  %v10436_v56 = vld [vmem:[#allocation97_spill] sm:$0xff] }
 0x4df   :  { %v3917_v40 = vclamps-f32 %v2869_v11, 1.0  ;;  %v2897_v46 = vsub.f32 1.0, %v2896_v60  ;;  %v2435_v4 = vadd.f32 0.00028619796, %v2434_v0  ;;  %v2446_v53 = vadd.f32 0.001143296, %v2445_v2  ;;  %vm2902_vm6 = vmor %vm2900_vm4, %vm2901_vm7 }
 0x4e0   :  { %vm8823_vm5 = vcmp.eq.f32.partialorder %v2904_v47, 8.507059e+37  ;;  %4049 = vrcp.f32 %v8821_v36  ;;  %v2472_v1 = vmul.f32 %v8810_v20, %v8810_v20  ;;  %v2638_v23 = vmul.f32 %v2637_v41, %v8776_v33 }
 0x4e1   :  { %v3644_v55 = vadd.f32 1.0, %v3917_v40  ;;  %v2898_v54 = vmul.f32 %v4048_v30, %v2897_v46  ;;  %v2649_v48 = vmul.f32 %v2648_v35, %v8776_v33  ;;  %v2907_v52 = vor.u32 1.1754944e-38, %v2906_v7 }
 0x4e2   :  { %v2603_v63 = vadd.f32 1.1283791, %v2602_v10  ;;  %v2436_v58 = vmul.f32 %v2435_v4, %v8805_v42  ;;  %v2447_v26 = vmul.f32 %v2446_v53, %v8805_v42  ;;  %v2639_v31 = vadd.f32 0.05243302, %v2638_v23  ;;  %v10438_v4 = vld [vmem:[#allocation81_spill] sm:$0xff] }
 0x4e3   :  { %v3676_v8 = vmul.f32 %v3644_v55, %v8750_v51  ;;  %v2899_v57 = vadd.f32 %v4048_v30, %v2898_v54  ;;  %v2650_v25 = vadd.f32 0.112945676, %v2649_v48  ;;  %v8838_v29 = vmin.f32 %v2472_v1, 16.0 }
 0x4e4   :  { %v2437_v15 = vadd.f32 0.0036580483, %v2436_v58  ;;  %v2448_v47 = vadd.f32 0.014752088, %v2447_v26  ;;  %v8842_v3 = vadd.f32 %v10435_v17, %v10434_v21  ;;  %v2640_v49 = vmul.f32 %v2639_v31, %v8776_v33 }
 0x4e5   :  { %3749 = vmatpush.msrb.mxu0 %v3676_v8  ;;  %v2903_v24 = vsel %vm2902_vm6, %v4048_v30, %v2899_v57  ;;  %v2651_v51 = vmul.f32 %v2650_v25, %v8776_v33  ;;  %v2031_v32 = vadd.f32 %v10437_v19, %v10436_v56  ;;  %v2474_v60 = vmul.f32 2.1237322e-06, %v8838_v29 }
 0x4e6   :  { %v4050_v0 = vpop.eup %4049  ;;  %v2908_v18 = vsel %vm8823_vm5, %v2907_v52, %v2903_v24  ;;  %v2438_v2 = vmul.f32 %v2437_v15, %v8805_v42  ;;  %v2449_v11 = vmul.f32 %v2448_v47, %v8805_v42  ;;  %v2624_v10 = vand.u32 2147483647, %v8821_v36 }
 0x4e7   :  { %v2909_v7 = vmul.f32 %v2908_v18, %v2884_v50  ;;  %v2616_v30 = vmul.f32 %v4050_v0, %v8821_v36  ;;  %v2641_v41 = vadd.f32 0.18741608, %v2640_v49  ;;  %v2652_v35 = vadd.f32 0.4994258, %v2651_v51 }
 0x4e8   :  { %v2439_v40 = vadd.f32 0.05243302, %v2438_v2  ;;  %v2450_v46 = vadd.f32 0.112945676, %v2449_v11  ;;  %v8856_v53 = vadd.f32 %v10438_v4, %v2031_v32  ;;  %v2626_v55 = vand.u32 2147483648, %v8821_v36  ;;  %v10439_v11 = vld [vmem:[#allocation99_spill] sm:$0xff] }
 0x4e9   :  { %v3918_v6 = vclamps-f32 %v2909_v7, 1.0  ;;  %v2617_v1 = vsub.f32 1.0, %v2616_v30  ;;  %v2475_v54 = vadd.f32 0.00028619796, %v2474_v60  ;;  %vm2621_vm9 = vweird.f32 %v4050_v0  ;;  %v10440_v60 = vld [vmem:[#allocation46_spill] sm:$0xff] }
 0x4ea   :  { %v2653_v23 = vmul.f32 %v2652_v35, %v8776_v33  ;;  %v2440_v50 = vmul.f32 %v2439_v40, %v8805_v42  ;;  %v2451_v48 = vmul.f32 %v2450_v46, %v8805_v42  ;;  %v2485_v8 = vmul.f32 3.8918573e-05, %v8838_v29 }
 0x4eb   :  { %v3645_v52 = vadd.f32 1.0, %v3918_v6  ;;  %v2618_v58 = vmul.f32 %v4050_v0, %v2617_v1  ;;  %v2476_v26 = vmul.f32 %v2475_v54, %v8838_v29  ;;  %v2642_v57 = vmul.f32 %v2641_v41, %v8776_v33 }
 0x4ec   :  { %v8865_v31 = vadd.f32 1.0, %v2653_v23  ;;  %v2441_v25 = vadd.f32 0.18741608, %v2440_v50  ;;  %v2452_v15 = vadd.f32 0.4994258, %v2451_v48  ;;  %vm2620_vm10 = vweird.f32 %v8821_v36  ;;  %v10443_v48 = vld [vmem:[#allocation54_spill] sm:$0xff] }
 0x4ed   :  { %v3677_v47 = vmul.f32 %v3645_v52, %v8756_v43  ;;  %v2619_v21 = vadd.f32 %v4050_v0, %v2618_v58  ;;  %v2477_v17 = vadd.f32 0.0036580483, %v2476_v26  ;;  %v8873_v24 = vsel %vm2123_vm8, %v8330_v37, %v8717_v27  ;;  %vm2622_vm11 = vmor %vm2620_vm10, %vm2621_vm9 }
 0x4ee   :  { %v2604_v49 = vmul.f32 %v2603_v63, %v8684_v45  ;;  %v2627_v33 = vor.u32 1.1754944e-38, %v2626_v55  ;;  %4051 = vrcp.f32 %v8865_v31  ;;  %vm2625_vm12 = vcmp.eq.f32.partialorder %v2624_v10, 8.507059e+37 }
 0x4ef   :  { %3778 = vmatpush.msrb.mxu1 %v3677_v47  ;;  %v2623_v51 = vsel %vm2622_vm11, %v4050_v0, %v2619_v21  ;;  %v2453_v43 = vmul.f32 %v2452_v15, %v8805_v42  ;;  %v2478_v36 = vmul.f32 %v2477_v17, %v8838_v29  ;;  %v2643_v19 = vadd.f32 1.1283791, %v2642_v57 }
 0x4f0   :  { %v2628_v56 = vsel %vm2625_vm12, %v2627_v33, %v2623_v51  ;;  %v2442_v13 = vmul.f32 %v2441_v25, %v8805_v42  ;;  %v2486_v37 = vadd.f32 0.001143296, %v2485_v8  ;;  %v2664_v45 = vand.u32 2147483647, %v8865_v31 }
 0x4f1   :  { %v2629_v27 = vmul.f32 %v2628_v56, %v2604_v49  ;;  %v2666_v63 = vand.u32 2147483648, %v8865_v31  ;;  %v8883_v32 = vadd.f32 1.0, %v2453_v43  ;;  %v2479_v18 = vadd.f32 0.05243302, %v2478_v36 }
 0x4f2   :  { %v2487_v0 = vmul.f32 %v2486_v37, %v8838_v29  ;;  %v8887_v2 = vmul.f32 0.70710677, %v8856_v53  ;;  %v2032_v7 = vadd.f32 %v10440_v60, %v10439_v11  ;;  %v2232_v42 = vmul.f32 %v10426_v44, %v8729_v16 }
 0x4f3   :  { %v2294_v30 = vmul.f32 0.5, %v8662_v38  ;;  %v3911_v10 = vclamps-f32 %v2629_v27, 1.0  ;;  %4053 = vrcp.f32 %v8883_v32  ;;  %v2644_v35 = vmul.f32 %v2643_v19, %v8753_v34 }
 0x4f4   :  { %v4052_v41 = vpop.eup %4051  ;;  %vm2660_vm8 = vweird.f32 %v8865_v31  ;;  %v2443_v40 = vadd.f32 1.1283791, %v2442_v13  ;;  %v2488_v46 = vadd.f32 0.014752088, %v2487_v0  ;;  %vm8898_vm13 = vcmp.eq.f32.partialorder %v2664_v45, 8.507059e+37 }
 0x4f5   :  { %v3638_v4 = vadd.f32 1.0, %v3911_v10  ;;  %v2656_v6 = vmul.f32 %v4052_v41, %v8865_v31  ;;  %v2512_v38 = vmul.f32 %v8887_v2, %v8887_v2  ;;  %v2667_v16 = vor.u32 1.1754944e-38, %v2666_v63 }
 0x4f6   :  { %v2466_v44 = vand.u32 2147483648, %v8883_v32  ;;  %v2480_v55 = vmul.f32 %v2479_v18, %v8838_v29  ;;  %v2489_v34 = vmul.f32 %v2488_v46, %v8838_v29  ;;  %v8910_v52 = vadd.f32 %v10443_v48, %v2032_v7  ;;  %v10445_v46 = vld [vmem:[#allocation50_spill] sm:$0xff] }
 0x4f7   :  { %v3670_v54 = vmul.f32 %v3638_v4, %v2294_v30  ;;  %v2657_v23 = vsub.f32 1.0, %v2656_v6  ;;  %v8907_v50 = vmin.f32 %v2512_v38, 16.0  ;;  %v2444_v58 = vmul.f32 %v2443_v40, %v8780_v22  ;;  %v10444_v40 = vld [vmem:[#allocation113_spill] sm:$0xff] }
 0x4f8   :  { %vm2460_vm14 = vweird.f32 %v8883_v32  ;;  %v2490_v26 = vadd.f32 0.112945676, %v2489_v34  ;;  %v8915_v8 = vadd.f32 %v2232_v42, %v8784_v59  ;;  %vm2661_vm15 = vweird.f32 %v4052_v41 }
 0x4f9   :  { %v4054_v57 = vpop.eup %4053  ;;  %3809 = vmatpush.msrb.mxu2 %v3670_v54  ;;  %v2658_v25 = vmul.f32 %v4052_v41, %v2657_v23  ;;  %v2514_v15 = vmul.f32 2.1237322e-06, %v8907_v50  ;;  %v2525_v47 = vmul.f32 3.8918573e-05, %v8907_v50  ;;  %v2464_v17 = vand.u32 2147483647, %v8883_v32  ;;  %vm2662_vm0 = vmor %vm2660_vm8, %vm2661_vm15 }
 0x4fa   :  { %v2456_v21 = vmul.f32 %v4054_v57, %v8883_v32  ;;  %v2467_v49 = vor.u32 1.1754944e-38, %v2466_v44  ;;  %v2491_v22 = vmul.f32 %v2490_v26, %v8838_v29  ;;  %v2481_v51 = vadd.f32 0.18741608, %v2480_v55 }
 0x4fb   :  { %v2659_v33 = vadd.f32 %v4052_v41, %v2658_v25  ;;  %v8923_v59 = vmul.f32 0.70710677, %v8915_v8  ;;  %v2515_v43 = vadd.f32 0.00028619796, %v2514_v15  ;;  %vm2461_vm1 = vweird.f32 %v4054_v57 }
 0x4fc   :  { %v2457_v36 = vsub.f32 1.0, %v2456_v21  ;;  %v2492_v56 = vadd.f32 0.4994258, %v2491_v22  ;;  %v2526_v19 = vadd.f32 0.001143296, %v2525_v47  ;;  %v2482_v60 = vmul.f32 %v2481_v51, %v8838_v29  ;;  %vm2462_vm2 = vmor %vm2460_vm14, %vm2461_vm1 }
 0x4fd   :  { %v2663_v13 = vsel %vm2662_vm0, %v4052_v41, %v2659_v33  ;;  %v2672_v37 = vmul.f32 %v8923_v59, %v8923_v59  ;;  %v2516_v27 = vmul.f32 %v2515_v43, %v8907_v50  ;;  %v8931_v45 = vmul.f32 0.70710677, %v8910_v52  ;;  %v10447_v33 = vld [vmem:[#allocation76_spill] sm:$0xff] }
 0x4fe   :  { %v2668_v63 = vsel %vm8898_vm13, %v2667_v16, %v2663_v13  ;;  %v2458_v18 = vmul.f32 %v4054_v57, %v2457_v36  ;;  %v2493_v31 = vmul.f32 %v2492_v56, %v8838_v29  ;;  %v2527_v0 = vmul.f32 %v2526_v19, %v8907_v50 }
 0x4ff   :  { %v2669_v11 = vmul.f32 %v2668_v63, %v2644_v35  ;;  %v8938_v7 = vmin.f32 %v2672_v37, 16.0  ;;  %v2517_v42 = vadd.f32 0.0036580483, %v2516_v27  ;;  %v8944_v4 = vadd.f32 %v10445_v46, %v10444_v40 }
 0x500   :  { %v2459_v30 = vadd.f32 %v4054_v57, %v2458_v18  ;;  %v8940_v10 = vadd.f32 1.0, %v2493_v31  ;;  %v2528_v41 = vadd.f32 0.014752088, %v2527_v0  ;;  %vm2465_vm3 = vcmp.eq.f32.partialorder %v2464_v17, 8.507059e+37 }
 0x501   :  { %v3912_v6 = vclamps-f32 %v2669_v11, 1.0  ;;  %v2674_v35 = vmul.f32 2.1237322e-06, %v8938_v7  ;;  %v2685_v29 = vmul.f32 3.8918573e-05, %v8938_v7  ;;  %v2518_v1 = vmul.f32 %v2517_v42, %v8907_v50 }
 0x502   :  { %v2463_v38 = vsel %vm2462_vm2, %v4054_v57, %v2459_v30  ;;  %4055 = vrcp.f32 %v8940_v10  ;;  %v2552_v16 = vmul.f32 %v8931_v45, %v8931_v45  ;;  %v2295_v44 = vmul.f32 0.5, %v8715_v9 }
 0x503   :  { %v3639_v55 = vadd.f32 1.0, %v3912_v6  ;;  %v2468_v34 = vsel %vm2465_vm3, %v2467_v49, %v2463_v38  ;;  %v2675_v54 = vadd.f32 0.00028619796, %v2674_v35  ;;  %v2483_v23 = vadd.f32 1.1283791, %v2482_v60 }
 0x504   :  { %v2469_v32 = vmul.f32 %v2468_v34, %v2444_v58  ;;  %v2686_v48 = vadd.f32 0.001143296, %v2685_v29  ;;  %v2519_v26 = vadd.f32 0.05243302, %v2518_v1  ;;  %v8958_v25 = vmul.f32 %v10409_v62, %v8735_v12  ;;  %v10446_v12 = vld [vmem:[#allocation60_spill] sm:$0xff] }
 0x505   :  { %v3671_v57 = vmul.f32 %v3639_v55, %v2295_v44  ;;  %v2676_v15 = vmul.f32 %v2675_v54, %v8938_v7  ;;  %v2529_v47 = vmul.f32 %v2528_v41, %v8907_v50  ;;  %v8964_v49 = vmin.f32 %v2552_v16, 16.0 }
 0x506   :  { %v3907_v21 = vclamps-f32 %v2469_v32, 1.0  ;;  %v2687_v17 = vmul.f32 %v2686_v48, %v8938_v7  ;;  %v2520_v9 = vmul.f32 %v2519_v26, %v8907_v50  ;;  %v8968_v22 = vadd.f32 %v8742_v61, %v8842_v3 }
 0x507   :  { %3838 = vmatpush.msrb.mxu3 %v3671_v57  ;;  %v2677_v58 = vadd.f32 0.0036580483, %v2676_v15  ;;  %v2530_v62 = vadd.f32 0.112945676, %v2529_v47  ;;  %v8972_v51 = vadd.f32 %v10447_v33, %v10446_v12  ;;  %v2290_v36 = vmul.f32 0.5, %v8763_v28 }
 0x508   :  { %v4056_v43 = vpop.eup %4055  ;;  %v3634_v56 = vadd.f32 1.0, %v3907_v21  ;;  %v2484_v19 = vmul.f32 %v2483_v23, %v8810_v20  ;;  %v2688_v13 = vadd.f32 0.014752088, %v2687_v17  ;;  %v2504_v27 = vand.u32 2147483647, %v8940_v10 }
 0x509   :  { %v2496_v37 = vmul.f32 %v4056_v43, %v8940_v10  ;;  %v2506_v63 = vand.u32 2147483648, %v8940_v10  ;;  %v2678_v61 = vmul.f32 %v2677_v58, %v8938_v7  ;;  %v8982_v31 = vmul.f32 0.70710677, %v8968_v22 }
 0x50a   :  { %v3666_v3 = vmul.f32 %v3634_v56, %v2290_v36  ;;  %v2689_v18 = vmul.f32 %v2688_v13, %v8938_v7  ;;  %v2521_v0 = vadd.f32 0.18741608, %v2520_v9  ;;  %v2531_v20 = vmul.f32 %v2530_v62, %v8907_v50 }
 0x50b   :  { %v2497_v28 = vsub.f32 1.0, %v2496_v37  ;;  %v2679_v11 = vadd.f32 0.05243302, %v2678_v61  ;;  %v2554_v60 = vmul.f32 2.1237322e-06, %v8964_v49  ;;  %vm2501_vm4 = vweird.f32 %v4056_v43 }
 0x50c   :  { %3810 = vmatpush.msrb.mxu2 %v3666_v3  ;;  %v2690_v42 = vadd.f32 0.112945676, %v2689_v18  ;;  %v2712_v30 = vmul.f32 %v8982_v31, %v8982_v31  ;;  %v2565_v41 = vmul.f32 3.8918573e-05, %v8964_v49  ;;  %v2532_v6 = vadd.f32 0.4994258, %v2531_v20 }
 0x50d   :  { %v2498_v40 = vmul.f32 %v4056_v43, %v2497_v28  ;;  %v2680_v46 = vmul.f32 %v2679_v11, %v8938_v7  ;;  %v2555_v35 = vadd.f32 0.00028619796, %v2554_v60  ;;  %vm2500_vm7 = vweird.f32 %v8940_v10 }
 0x50e   :  { %vm8991_vm5 = vcmp.eq.f32.partialorder %v2504_v27, 8.507059e+37  ;;  %v2691_v1 = vmul.f32 %v2690_v42, %v8938_v7  ;;  %v8996_v38 = vmin.f32 %v2712_v30, 16.0  ;;  %v2507_v44 = vor.u32 1.1754944e-38, %v2506_v63  ;;  %vm2502_vm6 = vmor %vm2500_vm7, %vm2501_vm4 }
 0x50f   :  { %v2499_v16 = vadd.f32 %v4056_v43, %v2498_v40  ;;  %v2533_v55 = vmul.f32 %v2532_v6, %v8907_v50  ;;  %v2556_v34 = vmul.f32 %v2555_v35, %v8964_v49  ;;  %v2522_v23 = vmul.f32 %v2521_v0, %v8907_v50 }
 0x510   :  { %v2692_v54 = vadd.f32 0.4994258, %v2691_v1  ;;  %v2714_v32 = vmul.f32 2.1237322e-06, %v8996_v38  ;;  %v2725_v10 = vmul.f32 3.8918573e-05, %v8996_v38  ;;  %v2160_v58 = vmul.f32 %v10425_v39, %v8873_v24 }
 0x511   :  { %v2503_v48 = vsel %vm2502_vm6, %v4056_v43, %v2499_v16  ;;  %v2681_v26 = vadd.f32 0.18741608, %v2680_v46  ;;  %v9004_v57 = vadd.f32 1.0, %v2533_v55  ;;  %v2566_v15 = vadd.f32 0.001143296, %v2565_v41 }
 0x512   :  { %v2508_v47 = vsel %vm8991_vm5, %v2507_v44, %v2503_v48  ;;  %v2693_v21 = vmul.f32 %v2692_v54, %v8938_v7  ;;  %v2715_v17 = vadd.f32 0.00028619796, %v2714_v32  ;;  %v2726_v9 = vadd.f32 0.001143296, %v2725_v10 }
 0x513   :  { %v2509_v62 = vmul.f32 %v2508_v47, %v2484_v19  ;;  %4057 = vrcp.f32 %v9004_v57  ;;  %v2557_v12 = vadd.f32 0.0036580483, %v2556_v34  ;;  %v2523_v36 = vadd.f32 1.1283791, %v2522_v23 }
 0x514   :  { %v9012_v50 = vadd.f32 1.0, %v2693_v21  ;;  %v2716_v33 = vmul.f32 %v2715_v17, %v8996_v38  ;;  %v2727_v43 = vmul.f32 %v2726_v9, %v8996_v38  ;;  %v2567_v13 = vmul.f32 %v2566_v15, %v8964_v49 }
 0x515   :  { %v3908_v56 = vclamps-f32 %v2509_v62, 1.0  ;;  %v2291_v37 = vmul.f32 0.5, %v8791_v14  ;;  %v2682_v27 = vmul.f32 %v2681_v26, %v8938_v7  ;;  %v2558_v63 = vmul.f32 %v2557_v12, %v8964_v49 }
 0x516   :  { %4059 = vrcp.f32 %v9012_v50  ;;  %v2717_v24 = vadd.f32 0.0036580483, %v2716_v33  ;;  %v2728_v19 = vadd.f32 0.014752088, %v2727_v43  ;;  %v2224_v61 = vmul.f32 %v8533_v5, %v2160_v58 }
 0x517   :  { %v3635_v39 = vadd.f32 1.0, %v3908_v56  ;;  %v2225_v3 = vmul.f32 %v8533_v5, %v8958_v25  ;;  %v2524_v18 = vmul.f32 %v2523_v36, %v8887_v2  ;;  %v2568_v11 = vadd.f32 0.014752088, %v2567_v13 }
 0x518   :  { %v2718_v14 = vmul.f32 %v2717_v24, %v8996_v38  ;;  %v2729_v7 = vmul.f32 %v2728_v19, %v8996_v38  ;;  %v2683_v20 = vadd.f32 1.1283791, %v2682_v27  ;;  %vm2540_vm9 = vweird.f32 %v9004_v57 }
 0x519   :  { %v4058_v0 = vpop.eup %4057  ;;  %v3667_v28 = vmul.f32 %v3635_v39, %v2291_v37  ;;  %v2544_v42 = vand.u32 2147483647, %v9004_v57  ;;  %v2559_v5 = vadd.f32 0.05243302, %v2558_v63  ;;  %v2569_v2 = vmul.f32 %v2568_v11, %v8964_v49 }
 0x51a   :  { %v2536_v60 = vmul.f32 %v4058_v0, %v9004_v57  ;;  %v2719_v30 = vadd.f32 0.05243302, %v2718_v14  ;;  %v2730_v41 = vadd.f32 0.112945676, %v2729_v7  ;;  %vm2700_vm10 = vweird.f32 %v9012_v50 }
 0x51b   :  { %3839 = vmatpush.msrb.mxu3 %v3667_v28  ;;  %v2704_v40 = vand.u32 2147483647, %v9012_v50  ;;  %v2546_v6 = vand.u32 2147483648, %v9004_v57  ;;  %v2706_v29 = vand.u32 2147483648, %v9012_v50  ;;  %vm2541_vm11 = vweird.f32 %v4058_v0 }
 0x51c   :  { %v4060_v25 = vpop.eup %4059  ;;  %v2537_v46 = vsub.f32 1.0, %v2536_v60  ;;  %v2731_v1 = vmul.f32 %v2730_v41, %v8996_v38  ;;  %v2720_v16 = vmul.f32 %v2719_v30, %v8996_v38  ;;  %v2570_v55 = vadd.f32 0.112945676, %v2569_v2  ;;  %vm2542_vm13 = vmor %vm2540_vm9, %vm2541_vm11 }
 0x51d   :  { %v2696_v35 = vmul.f32 %v4060_v25, %v9012_v50  ;;  %v9039_v34 = vadd.f32 %v2224_v61, %v8944_v4  ;;  %vm9041_vm12 = vcmp.eq.f32.partialorder %v2544_v42, 8.507059e+37  ;;  %v2560_v23 = vmul.f32 %v2559_v5, %v8964_v49 }
 0x51e   :  { %v2538_v44 = vmul.f32 %v4058_v0, %v2537_v46  ;;  %v2732_v32 = vadd.f32 0.4994258, %v2731_v1  ;;  %v2547_v26 = vor.u32 1.1754944e-38, %v2546_v6  ;;  %v2571_v15 = vmul.f32 %v2570_v55, %v8964_v49 }
 0x51f   :  { %v2697_v54 = vsub.f32 1.0, %v2696_v35  ;;  %v9048_v47 = vadd.f32 %v2225_v3, %v8972_v51  ;;  %vm2701_vm8 = vweird.f32 %v4060_v25  ;;  %v9055_v17 = vmul.f32 0.70710677, %v9039_v34 }
 0x520   :  { %v2539_v48 = vadd.f32 %v4058_v0, %v2538_v44  ;;  %v2733_v4 = vmul.f32 %v2732_v32, %v8996_v38  ;;  %v2707_v9 = vor.u32 1.1754944e-38, %v2706_v29  ;;  %v2721_v58 = vadd.f32 0.18741608, %v2720_v16  ;;  %vm2702_vm14 = vmor %vm2700_vm10, %vm2701_vm8 }
 0x521   :  { %v2698_v21 = vmul.f32 %v4060_v25, %v2697_v54  ;;  %v2572_v12 = vadd.f32 0.4994258, %v2571_v15  ;;  %v2561_v36 = vadd.f32 0.18741608, %v2560_v23  ;;  %v2352_v13 = vmul.f32 %v9055_v17, %v9055_v17 }
 0x522   :  { %v2543_v62 = vsel %vm2542_vm13, %v4058_v0, %v2539_v48  ;;  %v2734_v43 = vadd.f32 1.0, %v2733_v4  ;;  %v9065_v37 = vmul.f32 0.70710677, %v9048_v47  ;;  %v2684_v27 = vmul.f32 %v2683_v20, %v8923_v59 }
 0x523   :  { %v2699_v33 = vadd.f32 %v4060_v25, %v2698_v21  ;;  %v2548_v51 = vsel %vm9041_vm12, %v2547_v26, %v2543_v62  ;;  %v2573_v57 = vmul.f32 %v2572_v12, %v8964_v49  ;;  %vm2705_vm15 = vcmp.eq.f32.partialorder %v2704_v40, 8.507059e+37 }
 0x524   :  { %v2549_v56 = vmul.f32 %v2548_v51, %v2524_v18  ;;  %4061 = vrcp.f32 %v2734_v43  ;;  %v2722_v19 = vmul.f32 %v2721_v58, %v8996_v38  ;;  %v9071_v3 = vmin.f32 %v2352_v13, 16.0 }
 0x525   :  { %v2703_v39 = vsel %vm2702_vm14, %v4060_v25, %v2699_v33  ;;  %v9069_v61 = vadd.f32 1.0, %v2573_v57  ;;  %v2392_v18 = vmul.f32 %v9065_v37, %v9065_v37  ;;  %v2562_v0 = vmul.f32 %v2561_v36, %v8964_v49 }
 0x526   :  { %v2708_v24 = vsel %vm2705_vm15, %v2707_v9, %v2703_v39  ;;  %v3909_v63 = vclamps-f32 %v2549_v56, 1.0  ;;  %v2292_v59 = vmul.f32 0.5, %v8856_v53  ;;  %v2723_v14 = vadd.f32 1.1283791, %v2722_v19 }
 0x527   :  { %v2709_v50 = vmul.f32 %v2708_v24, %v2684_v27  ;;  %4063 = vrcp.f32 %v9069_v61  ;;  %v2354_v7 = vmul.f32 2.1237322e-06, %v9071_v3  ;;  %v2365_v38 = vmul.f32 3.8918573e-05, %v9071_v3 }
 0x528   :  { %v2296_v20 = vmul.f32 0.5, %v8915_v8  ;;  %v3636_v42 = vadd.f32 1.0, %v3909_v63  ;;  %v9081_v30 = vmin.f32 %v2392_v18, 16.0  ;;  %v2744_v5 = vand.u32 2147483647, %v2734_v43 }
 0x529   :  { %v3913_v28 = vclamps-f32 %v2709_v50, 1.0  ;;  %v2563_v49 = vadd.f32 1.1283791, %v2562_v0  ;;  %v2355_v2 = vadd.f32 0.00028619796, %v2354_v7  ;;  %v2724_v6 = vmul.f32 %v2723_v14, %v8982_v31 }
 0x52a   :  { %v4062_v11 = vpop.eup %4061  ;;  %v2366_v53 = vadd.f32 0.001143296, %v2365_v38  ;;  %v2394_v40 = vmul.f32 2.1237322e-06, %v9081_v30  ;;  %v2405_v46 = vmul.f32 3.8918573e-05, %v9081_v30  ;;  %v3668_v16 = vmul.f32 %v3636_v42, %v2292_v59 }
 0x52b   :  { %v3640_v60 = vadd.f32 1.0, %v3913_v28  ;;  %v2736_v41 = vmul.f32 %v4062_v11, %v2734_v43  ;;  %v2746_v29 = vand.u32 2147483648, %v2734_v43  ;;  %v2356_v8 = vmul.f32 %v2355_v2, %v9071_v3 }
 0x52c   :  { %v2367_v44 = vmul.f32 %v2366_v53, %v9071_v3  ;;  %v2395_v55 = vadd.f32 0.00028619796, %v2394_v40  ;;  %v2406_v54 = vadd.f32 0.001143296, %v2405_v46  ;;  %vm2740_vm0 = vweird.f32 %v2734_v43 }
 0x52d   :  { %v3672_v25 = vmul.f32 %v3640_v60, %v2296_v20  ;;  %v2737_v35 = vsub.f32 1.0, %v2736_v41  ;;  %v4064_v1 = vpop.eup %4063  ;;  %vm2741_vm1 = vweird.f32 %v4062_v11  ;;  %vm9089_vm2 = vcmp.eq.f32.partialorder %v2744_v5, 8.507059e+37  ;;  %v9112_v41 = vld [vmem:[%s9225_s6] sm:$0xff] }
 0x52e   :  { %v2576_v10 = vmul.f32 %v4064_v1, %v9069_v61  ;;  %v2368_v31 = vadd.f32 0.014752088, %v2367_v44  ;;  %v2396_v48 = vmul.f32 %v2395_v55, %v9081_v30  ;;  %v2407_v26 = vmul.f32 %v2406_v54, %v9081_v30  ;;  %vm2742_vm3 = vmor %vm2740_vm0, %vm2741_vm1 }
 0x52f   :  { %3750 = vmatpush.msrb.mxu0 %v3672_v25  ;;  %v2738_v32 = vmul.f32 %v4062_v11, %v2737_v35  ;;  %v2747_v21 = vor.u32 1.1754944e-38, %v2746_v29  ;;  %v2357_v9 = vadd.f32 0.0036580483, %v2356_v8  ;;  %v2584_v58 = vand.u32 2147483647, %v9069_v61  ;;  %v9125_v8 = vld [vmem:[%s9225_s6 + $0x8] sm:$0xff] }
 0x530   :  { %v2577_v4 = vsub.f32 1.0, %v2576_v10  ;;  %v2586_v62 = vand.u32 2147483648, %v9069_v61  ;;  %v2369_v12 = vmul.f32 %v2368_v31, %v9071_v3  ;;  %v2408_v33 = vadd.f32 0.014752088, %v2407_v26 }
 0x531   :  { %3751 = vmatpush.msrb.mxu0 %v3668_v16  ;;  %v2739_v15 = vadd.f32 %v4062_v11, %v2738_v32  ;;  %vm2581_vm4 = vweird.f32 %v4064_v1  ;;  %v2397_v36 = vadd.f32 0.0036580483, %v2396_v48  ;;  %vm2580_vm7 = vweird.f32 %v9069_v61  ;;  %v3698_v48 = vld [vmem:[%s9225_s6 + $0x10] sm:$0xff] }
 0x532   :  { %v2578_v51 = vmul.f32 %v4064_v1, %v2577_v4  ;;  %v2370_v57 = vadd.f32 0.112945676, %v2369_v12  ;;  %v2409_v13 = vmul.f32 %v2408_v33, %v9081_v30  ;;  %v2358_v24 = vmul.f32 %v2357_v9, %v9071_v3  ;;  %vm2582_vm5 = vmor %vm2580_vm7, %vm2581_vm4 }
 0x533   :  { %v2743_v43 = vsel %vm2742_vm3, %v4062_v11, %v2739_v15  ;;  %v2564_v19 = vmul.f32 %v2563_v49, %v8931_v45  ;;  %v2587_v63 = vor.u32 1.1754944e-38, %v2586_v62  ;;  %vm2585_vm6 = vcmp.eq.f32.partialorder %v2584_v58, 8.507059e+37 }
 0x534   :  { %v2748_v56 = vsel %vm9089_vm2, %v2747_v21, %v2743_v43  ;;  %v2579_v39 = vadd.f32 %v4064_v1, %v2578_v51  ;;  %v2371_v50 = vmul.f32 %v2370_v57, %v9071_v3  ;;  %v2410_v18 = vadd.f32 0.112945676, %v2409_v13 }
 0x535   :  { %v2749_v27 = vmul.f32 %v2748_v56, %v2724_v6  ;;  %v2398_v59 = vmul.f32 %v2397_v36, %v9081_v30  ;;  %v2297_v61 = vmul.f32 0.5, %v8968_v22  ;;  %v2359_v60 = vadd.f32 0.05243302, %v2358_v24 }
 0x536   :  { %v2583_v28 = vsel %vm2582_vm5, %v4064_v1, %v2579_v39  ;;  %v2372_v7 = vadd.f32 0.4994258, %v2371_v50  ;;  %v2411_v38 = vmul.f32 %v2410_v18, %v9081_v30  ;;  %vm3724_vm9 = vcmask 523264   ;;  %v3699_v39 = vld [vmem:[%s9225_s6 + $0x18] sm:$0xff]  ;;  %v3702_v18 = vld [vmem:[%s9226_s7 + $0x10] sm:$0xff] }
 0x537   :  { %v3914_v0 = vclamps-f32 %v2749_v27, 1.0  ;;  %v2588_v14 = vsel %vm2585_vm6, %v2587_v63, %v2583_v28  ;;  %v2399_v2 = vadd.f32 0.05243302, %v2398_v59  ;;  %3945 = vmatmul.msk.f32.vlgmr.msrb.gmra.mxu2 %vm3724_vm9, %v9112_v41  ;;  %3949 = vmatmul.msk.f32.vlgmr.msrb.gmra.mxu3 %vm3724_vm9, %v9112_v41  ;;  %v2293_v53 = vmul.f32 0.5, %v8910_v52 }
 0x538   :  { %v2589_v20 = vmul.f32 %v2588_v14, %v2564_v19  ;;  %v2373_v45 = vmul.f32 %v2372_v7, %v9071_v3  ;;  %v2412_v42 = vadd.f32 0.4994258, %v2411_v38  ;;  %v2360_v46 = vmul.f32 %v2359_v60, %v9071_v3  ;;  %3716 = vperm.xlu1 %4004, %v3702_v18   ;;  %v3703_v38 = vld [vmem:[%s9226_s7 + $0x18] sm:$0xff] }
 0x539   :  { %v3641_v11 = vadd.f32 1.0, %v3914_v0  ;;  %v2400_v35 = vmul.f32 %v2399_v2, %v9081_v30  ;;  %v3700_v0 = vld [vmem:[%s9226_s7] sm:$0xff]  ;;  %v2289_v59 = vmul.f32 0.5, %v9048_v47 }
 0x53a   :  { %v3910_v49 = vclamps-f32 %v2589_v20, 1.0  ;;  %v2374_v22 = vadd.f32 1.0, %v2373_v45  ;;  %v2413_v25 = vmul.f32 %v2412_v42, %v9081_v30  ;;  %v2361_v1 = vadd.f32 0.18741608, %v2360_v46  ;;  %3706 = vperm.xlu2 %4002, %v3700_v0  }
 0x53b   :  { %v3673_v5 = vmul.f32 %v3641_v11, %v2297_v61  ;;  %v2401_v16 = vadd.f32 0.18741608, %v2400_v35 }
 0x53c   :  { %v3637_v40 = vadd.f32 1.0, %v3910_v49  ;;  %4065 = vrcp.f32 %v2374_v22  ;;  %v2414_v29 = vadd.f32 1.0, %v2413_v25  ;;  %v2362_v44 = vmul.f32 %v2361_v1, %v9071_v3 }
 0x53d   :  { %3779 = vmatpush.msrb.mxu1 %v3673_v5  ;;  %v2402_v10 = vmul.f32 %v2401_v16, %v9081_v30  ;;  %v2386_v23 = vand.u32 2147483648, %v2374_v22  ;;  %v2384_v21 = vand.u32 2147483647, %v2374_v22  ;;  %vm2380_vm11 = vweird.f32 %v2374_v22 }
 0x53e   :  { %v3669_v6 = vmul.f32 %v3637_v40, %v2293_v53  ;;  %4067 = vrcp.f32 %v2414_v29  ;;  %v2363_v26 = vadd.f32 1.1283791, %v2362_v44  ;;  %v2426_v3 = vand.u32 2147483648, %v2414_v29 }
 0x53f   :  { %3946 = vmatmul.msk.f32.gmra.mxu2 %vm3724_vm9, %v9125_v8  ;;  %3950 = vmatmul.msk.f32.gmra.mxu3 %vm3724_vm9, %v9125_v8  ;;  %v2403_v58 = vadd.f32 1.1283791, %v2402_v10  ;;  %v2387_v30 = vor.u32 1.1754944e-38, %v2386_v23  ;;  %v2424_v12 = vand.u32 2147483647, %v2414_v29  ;;  %vm2385_vm13 = vcmp.eq.f32.partialorder %v2384_v21, 8.507059e+37 }
 0x540   :  { %3780 = vmatpush.msrb.mxu1 %v3669_v6  ;;  %v2364_v33 = vmul.f32 %v2363_v26, %v9055_v17  ;;  %vm2420_vm14 = vweird.f32 %v2414_v29  ;;  %v2427_v57 = vor.u32 1.1754944e-38, %v2426_v3  ;;  %v2288_v17 = vmul.f32 0.5, %v9039_v34 }
 0x541   :  { %v2404_v13 = vmul.f32 %v2403_v58, %v9065_v37  ;;  %vm2425_vm0 = vcmp.eq.f32.partialorder %v2424_v12, 8.507059e+37  ;;  %v3701_v37 = vld [vmem:[%s9226_s7 + $0x8] sm:$0xff] }
 0x542   :  { %v4066_v52 = vpop.eup %4065  ;;  %3711 = vperm.xlu0 %4003, %v3701_v37   ;;  %3721 = vperm.xlu2 %4002, %v3703_v38  }
 0x543   :  { %v2376_v55 = vmul.f32 %v4066_v52, %v2374_v22  ;;  %vm2381_vm10 = vweird.f32 %v4066_v52 }
 0x544   :  { %v4068_v54 = vpop.eup %4067  ;;  %vm2382_vm12 = vmor %vm2380_vm11, %vm2381_vm10 }
 0x545   :  { %v2377_v32 = vsub.f32 1.0, %v2376_v55  ;;  %v2416_v31 = vmul.f32 %v4068_v54, %v2414_v29  ;;  %vm2421_vm8 = vweird.f32 %v4068_v54 }
 0x546   :  { %vm2422_vm15 = vmor %vm2420_vm14, %vm2421_vm8 }
 0x547   :  { %v2378_v15 = vmul.f32 %v4066_v52, %v2377_v32  ;;  %v2417_v4 = vsub.f32 1.0, %v2416_v31  ;;  %3947 = vmatmul.msk.f32.gmra.mxu2 %vm3724_vm9, %v3698_v48  ;;  %3951 = vmatmul.msk.f32.gmra.mxu3 %vm3724_vm9, %v3698_v48 }
 0x549   :  { %v2379_v9 = vadd.f32 %v4066_v52, %v2378_v15  ;;  %v2418_v62 = vmul.f32 %v4068_v54, %v2417_v4 }
 0x54b   :  { %v2383_v43 = vsel %vm2382_vm12, %v4066_v52, %v2379_v9  ;;  %v2419_v36 = vadd.f32 %v4068_v54, %v2418_v62 }
 0x54c   :  { %v2388_v51 = vsel %vm2385_vm13, %v2387_v30, %v2383_v43 }
 0x54d   :  { %v2389_v56 = vmul.f32 %v2388_v51, %v2364_v33  ;;  %v2423_v27 = vsel %vm2422_vm15, %v4068_v54, %v2419_v36 }
 0x54e   :  { %v2428_v19 = vsel %vm2425_vm0, %v2427_v57, %v2423_v27 }
 0x54f   :  { %v3905_v24 = vclamps-f32 %v2389_v56, 1.0  ;;  %v2429_v63 = vmul.f32 %v2428_v19, %v2404_v13  ;;  %3948 = vmatmul.msk.f32.gmra.mxu2 %vm3724_vm9, %v3699_v39  ;;  %3952 = vmatmul.msk.f32.gmra.mxu3 %vm3724_vm9, %v3699_v39 }
 0x551   :  { %v3632_v50 = vadd.f32 1.0, %v3905_v24  ;;  %v3906_v28 = vclamps-f32 %v2429_v63, 1.0 }
 0x553   :  { %v3664_v34 = vmul.f32 %v3632_v50, %v2288_v17  ;;  %v3633_v14 = vadd.f32 1.0, %v3906_v28 }
 0x555   :  { %3752 = vmatpush.msrb.mxu0 %v3664_v34  ;;  %v3665_v7 = vmul.f32 %v3633_v14, %v2289_v59 }
 0x556   :  { %3937 = vmatmul.msk.f32.vlgmr.msrb.gmra.mxu0 %vm3724_vm9, %v9112_v41 }
 0x557   :  { %3781 = vmatpush.msrb.mxu1 %v3665_v7 }
 0x558   :  { %3941 = vmatmul.msk.f32.vlgmr.msrb.gmra.mxu1 %vm3724_vm9, %v9112_v41 }
 0x55e   :  { %3938 = vmatmul.msk.f32.gmra.mxu0 %vm3724_vm9, %v9125_v8 }
 0x560   :  { %3942 = vmatmul.msk.f32.gmra.mxu1 %vm3724_vm9, %v9125_v8 }
 0x566   :  { %3939 = vmatmul.msk.f32.gmra.mxu0 %vm3724_vm9, %v3698_v48 }
 0x568   :  { %3943 = vmatmul.msk.f32.gmra.mxu1 %vm3724_vm9, %v3698_v48 }
 0x56e   :  { %3940 = vmatmul.msk.f32.gmra.mxu0 %vm3724_vm9, %v3699_v39 }
 0x570   :  { %3944 = vmatmul.msk.f32.gmra.mxu1 %vm3724_vm9, %v3699_v39 }
 0x594   :  { %v3707_v11 = vpop.permute.xlu2 %3706 }
 0x59c   :  { %v3722_v46 = vpop.permute.xlu2 %3721 }
 0x5aa   :  { %v3717_v2 = vpop.permute.xlu1 %3716 }
 0x5b4   :  { %v3712_v41 = vpop.permute.xlu0 %3711 }
 0x5ba   :  { %v3812_v47 = vpop.f32.mrf.mxu2  ;;  %v3841_v61 = vpop.f32.mrf.mxu3 }
 0x5bb   :  { %v3813_v20 = vadd.f32 %v3812_v47, %v3707_v11  ;;  %v3842_v60 = vadd.f32 %v3841_v61, %v3707_v11 }
 0x5bd   :  { %3855 = vst [vmem:[%s9227_s8 + $0x10] sm:$0xff] %v3813_v20 }
 0x5be   :  { %3856 = vst [vmem:[%s9227_s8 + $0x18] sm:$0xff] %v3842_v60 }
 0x5c2   :  { %v3815_v45 = vpop.f32.mrf.mxu2  ;;  %v3844_v42 = vpop.f32.mrf.mxu3 }
 0x5c3   :  { %v3816_v5 = vadd.f32 %v3815_v45, %v3712_v41  ;;  %v3845_v49 = vadd.f32 %v3844_v42, %v3712_v41 }
 0x5c5   :  { %3859 = vst [vmem:[%s9227_s8 + $0x30] sm:$0xff] %v3816_v5 }
 0x5c6   :  { %3860 = vst [vmem:[%s9227_s8 + $0x38] sm:$0xff] %v3845_v49 }
 0x5ca   :  { %v3818_v22 = vpop.f32.mrf.mxu2  ;;  %v3847_v25 = vpop.f32.mrf.mxu3 }
 0x5cb   :  { %v3819_v53 = vadd.f32 %v3818_v22, %v3717_v2  ;;  %v3848_v40 = vadd.f32 %v3847_v25, %v3717_v2 }
 0x5cd   :  { %3863 = vst [vmem:[%s9227_s8 + $0x50] sm:$0xff] %v3819_v53 }
 0x5ce   :  { %3864 = vst [vmem:[%s9227_s8 + $0x58] sm:$0xff] %v3848_v40 }
 0x5d2   :  { %v3821_v29 = vpop.f32.mrf.mxu2  ;;  %v3850_v8 = vpop.f32.mrf.mxu3 }
 0x5d3   :  { %v3754_v6 = vpop.f32.mrf.mxu0  ;;  %v3822_v1 = vadd.f32 %v3821_v29, %v3722_v46  ;;  %v3851_v16 = vadd.f32 %v3850_v8, %v3722_v46 }
 0x5d4   :  { %v3755_v35 = vadd.f32 %v3754_v6, %v3707_v11 }
 0x5d5   :  { %v3783_v52 = vpop.f32.mrf.mxu1  ;;  %3867 = vst [vmem:[%s9227_s8 + $0x70] sm:$0xff] %v3822_v1 }
 0x5d6   :  { %3853 = vst [vmem:[%s9227_s8] sm:$0xff] %v3755_v35  ;;  %v3784_v44 = vadd.f32 %v3783_v52, %v3707_v11 }
 0x5d7   :  { %3868 = vst [vmem:[%s9227_s8 + $0x78] sm:$0xff] %v3851_v16 }
 0x5d8   :  { %3854 = vst [vmem:[%s9227_s8 + $0x8] sm:$0xff] %v3784_v44 }
 0x5db   :  { %v3757_v55 = vpop.f32.mrf.mxu0 }
 0x5dc   :  { %v3758_v54 = vadd.f32 %v3757_v55, %v3712_v41 }
 0x5dd   :  { %v3786_v32 = vpop.f32.mrf.mxu1 }
 0x5de   :  { %3857 = vst [vmem:[%s9227_s8 + $0x20] sm:$0xff] %v3758_v54  ;;  %v3787_v10 = vadd.f32 %v3786_v32, %v3712_v41 }
 0x5e0   :  { %3858 = vst [vmem:[%s9227_s8 + $0x28] sm:$0xff] %v3787_v10 }
 0x5e3   :  { %v3760_v23 = vpop.f32.mrf.mxu0 }
 0x5e4   :  { %v3761_v31 = vadd.f32 %v3760_v23, %v3717_v2 }
 0x5e5   :  { %v3789_v48 = vpop.f32.mrf.mxu1 }
 0x5e6   :  { %3861 = vst [vmem:[%s9227_s8 + $0x40] sm:$0xff] %v3761_v31  ;;  %v3790_v26 = vadd.f32 %v3789_v48, %v3717_v2 }
 0x5e8   :  { %3862 = vst [vmem:[%s9227_s8 + $0x48] sm:$0xff] %v3790_v26 }
 0x5eb   :  { %v3763_v15 = vpop.f32.mrf.mxu0 }
 0x5ec   :  { %v3764_v21 = vadd.f32 %v3763_v15, %v3722_v46 }
 0x5ed   :  { %v3792_v4 = vpop.f32.mrf.mxu1 }
 0x5ee   :  { %3865 = vst [vmem:[%s9227_s8 + $0x60] sm:$0xff] %v3764_v21  ;;  %v3793_v9 = vadd.f32 %v3792_v4, %v3722_v46 }
 0x5f0   :  { %3866 = vst [vmem:[%s9227_s8 + $0x68] sm:$0xff] %v3793_v9 }

</bundles_post_ra>
